<compile_context>
chip_gen: v7x
topology: tpu7x:2x2x1
jax: 0.10.0
libtpu: 0.0.40
codegen_flags: <defaults>
</compile_context>

<pallas_src>
import jax
import jax.numpy as jnp
from jax.experimental import pallas as pl
from jax.experimental.pallas import tpu as pltpu

POOL_H, POOL_W = 30, 40                 # pooled spatial extent (from fc = 32*30*40)
IN_H, IN_W = 2 * POOL_H, 2 * POOL_W     # 60 x 80 input spatial
C_IN, C_OUT, N_CLS = 3, 32, 3
HW = POOL_H * POOL_W                    # 1200
HWP = 1280                              # lane-dense padded pooled spatial
N_OFF = 4                               # 2x2 pooling window offsets


def _hash_keep_mask(shape, key_u32):
    """p=0.5 keep mask from a cheap murmur-style integer hash (pure jnp ops)."""
    r = jax.lax.broadcasted_iota(jnp.int32, shape, 0).astype(jnp.uint32)
    c = jax.lax.broadcasted_iota(jnp.int32, shape, 1).astype(jnp.uint32)
    z = r * jnp.uint32(0x9E3779B1) + c * jnp.uint32(0x85EBCA77) + key_u32
    z = (z ^ (z >> 16)) * jnp.uint32(0x7FEB352D)
    z = (z ^ (z >> 15)) * jnp.uint32(0x846CA68B)
    z = z ^ (z >> 16)
    return z < jnp.uint32(0x80000000)   # keep with prob 0.5


def _net3_kernel(seed_ref, x_ref, wc_ref, bc_ref, wfc_ref, bfc_ref, out_ref):
    # x_ref  : (1, KP, N_OFF*B_TILE*HWP) taps on sublanes; lanes offset-major
    # wc_ref : (C_OUT, KP)    conv weights, tap order c*k*k + kh*k + kw
    # bc_ref : (C_OUT, 1)     conv bias
    # wfc_ref: (N_CLS, C_OUT, HWP) fc weights * 2.0 (dropout scale folded in)
    # bfc_ref: (1, N_CLS)
    # out_ref: (1, B_TILE, N_CLS)
    b_tile = out_ref.shape[1]
    hwp = wfc_ref.shape[-1]
    nb = b_tile * hwp

    # conv('same') for all 4 pool offsets and all B_TILE samples in one MXU
    # matmul: (32, KP) x (KP, 4*B_TILE*HWP).
    acc = jnp.dot(wc_ref[...], x_ref[0],
                  preferred_element_type=jnp.float32)         # (32, 4*nb)

    # maxpool(2,2): max over the 4 contiguous offset blocks; then bias + relu
    # once (bias/relu commute with max).
    pooled = jnp.maximum(jnp.maximum(acc[:, 0:nb], acc[:, nb:2 * nb]),
                         jnp.maximum(acc[:, 2 * nb:3 * nb],
                                     acc[:, 3 * nb:4 * nb]))  # (32, nb)
    pooled = jnp.maximum(pooled + bc_ref[...], 0.0)

    # F.dropout(x): p=0.5, training=True (PyTorch default). Scale 1/(1-p)=2 is
    # folded into wfc host-side, so here we only zero out dropped elements.
    # TODO(synk): RNG stream differs from torch (in-kernel integer hash);
    # drop probability / scaling semantics are preserved.
    key = (seed_ref[0] + pl.program_id(0) * 7919).astype(jnp.uint32)
    keep = _hash_keep_mask(pooled.shape, key)
    act = jnp.where(keep, pooled, 0.0)                        # (32, nb)

    # fc: 3 classes; per-sample multiply + full reduction against (32, HWP).
    # (Padded lanes of wfc are zero, so HWP padding stays exact.)
    col = jax.lax.broadcasted_iota(jnp.int32, (1, N_CLS), 1)
    rows = []
    for b in range(b_tile):
        a_b = act[:, b * hwp:(b + 1) * hwp]                   # (32, HWP)
        v = [jnp.sum(a_b * wfc_ref[n]) for n in range(N_CLS)]
        rows.append(jnp.where(col == 0, v[0],
                              jnp.where(col == 1, v[1], v[2])))
    logits = jnp.concatenate(rows, axis=0) + bfc_ref[...]     # (B_TILE, N_CLS)
    out_ref[0] = logits.astype(out_ref.dtype)


def net3_forward(x, params, seed, *, kernel_size=3, batch_tile=8):
    conv_w, conv_b, fc_w, fc_b = params
    B = x.shape[0]
    k = kernel_size
    p = (k - 1) // 2
    kk = C_IN * k * k                       # conv contraction depth (27 for k=3)
    KP = max(8, -(-kk // 8) * 8)            # padded to sublane multiple (-> 32)

    # B_TILE=8 keeps the double-buffered input block well under the default
    # scoped VMEM on v5e/v6e/v7x; raise vmem_limit_bytes before going bigger.
    bt = max(1, min(batch_tile, B))
    Bp = -(-B // bt) * bt
    T = Bp // bt

    # ---- layout glue: per-(pool offset, tap) strided views, channel-major ----
    xf = x.astype(jnp.float32)
    if Bp != B:
        xf = jnp.pad(xf, ((0, Bp - B), (0, 0), (0, 0), (0, 0)))
    x_pad = jnp.pad(xf, ((0, 0), (0, 0), (p, p), (p, p)))     # (Bp,3,60+2p,80+2p)

    offs = []
    for r in range(2):
        for s in range(2):
            taps = []
            for kh in range(k):
                for kw in range(k):
                    taps.append(x_pad[:, :, r + kh:r + kh + IN_H:2,
                                      s + kw:s + kw + IN_W:2])  # (Bp,3,30,40)
            t = jnp.stack(taps, axis=2)                         # (Bp,3,k*k,30,40)
            offs.append(t.reshape(Bp, kk, HW))                  # c-major tap order
    x_off = jnp.stack(offs, axis=1)                             # (Bp,4,kk,HW)
    x_off = jnp.pad(x_off, ((0, 0), (0, 0), (0, KP - kk), (0, HWP - HW)))
    # (T, KP, 4*bt*HWP): lane index = offset*(bt*HWP) + b_local*HWP + hw
    xq = x_off.reshape(T, bt, N_OFF, KP, HWP).transpose(0, 3, 2, 1, 4)
    xq = xq.reshape(T, KP, N_OFF * bt * HWP)

    wc = jnp.pad(conv_w.reshape(C_OUT, kk).astype(jnp.float32),
                 ((0, 0), (0, KP - kk)))                        # (32, KP)
    bc = conv_b.reshape(C_OUT, 1).astype(jnp.float32)
    # fc weights in PyTorch flatten order (C, H, W); dropout 1/(1-p)=2 folded.
    wfc = fc_w.reshape(N_CLS, C_OUT, HW).astype(jnp.float32) * 2.0
    wfc = jnp.pad(wfc, ((0, 0), (0, 0), (0, HWP - HW)))         # (3, 32, HWP)
    bfc = fc_b.reshape(1, N_CLS).astype(jnp.float32)
    seed_arr = jnp.asarray([seed], dtype=jnp.int32)

    lanes = N_OFF * bt * HWP
    grid_spec = pltpu.PrefetchScalarGridSpec(
        num_scalar_prefetch=1,              # seed -> SMEM
        grid=(T,),
        in_specs=[
            pl.BlockSpec((1, KP, lanes), lambda t, s: (t, 0, 0)),
            pl.BlockSpec((C_OUT, KP), lambda t, s: (0, 0)),
            pl.BlockSpec((C_OUT, 1), lambda t, s: (0, 0)),
            pl.BlockSpec((N_CLS, C_OUT, HWP), lambda t, s: (0, 0, 0)),
            pl.BlockSpec((1, N_CLS), lambda t, s: (0, 0)),
        ],
        out_specs=pl.BlockSpec((1, bt, N_CLS), lambda t, s: (t, 0, 0)),
    )
    out = pl.pallas_call(
        _net3_kernel,
        out_shape=jax.ShapeDtypeStruct((T, bt, N_CLS), jnp.float32),
        grid_spec=grid_spec,
        compiler_params=pltpu.CompilerParams(
            dimension_semantics=("parallel",)),   # batch tiles are independent
    )(seed_arr, xq, wc, bc, wfc, bfc)
    return out.reshape(Bp, N_CLS)[:B]


if __name__ == "__main__":
    kernel_size = 3
    key = jax.random.PRNGKey(0)
    kx, kw1, kb1, kw2, kb2 = jax.random.split(key, 5)

    # Input: batch=2, NCHW, spatial 60x80 (required by fc = 32*30*40).
    x = jax.random.normal(kx, (2, C_IN, IN_H, IN_W), dtype=jnp.float32)

    # Deterministic parameter init (PyTorch-style uniform(-1/sqrt(fan_in), .)).
    fan_c = C_IN * kernel_size * kernel_size
    bnd_c = 1.0 / (fan_c ** 0.5)
    conv_w = jax.random.uniform(kw1, (C_OUT, C_IN, kernel_size, kernel_size),
                                minval=-bnd_c, maxval=bnd_c, dtype=jnp.float32)
    conv_b = jax.random.uniform(kb1, (C_OUT,), minval=-bnd_c, maxval=bnd_c,
                                dtype=jnp.float32)
    fan_f = C_OUT * HW
    bnd_f = 1.0 / (fan_f ** 0.5)
    fc_w = jax.random.uniform(kw2, (N_CLS, fan_f), minval=-bnd_f, maxval=bnd_f,
                              dtype=jnp.float32)
    fc_b = jax.random.uniform(kb2, (N_CLS,), minval=-bnd_f, maxval=bnd_f,
                              dtype=jnp.float32)

    out = net3_forward(x, (conv_w, conv_b, fc_w, fc_b), seed=1234,
                       kernel_size=kernel_size)
    out = jax.block_until_ready(out)
    assert out.shape == (2, N_CLS), out.shape
    assert bool(jnp.all(jnp.isfinite(out)))
    print("KERNEL_OK")
</pallas_src>

<mosaic_0001>
module attributes {stable_mosaic.version = 11 : i64} {
  func.func @_net3_kernel(%arg0: i32, %arg1: memref<1xi32, #tpu.memory_space<smem>>, %arg2: memref<1x32x10240xf32, #tpu.memory_space<vmem>>, %arg3: memref<32x32xf32, #tpu.memory_space<vmem>>, %arg4: memref<32x1xf32, #tpu.memory_space<vmem>>, %arg5: memref<3x32x1280xf32, #tpu.memory_space<vmem>>, %arg6: memref<1x3xf32, #tpu.memory_space<vmem>>, %arg7: memref<1x2x3xf32, #tpu.memory_space<vmem>>) attributes {dimension_semantics = [#tpu.dimension_semantics<parallel>], iteration_bounds = array<i64: 1>, scalar_prefetch = 1 : i64, scratch_operands = 0 : i64, tpu.core_type = #tpu.core_type<tc>, window_params = [{transform_indices = @transform_0, window_bounds = array<i64: 1, 32, 10240>}, {pipeline_mode = #tpu.pipeline_mode<synchronous>, transform_indices = @transform_1, window_bounds = array<i64: 32, 32>}, {pipeline_mode = #tpu.pipeline_mode<synchronous>, transform_indices = @transform_2, window_bounds = array<i64: 32, 1>}, {pipeline_mode = #tpu.pipeline_mode<synchronous>, transform_indices = @transform_3, window_bounds = array<i64: 3, 32, 1280>}, {pipeline_mode = #tpu.pipeline_mode<synchronous>, transform_indices = @transform_4, window_bounds = array<i64: 1, 3>}, {transform_indices = @transform_5, window_bounds = array<i64: 1, 2, 3>}]} {
    %c0 = arith.constant 0 : index
    %c0_0 = arith.constant 0 : index
    %0 = vector.load %arg3[%c0, %c0_0] : memref<32x32xf32, #tpu.memory_space<vmem>>, vector<32x32xf32>
    %c0_1 = arith.constant 0 : index
    %c0_2 = arith.constant 0 : index
    %c0_3 = arith.constant 0 : index
    %1 = vector.load %arg2[%c0_1, %c0_2, %c0_3] : memref<1x32x10240xf32, #tpu.memory_space<vmem>>, vector<1x32x10240xf32>
    %2 = vector.shape_cast %1 : vector<1x32x10240xf32> to vector<32x10240xf32>
    %cst = arith.constant dense<0.000000e+00> : vector<32x10240xf32>
    %3 = tpu.matmul %0, %2, %cst {dimension_numbers = #tpu.dot_dimension_numbers<[1], [0], [0], [1], [0, 0, 1, 1], [], []>} : vector<32x32xf32>, vector<32x10240xf32>, vector<32x10240xf32> -> vector<32x10240xf32>
    %4 = vector.extract_strided_slice %3 {offsets = [0, 0], sizes = [32, 2560], strides = [1, 1]} : vector<32x10240xf32> to vector<32x2560xf32>
    %5 = vector.extract_strided_slice %3 {offsets = [0, 2560], sizes = [32, 2560], strides = [1, 1]} : vector<32x10240xf32> to vector<32x2560xf32>
    %6 = arith.maximumf %4, %5 : vector<32x2560xf32>
    %7 = vector.extract_strided_slice %3 {offsets = [0, 5120], sizes = [32, 2560], strides = [1, 1]} : vector<32x10240xf32> to vector<32x2560xf32>
    %8 = vector.extract_strided_slice %3 {offsets = [0, 7680], sizes = [32, 2560], strides = [1, 1]} : vector<32x10240xf32> to vector<32x2560xf32>
    %9 = arith.maximumf %7, %8 : vector<32x2560xf32>
    %10 = arith.maximumf %6, %9 : vector<32x2560xf32>
    %c0_4 = arith.constant 0 : index
    %c0_5 = arith.constant 0 : index
    %11 = vector.load %arg4[%c0_4, %c0_5] : memref<32x1xf32, #tpu.memory_space<vmem>>, vector<32x1xf32>
    %12 = vector.broadcast %11 : vector<32x1xf32> to vector<32x2560xf32>
    %13 = arith.addf %10, %12 : vector<32x2560xf32>
    %cst_6 = arith.constant 0.000000e+00 : f32
    %14 = vector.broadcast %cst_6 : f32 to vector<32x2560xf32>
    %15 = arith.maximumf %13, %14 : vector<32x2560xf32>
    %c0_7 = arith.constant 0 : index
    %16 = memref.load %arg1[%c0_7] : memref<1xi32, #tpu.memory_space<smem>>
    %c7919_i32 = arith.constant 7919 : i32
    %17 = arith.muli %arg0, %c7919_i32 : i32
    %18 = arith.addi %16, %17 : i32
    %19 = tpu.iota {dimensions = array<i32: 0>} : vector<32x2560xi32>
    %20 = tpu.iota {dimensions = array<i32: 1>} : vector<32x2560xi32>
    %c-1640531535_i32 = arith.constant -1640531535 : i32
    %21 = vector.broadcast %c-1640531535_i32 : i32 to vector<32x2560xi32>
    %22 = arith.muli %19, %21 : vector<32x2560xi32>
    %c-2048144777_i32 = arith.constant -2048144777 : i32
    %23 = vector.broadcast %c-2048144777_i32 : i32 to vector<32x2560xi32>
    %24 = arith.muli %20, %23 : vector<32x2560xi32>
    %25 = arith.addi %22, %24 : vector<32x2560xi32>
    %26 = vector.broadcast %18 : i32 to vector<32x2560xi32>
    %27 = arith.addi %25, %26 : vector<32x2560xi32>
    %c16_i32 = arith.constant 16 : i32
    %28 = vector.broadcast %c16_i32 : i32 to vector<32x2560xi32>
    %29 = arith.shrui %27, %28 : vector<32x2560xi32>
    %30 = arith.xori %27, %29 : vector<32x2560xi32>
    %c2146121005_i32 = arith.constant 2146121005 : i32
    %31 = vector.broadcast %c2146121005_i32 : i32 to vector<32x2560xi32>
    %32 = arith.muli %30, %31 : vector<32x2560xi32>
    %c15_i32 = arith.constant 15 : i32
    %33 = vector.broadcast %c15_i32 : i32 to vector<32x2560xi32>
    %34 = arith.shrui %32, %33 : vector<32x2560xi32>
    %35 = arith.xori %32, %34 : vector<32x2560xi32>
    %c-2073254261_i32 = arith.constant -2073254261 : i32
    %36 = vector.broadcast %c-2073254261_i32 : i32 to vector<32x2560xi32>
    %37 = arith.muli %35, %36 : vector<32x2560xi32>
    %c16_i32_8 = arith.constant 16 : i32
    %38 = vector.broadcast %c16_i32_8 : i32 to vector<32x2560xi32>
    %39 = arith.shrui %37, %38 : vector<32x2560xi32>
    %40 = arith.xori %37, %39 : vector<32x2560xi32>
    %c-2147483648_i32 = arith.constant -2147483648 : i32
    %41 = vector.broadcast %c-2147483648_i32 : i32 to vector<32x2560xi32>
    %42 = arith.cmpi ult, %40, %41 : vector<32x2560xi32>
    %cst_9 = arith.constant 0.000000e+00 : f32
    %43 = vector.broadcast %cst_9 : f32 to vector<32x2560xf32>
    %44 = arith.select %42, %15, %43 : vector<32x2560xi1>, vector<32x2560xf32>
    %45 = tpu.iota {dimensions = array<i32: 1>} : vector<1x3xi32>
    %46 = vector.extract_strided_slice %44 {offsets = [0, 0], sizes = [32, 1280], strides = [1, 1]} : vector<32x2560xf32> to vector<32x1280xf32>
    %c0_10 = arith.constant 0 : index
    %c0_11 = arith.constant 0 : index
    %c0_12 = arith.constant 0 : index
    %47 = vector.load %arg5[%c0_10, %c0_11, %c0_12] : memref<3x32x1280xf32, #tpu.memory_space<vmem>>, vector<1x32x1280xf32>
    %48 = vector.shape_cast %47 : vector<1x32x1280xf32> to vector<32x1280xf32>
    %49 = arith.mulf %46, %48 : vector<32x1280xf32>
    %50 = vector.shape_cast %49 : vector<32x1280xf32> to vector<1x32x1280xf32>
    %cst_13 = arith.constant dense<0.000000e+00> : vector<1xf32>
    %51 = vector.multi_reduction <add>, %50, %cst_13 [1, 2] : vector<1x32x1280xf32> to vector<1xf32>
    %52 = vector.shape_cast %51 : vector<1xf32> to vector<1x1x1xf32>
    %53 = vector.extract %52[0, 0, 0] : f32 from vector<1x1x1xf32>
    %c1 = arith.constant 1 : index
    %c0_14 = arith.constant 0 : index
    %c0_15 = arith.constant 0 : index
    %54 = vector.load %arg5[%c1, %c0_14, %c0_15] : memref<3x32x1280xf32, #tpu.memory_space<vmem>>, vector<1x32x1280xf32>
    %55 = vector.shape_cast %54 : vector<1x32x1280xf32> to vector<32x1280xf32>
    %56 = arith.mulf %46, %55 : vector<32x1280xf32>
    %57 = vector.shape_cast %56 : vector<32x1280xf32> to vector<1x32x1280xf32>
    %cst_16 = arith.constant dense<0.000000e+00> : vector<1xf32>
    %58 = vector.multi_reduction <add>, %57, %cst_16 [1, 2] : vector<1x32x1280xf32> to vector<1xf32>
    %59 = vector.shape_cast %58 : vector<1xf32> to vector<1x1x1xf32>
    %60 = vector.extract %59[0, 0, 0] : f32 from vector<1x1x1xf32>
    %c2 = arith.constant 2 : index
    %c0_17 = arith.constant 0 : index
    %c0_18 = arith.constant 0 : index
    %61 = vector.load %arg5[%c2, %c0_17, %c0_18] : memref<3x32x1280xf32, #tpu.memory_space<vmem>>, vector<1x32x1280xf32>
    %62 = vector.shape_cast %61 : vector<1x32x1280xf32> to vector<32x1280xf32>
    %63 = arith.mulf %46, %62 : vector<32x1280xf32>
    %64 = vector.shape_cast %63 : vector<32x1280xf32> to vector<1x32x1280xf32>
    %cst_19 = arith.constant dense<0.000000e+00> : vector<1xf32>
    %65 = vector.multi_reduction <add>, %64, %cst_19 [1, 2] : vector<1x32x1280xf32> to vector<1xf32>
    %66 = vector.shape_cast %65 : vector<1xf32> to vector<1x1x1xf32>
    %67 = vector.extract %66[0, 0, 0] : f32 from vector<1x1x1xf32>
    %c0_i32 = arith.constant 0 : i32
    %68 = vector.broadcast %c0_i32 : i32 to vector<1x3xi32>
    %69 = arith.cmpi eq, %45, %68 : vector<1x3xi32>
    %c1_i32 = arith.constant 1 : i32
    %70 = vector.broadcast %c1_i32 : i32 to vector<1x3xi32>
    %71 = arith.cmpi eq, %45, %70 : vector<1x3xi32>
    %72 = vector.broadcast %60 : f32 to vector<1x3xf32>
    %73 = vector.broadcast %67 : f32 to vector<1x3xf32>
    %74 = arith.select %71, %72, %73 : vector<1x3xi1>, vector<1x3xf32>
    %75 = vector.broadcast %53 : f32 to vector<1x3xf32>
    %76 = arith.select %69, %75, %74 : vector<1x3xi1>, vector<1x3xf32>
    %77 = vector.extract_strided_slice %44 {offsets = [0, 1280], sizes = [32, 1280], strides = [1, 1]} : vector<32x2560xf32> to vector<32x1280xf32>
    %c0_20 = arith.constant 0 : index
    %c0_21 = arith.constant 0 : index
    %c0_22 = arith.constant 0 : index
    %78 = vector.load %arg5[%c0_20, %c0_21, %c0_22] : memref<3x32x1280xf32, #tpu.memory_space<vmem>>, vector<1x32x1280xf32>
    %79 = vector.shape_cast %78 : vector<1x32x1280xf32> to vector<32x1280xf32>
    %80 = arith.mulf %77, %79 : vector<32x1280xf32>
    %81 = vector.shape_cast %80 : vector<32x1280xf32> to vector<1x32x1280xf32>
    %cst_23 = arith.constant dense<0.000000e+00> : vector<1xf32>
    %82 = vector.multi_reduction <add>, %81, %cst_23 [1, 2] : vector<1x32x1280xf32> to vector<1xf32>
    %83 = vector.shape_cast %82 : vector<1xf32> to vector<1x1x1xf32>
    %84 = vector.extract %83[0, 0, 0] : f32 from vector<1x1x1xf32>
    %c1_24 = arith.constant 1 : index
    %c0_25 = arith.constant 0 : index
    %c0_26 = arith.constant 0 : index
    %85 = vector.load %arg5[%c1_24, %c0_25, %c0_26] : memref<3x32x1280xf32, #tpu.memory_space<vmem>>, vector<1x32x1280xf32>
    %86 = vector.shape_cast %85 : vector<1x32x1280xf32> to vector<32x1280xf32>
    %87 = arith.mulf %77, %86 : vector<32x1280xf32>
    %88 = vector.shape_cast %87 : vector<32x1280xf32> to vector<1x32x1280xf32>
    %cst_27 = arith.constant dense<0.000000e+00> : vector<1xf32>
    %89 = vector.multi_reduction <add>, %88, %cst_27 [1, 2] : vector<1x32x1280xf32> to vector<1xf32>
    %90 = vector.shape_cast %89 : vector<1xf32> to vector<1x1x1xf32>
    %91 = vector.extract %90[0, 0, 0] : f32 from vector<1x1x1xf32>
    %c2_28 = arith.constant 2 : index
    %c0_29 = arith.constant 0 : index
    %c0_30 = arith.constant 0 : index
    %92 = vector.load %arg5[%c2_28, %c0_29, %c0_30] : memref<3x32x1280xf32, #tpu.memory_space<vmem>>, vector<1x32x1280xf32>
    %93 = vector.shape_cast %92 : vector<1x32x1280xf32> to vector<32x1280xf32>
    %94 = arith.mulf %77, %93 : vector<32x1280xf32>
    %95 = vector.shape_cast %94 : vector<32x1280xf32> to vector<1x32x1280xf32>
    %cst_31 = arith.constant dense<0.000000e+00> : vector<1xf32>
    %96 = vector.multi_reduction <add>, %95, %cst_31 [1, 2] : vector<1x32x1280xf32> to vector<1xf32>
    %97 = vector.shape_cast %96 : vector<1xf32> to vector<1x1x1xf32>
    %98 = vector.extract %97[0, 0, 0] : f32 from vector<1x1x1xf32>
    %c0_i32_32 = arith.constant 0 : i32
    %99 = vector.broadcast %c0_i32_32 : i32 to vector<1x3xi32>
    %100 = arith.cmpi eq, %45, %99 : vector<1x3xi32>
    %c1_i32_33 = arith.constant 1 : i32
    %101 = vector.broadcast %c1_i32_33 : i32 to vector<1x3xi32>
    %102 = arith.cmpi eq, %45, %101 : vector<1x3xi32>
    %103 = vector.broadcast %91 : f32 to vector<1x3xf32>
    %104 = vector.broadcast %98 : f32 to vector<1x3xf32>
    %105 = arith.select %102, %103, %104 : vector<1x3xi1>, vector<1x3xf32>
    %106 = vector.broadcast %84 : f32 to vector<1x3xf32>
    %107 = arith.select %100, %106, %105 : vector<1x3xi1>, vector<1x3xf32>
    %108 = tpu.concatenate %76, %107 in 0 : vector<1x3xf32>, vector<1x3xf32> -> vector<2x3xf32>
    %c0_34 = arith.constant 0 : index
    %c0_35 = arith.constant 0 : index
    %109 = vector.load %arg6[%c0_34, %c0_35] : memref<1x3xf32, #tpu.memory_space<vmem>>, vector<1x3xf32>
    %110 = vector.broadcast %109 : vector<1x3xf32> to vector<2x3xf32>
    %111 = arith.addf %108, %110 : vector<2x3xf32>
    %c0_36 = arith.constant 0 : index
    %c0_37 = arith.constant 0 : index
    %c0_38 = arith.constant 0 : index
    %112 = vector.load %arg7[%c0_36, %c0_37, %c0_38] : memref<1x2x3xf32, #tpu.memory_space<vmem>>, vector<1x2x3xf32>
    %113 = vector.shape_cast %112 : vector<1x2x3xf32> to vector<2x3xf32>
    %114 = vector.shape_cast %111 : vector<2x3xf32> to vector<1x2x3xf32>
    tpu.vector_store %arg7[%c0_36, %c0_37, %c0_38], %114 {strides = array<i32>} : memref<1x2x3xf32, #tpu.memory_space<vmem>>, vector<1x2x3xf32>,
    return
  }
  func.func @transform_0(%arg0: i32, %arg1: memref<1xi32, #tpu.memory_space<smem>>) -> (i32, i32, i32) {
    %c0_i32 = arith.constant 0 : i32
    %c0_i32_0 = arith.constant 0 : i32
    %c0_i32_1 = arith.constant 0 : i32
    return %arg0, %c0_i32, %c0_i32_0 : i32, i32, i32
  }
  func.func @transform_1(%arg0: i32, %arg1: memref<1xi32, #tpu.memory_space<smem>>) -> (i32, i32) {
    %c0_i32 = arith.constant 0 : i32
    %c0_i32_0 = arith.constant 0 : i32
    %c0_i32_1 = arith.constant 0 : i32
    return %c0_i32, %c0_i32_0 : i32, i32
  }
  func.func @transform_2(%arg0: i32, %arg1: memref<1xi32, #tpu.memory_space<smem>>) -> (i32, i32) {
    %c0_i32 = arith.constant 0 : i32
    %c0_i32_0 = arith.constant 0 : i32
    %c0_i32_1 = arith.constant 0 : i32
    return %c0_i32, %c0_i32_0 : i32, i32
  }
  func.func @transform_3(%arg0: i32, %arg1: memref<1xi32, #tpu.memory_space<smem>>) -> (i32, i32, i32) {
    %c0_i32 = arith.constant 0 : i32
    %c0_i32_0 = arith.constant 0 : i32
    %c0_i32_1 = arith.constant 0 : i32
    %c0_i32_2 = arith.constant 0 : i32
    return %c0_i32, %c0_i32_0, %c0_i32_1 : i32, i32, i32
  }
  func.func @transform_4(%arg0: i32, %arg1: memref<1xi32, #tpu.memory_space<smem>>) -> (i32, i32) {
    %c0_i32 = arith.constant 0 : i32
    %c0_i32_0 = arith.constant 0 : i32
    %c0_i32_1 = arith.constant 0 : i32
    return %c0_i32, %c0_i32_0 : i32, i32
  }
  func.func @transform_5(%arg0: i32, %arg1: memref<1xi32, #tpu.memory_space<smem>>) -> (i32, i32, i32) {
    %c0_i32 = arith.constant 0 : i32
    %c0_i32_0 = arith.constant 0 : i32
    %c0_i32_1 = arith.constant 0 : i32
    return %arg0, %c0_i32, %c0_i32_0 : i32, i32, i32
  }
}

</mosaic_0001>

<bundles_post_ra>
// kernel: tpu_custom_call.1
= control target key start
LH: loop header
LB: loop body
LE: loop exit
PB: predicated region body
PF: predicated region fallthrough
CT: control target
= control target key end

     0   :  { %12 = vsyncpa [#allocation5], 0  ;;  %s10185_s0 = inlined_call_operand.<no memory space> [shape: s32[1], index: 0, kind: input, shape index: {}]   ;;  %s10186_s1 = inlined_call_operand.hbm [shape: f32[1,32,10240], index: 1, kind: input, shape index: {}]   ;;  %s10187_s2 = inlined_call_operand.hbm [shape: f32[32,32], index: 2, kind: input, shape index: {}]   ;;  %s10188_s3 = inlined_call_operand.vmem [shape: f32[32,1], index: 3, kind: input, shape index: {}]   ;;  %s10189_s4 = inlined_call_operand.hbm [shape: f32[3,32,1280], index: 4, kind: input, shape index: {}]   ;;  %s10190_s5 = inlined_call_operand.hbm [shape: f32[1,3], index: 5, kind: input, shape index: {}]   ;;  %s10191_s6 = inlined_call_operand.hbm [shape: f32[1,2,3], index: 6, kind: output, shape index: {}]  }
   0x1   :  { %13 = vsyncpa [#allocation8], 0 }
   0x2   :  { %14 = vsyncpa [#allocation11], 0 }
   0x3   :  { %15 = vsyncpa [#allocation6], 0  ;;  %s6789_s21 = smov [#allocation7]   ;;  %s6671_s25 = scalar_lea.hbm %s10187_s2, 512 }
   0x4   :  { %s33_s22 = sshll.u32 %s6789_s21, 4  ;;  %p6672_p0 = scmp.ne.s32.totalorder %s10187_s2, %s6671_s25  ;;  %s34_s22 = int_to_ptr.vmem [resolvable:$true] %s33_s22 }
   0x5   :  { %p6675_p1 = scmp.lt.u32.totalorder %s6671_s25, %s10187_s2 }
   0x7   :  { %p6677_p2 = pnand %p6675_p1, %p6672_p0 }
   0x9   :  { %6680 = shalt.err (!%p6677_p2)
}
   0xa   :  { %s6681_s30 = scalar_lea.vmem %s34_s22, 512  ;;  %p6686_p4 = scmp.lt.s32.totalorder %s34_s22, %s34_s22 }
   0xb   :  { %p6682_p3 = scmp.ne.s32.totalorder %s34_s22, %s6681_s30  ;;  %p6687_p5 = scmp.lt.s32.totalorder %s6681_s30, %s6681_s30 }
   0xd   :  { %p6688_p6 = por %p6687_p5, %p6686_p4 }
   0xf   :  { %p6689_p7 = pnand %p6688_p6, %p6682_p3 }
  0x11   :  { %6692 = shalt.err (!%p6689_p7)
}
  0x12   :  { %s6790_s7 = smov 128   ;;  %s6791_s8 = smov 8  }
  0x13   :  { %39 = dma.hbm_to_vmem [thread:$0]  %s10187_s2, 512, %s34_s22, [#allocation8], %s6790_s7, %s6790_s7, %s6791_s8  }
  0x14   :  { %s6792_s11 = smov [#allocation4]   ;;  %s6693_s15 = scalar_lea.hbm %s10186_s1, 40960 }
  0x15   :  { %s21_s12 = sshll.u32 %s6792_s11, 4  ;;  %p6694_p8 = scmp.ne.s32.totalorder %s10186_s1, %s6693_s15  ;;  %s22_s12 = int_to_ptr.vmem [resolvable:$true] %s21_s12 }
  0x16   :  { %p6697_p9 = scmp.lt.u32.totalorder %s6693_s15, %s10186_s1 }
  0x18   :  { %p6699_p10 = pnand %p6697_p9, %p6694_p8 }
  0x1a   :  { %6702 = shalt.err (!%p6699_p10)
}
  0x1b   :  { %s6703_s20 = scalar_lea.vmem %s22_s12, 40960  ;;  %p6708_p12 = scmp.lt.s32.totalorder %s22_s12, %s22_s12 }
  0x1c   :  { %p6704_p11 = scmp.ne.s32.totalorder %s22_s12, %s6703_s20  ;;  %p6709_p13 = scmp.lt.s32.totalorder %s6703_s20, %s6703_s20 }
  0x1e   :  { %p6710_p0 = por %p6709_p13, %p6708_p12 }
  0x20   :  { %p6711_p1 = pnand %p6710_p0, %p6704_p11 }
  0x22   :  { %6714 = shalt.err (!%p6711_p1)
}
  0x23   :  { %s6793_s2 = smov 10240   ;;  %s6794_s21 = smov 640  }
  0x24   :  { %27 = dma.hbm_to_vmem [thread:$0]  %s10186_s1, 40960, %s22_s12, [#allocation5], %s6793_s2, %s6793_s2, %s6794_s21  }
  0x25   :  { %s6795_s24 = smov [#allocation9]   ;;  %s6715_s28 = scalar_lea.hbm %s10189_s4, 15360 }
  0x26   :  { %s47_s25 = sshll.u32 %s6795_s24, 4  ;;  %p6716_p2 = scmp.ne.s32.totalorder %s10189_s4, %s6715_s28  ;;  %s48_s25 = int_to_ptr.vmem [resolvable:$true] %s47_s25 }
  0x27   :  { %p6719_p3 = scmp.lt.u32.totalorder %s6715_s28, %s10189_s4 }
  0x29   :  { %p6721_p4 = pnand %p6719_p3, %p6716_p2 }
  0x2b   :  { %6724 = shalt.err (!%p6721_p4)
}
  0x2c   :  { %s6725_s9 = scalar_lea.vmem %s48_s25, 15360  ;;  %p6730_p6 = scmp.lt.s32.totalorder %s48_s25, %s48_s25 }
  0x2d   :  { %p6726_p5 = scmp.ne.s32.totalorder %s48_s25, %s6725_s9  ;;  %p6731_p7 = scmp.lt.s32.totalorder %s6725_s9, %s6725_s9 }
  0x2f   :  { %p6732_p8 = por %p6731_p7, %p6730_p6 }
  0x31   :  { %p6733_p9 = pnand %p6732_p8, %p6726_p5 }
  0x33   :  { %6736 = shalt.err (!%p6733_p9)
}
  0x34   :  { %s6796_s1 = smov 1280   ;;  %s6797_s10 = smov 80  }
  0x35   :  { %53 = dma.hbm_to_vmem [thread:$0]  %s10189_s4, 15360, %s48_s25, [#allocation8], %s6796_s1, %s6796_s1, %s6797_s10  }
  0x36   :  { %s6798_s13 = smov [#allocation10]   ;;  %s6737_s17 = scalar_lea.hbm %s10190_s5, 16 }
  0x37   :  { %s60_s14 = sshll.u32 %s6798_s13, 4  ;;  %p6738_p10 = scmp.ne.s32.totalorder %s10190_s5, %s6737_s17  ;;  %s61_s14 = int_to_ptr.vmem [resolvable:$true] %s60_s14 }
  0x38   :  { %p6741_p11 = scmp.lt.u32.totalorder %s6737_s17, %s10190_s5 }
  0x3a   :  { %p6743_p12 = pnand %p6741_p11, %p6738_p10 }
  0x3c   :  { %6746 = shalt.err (!%p6743_p12)
}
  0x3d   :  { %s6747_s21 = scalar_lea.vmem %s61_s14, 16  ;;  %s6751_s4 = scalar_lea.vmem %s61_s14, 32 }
  0x3e   :  { %p6748_p13 = scmp.ne.s32.totalorder %s61_s14, %s6747_s21  ;;  %p6752_p0 = scmp.lt.s32.totalorder %s61_s14, %s61_s14 }
  0x3f   :  { %p6753_p1 = scmp.lt.s32.totalorder %s6751_s4, %s6747_s21 }
  0x41   :  { %p6754_p2 = por %p6753_p1, %p6752_p0 }
  0x43   :  { %p6755_p3 = pnand %p6754_p2, %p6748_p13 }
  0x45   :  { %6758 = shalt.err (!%p6755_p3)
}
  0x46   :  { %63 = dma.hbm_to_vmem [thread:$0]  %s10190_s5, 16, %s61_s14, [#allocation11]  }
  0x47   :  { %6781 = dma.done.wait [#allocation5], 40960  }
  0x48   :  { %6782 = vsyncadd [#allocation5], 4294926336 }
  0x49   :  { %6783 = dma.done.wait [#allocation8], 15872  }
  0x4a   :  { %6784 = vsyncadd [#allocation8], 4294951424 }
  0x4b   :  { %6785 = dma.done.wait [#allocation11], 16  }
  0x4c   :  { %6786 = vsyncadd [#allocation11], 4294967280  ;;  %v6799_v0 = vmov 0.0   ;;  %v81_v1 = vld [vmem:[#allocation4 + $0x8] sm:$0xff]  ;;  %v83_v3 = vld [vmem:[#allocation4 + $0x18] sm:$0xff]  ;;  %vm400_vm0 = vcmask 261120  }
  0x4d   :  { %477 = vmatprep.mubr.f32.mxu0 %v6799_v0  ;;  %566 = vmatprep.mubr.f32.mxu1 %v6799_v0  ;;  %v161_v2 = vld [vmem:[#allocation4 + $0x288] sm:$0xff]  ;;  %v163_v5 = vld [vmem:[#allocation4 + $0x298] sm:$0xff]  ;;  %v80_v6 = vld [vmem:[#allocation4] sm:$0xff]  ;;  %s6801_s12 = smov [#allocation12]  }
  0x4e   :  { %v6263_v4 = vpack.c.bf16 %v161_v2, %v81_v1  ;;  %v160_v7 = vld [vmem:[#allocation4 + $0x280] sm:$0xff]  ;;  %v6271_v8 = vpack.c.bf16 %v163_v5, %v83_v3  ;;  %v82_v10 = vld [vmem:[#allocation4 + $0x10] sm:$0xff]  ;;  %v241_v12 = vld [vmem:[#allocation4 + $0x508] sm:$0xff]  ;;  %s6091_s13 = sshll.u32 %s6801_s12, 4  ;;  %s6092_s13 = int_to_ptr.vmem [resolvable:$true] %s6091_s13 }
  0x4f   :  { %v6265_v9 = vpack.c.bf16 %v160_v7, %v80_v6  ;;  %v162_v11 = vld [vmem:[#allocation4 + $0x290] sm:$0xff]  ;;  %v321_v14 = vld [vmem:[#allocation4 + $0x788] sm:$0xff]  ;;  %v243_v15 = vld [vmem:[#allocation4 + $0x518] sm:$0xff]  ;;  %s6759_s14 = scalar_lea.vmem %s6092_s13, 32  ;;  %p6764_p5 = scmp.lt.s32.totalorder %s6092_s13, %s6092_s13 }
  0x50   :  { %6264 = vmatprep.subr.bf16.mxu0 %v6263_v4  ;;  %v6273_v13 = vpack.c.bf16 %v162_v11, %v82_v10  ;;  %v323_v16 = vld [vmem:[#allocation4 + $0x798] sm:$0xff]  ;;  %6272 = vmatprep.subr.bf16.mxu1 %v6271_v8  ;;  %v6267_v17 = vpack.c.bf16 %v321_v14, %v241_v12  ;;  %v240_v19 = vld [vmem:[#allocation4 + $0x500] sm:$0xff]  ;;  %v242_v21 = vld [vmem:[#allocation4 + $0x510] sm:$0xff]  ;;  %p6760_p4 = scmp.ne.s32.totalorder %s6092_s13, %s6759_s14  ;;  %p6765_p6 = scmp.lt.s32.totalorder %s6759_s14, %s6759_s14 }
  0x51   :  { %6266 = vmatpush1.bf16.msra.mxu0 %v6265_v9  ;;  %v6275_v18 = vpack.c.bf16 %v323_v16, %v243_v15  ;;  %v320_v20 = vld [vmem:[#allocation4 + $0x780] sm:$0xff]  ;;  %v322_v23 = vld [vmem:[#allocation4 + $0x790] sm:$0xff]  ;;  %v85_v24 = vld [vmem:[#allocation4 + $0x28] sm:$0xff] }
  0x52   :  { %6274 = vmatpush1.bf16.msra.mxu1 %v6273_v13  ;;  %v6269_v22 = vpack.c.bf16 %v320_v20, %v240_v19  ;;  %6268 = vmatprep.subr.bf16.mxu0 %v6267_v17  ;;  %v6277_v25 = vpack.c.bf16 %v322_v23, %v242_v21  ;;  %v165_v26 = vld [vmem:[#allocation4 + $0x2a8] sm:$0xff]  ;;  %v84_v27 = vld [vmem:[#allocation4 + $0x20] sm:$0xff]  ;;  %v87_v30 = vld [vmem:[#allocation4 + $0x38] sm:$0xff]  ;;  %p6766_p7 = por %p6765_p6, %p6764_p5 }
  0x53   :  { %6276 = vmatprep.subr.bf16.mxu1 %v6275_v18  ;;  %v164_v28 = vld [vmem:[#allocation4 + $0x2a0] sm:$0xff]  ;;  %v6279_v29 = vpack.c.bf16 %v165_v26, %v85_v24  ;;  %v167_v31 = vld [vmem:[#allocation4 + $0x2b8] sm:$0xff]  ;;  %v86_v35 = vld [vmem:[#allocation4 + $0x30] sm:$0xff] }
  0x54   :  { %v6887_v32 = vld [vmem:[#allocation7] sm:$0xff]  ;;  %v6281_v33 = vpack.c.bf16 %v164_v28, %v84_v27  ;;  %v6287_v34 = vpack.c.bf16 %v167_v31, %v87_v30  ;;  %v166_v36 = vld [vmem:[#allocation4 + $0x2b0] sm:$0xff]  ;;  %v245_v37 = vld [vmem:[#allocation4 + $0x528] sm:$0xff]  ;;  %p6767_p8 = pnand %p6766_p7, %p6760_p4 }
  0x55   :  { %6270 = vmatpush1.bf16.msra.mxu0 %v6269_v22  ;;  %v325_v38 = vld [vmem:[#allocation4 + $0x7a8] sm:$0xff]  ;;  %v6289_v39 = vpack.c.bf16 %v166_v36, %v86_v35  ;;  %v244_v41 = vld [vmem:[#allocation4 + $0x520] sm:$0xff]  ;;  %v247_v43 = vld [vmem:[#allocation4 + $0x538] sm:$0xff] }
  0x56   :  { %6278 = vmatpush1.bf16.msra.mxu1 %v6277_v25  ;;  %6280 = vmatprep.subr.bf16.mxu0 %v6279_v29  ;;  %v6283_v40 = vpack.c.bf16 %v325_v38, %v245_v37  ;;  %v324_v42 = vld [vmem:[#allocation4 + $0x7a0] sm:$0xff]  ;;  %v327_v44 = vld [vmem:[#allocation4 + $0x7b8] sm:$0xff]  ;;  %v246_v45 = vld [vmem:[#allocation4 + $0x530] sm:$0xff] }
  0x57   :  { %6288 = vmatprep.subr.bf16.mxu1 %v6287_v34  ;;  %v326_v46 = vld [vmem:[#allocation4 + $0x7b0] sm:$0xff]  ;;  %v6893_v47 = vld [vmem:[#allocation7 + $0x8] sm:$0xff]  ;;  %v6291_v48 = vpack.c.bf16 %v327_v44, %v247_v43  ;;  %v6285_v51 = vpack.c.bf16 %v324_v42, %v244_v41  ;;  %v91_v52 = vld [vmem:[#allocation4 + $0x58] sm:$0xff] }
  0x58   :  { %6102 = vmatmul.mubr.msk.f32.vlgmr.msra.gmra.mrb[0].mxu0 %vm400_vm0, %v6887_v32  ;;  %v89_v49 = vld [vmem:[#allocation4 + $0x48] sm:$0xff]  ;;  %v171_v53 = vld [vmem:[#allocation4 + $0x2d8] sm:$0xff]  ;;  %v6293_v54 = vpack.c.bf16 %v326_v46, %v246_v45  ;;  %v6902_v57 = vld [vmem:[#allocation7 + $0x10] sm:$0xff] }
  0x59   :  { %6106 = vmatmul.mubr.msk.f32.vlgmr.msra.gmra.mrb[0].mxu1 %vm400_vm0, %v6887_v32  ;;  %6282 = vmatpush1.bf16.msra.mxu0 %v6281_v33  ;;  %v169_v50 = vld [vmem:[#allocation4 + $0x2c8] sm:$0xff]  ;;  %v6303_v56 = vpack.c.bf16 %v171_v53, %v91_v52  ;;  %v6910_v58 = vld [vmem:[#allocation7 + $0x18] sm:$0xff]  ;;  %v88_v59 = vld [vmem:[#allocation4 + $0x40] sm:$0xff] }
  0x5a   :  { %483 = vmatprep.mubr.f32.mxu0 %v6799_v0  ;;  %572 = vmatprep.mubr.f32.mxu1 %v6799_v0  ;;  %v6295_v55 = vpack.c.bf16 %v169_v50, %v89_v49  ;;  %v168_v60 = vld [vmem:[#allocation4 + $0x2c0] sm:$0xff]  ;;  %v90_v61 = vld [vmem:[#allocation4 + $0x50] sm:$0xff]  ;;  %v249_v63 = vld [vmem:[#allocation4 + $0x548] sm:$0xff] }
  0x5b   :  { %6290 = vmatpush1.bf16.msra.mxu1 %v6289_v39  ;;  %6284 = vmatprep.subr.bf16.mxu0 %v6283_v40  ;;  %v170_v62 = vld [vmem:[#allocation4 + $0x2d0] sm:$0xff]  ;;  %v329_v1 = vld [vmem:[#allocation4 + $0x7c8] sm:$0xff]  ;;  %v6297_v2 = vpack.c.bf16 %v168_v60, %v88_v59  ;;  %v251_v3 = vld [vmem:[#allocation4 + $0x558] sm:$0xff] }
  0x5c   :  { %6103 = vmatmul.mubr.msk.f32.gmra.mrb[2].mxu0 %vm400_vm0, %v6893_v47  ;;  %6292 = vmatprep.subr.bf16.mxu1 %v6291_v48  ;;  %v331_v4 = vld [vmem:[#allocation4 + $0x7d8] sm:$0xff]  ;;  %v6305_v5 = vpack.c.bf16 %v170_v62, %v90_v61  ;;  %v6299_v6 = vpack.c.bf16 %v329_v1, %v249_v63  ;;  %v248_v7 = vld [vmem:[#allocation4 + $0x540] sm:$0xff]  ;;  %v250_v9 = vld [vmem:[#allocation4 + $0x550] sm:$0xff] }
  0x5d   :  { %6107 = vmatmul.mubr.msk.f32.gmra.mrb[2].mxu1 %vm400_vm0, %v6893_v47  ;;  %489 = vmatprep.mubr.f32.mxu0 %v6799_v0  ;;  %v328_v8 = vld [vmem:[#allocation4 + $0x7c0] sm:$0xff]  ;;  %v6307_v10 = vpack.c.bf16 %v331_v4, %v251_v3  ;;  %v330_v11 = vld [vmem:[#allocation4 + $0x7d0] sm:$0xff]  ;;  %v93_v12 = vld [vmem:[#allocation4 + $0x68] sm:$0xff] }
  0x5e   :  { %578 = vmatprep.mubr.f32.mxu1 %v6799_v0  ;;  %6286 = vmatpush1.bf16.msra.mxu0 %v6285_v51  ;;  %v173_v13 = vld [vmem:[#allocation4 + $0x2e8] sm:$0xff]  ;;  %v95_v14 = vld [vmem:[#allocation4 + $0x78] sm:$0xff]  ;;  %v6301_v16 = vpack.c.bf16 %v328_v8, %v248_v7  ;;  %v6309_v17 = vpack.c.bf16 %v330_v11, %v250_v9  ;;  %v92_v20 = vld [vmem:[#allocation4 + $0x60] sm:$0xff] }
  0x5f   :  { %6294 = vmatpush1.bf16.msra.mxu1 %v6293_v54  ;;  %6296 = vmatprep.subr.bf16.mxu0 %v6295_v55  ;;  %v175_v15 = vld [vmem:[#allocation4 + $0x2f8] sm:$0xff]  ;;  %v6311_v18 = vpack.c.bf16 %v173_v13, %v93_v12  ;;  %v172_v21 = vld [vmem:[#allocation4 + $0x2e0] sm:$0xff]  ;;  %v94_v22 = vld [vmem:[#allocation4 + $0x70] sm:$0xff] }
  0x60   :  { %6104 = vmatmul.mubr.msk.f32.gmra.mrb[4].mxu0 %vm400_vm0, %v6902_v57  ;;  %6304 = vmatprep.subr.bf16.mxu1 %v6303_v56  ;;  %v6319_v19 = vpack.c.bf16 %v175_v15, %v95_v14  ;;  %v174_v23 = vld [vmem:[#allocation4 + $0x2f0] sm:$0xff]  ;;  %v253_v24 = vld [vmem:[#allocation4 + $0x568] sm:$0xff]  ;;  %v6313_v26 = vpack.c.bf16 %v172_v21, %v92_v20  ;;  %v255_v27 = vld [vmem:[#allocation4 + $0x578] sm:$0xff] }
  0x61   :  { %6108 = vmatmul.mubr.msk.f32.gmra.mrb[4].mxu1 %vm400_vm0, %v6902_v57  ;;  %495 = vmatprep.mubr.f32.mxu0 %v6799_v0  ;;  %v333_v25 = vld [vmem:[#allocation4 + $0x7e8] sm:$0xff]  ;;  %v335_v28 = vld [vmem:[#allocation4 + $0x7f8] sm:$0xff]  ;;  %v6321_v29 = vpack.c.bf16 %v174_v23, %v94_v22  ;;  %v252_v31 = vld [vmem:[#allocation4 + $0x560] sm:$0xff] }
  0x62   :  { %584 = vmatprep.mubr.f32.mxu1 %v6799_v0  ;;  %v6315_v30 = vpack.c.bf16 %v333_v25, %v253_v24  ;;  %v332_v33 = vld [vmem:[#allocation4 + $0x7e0] sm:$0xff]  ;;  %v254_v34 = vld [vmem:[#allocation4 + $0x570] sm:$0xff]  ;;  %v6323_v35 = vpack.c.bf16 %v335_v28, %v255_v27  ;;  %v97_v37 = vld [vmem:[#allocation4 + $0x88] sm:$0xff] }
  0x63   :  { %v334_v36 = vld [vmem:[#allocation4 + $0x7f0] sm:$0xff]  ;;  %v177_v38 = vld [vmem:[#allocation4 + $0x308] sm:$0xff]  ;;  %v99_v39 = vld [vmem:[#allocation4 + $0x98] sm:$0xff]  ;;  %v6317_v41 = vpack.c.bf16 %v332_v33, %v252_v31 }
  0x64   :  { %6105 = vmatmul.mubr.msk.f32.gmra.mrb[6].mxu0 %vm400_vm0, %v6910_v58  ;;  %v179_v40 = vld [vmem:[#allocation4 + $0x318] sm:$0xff]  ;;  %v6325_v42 = vpack.c.bf16 %v334_v36, %v254_v34  ;;  %v6327_v43 = vpack.c.bf16 %v177_v38, %v97_v37  ;;  %v96_v45 = vld [vmem:[#allocation4 + $0x80] sm:$0xff]  ;;  %v98_v48 = vld [vmem:[#allocation4 + $0x90] sm:$0xff] }
  0x65   :  { %6109 = vmatmul.mubr.msk.f32.gmra.mrb[6].mxu1 %vm400_vm0, %v6910_v58  ;;  %655 = vmatprep.mubr.f32.mxu0 %v6799_v0  ;;  %v6335_v44 = vpack.c.bf16 %v179_v40, %v99_v39  ;;  %v176_v46 = vld [vmem:[#allocation4 + $0x300] sm:$0xff]  ;;  %v178_v49 = vld [vmem:[#allocation4 + $0x310] sm:$0xff]  ;;  %v257_v50 = vld [vmem:[#allocation4 + $0x588] sm:$0xff] }
  0x66   :  { %744 = vmatprep.mubr.f32.mxu1 %v6799_v0  ;;  %v337_v51 = vld [vmem:[#allocation4 + $0x808] sm:$0xff]  ;;  %v6329_v52 = vpack.c.bf16 %v176_v46, %v96_v45  ;;  %v259_v53 = vld [vmem:[#allocation4 + $0x598] sm:$0xff]  ;;  %v6337_v55 = vpack.c.bf16 %v178_v49, %v98_v48  ;;  %v256_v59 = vld [vmem:[#allocation4 + $0x580] sm:$0xff] }
  0x67   :  { %v339_v54 = vld [vmem:[#allocation4 + $0x818] sm:$0xff]  ;;  %v6331_v56 = vpack.c.bf16 %v337_v51, %v257_v50  ;;  %v336_v60 = vld [vmem:[#allocation4 + $0x800] sm:$0xff]  ;;  %v258_v61 = vld [vmem:[#allocation4 + $0x590] sm:$0xff] }
  0x68   :  { %6110 = vmatmul.mubr.msk.f32.vlgmr.msra.gmra.mrb[8].mxu0 %vm400_vm0, %v6887_v32  ;;  %v6339_v62 = vpack.c.bf16 %v339_v54, %v259_v53  ;;  %v338_v63 = vld [vmem:[#allocation4 + $0x810] sm:$0xff]  ;;  %v101_v1 = vld [vmem:[#allocation4 + $0xa8] sm:$0xff]  ;;  %v103_v3 = vld [vmem:[#allocation4 + $0xb8] sm:$0xff] }
  0x69   :  { %6114 = vmatmul.mubr.msk.f32.vlgmr.msra.gmra.mrb[8].mxu1 %vm400_vm0, %v6887_v32  ;;  %6298 = vmatpush1.bf16.msra.mxu0 %v6297_v2  ;;  %v181_v2 = vld [vmem:[#allocation4 + $0x328] sm:$0xff]  ;;  %v183_v4 = vld [vmem:[#allocation4 + $0x338] sm:$0xff]  ;;  %v100_v9 = vld [vmem:[#allocation4 + $0xa0] sm:$0xff] }
  0x6a   :  { %661 = vmatprep.mubr.f32.mxu0 %v6799_v0  ;;  %750 = vmatprep.mubr.f32.mxu1 %v6799_v0  ;;  %v6343_v7 = vpack.c.bf16 %v181_v2, %v101_v1  ;;  %v6351_v8 = vpack.c.bf16 %v183_v4, %v103_v3  ;;  %v102_v11 = vld [vmem:[#allocation4 + $0xb0] sm:$0xff]  ;;  %v261_v13 = vld [vmem:[#allocation4 + $0x5a8] sm:$0xff]  ;;  %v260_v20 = vld [vmem:[#allocation4 + $0x5a0] sm:$0xff] }
  0x6b   :  { %6306 = vmatpush1.bf16.msra.mxu1 %v6305_v5  ;;  %6300 = vmatprep.subr.bf16.mxu0 %v6299_v6  ;;  %v6333_v5 = vpack.c.bf16 %v336_v60, %v256_v59  ;;  %v6341_v6 = vpack.c.bf16 %v338_v63, %v258_v61  ;;  %v182_v12 = vld [vmem:[#allocation4 + $0x330] sm:$0xff]  ;;  %v341_v14 = vld [vmem:[#allocation4 + $0x828] sm:$0xff]  ;;  %v340_v21 = vld [vmem:[#allocation4 + $0x820] sm:$0xff] }
  0x6c   :  { %6111 = vmatmul.mubr.msk.f32.gmra.mrb[10].mxu0 %vm400_vm0, %v6893_v47  ;;  %6308 = vmatprep.subr.bf16.mxu1 %v6307_v10  ;;  %v180_v10 = vld [vmem:[#allocation4 + $0x320] sm:$0xff]  ;;  %v262_v22 = vld [vmem:[#allocation4 + $0x5b0] sm:$0xff]  ;;  %v105_v25 = vld [vmem:[#allocation4 + $0xc8] sm:$0xff] }
  0x6d   :  { %6115 = vmatmul.mubr.msk.f32.gmra.mrb[10].mxu1 %vm400_vm0, %v6893_v47  ;;  %667 = vmatprep.mubr.f32.mxu0 %v6799_v0  ;;  %v6345_v15 = vpack.c.bf16 %v180_v10, %v100_v9  ;;  %v342_v24 = vld [vmem:[#allocation4 + $0x830] sm:$0xff]  ;;  %v107_v27 = vld [vmem:[#allocation4 + $0xd8] sm:$0xff]  ;;  %v104_v34 = vld [vmem:[#allocation4 + $0xc0] sm:$0xff] }
  0x6e   :  { %756 = vmatprep.mubr.f32.mxu1 %v6799_v0  ;;  %6302 = vmatpush1.bf16.msra.mxu0 %v6301_v16  ;;  %v263_v16 = vld [vmem:[#allocation4 + $0x5b8] sm:$0xff]  ;;  %v106_v36 = vld [vmem:[#allocation4 + $0xd0] sm:$0xff]  ;;  %v265_v38 = vld [vmem:[#allocation4 + $0x5c8] sm:$0xff] }
  0x6f   :  { %6310 = vmatpush1.bf16.msra.mxu1 %v6309_v17  ;;  %6312 = vmatprep.subr.bf16.mxu0 %v6311_v18  ;;  %v343_v17 = vld [vmem:[#allocation4 + $0x838] sm:$0xff]  ;;  %v6353_v18 = vpack.c.bf16 %v182_v12, %v102_v11  ;;  %v186_v37 = vld [vmem:[#allocation4 + $0x350] sm:$0xff]  ;;  %v345_v39 = vld [vmem:[#allocation4 + $0x848] sm:$0xff] }
  0x70   :  { %6112 = vmatmul.mubr.msk.f32.gmra.mrb[12].mxu0 %vm400_vm0, %v6902_v57  ;;  %6320 = vmatprep.subr.bf16.mxu1 %v6319_v19  ;;  %v6347_v19 = vpack.c.bf16 %v341_v14, %v261_v13  ;;  %v6355_v23 = vpack.c.bf16 %v343_v17, %v263_v16  ;;  %v187_v28 = vld [vmem:[#allocation4 + $0x358] sm:$0xff]  ;;  %v264_v45 = vld [vmem:[#allocation4 + $0x5c0] sm:$0xff]  ;;  %v266_v48 = vld [vmem:[#allocation4 + $0x5d0] sm:$0xff] }
  0x71   :  { %6116 = vmatmul.mubr.msk.f32.gmra.mrb[12].mxu1 %vm400_vm0, %v6902_v57  ;;  %673 = vmatprep.mubr.f32.mxu0 %v6799_v0  ;;  %v6367_v33 = vpack.c.bf16 %v187_v28, %v107_v27  ;;  %v344_v46 = vld [vmem:[#allocation4 + $0x840] sm:$0xff]  ;;  %v346_v50 = vld [vmem:[#allocation4 + $0x850] sm:$0xff]  ;;  %v109_v51 = vld [vmem:[#allocation4 + $0xe8] sm:$0xff] }
  0x72   :  { %762 = vmatprep.mubr.f32.mxu1 %v6799_v0  ;;  %v111_v53 = vld [vmem:[#allocation4 + $0xf8] sm:$0xff]  ;;  %v108_v61 = vld [vmem:[#allocation4 + $0xe0] sm:$0xff]  ;;  %v110_v63 = vld [vmem:[#allocation4 + $0xf0] sm:$0xff] }
  0x73   :  { %v191_v54 = vld [vmem:[#allocation4 + $0x378] sm:$0xff]  ;;  %v190_v1 = vld [vmem:[#allocation4 + $0x370] sm:$0xff]  ;;  %v269_v2 = vld [vmem:[#allocation4 + $0x5e8] sm:$0xff] }
  0x74   :  { %6113 = vmatmul.mubr.msk.f32.gmra.mrb[14].mxu0 %vm400_vm0, %v6910_v58  ;;  %v6383_v60 = vpack.c.bf16 %v191_v54, %v111_v53  ;;  %v349_v3 = vld [vmem:[#allocation4 + $0x868] sm:$0xff]  ;;  %v268_v9 = vld [vmem:[#allocation4 + $0x5e0] sm:$0xff]  ;;  %v270_v11 = vld [vmem:[#allocation4 + $0x5f0] sm:$0xff] }
  0x75   :  { %6117 = vmatmul.mubr.msk.f32.gmra.mrb[14].mxu1 %vm400_vm0, %v6910_v58  ;;  %833 = vmatprep.mubr.f32.mxu0 %v6799_v0  ;;  %v348_v10 = vld [vmem:[#allocation4 + $0x860] sm:$0xff]  ;;  %v350_v13 = vld [vmem:[#allocation4 + $0x870] sm:$0xff]  ;;  %v113_v14 = vld [vmem:[#allocation4 + $0x108] sm:$0xff] }
  0x76   :  { %922 = vmatprep.mubr.f32.mxu1 %v6799_v0  ;;  %v115_v16 = vld [vmem:[#allocation4 + $0x118] sm:$0xff]  ;;  %v353_v27 = vld [vmem:[#allocation4 + $0x888] sm:$0xff] }
  0x77   :  { %v195_v17 = vld [vmem:[#allocation4 + $0x398] sm:$0xff]  ;;  %v357_v53 = vld [vmem:[#allocation4 + $0x8a8] sm:$0xff] }
  0x78   :  { %6118 = vmatmul.mubr.msk.f32.vlgmr.msra.gmra.mrb[16].mxu0 %vm400_vm0, %v6887_v32 }
  0x79   :  { %6122 = vmatmul.mubr.msk.f32.vlgmr.msra.gmra.mrb[16].mxu1 %vm400_vm0, %v6887_v32  ;;  %6314 = vmatpush1.bf16.msra.mxu0 %v6313_v26  ;;  %v185_v26 = vld [vmem:[#allocation4 + $0x348] sm:$0xff] }
  0x7a   :  { %839 = vmatprep.mubr.f32.mxu0 %v6799_v0  ;;  %928 = vmatprep.mubr.f32.mxu1 %v6799_v0  ;;  %v6359_v31 = vpack.c.bf16 %v185_v26, %v105_v25  ;;  %v194_v25 = vld [vmem:[#allocation4 + $0x390] sm:$0xff]  ;;  %v273_v26 = vld [vmem:[#allocation4 + $0x608] sm:$0xff] }
  0x7b   :  { %6322 = vmatpush1.bf16.msra.mxu1 %v6321_v29  ;;  %6316 = vmatprep.subr.bf16.mxu0 %v6315_v30  ;;  %v6349_v29 = vpack.c.bf16 %v340_v21, %v260_v20  ;;  %v6357_v30 = vpack.c.bf16 %v342_v24, %v262_v22  ;;  %v6399_v21 = vpack.c.bf16 %v195_v17, %v115_v16  ;;  %v112_v22 = vld [vmem:[#allocation4 + $0x100] sm:$0xff]  ;;  %v114_v24 = vld [vmem:[#allocation4 + $0x110] sm:$0xff]  ;;  %v361_v16 = vld [vmem:[#allocation4 + $0x8c8] sm:$0xff] }
  0x7c   :  { %6119 = vmatmul.mubr.msk.f32.gmra.mrb[18].mxu0 %vm400_vm0, %v6893_v47  ;;  %6324 = vmatprep.subr.bf16.mxu1 %v6323_v35  ;;  %v184_v35 = vld [vmem:[#allocation4 + $0x340] sm:$0xff] }
  0x7d   :  { %6123 = vmatmul.mubr.msk.f32.gmra.mrb[18].mxu1 %vm400_vm0, %v6893_v47  ;;  %845 = vmatprep.mubr.f32.mxu0 %v6799_v0  ;;  %v6361_v40 = vpack.c.bf16 %v184_v35, %v104_v34  ;;  %v272_v34 = vld [vmem:[#allocation4 + $0x600] sm:$0xff] }
  0x7e   :  { %934 = vmatprep.mubr.f32.mxu1 %v6799_v0  ;;  %6318 = vmatpush1.bf16.msra.mxu0 %v6317_v41  ;;  %v267_v41 = vld [vmem:[#allocation4 + $0x5d8] sm:$0xff]  ;;  %v352_v35 = vld [vmem:[#allocation4 + $0x880] sm:$0xff] }
  0x7f   :  { %6326 = vmatpush1.bf16.msra.mxu1 %v6325_v42  ;;  %6328 = vmatprep.subr.bf16.mxu0 %v6327_v43  ;;  %v347_v42 = vld [vmem:[#allocation4 + $0x858] sm:$0xff]  ;;  %v6369_v43 = vpack.c.bf16 %v186_v37, %v106_v36  ;;  %v274_v36 = vld [vmem:[#allocation4 + $0x610] sm:$0xff] }
  0x80   :  { %6120 = vmatmul.mubr.msk.f32.gmra.mrb[20].mxu0 %vm400_vm0, %v6902_v57  ;;  %6336 = vmatprep.subr.bf16.mxu1 %v6335_v44  ;;  %v6363_v44 = vpack.c.bf16 %v345_v39, %v265_v38  ;;  %v6371_v49 = vpack.c.bf16 %v347_v42, %v267_v41  ;;  %v354_v38 = vld [vmem:[#allocation4 + $0x890] sm:$0xff]  ;;  %v117_v39 = vld [vmem:[#allocation4 + $0x128] sm:$0xff]  ;;  %v119_v41 = vld [vmem:[#allocation4 + $0x138] sm:$0xff] }
  0x81   :  { %6124 = vmatmul.mubr.msk.f32.gmra.mrb[20].mxu1 %vm400_vm0, %v6902_v57  ;;  %851 = vmatprep.mubr.f32.mxu0 %v6799_v0  ;;  %v199_v42 = vld [vmem:[#allocation4 + $0x3b8] sm:$0xff] }
  0x82   :  { %940 = vmatprep.mubr.f32.mxu1 %v6799_v0 }
  0x84   :  { %6121 = vmatmul.mubr.msk.f32.gmra.mrb[22].mxu0 %vm400_vm0, %v6910_v58 }
  0x85   :  { %6125 = vmatmul.mubr.msk.f32.gmra.mrb[22].mxu1 %vm400_vm0, %v6910_v58  ;;  %1011 = vmatprep.mubr.f32.mxu0 %v6799_v0 }
  0x86   :  { %1100 = vmatprep.mubr.f32.mxu1 %v6799_v0 }
  0x88   :  { %6126 = vmatmul.mubr.msk.f32.vlgmr.msra.gmra.mrb[24].mxu0 %vm400_vm0, %v6887_v32 }
  0x89   :  { %6130 = vmatmul.mubr.msk.f32.vlgmr.msra.gmra.mrb[24].mxu1 %vm400_vm0, %v6887_v32  ;;  %6330 = vmatpush1.bf16.msra.mxu0 %v6329_v52  ;;  %v189_v52 = vld [vmem:[#allocation4 + $0x368] sm:$0xff] }
  0x8a   :  { %1017 = vmatprep.mubr.f32.mxu0 %v6799_v0  ;;  %1106 = vmatprep.mubr.f32.mxu1 %v6799_v0  ;;  %v6375_v59 = vpack.c.bf16 %v189_v52, %v109_v51  ;;  %v198_v51 = vld [vmem:[#allocation4 + $0x3b0] sm:$0xff]  ;;  %v277_v52 = vld [vmem:[#allocation4 + $0x628] sm:$0xff] }
  0x8b   :  { %6338 = vmatpush1.bf16.msra.mxu1 %v6337_v55  ;;  %6332 = vmatprep.subr.bf16.mxu0 %v6331_v56  ;;  %v6365_v55 = vpack.c.bf16 %v344_v46, %v264_v45  ;;  %v6373_v56 = vpack.c.bf16 %v346_v50, %v266_v48  ;;  %v6415_v46 = vpack.c.bf16 %v199_v42, %v119_v41  ;;  %v116_v48 = vld [vmem:[#allocation4 + $0x120] sm:$0xff]  ;;  %v118_v50 = vld [vmem:[#allocation4 + $0x130] sm:$0xff]  ;;  %v365_v41 = vld [vmem:[#allocation4 + $0x8e8] sm:$0xff] }
  0x8c   :  { %6127 = vmatmul.mubr.msk.f32.gmra.mrb[26].mxu0 %vm400_vm0, %v6893_v47  ;;  %6340 = vmatprep.subr.bf16.mxu1 %v6339_v62  ;;  %v188_v62 = vld [vmem:[#allocation4 + $0x360] sm:$0xff] }
  0x8d   :  { %6131 = vmatmul.mubr.msk.f32.gmra.mrb[26].mxu1 %vm400_vm0, %v6893_v47  ;;  %1023 = vmatprep.mubr.f32.mxu0 %v6799_v0  ;;  %v6377_v4 = vpack.c.bf16 %v188_v62, %v108_v61  ;;  %v276_v61 = vld [vmem:[#allocation4 + $0x620] sm:$0xff] }
  0x8e   :  { %1112 = vmatprep.mubr.f32.mxu1 %v6799_v0  ;;  %6334 = vmatpush1.bf16.msra.mxu0 %v6333_v5  ;;  %v271_v5 = vld [vmem:[#allocation4 + $0x5f8] sm:$0xff]  ;;  %v356_v62 = vld [vmem:[#allocation4 + $0x8a0] sm:$0xff] }
  0x8f   :  { %6342 = vmatpush1.bf16.msra.mxu1 %v6341_v6  ;;  %6344 = vmatprep.subr.bf16.mxu0 %v6343_v7  ;;  %v351_v6 = vld [vmem:[#allocation4 + $0x878] sm:$0xff]  ;;  %v6385_v7 = vpack.c.bf16 %v190_v1, %v110_v63  ;;  %v278_v63 = vld [vmem:[#allocation4 + $0x630] sm:$0xff] }
  0x90   :  { %6128 = vmatmul.mubr.msk.f32.gmra.mrb[28].mxu0 %vm400_vm0, %v6902_v57  ;;  %6352 = vmatprep.subr.bf16.mxu1 %v6351_v8  ;;  %v6379_v8 = vpack.c.bf16 %v349_v3, %v269_v2  ;;  %v6387_v12 = vpack.c.bf16 %v351_v6, %v271_v5  ;;  %v358_v2 = vld [vmem:[#allocation4 + $0x8b0] sm:$0xff]  ;;  %v121_v3 = vld [vmem:[#allocation4 + $0x148] sm:$0xff]  ;;  %v123_v5 = vld [vmem:[#allocation4 + $0x158] sm:$0xff] }
  0x91   :  { %6132 = vmatmul.mubr.msk.f32.gmra.mrb[28].mxu1 %vm400_vm0, %v6902_v57  ;;  %1029 = vmatprep.mubr.f32.mxu0 %v6799_v0  ;;  %v203_v6 = vld [vmem:[#allocation4 + $0x3d8] sm:$0xff] }
  0x92   :  { %1118 = vmatprep.mubr.f32.mxu1 %v6799_v0 }
  0x94   :  { %6129 = vmatmul.mubr.msk.f32.gmra.mrb[30].mxu0 %vm400_vm0, %v6910_v58 }
  0x95   :  { %6133 = vmatmul.mubr.msk.f32.gmra.mrb[30].mxu1 %vm400_vm0, %v6910_v58  ;;  %1189 = vmatprep.mubr.f32.mxu0 %v6799_v0 }
  0x96   :  { %1278 = vmatprep.mubr.f32.mxu1 %v6799_v0 }
  0x98   :  { %6134 = vmatmul.mubr.msk.f32.vlgmr.msra.gmra.mrb[32].mxu0 %vm400_vm0, %v6887_v32 }
  0x99   :  { %6138 = vmatmul.mubr.msk.f32.vlgmr.msra.gmra.mrb[32].mxu1 %vm400_vm0, %v6887_v32  ;;  %6346 = vmatpush1.bf16.msra.mxu0 %v6345_v15  ;;  %v193_v15 = vld [vmem:[#allocation4 + $0x388] sm:$0xff] }
  0x9a   :  { %1195 = vmatprep.mubr.f32.mxu0 %v6799_v0  ;;  %1284 = vmatprep.mubr.f32.mxu1 %v6799_v0  ;;  %v6391_v20 = vpack.c.bf16 %v193_v15, %v113_v14  ;;  %v202_v14 = vld [vmem:[#allocation4 + $0x3d0] sm:$0xff]  ;;  %v281_v15 = vld [vmem:[#allocation4 + $0x648] sm:$0xff] }
  0x9b   :  { %6354 = vmatpush1.bf16.msra.mxu1 %v6353_v18  ;;  %6348 = vmatprep.subr.bf16.mxu0 %v6347_v19  ;;  %v6381_v18 = vpack.c.bf16 %v348_v10, %v268_v9  ;;  %v6389_v19 = vpack.c.bf16 %v350_v13, %v270_v11  ;;  %v6431_v10 = vpack.c.bf16 %v203_v6, %v123_v5  ;;  %v120_v11 = vld [vmem:[#allocation4 + $0x140] sm:$0xff]  ;;  %v122_v13 = vld [vmem:[#allocation4 + $0x150] sm:$0xff]  ;;  %v371_v5 = vld [vmem:[#allocation4 + $0x918] sm:$0xff] }
  0x9c   :  { %6135 = vmatmul.mubr.msk.f32.gmra.mrb[34].mxu0 %vm400_vm0, %v6893_v47  ;;  %6356 = vmatprep.subr.bf16.mxu1 %v6355_v23  ;;  %v192_v23 = vld [vmem:[#allocation4 + $0x380] sm:$0xff] }
  0x9d   :  { %6139 = vmatmul.mubr.msk.f32.gmra.mrb[34].mxu1 %vm400_vm0, %v6893_v47  ;;  %1201 = vmatprep.mubr.f32.mxu0 %v6799_v0  ;;  %v6393_v28 = vpack.c.bf16 %v192_v23, %v112_v22  ;;  %v280_v22 = vld [vmem:[#allocation4 + $0x640] sm:$0xff] }
  0x9e   :  { %1290 = vmatprep.mubr.f32.mxu1 %v6799_v0  ;;  %6350 = vmatpush1.bf16.msra.mxu0 %v6349_v29  ;;  %v275_v29 = vld [vmem:[#allocation4 + $0x618] sm:$0xff]  ;;  %v360_v23 = vld [vmem:[#allocation4 + $0x8c0] sm:$0xff] }
  0x9f   :  { %6358 = vmatpush1.bf16.msra.mxu1 %v6357_v30  ;;  %6360 = vmatprep.subr.bf16.mxu0 %v6359_v31  ;;  %v355_v30 = vld [vmem:[#allocation4 + $0x898] sm:$0xff]  ;;  %v6401_v31 = vpack.c.bf16 %v194_v25, %v114_v24  ;;  %v282_v24 = vld [vmem:[#allocation4 + $0x650] sm:$0xff] }
  0xa0   :  { %6136 = vmatmul.mubr.msk.f32.gmra.mrb[36].mxu0 %vm400_vm0, %v6902_v57  ;;  %6368 = vmatprep.subr.bf16.mxu1 %v6367_v33  ;;  %v6395_v33 = vpack.c.bf16 %v353_v27, %v273_v26  ;;  %v6403_v37 = vpack.c.bf16 %v355_v30, %v275_v29  ;;  %v362_v26 = vld [vmem:[#allocation4 + $0x8d0] sm:$0xff]  ;;  %v125_v27 = vld [vmem:[#allocation4 + $0x168] sm:$0xff]  ;;  %v127_v29 = vld [vmem:[#allocation4 + $0x178] sm:$0xff] }
  0xa1   :  { %6140 = vmatmul.mubr.msk.f32.gmra.mrb[36].mxu1 %vm400_vm0, %v6902_v57  ;;  %1207 = vmatprep.mubr.f32.mxu0 %v6799_v0  ;;  %v207_v30 = vld [vmem:[#allocation4 + $0x3f8] sm:$0xff] }
  0xa2   :  { %1296 = vmatprep.mubr.f32.mxu1 %v6799_v0 }
  0xa4   :  { %6137 = vmatmul.mubr.msk.f32.gmra.mrb[38].mxu0 %vm400_vm0, %v6910_v58 }
  0xa5   :  { %6141 = vmatmul.mubr.msk.f32.gmra.mrb[38].mxu1 %vm400_vm0, %v6910_v58  ;;  %1367 = vmatprep.mubr.f32.mxu0 %v6799_v0 }
  0xa6   :  { %1456 = vmatprep.mubr.f32.mxu1 %v6799_v0 }
  0xa8   :  { %6142 = vmatmul.mubr.msk.f32.vlgmr.msra.gmra.mrb[40].mxu0 %vm400_vm0, %v6887_v32 }
  0xa9   :  { %6146 = vmatmul.mubr.msk.f32.vlgmr.msra.gmra.mrb[40].mxu1 %vm400_vm0, %v6887_v32  ;;  %6362 = vmatpush1.bf16.msra.mxu0 %v6361_v40  ;;  %v197_v40 = vld [vmem:[#allocation4 + $0x3a8] sm:$0xff] }
  0xaa   :  { %1373 = vmatprep.mubr.f32.mxu0 %v6799_v0  ;;  %1462 = vmatprep.mubr.f32.mxu1 %v6799_v0  ;;  %v6407_v45 = vpack.c.bf16 %v197_v40, %v117_v39  ;;  %v206_v39 = vld [vmem:[#allocation4 + $0x3f0] sm:$0xff]  ;;  %v285_v40 = vld [vmem:[#allocation4 + $0x668] sm:$0xff] }
  0xab   :  { %6370 = vmatpush1.bf16.msra.mxu1 %v6369_v43  ;;  %6364 = vmatprep.subr.bf16.mxu0 %v6363_v44  ;;  %v6397_v43 = vpack.c.bf16 %v352_v35, %v272_v34  ;;  %v6405_v44 = vpack.c.bf16 %v354_v38, %v274_v36  ;;  %v6447_v35 = vpack.c.bf16 %v207_v30, %v127_v29  ;;  %v124_v36 = vld [vmem:[#allocation4 + $0x160] sm:$0xff]  ;;  %v126_v38 = vld [vmem:[#allocation4 + $0x170] sm:$0xff]  ;;  %v373_v29 = vld [vmem:[#allocation4 + $0x928] sm:$0xff] }
  0xac   :  { %6143 = vmatmul.mubr.msk.f32.gmra.mrb[42].mxu0 %vm400_vm0, %v6893_v47  ;;  %6372 = vmatprep.subr.bf16.mxu1 %v6371_v49  ;;  %v196_v49 = vld [vmem:[#allocation4 + $0x3a0] sm:$0xff] }
  0xad   :  { %6147 = vmatmul.mubr.msk.f32.gmra.mrb[42].mxu1 %vm400_vm0, %v6893_v47  ;;  %1379 = vmatprep.mubr.f32.mxu0 %v6799_v0  ;;  %v6409_v54 = vpack.c.bf16 %v196_v49, %v116_v48  ;;  %v284_v48 = vld [vmem:[#allocation4 + $0x660] sm:$0xff] }
  0xae   :  { %1468 = vmatprep.mubr.f32.mxu1 %v6799_v0  ;;  %6366 = vmatpush1.bf16.msra.mxu0 %v6365_v55  ;;  %v279_v55 = vld [vmem:[#allocation4 + $0x638] sm:$0xff]  ;;  %v364_v49 = vld [vmem:[#allocation4 + $0x8e0] sm:$0xff] }
  0xaf   :  { %6374 = vmatpush1.bf16.msra.mxu1 %v6373_v56  ;;  %6376 = vmatprep.subr.bf16.mxu0 %v6375_v59  ;;  %v359_v56 = vld [vmem:[#allocation4 + $0x8b8] sm:$0xff]  ;;  %v6417_v59 = vpack.c.bf16 %v198_v51, %v118_v50  ;;  %v286_v50 = vld [vmem:[#allocation4 + $0x670] sm:$0xff] }
  0xb0   :  { %6144 = vmatmul.mubr.msk.f32.gmra.mrb[44].mxu0 %vm400_vm0, %v6902_v57  ;;  %6384 = vmatprep.subr.bf16.mxu1 %v6383_v60  ;;  %v6411_v60 = vpack.c.bf16 %v357_v53, %v277_v52  ;;  %v6419_v1 = vpack.c.bf16 %v359_v56, %v279_v55  ;;  %v366_v52 = vld [vmem:[#allocation4 + $0x8f0] sm:$0xff]  ;;  %v129_v53 = vld [vmem:[#allocation4 + $0x188] sm:$0xff]  ;;  %v131_v55 = vld [vmem:[#allocation4 + $0x198] sm:$0xff] }
  0xb1   :  { %6148 = vmatmul.mubr.msk.f32.gmra.mrb[44].mxu1 %vm400_vm0, %v6902_v57  ;;  %1385 = vmatprep.mubr.f32.mxu0 %v6799_v0  ;;  %v211_v56 = vld [vmem:[#allocation4 + $0x418] sm:$0xff] }
  0xb2   :  { %1474 = vmatprep.mubr.f32.mxu1 %v6799_v0 }
  0xb4   :  { %6145 = vmatmul.mubr.msk.f32.gmra.mrb[46].mxu0 %vm400_vm0, %v6910_v58 }
  0xb5   :  { %6149 = vmatmul.mubr.msk.f32.gmra.mrb[46].mxu1 %vm400_vm0, %v6910_v58  ;;  %1545 = vmatprep.mubr.f32.mxu0 %v6799_v0 }
  0xb6   :  { %1634 = vmatprep.mubr.f32.mxu1 %v6799_v0 }
  0xb8   :  { %6150 = vmatmul.mubr.msk.f32.vlgmr.msra.gmra.mrb[48].mxu0 %vm400_vm0, %v6887_v32 }
  0xb9   :  { %6154 = vmatmul.mubr.msk.f32.vlgmr.msra.gmra.mrb[48].mxu1 %vm400_vm0, %v6887_v32  ;;  %6378 = vmatpush1.bf16.msra.mxu0 %v6377_v4  ;;  %v201_v4 = vld [vmem:[#allocation4 + $0x3c8] sm:$0xff] }
  0xba   :  { %1551 = vmatprep.mubr.f32.mxu0 %v6799_v0  ;;  %1640 = vmatprep.mubr.f32.mxu1 %v6799_v0  ;;  %v6423_v9 = vpack.c.bf16 %v201_v4, %v121_v3  ;;  %v369_v3 = vld [vmem:[#allocation4 + $0x908] sm:$0xff] }
  0xbb   :  { %6386 = vmatpush1.bf16.msra.mxu1 %v6385_v7  ;;  %6380 = vmatprep.subr.bf16.mxu0 %v6379_v8  ;;  %v6413_v7 = vpack.c.bf16 %v356_v62, %v276_v61  ;;  %v6421_v8 = vpack.c.bf16 %v358_v2, %v278_v63  ;;  %v6463_v62 = vpack.c.bf16 %v211_v56, %v131_v55  ;;  %v130_v63 = vld [vmem:[#allocation4 + $0x190] sm:$0xff]  ;;  %v289_v2 = vld [vmem:[#allocation4 + $0x688] sm:$0xff] }
  0xbc   :  { %6151 = vmatmul.mubr.msk.f32.gmra.mrb[50].mxu0 %vm400_vm0, %v6893_v47  ;;  %6388 = vmatprep.subr.bf16.mxu1 %v6387_v12  ;;  %v200_v12 = vld [vmem:[#allocation4 + $0x3c0] sm:$0xff]  ;;  %v218_v55 = vld [vmem:[#allocation4 + $0x450] sm:$0xff]  ;;  %v297_v56 = vld [vmem:[#allocation4 + $0x6c8] sm:$0xff] }
  0xbd   :  { %6155 = vmatmul.mubr.msk.f32.gmra.mrb[50].mxu1 %vm400_vm0, %v6893_v47  ;;  %1557 = vmatprep.mubr.f32.mxu0 %v6799_v0  ;;  %v6425_v17 = vpack.c.bf16 %v200_v12, %v120_v11  ;;  %v7159_v11 = vld [vmem:[#allocation7] sm:$0xff] }
  0xbe   :  { %1646 = vmatprep.mubr.f32.mxu1 %v6799_v0  ;;  %6382 = vmatpush1.bf16.msra.mxu0 %v6381_v18  ;;  %v283_v18 = vld [vmem:[#allocation4 + $0x658] sm:$0xff] }
  0xbf   :  { %6390 = vmatpush1.bf16.msra.mxu1 %v6389_v19  ;;  %6392 = vmatprep.subr.bf16.mxu0 %v6391_v20  ;;  %v363_v19 = vld [vmem:[#allocation4 + $0x8d8] sm:$0xff]  ;;  %v6433_v20 = vpack.c.bf16 %v202_v14, %v122_v13  ;;  %v370_v13 = vld [vmem:[#allocation4 + $0x910] sm:$0xff]  ;;  %v213_v14 = vld [vmem:[#allocation4 + $0x428] sm:$0xff] }
  0xc0   :  { %6152 = vmatmul.mubr.msk.f32.gmra.mrb[52].mxu0 %vm400_vm0, %v6902_v57  ;;  %6400 = vmatprep.subr.bf16.mxu1 %v6399_v21  ;;  %v6427_v21 = vpack.c.bf16 %v361_v16, %v281_v15  ;;  %v6435_v25 = vpack.c.bf16 %v363_v19, %v283_v18  ;;  %v135_v15 = vld [vmem:[#allocation4 + $0x1b8] sm:$0xff] }
  0xc1   :  { %6156 = vmatmul.mubr.msk.f32.gmra.mrb[52].mxu1 %vm400_vm0, %v6902_v57  ;;  %1563 = vmatprep.mubr.f32.mxu0 %v6799_v0  ;;  %v215_v16 = vld [vmem:[#allocation4 + $0x438] sm:$0xff] }
  0xc2   :  { %1652 = vmatprep.mubr.f32.mxu1 %v6799_v0 }
  0xc4   :  { %6153 = vmatmul.mubr.msk.f32.gmra.mrb[54].mxu0 %vm400_vm0, %v6910_v58 }
  0xc5   :  { %6157 = vmatmul.mubr.msk.f32.gmra.mrb[54].mxu1 %vm400_vm0, %v6910_v58  ;;  %1723 = vmatprep.mubr.f32.mxu0 %v6799_v0 }
  0xc6   :  { %1812 = vmatprep.mubr.f32.mxu1 %v6799_v0 }
  0xc8   :  { %6158 = vmatmul.mubr.msk.f32.vlgmr.msra.gmra.mrb[56].mxu0 %vm400_vm0, %v6887_v32 }
  0xc9   :  { %6162 = vmatmul.mubr.msk.f32.vlgmr.msra.gmra.mrb[56].mxu1 %vm400_vm0, %v6887_v32  ;;  %6394 = vmatpush1.bf16.msra.mxu0 %v6393_v28  ;;  %v205_v28 = vld [vmem:[#allocation4 + $0x3e8] sm:$0xff] }
  0xca   :  { %1729 = vmatprep.mubr.f32.mxu0 %v6799_v0  ;;  %1818 = vmatprep.mubr.f32.mxu1 %v6799_v0  ;;  %v6439_v34 = vpack.c.bf16 %v205_v28, %v125_v27  ;;  %v214_v27 = vld [vmem:[#allocation4 + $0x430] sm:$0xff]  ;;  %v293_v28 = vld [vmem:[#allocation4 + $0x6a8] sm:$0xff] }
  0xcb   :  { %6402 = vmatpush1.bf16.msra.mxu1 %v6401_v31  ;;  %6396 = vmatprep.subr.bf16.mxu0 %v6395_v33  ;;  %v6429_v31 = vpack.c.bf16 %v360_v23, %v280_v22  ;;  %v6437_v33 = vpack.c.bf16 %v362_v26, %v282_v24  ;;  %v7175_v22 = vld [vmem:[#allocation7 + $0x10] sm:$0xff]  ;;  %v132_v23 = vld [vmem:[#allocation4 + $0x1a0] sm:$0xff]  ;;  %v7183_v26 = vld [vmem:[#allocation7 + $0x18] sm:$0xff] }
  0xcc   :  { %6159 = vmatmul.mubr.msk.f32.gmra.mrb[58].mxu0 %vm400_vm0, %v6893_v47  ;;  %6404 = vmatprep.subr.bf16.mxu1 %v6403_v37  ;;  %v204_v37 = vld [vmem:[#allocation4 + $0x3e0] sm:$0xff] }
  0xcd   :  { %6163 = vmatmul.mubr.msk.f32.gmra.mrb[58].mxu1 %vm400_vm0, %v6893_v47  ;;  %1735 = vmatprep.mubr.f32.mxu0 %v6799_v0  ;;  %v6441_v42 = vpack.c.bf16 %v204_v37, %v124_v36  ;;  %v212_v24 = vld [vmem:[#allocation4 + $0x420] sm:$0xff] }
  0xce   :  { %1824 = vmatprep.mubr.f32.mxu1 %v6799_v0  ;;  %6398 = vmatpush1.bf16.msra.mxu0 %v6397_v43  ;;  %v287_v43 = vld [vmem:[#allocation4 + $0x678] sm:$0xff]  ;;  %v6473_v30 = vpack.c.bf16 %v212_v24, %v132_v23  ;;  %v292_v36 = vld [vmem:[#allocation4 + $0x6a0] sm:$0xff] }
  0xcf   :  { %6406 = vmatpush1.bf16.msra.mxu1 %v6405_v44  ;;  %6408 = vmatprep.subr.bf16.mxu0 %v6407_v45  ;;  %v367_v44 = vld [vmem:[#allocation4 + $0x8f8] sm:$0xff]  ;;  %v6449_v45 = vpack.c.bf16 %v206_v39, %v126_v38  ;;  %v372_v37 = vld [vmem:[#allocation4 + $0x920] sm:$0xff]  ;;  %v294_v38 = vld [vmem:[#allocation4 + $0x6b0] sm:$0xff] }
  0xd0   :  { %6160 = vmatmul.mubr.msk.f32.gmra.mrb[60].mxu0 %vm400_vm0, %v6902_v57  ;;  %6416 = vmatprep.subr.bf16.mxu1 %v6415_v46  ;;  %v6443_v46 = vpack.c.bf16 %v365_v41, %v285_v40  ;;  %v6451_v51 = vpack.c.bf16 %v367_v44, %v287_v43  ;;  %v374_v40 = vld [vmem:[#allocation4 + $0x930] sm:$0xff]  ;;  %v137_v41 = vld [vmem:[#allocation4 + $0x1c8] sm:$0xff]  ;;  %v139_v43 = vld [vmem:[#allocation4 + $0x1d8] sm:$0xff] }
  0xd1   :  { %6164 = vmatmul.mubr.msk.f32.gmra.mrb[60].mxu1 %vm400_vm0, %v6902_v57  ;;  %1741 = vmatprep.mubr.f32.mxu0 %v6799_v0  ;;  %v219_v44 = vld [vmem:[#allocation4 + $0x458] sm:$0xff]  ;;  %v140_v24 = vld [vmem:[#allocation4 + $0x1e0] sm:$0xff] }
  0xd2   :  { %1830 = vmatprep.mubr.f32.mxu1 %v6799_v0 }
  0xd4   :  { %6161 = vmatmul.mubr.msk.f32.gmra.mrb[62].mxu0 %vm400_vm0, %v6910_v58 }
  0xd5   :  { %6165 = vmatmul.mubr.msk.f32.gmra.mrb[62].mxu1 %vm400_vm0, %v6910_v58  ;;  %1901 = vmatprep.mubr.f32.mxu0 %v6799_v0 }
  0xd6   :  { %1990 = vmatprep.mubr.f32.mxu1 %v6799_v0 }
  0xd8   :  { %6166 = vmatmul.mubr.msk.f32.vlgmr.msra.gmra.mrb[64].mxu0 %vm400_vm0, %v6887_v32 }
  0xd9   :  { %6170 = vmatmul.mubr.msk.f32.vlgmr.msra.gmra.mrb[64].mxu1 %vm400_vm0, %v6887_v32  ;;  %6410 = vmatpush1.bf16.msra.mxu0 %v6409_v54  ;;  %v209_v54 = vld [vmem:[#allocation4 + $0x408] sm:$0xff] }
  0xda   :  { %1907 = vmatprep.mubr.f32.mxu0 %v6799_v0  ;;  %1996 = vmatprep.mubr.f32.mxu1 %v6799_v0  ;;  %v6455_v61 = vpack.c.bf16 %v209_v54, %v129_v53  ;;  %v6800_v53 = vmov 0   ;;  %v138_v54 = vld [vmem:[#allocation4 + $0x1d0] sm:$0xff] }
  0xdb   :  { %6418 = vmatpush1.bf16.msra.mxu1 %v6417_v59  ;;  %6412 = vmatprep.subr.bf16.mxu0 %v6411_v60  ;;  %v6445_v59 = vpack.c.bf16 %v364_v49, %v284_v48  ;;  %v6453_v60 = vpack.c.bf16 %v366_v52, %v286_v50  ;;  %v6495_v49 = vpack.c.bf16 %v219_v44, %v139_v43  ;;  %v4213_v50 = vld [vmem:[%s10188_s3] sm:$0xff] }
  0xdc   :  { %6167 = vmatmul.mubr.msk.f32.gmra.mrb[66].mxu0 %vm400_vm0, %v6893_v47  ;;  %6420 = vmatprep.subr.bf16.mxu1 %v6419_v1  ;;  %v210_v1 = vld [vmem:[#allocation4 + $0x410] sm:$0xff]  ;;  %v216_v52 = vld [vmem:[#allocation4 + $0x440] sm:$0xff] }
  0xdd   :  { %6171 = vmatmul.mubr.msk.f32.gmra.mrb[66].mxu1 %vm400_vm0, %v6893_v47  ;;  %1913 = vmatprep.mubr.f32.mxu0 %v6799_v0  ;;  %v6465_v6 = vpack.c.bf16 %v210_v1, %v130_v63  ;;  %v296_v1 = vld [vmem:[#allocation4 + $0x6c0] sm:$0xff] }
  0xde   :  { %2002 = vmatprep.mubr.f32.mxu1 %v6799_v0  ;;  %6414 = vmatpush1.bf16.msra.mxu0 %v6413_v7  ;;  %v6459_v7 = vpack.c.bf16 %v369_v3, %v289_v2  ;;  %v376_v2 = vld [vmem:[#allocation4 + $0x940] sm:$0xff]  ;;  %v298_v3 = vld [vmem:[#allocation4 + $0x6d0] sm:$0xff] }
  0xdf   :  { %6422 = vmatpush1.bf16.msra.mxu1 %v6421_v8  ;;  %6424 = vmatprep.subr.bf16.mxu0 %v6423_v9  ;;  %v288_v8 = vld [vmem:[#allocation4 + $0x680] sm:$0xff] }
  0xe0   :  { %6168 = vmatmul.mubr.msk.f32.gmra.mrb[68].mxu0 %vm400_vm0, %v6902_v57  ;;  %6432 = vmatprep.subr.bf16.mxu1 %v6431_v10  ;;  %v368_v9 = vld [vmem:[#allocation4 + $0x900] sm:$0xff]  ;;  %v290_v10 = vld [vmem:[#allocation4 + $0x690] sm:$0xff] }
  0xe1   :  { %6172 = vmatmul.mubr.msk.f32.gmra.mrb[68].mxu1 %vm400_vm0, %v6902_v57  ;;  %1919 = vmatprep.mubr.f32.mxu0 %v6799_v0  ;;  %v6469_v18 = vpack.c.bf16 %v370_v13, %v290_v10  ;;  %v300_v43 = vld [vmem:[#allocation4 + $0x6e0] sm:$0xff] }
  0xe2   :  { %2008 = vmatprep.mubr.f32.mxu1 %v6799_v0  ;;  %6608 = vset.pattern.permute.xlu0 %v6800_v53  ;;  %v380_v44 = vld [vmem:[#allocation4 + $0x960] sm:$0xff] }
  0xe3   :  { %4219 = vperm.xlu0 %6608, %v4213_v50   ;;  %6609 = vset.pattern.permute.xlu1 %v6800_v53  ;;  %v382_v50 = vld [vmem:[#allocation4 + $0x970] sm:$0xff] }
  0xe4   :  { %6169 = vmatmul.mubr.msk.f32.gmra.mrb[70].mxu0 %vm400_vm0, %v6910_v58 }
  0xe5   :  { %6173 = vmatmul.mubr.msk.f32.gmra.mrb[70].mxu1 %vm400_vm0, %v6910_v58  ;;  %2079 = vmatprep.mubr.f32.mxu0 %v6799_v0 }
  0xe6   :  { %2168 = vmatprep.mubr.f32.mxu1 %v6799_v0 }
  0xe8   :  { %6174 = vmatmul.mubr.msk.f32.vlgmr.msra.gmra.mrb[72].mxu0 %vm400_vm0, %v6887_v32 }
  0xe9   :  { %6178 = vmatmul.mubr.msk.f32.vlgmr.msra.gmra.mrb[72].mxu1 %vm400_vm0, %v6887_v32  ;;  %6426 = vmatpush1.bf16.msra.mxu0 %v6425_v17  ;;  %v6461_v17 = vpack.c.bf16 %v368_v9, %v288_v8  ;;  %v223_v8 = vld [vmem:[#allocation4 + $0x478] sm:$0xff]  ;;  %v6493_v9 = vpack.c.bf16 %v376_v2, %v296_v1 }
  0xea   :  { %2085 = vmatprep.mubr.f32.mxu0 %v6799_v0  ;;  %2174 = vmatprep.mubr.f32.mxu1 %v6799_v0 }
  0xeb   :  { %6434 = vmatpush1.bf16.msra.mxu1 %v6433_v20  ;;  %6428 = vmatprep.subr.bf16.mxu0 %v6427_v21  ;;  %v7167_v20 = vld [vmem:[#allocation7 + $0x8] sm:$0xff]  ;;  %v6479_v21 = vpack.c.bf16 %v215_v16, %v135_v15 }
  0xec   :  { %6175 = vmatmul.mubr.msk.f32.gmra.mrb[74].mxu0 %vm400_vm0, %v6893_v47  ;;  %6436 = vmatprep.subr.bf16.mxu1 %v6435_v25  ;;  %v134_v25 = vld [vmem:[#allocation4 + $0x1b0] sm:$0xff] }
  0xed   :  { %6179 = vmatmul.mubr.msk.f32.gmra.mrb[74].mxu1 %vm400_vm0, %v6893_v47  ;;  %2091 = vmatprep.mubr.f32.mxu0 %v6799_v0 }
  0xee   :  { %2180 = vmatprep.mubr.f32.mxu1 %v6799_v0  ;;  %6430 = vmatpush1.bf16.msra.mxu0 %v6429_v31  ;;  %v295_v31 = vld [vmem:[#allocation4 + $0x6b8] sm:$0xff] }
  0xef   :  { %6438 = vmatpush1.bf16.msra.mxu1 %v6437_v33  ;;  %6440 = vmatprep.subr.bf16.mxu0 %v6439_v34  ;;  %v375_v33 = vld [vmem:[#allocation4 + $0x938] sm:$0xff]  ;;  %v6481_v34 = vpack.c.bf16 %v214_v27, %v134_v25  ;;  %v220_v25 = vld [vmem:[#allocation4 + $0x460] sm:$0xff] }
  0xf0   :  { %6176 = vmatmul.mubr.msk.f32.gmra.mrb[76].mxu0 %vm400_vm0, %v6902_v57  ;;  %6448 = vmatprep.subr.bf16.mxu1 %v6447_v35  ;;  %v6475_v35 = vpack.c.bf16 %v373_v29, %v293_v28  ;;  %v6483_v39 = vpack.c.bf16 %v375_v33, %v295_v31  ;;  %v142_v28 = vld [vmem:[#allocation4 + $0x1f0] sm:$0xff]  ;;  %v4216_v29 = vld [vmem:[%s10188_s3 + $0x18] sm:$0xff] }
  0xf1   :  { %6180 = vmatmul.mubr.msk.f32.gmra.mrb[76].mxu1 %vm400_vm0, %v6902_v57  ;;  %2097 = vmatprep.mubr.f32.mxu0 %v6799_v0  ;;  %v222_v33 = vld [vmem:[#allocation4 + $0x470] sm:$0xff] }
  0xf2   :  { %2186 = vmatprep.mubr.f32.mxu1 %v6799_v0 }
  0xf4   :  { %6177 = vmatmul.mubr.msk.f32.gmra.mrb[78].mxu0 %vm400_vm0, %v6910_v58 }
  0xf5   :  { %6181 = vmatmul.mubr.msk.f32.gmra.mrb[78].mxu1 %vm400_vm0, %v6910_v58  ;;  %2257 = vmatprep.mubr.f32.mxu0 %v6799_v0 }
  0xf6   :  { %2346 = vmatprep.mubr.f32.mxu1 %v6799_v0 }
  0xf8   :  { %6182 = vmatmul.mubr.msk.f32.vlgmr.msra.gmra.mrb[80].mxu0 %vm400_vm0, %v6887_v32 }
  0xf9   :  { %6186 = vmatmul.mubr.msk.f32.vlgmr.msra.gmra.mrb[80].mxu1 %vm400_vm0, %v6887_v32  ;;  %6442 = vmatpush1.bf16.msra.mxu0 %v6441_v42  ;;  %v128_v32 = vld [vmem:[#allocation4 + $0x180] sm:$0xff]  ;;  %v217_v42 = vld [vmem:[#allocation4 + $0x448] sm:$0xff] }
  0xfa   :  { %2263 = vmatprep.mubr.f32.mxu0 %v6799_v0  ;;  %2352 = vmatprep.mubr.f32.mxu1 %v6799_v0  ;;  %v6487_v48 = vpack.c.bf16 %v217_v42, %v137_v41  ;;  %v6513_v41 = vpack.c.bf16 %v222_v33, %v142_v28  ;;  %v387_v28 = vld [vmem:[#allocation4 + $0x998] sm:$0xff] }
  0xfb   :  { %6450 = vmatpush1.bf16.msra.mxu1 %v6449_v45  ;;  %6444 = vmatprep.subr.bf16.mxu0 %v6443_v46  ;;  %v6477_v45 = vpack.c.bf16 %v372_v37, %v292_v36  ;;  %v6485_v46 = vpack.c.bf16 %v374_v40, %v294_v38  ;;  %v6505_v37 = vpack.c.bf16 %v220_v25, %v140_v24  ;;  %v303_v38 = vld [vmem:[#allocation4 + $0x6f8] sm:$0xff] }
  0xfc   :  { %6183 = vmatmul.mubr.msk.f32.gmra.mrb[82].mxu0 %vm400_vm0, %v6893_v47  ;;  %6452 = vmatprep.subr.bf16.mxu1 %v6451_v51  ;;  %v136_v51 = vld [vmem:[#allocation4 + $0x1c0] sm:$0xff]  ;;  %v307_v25 = vld [vmem:[#allocation4 + $0x718] sm:$0xff] }
  0xfd   :  { %6187 = vmatmul.mubr.msk.f32.gmra.mrb[82].mxu1 %vm400_vm0, %v6893_v47  ;;  %2269 = vmatprep.mubr.f32.mxu0 %v6799_v0  ;;  %v208_v47 = vld [vmem:[#allocation4 + $0x400] sm:$0xff] }
  0xfe   :  { %2358 = vmatprep.mubr.f32.mxu1 %v6799_v0  ;;  %6446 = vmatpush1.bf16.msra.mxu0 %v6445_v59  ;;  %v6457_v4 = vpack.c.bf16 %v208_v47, %v128_v32  ;;  %v377_v59 = vld [vmem:[#allocation4 + $0x948] sm:$0xff]  ;;  %v379_v32 = vld [vmem:[#allocation4 + $0x958] sm:$0xff]  ;;  %v6497_v47 = vpack.c.bf16 %v218_v55, %v138_v54 }
  0xff   :  { %6454 = vmatpush1.bf16.msra.mxu1 %v6453_v60  ;;  %6456 = vmatprep.subr.bf16.mxu0 %v6455_v61  ;;  %v4214_v60 = vld [vmem:[%s10188_s3 + $0x8] sm:$0xff]  ;;  %v6489_v61 = vpack.c.bf16 %v216_v52, %v136_v51  ;;  %v6491_v63 = vpack.c.bf16 %v377_v59, %v297_v56  ;;  %v147_v54 = vld [vmem:[#allocation4 + $0x218] sm:$0xff]  ;;  %v6509_v56 = vpack.c.bf16 %v380_v44, %v300_v43  ;;  %v386_v43 = vld [vmem:[#allocation4 + $0x990] sm:$0xff] }
 0x100   :  { %6184 = vmatmul.mubr.msk.f32.gmra.mrb[84].mxu0 %vm400_vm0, %v6902_v57  ;;  %6464 = vmatprep.subr.bf16.mxu1 %v6463_v62  ;;  %v299_v62 = vld [vmem:[#allocation4 + $0x6d8] sm:$0xff]  ;;  %v145_v51 = vld [vmem:[#allocation4 + $0x208] sm:$0xff] }
 0x101   :  { %6188 = vmatmul.mubr.msk.f32.gmra.mrb[84].mxu1 %vm400_vm0, %v6902_v57  ;;  %2275 = vmatprep.mubr.f32.mxu0 %v6799_v0  ;;  %v291_v57 = vld [vmem:[#allocation4 + $0x698] sm:$0xff]  ;;  %v225_v52 = vld [vmem:[#allocation4 + $0x488] sm:$0xff] }
 0x102   :  { %2364 = vmatprep.mubr.f32.mxu1 %v6799_v0  ;;  %v6467_v12 = vpack.c.bf16 %v371_v5, %v291_v57  ;;  %4224 = vperm.xlu0 %6608, %v4214_v60   ;;  %v378_v57 = vld [vmem:[#allocation4 + $0x950] sm:$0xff]  ;;  %v141_v5 = vld [vmem:[#allocation4 + $0x1e8] sm:$0xff]  ;;  %v227_v55 = vld [vmem:[#allocation4 + $0x498] sm:$0xff] }
 0x103   :  { %v149_v44 = vld [vmem:[#allocation4 + $0x228] sm:$0xff] }
 0x104   :  { %6185 = vmatmul.mubr.msk.f32.gmra.mrb[86].mxu0 %vm400_vm0, %v6910_v58 }
 0x105   :  { %6189 = vmatmul.mubr.msk.f32.gmra.mrb[86].mxu1 %vm400_vm0, %v6910_v58  ;;  %2435 = vmatprep.mubr.f32.mxu0 %v6799_v0  ;;  %v133_v58 = vld [vmem:[#allocation4 + $0x1a8] sm:$0xff] }
 0x106   :  { %2524 = vmatprep.mubr.f32.mxu1 %v6799_v0  ;;  %v6471_v19 = vpack.c.bf16 %v213_v14, %v133_v58 }
 0x108   :  { %6190 = vmatmul.mubr.msk.f32.vlgmr.msra.gmra.mrb[88].mxu0 %vm400_vm0, %v7159_v11 }
 0x109   :  { %6194 = vmatmul.mubr.msk.f32.vlgmr.msra.gmra.mrb[88].mxu1 %vm400_vm0, %v7159_v11  ;;  %6458 = vmatpush1.bf16.msra.mxu0 %v6457_v4  ;;  %v6499_v4 = vpack.c.bf16 %v379_v32, %v299_v62 }
 0x10a   :  { %2441 = vmatprep.mubr.f32.mxu0 %v6799_v0  ;;  %2530 = vmatprep.mubr.f32.mxu1 %v6799_v0 }
 0x10b   :  { %6466 = vmatpush1.bf16.msra.mxu1 %v6465_v6  ;;  %6460 = vmatprep.subr.bf16.mxu0 %v6459_v7  ;;  %v221_v6 = vld [vmem:[#allocation4 + $0x468] sm:$0xff]  ;;  %v143_v7 = vld [vmem:[#allocation4 + $0x1f8] sm:$0xff] }
 0x10c   :  { %6191 = vmatmul.mubr.msk.f32.gmra.mrb[90].mxu0 %vm400_vm0, %v7167_v20  ;;  %6468 = vmatprep.subr.bf16.mxu1 %v6467_v12  ;;  %v6501_v12 = vpack.c.bf16 %v378_v57, %v298_v3  ;;  %v6503_v13 = vpack.c.bf16 %v221_v6, %v141_v5  ;;  %v6511_v15 = vpack.c.bf16 %v223_v8, %v143_v7  ;;  %v144_v57 = vld [vmem:[#allocation4 + $0x200] sm:$0xff]  ;;  %v146_v7 = vld [vmem:[#allocation4 + $0x210] sm:$0xff] }
 0x10d   :  { %6195 = vmatmul.mubr.msk.f32.gmra.mrb[90].mxu1 %vm400_vm0, %v7167_v20  ;;  %2447 = vmatprep.mubr.f32.mxu0 %v6799_v0  ;;  %v224_v5 = vld [vmem:[#allocation4 + $0x480] sm:$0xff] }
 0x10e   :  { %2536 = vmatprep.mubr.f32.mxu1 %v6799_v0  ;;  %6462 = vmatpush1.bf16.msra.mxu0 %v6461_v17  ;;  %v6521_v24 = vpack.c.bf16 %v224_v5, %v144_v57 }
 0x10f   :  { %6470 = vmatpush1.bf16.msra.mxu1 %v6469_v18  ;;  %6472 = vmatprep.subr.bf16.mxu0 %v6471_v19  ;;  %v4215_v18 = vld [vmem:[%s10188_s3 + $0x10] sm:$0xff] }
 0x110   :  { %6192 = vmatmul.mubr.msk.f32.gmra.mrb[92].mxu0 %vm400_vm0, %v7175_v22  ;;  %6480 = vmatprep.subr.bf16.mxu1 %v6479_v21 }
 0x111   :  { %6196 = vmatmul.mubr.msk.f32.gmra.mrb[92].mxu1 %vm400_vm0, %v7175_v22  ;;  %2453 = vmatprep.mubr.f32.mxu0 %v6799_v0 }
 0x112   :  { %2542 = vmatprep.mubr.f32.mxu1 %v6799_v0  ;;  %4229 = vperm.xlu1 %6609, %v4215_v18  }
 0x114   :  { %6193 = vmatmul.mubr.msk.f32.gmra.mrb[94].mxu0 %vm400_vm0, %v7183_v26 }
 0x115   :  { %6197 = vmatmul.mubr.msk.f32.gmra.mrb[94].mxu1 %vm400_vm0, %v7183_v26  ;;  %2613 = vmatprep.mubr.f32.mxu0 %v6799_v0 }
 0x116   :  { %2702 = vmatprep.mubr.f32.mxu1 %v6799_v0  ;;  %4234 = vperm.xlu1 %6609, %v4216_v29  }
 0x118   :  { %6198 = vmatmul.mubr.msk.f32.vlgmr.msra.gmra.mrb[96].mxu0 %vm400_vm0, %v7159_v11 }
 0x119   :  { %6202 = vmatmul.mubr.msk.f32.vlgmr.msra.gmra.mrb[96].mxu1 %vm400_vm0, %v7159_v11  ;;  %6474 = vmatpush1.bf16.msra.mxu0 %v6473_v30 }
 0x11a   :  { %2619 = vmatprep.mubr.f32.mxu0 %v6799_v0  ;;  %2708 = vmatprep.mubr.f32.mxu1 %v6799_v0 }
 0x11b   :  { %6482 = vmatpush1.bf16.msra.mxu1 %v6481_v34  ;;  %6476 = vmatprep.subr.bf16.mxu0 %v6475_v35  ;;  %v301_v34 = vld [vmem:[#allocation4 + $0x6e8] sm:$0xff] }
 0x11c   :  { %6199 = vmatmul.mubr.msk.f32.gmra.mrb[98].mxu0 %vm400_vm0, %v7167_v20  ;;  %6484 = vmatprep.subr.bf16.mxu1 %v6483_v39  ;;  %v381_v35 = vld [vmem:[#allocation4 + $0x968] sm:$0xff]  ;;  %v383_v39 = vld [vmem:[#allocation4 + $0x978] sm:$0xff] }
 0x11d   :  { %6203 = vmatmul.mubr.msk.f32.gmra.mrb[98].mxu1 %vm400_vm0, %v7167_v20  ;;  %2625 = vmatprep.mubr.f32.mxu0 %v6799_v0  ;;  %v6507_v42 = vpack.c.bf16 %v381_v35, %v301_v34  ;;  %v304_v35 = vld [vmem:[#allocation4 + $0x700] sm:$0xff] }
 0x11e   :  { %2714 = vmatprep.mubr.f32.mxu1 %v6799_v0  ;;  %6478 = vmatpush1.bf16.msra.mxu0 %v6477_v45  ;;  %v302_v45 = vld [vmem:[#allocation4 + $0x6f0] sm:$0xff] }
 0x11f   :  { %6486 = vmatpush1.bf16.msra.mxu1 %v6485_v46  ;;  %6488 = vmatprep.subr.bf16.mxu0 %v6487_v48  ;;  %v6517_v60 = vpack.c.bf16 %v382_v50, %v302_v45  ;;  %v229_v45 = vld [vmem:[#allocation4 + $0x4a8] sm:$0xff]  ;;  %v151_v50 = vld [vmem:[#allocation4 + $0x238] sm:$0xff] }
 0x120   :  { %6200 = vmatmul.mubr.msk.f32.gmra.mrb[100].mxu0 %vm400_vm0, %v7175_v22  ;;  %6496 = vmatprep.subr.bf16.mxu1 %v6495_v49  ;;  %v6515_v49 = vpack.c.bf16 %v383_v39, %v303_v38  ;;  %v306_v38 = vld [vmem:[#allocation4 + $0x710] sm:$0xff] }
 0x121   :  { %6204 = vmatmul.mubr.msk.f32.gmra.mrb[100].mxu1 %vm400_vm0, %v7175_v22  ;;  %2631 = vmatprep.mubr.f32.mxu0 %v6799_v0 }
 0x122   :  { %2720 = vmatprep.mubr.f32.mxu1 %v6799_v0 }
 0x124   :  { %6201 = vmatmul.mubr.msk.f32.gmra.mrb[102].mxu0 %vm400_vm0, %v7183_v26 }
 0x125   :  { %6205 = vmatmul.mubr.msk.f32.gmra.mrb[102].mxu1 %vm400_vm0, %v7183_v26  ;;  %2791 = vmatprep.mubr.f32.mxu0 %v6799_v0 }
 0x126   :  { %2880 = vmatprep.mubr.f32.mxu1 %v6799_v0 }
 0x128   :  { %6206 = vmatmul.mubr.msk.f32.vlgmr.msra.gmra.mrb[104].mxu0 %vm400_vm0, %v7159_v11 }
 0x129   :  { %6210 = vmatmul.mubr.msk.f32.vlgmr.msra.gmra.mrb[104].mxu1 %vm400_vm0, %v7159_v11  ;;  %6490 = vmatpush1.bf16.msra.mxu0 %v6489_v61  ;;  %v6519_v61 = vpack.c.bf16 %v225_v52, %v145_v51  ;;  %v231_v51 = vld [vmem:[#allocation4 + $0x4b8] sm:$0xff] }
 0x12a   :  { %2797 = vmatprep.mubr.f32.mxu0 %v6799_v0  ;;  %2886 = vmatprep.mubr.f32.mxu1 %v6799_v0 }
 0x12b   :  { %v7227_v10 = vpop.f32.mrb[0].mxu0  ;;  %6498 = vmatpush1.bf16.msra.mxu1 %v6497_v47  ;;  %6492 = vmatprep.subr.bf16.mxu0 %v6491_v63  ;;  %v6527_v47 = vpack.c.bf16 %v227_v55, %v147_v54  ;;  %v6533_v55 = vpack.c.bf16 %v386_v43, %v306_v38  ;;  %v389_v38 = vld [vmem:[#allocation4 + $0x9a8] sm:$0xff] }
 0x12c   :  { %v7229_v58 = vpop.f32.mrb[1].mxu0  ;;  %6207 = vmatmul.mubr.msk.f32.gmra.mrb[106].mxu0 %vm400_vm0, %v7167_v20  ;;  %v7233_v14 = vpop.f32.mrb[0].mxu1  ;;  %6500 = vmatprep.subr.bf16.mxu1 %v6499_v4 }
 0x12d   :  { %6211 = vmatmul.mubr.msk.f32.gmra.mrb[106].mxu1 %vm400_vm0, %v7167_v20  ;;  %2803 = vmatprep.mubr.f32.mxu0 %v6799_v0  ;;  %v7238_v16 = vpop.f32.mrb[1].mxu1 }
 0x12e   :  { %2892 = vmatprep.mubr.f32.mxu1 %v6799_v0  ;;  %6494 = vmatpush1.bf16.msra.mxu0 %v6493_v9 }
 0x12f   :  { %v7241_v17 = vpop.f32.mrb[2].mxu0  ;;  %6502 = vmatpush1.bf16.msra.mxu1 %v6501_v12  ;;  %6504 = vmatprep.subr.bf16.mxu0 %v6503_v13  ;;  %v226_v12 = vld [vmem:[#allocation4 + $0x490] sm:$0xff]  ;;  %v305_v13 = vld [vmem:[#allocation4 + $0x708] sm:$0xff] }
 0x130   :  { %10423 = vst [vmem:[#allocation17_spill] sm:$0xff] %v7241_v17  ;;  %v7246_v19 = vpop.f32.mrb[3].mxu0  ;;  %6208 = vmatmul.mubr.msk.f32.gmra.mrb[108].mxu0 %vm400_vm0, %v7175_v22  ;;  %v7250_v21 = vpop.f32.mrb[2].mxu1  ;;  %6512 = vmatprep.subr.bf16.mxu1 %v6511_v15  ;;  %v385_v15 = vld [vmem:[#allocation4 + $0x988] sm:$0xff]  ;;  %v6529_v33 = vpack.c.bf16 %v226_v12, %v146_v7 }
 0x131   :  { %10424 = vst [vmem:[#allocation18_spill] sm:$0xff] %v7246_v19  ;;  %10425 = vst [vmem:[#allocation19_spill] sm:$0xff] %v7250_v21  ;;  %6212 = vmatmul.mubr.msk.f32.gmra.mrb[108].mxu1 %vm400_vm0, %v7175_v22  ;;  %2809 = vmatprep.mubr.f32.mxu0 %v6799_v0  ;;  %v7255_v23 = vpop.f32.mrb[3].mxu1  ;;  %v6523_v34 = vpack.c.bf16 %v385_v15, %v305_v13  ;;  %v148_v15 = vld [vmem:[#allocation4 + $0x220] sm:$0xff] }
 0x132   :  { %10426 = vst [vmem:[#allocation20_spill] sm:$0xff] %v7255_v23  ;;  %2898 = vmatprep.mubr.f32.mxu1 %v6799_v0 }
 0x133   :  { %v7258_v27 = vpop.f32.mrb[4].mxu0 }
 0x134   :  { %10427 = vst [vmem:[#allocation21_spill] sm:$0xff] %v7258_v27  ;;  %v7263_v30 = vpop.f32.mrb[5].mxu0  ;;  %6209 = vmatmul.mubr.msk.f32.gmra.mrb[110].mxu0 %vm400_vm0, %v7183_v26  ;;  %v7267_v31 = vpop.f32.mrb[4].mxu1 }
 0x135   :  { %10428 = vst [vmem:[#allocation22_spill] sm:$0xff] %v7263_v30  ;;  %10429 = vst [vmem:[#allocation23_spill] sm:$0xff] %v7267_v31  ;;  %6213 = vmatmul.mubr.msk.f32.gmra.mrb[110].mxu1 %vm400_vm0, %v7183_v26  ;;  %2969 = vmatprep.mubr.f32.mxu0 %v6799_v0  ;;  %v7272_v36 = vpop.f32.mrb[5].mxu1 }
 0x136   :  { %10430 = vst [vmem:[#allocation24_spill] sm:$0xff] %v7272_v36  ;;  %3058 = vmatprep.mubr.f32.mxu1 %v6799_v0 }
 0x137   :  { %v7275_v40 = vpop.f32.mrb[6].mxu0 }
 0x138   :  { %10431 = vst [vmem:[#allocation25_spill] sm:$0xff] %v7275_v40  ;;  %v7277_v46 = vpop.f32.mrb[7].mxu0  ;;  %6214 = vmatmul.mubr.msk.f32.vlgmr.msra.gmra.mrb[112].mxu0 %vm400_vm0, %v7159_v11  ;;  %v7281_v48 = vpop.f32.mrb[6].mxu1 }
 0x139   :  { %10432 = vst [vmem:[#allocation26_spill] sm:$0xff] %v7277_v46  ;;  %10433 = vst [vmem:[#allocation27_spill] sm:$0xff] %v7281_v48  ;;  %6218 = vmatmul.mubr.msk.f32.vlgmr.msra.gmra.mrb[112].mxu1 %vm400_vm0, %v7159_v11  ;;  %6506 = vmatpush1.bf16.msra.mxu0 %v6505_v37  ;;  %v7285_v53 = vpop.f32.mrb[7].mxu1  ;;  %v384_v37 = vld [vmem:[#allocation4 + $0x980] sm:$0xff] }
 0x13a   :  { %10434 = vst [vmem:[#allocation28_spill] sm:$0xff] %v7285_v53  ;;  %2975 = vmatprep.mubr.f32.mxu0 %v6799_v0  ;;  %3064 = vmatprep.mubr.f32.mxu1 %v6799_v0  ;;  %v6525_v52 = vpack.c.bf16 %v384_v37, %v304_v35  ;;  %v230_v35 = vld [vmem:[#allocation4 + $0x4b0] sm:$0xff]  ;;  %v309_v37 = vld [vmem:[#allocation4 + $0x728] sm:$0xff] }
 0x13b   :  { %v7289_v59 = vpop.f32.mrb[8].mxu0  ;;  %6514 = vmatpush1.bf16.msra.mxu1 %v6513_v41  ;;  %6508 = vmatprep.subr.bf16.mxu0 %v6507_v42  ;;  %v6531_v42 = vpack.c.bf16 %v387_v28, %v307_v25  ;;  %v150_v28 = vld [vmem:[#allocation4 + $0x230] sm:$0xff] }
 0x13c   :  { %10435 = vst [vmem:[#allocation29_spill] sm:$0xff] %v7289_v59  ;;  %v7291_v62 = vpop.f32.mrb[9].mxu0  ;;  %6215 = vmatmul.mubr.msk.f32.gmra.mrb[114].mxu0 %vm400_vm0, %v7167_v20  ;;  %v7295_v32 = vpop.f32.mrb[8].mxu1  ;;  %6516 = vmatprep.subr.bf16.mxu1 %v6515_v49 }
 0x13d   :  { %10436 = vst [vmem:[#allocation30_spill] sm:$0xff] %v7291_v62  ;;  %10437 = vst [vmem:[#allocation31_spill] sm:$0xff] %v7295_v32  ;;  %6219 = vmatmul.mubr.msk.f32.gmra.mrb[114].mxu1 %vm400_vm0, %v7167_v20  ;;  %2981 = vmatprep.mubr.f32.mxu0 %v6799_v0  ;;  %v7300_v63 = vpop.f32.mrb[9].mxu1 }
 0x13e   :  { %10438 = vst [vmem:[#allocation32_spill] sm:$0xff] %v7300_v63  ;;  %3070 = vmatprep.mubr.f32.mxu1 %v6799_v0  ;;  %6510 = vmatpush1.bf16.msra.mxu0 %v6509_v56  ;;  %v6535_v56 = vpack.c.bf16 %v229_v45, %v149_v44  ;;  %v311_v44 = vld [vmem:[#allocation4 + $0x738] sm:$0xff] }
 0x13f   :  { %v7303_v1 = vpop.f32.mrb[10].mxu0  ;;  %6518 = vmatpush1.bf16.msra.mxu1 %v6517_v60  ;;  %6520 = vmatprep.subr.bf16.mxu0 %v6519_v61  ;;  %v391_v45 = vld [vmem:[#allocation4 + $0x9b8] sm:$0xff] }
 0x140   :  { %10439 = vst [vmem:[#allocation33_spill] sm:$0xff] %v7303_v1  ;;  %v7305_v2 = vpop.f32.mrb[11].mxu0  ;;  %6216 = vmatmul.mubr.msk.f32.gmra.mrb[116].mxu0 %vm400_vm0, %v7175_v22  ;;  %v7309_v3 = vpop.f32.mrb[10].mxu1  ;;  %6528 = vmatprep.subr.bf16.mxu1 %v6527_v47  ;;  %v6543_v47 = vpack.c.bf16 %v231_v51, %v151_v50  ;;  %v6545_v51 = vpack.c.bf16 %v230_v35, %v150_v28  ;;  %v155_v35 = vld [vmem:[#allocation4 + $0x258] sm:$0xff] }
 0x141   :  { %10440 = vst [vmem:[#allocation34_spill] sm:$0xff] %v7305_v2  ;;  %10441 = vst [vmem:[#allocation35_spill] sm:$0xff] %v7309_v3  ;;  %6220 = vmatmul.mubr.msk.f32.gmra.mrb[116].mxu1 %vm400_vm0, %v7175_v22  ;;  %2987 = vmatprep.mubr.f32.mxu0 %v6799_v0  ;;  %v7314_v4 = vpop.f32.mrb[11].mxu1 }
 0x142   :  { %10442 = vst [vmem:[#allocation36_spill] sm:$0xff] %v7314_v4  ;;  %3076 = vmatprep.mubr.f32.mxu1 %v6799_v0 }
 0x143   :  { %v7317_v6 = vpop.f32.mrb[12].mxu0 }
 0x144   :  { %10443 = vst [vmem:[#allocation37_spill] sm:$0xff] %v7317_v6  ;;  %v7319_v8 = vpop.f32.mrb[13].mxu0  ;;  %6217 = vmatmul.mubr.msk.f32.gmra.mrb[118].mxu0 %vm400_vm0, %v7183_v26  ;;  %v7323_v9 = vpop.f32.mrb[12].mxu1 }
 0x145   :  { %10444 = vst [vmem:[#allocation38_spill] sm:$0xff] %v7319_v8  ;;  %10445 = vst [vmem:[#allocation39_spill] sm:$0xff] %v7323_v9  ;;  %6221 = vmatmul.mubr.msk.f32.gmra.mrb[118].mxu1 %vm400_vm0, %v7183_v26  ;;  %3147 = vmatprep.mubr.f32.mxu0 %v6799_v0  ;;  %v7328_v18 = vpop.f32.mrb[13].mxu1 }
 0x146   :  { %10446 = vst [vmem:[#allocation40_spill] sm:$0xff] %v7328_v18  ;;  %3236 = vmatprep.mubr.f32.mxu1 %v6799_v0 }
 0x147   :  { %v7331_v29 = vpop.f32.mrb[14].mxu0 }
 0x148   :  { %10447 = vst [vmem:[#allocation41_spill] sm:$0xff] %v7331_v29  ;;  %v7333_v39 = vpop.f32.mrb[15].mxu0  ;;  %6222 = vmatmul.mubr.msk.f32.vlgmr.msra.gmra.mrb[120].mxu0 %vm400_vm0, %v7159_v11  ;;  %v7337_v41 = vpop.f32.mrb[14].mxu1 }
 0x149   :  { %10448 = vst [vmem:[#allocation42_spill] sm:$0xff] %v7333_v39  ;;  %10449 = vst [vmem:[#allocation43_spill] sm:$0xff] %v7337_v41  ;;  %6226 = vmatmul.mubr.msk.f32.vlgmr.msra.gmra.mrb[120].mxu1 %vm400_vm0, %v7159_v11  ;;  %6522 = vmatpush1.bf16.msra.mxu0 %v6521_v24  ;;  %v7341_v49 = vpop.f32.mrb[15].mxu1  ;;  %v228_v24 = vld [vmem:[#allocation4 + $0x4a0] sm:$0xff] }
 0x14a   :  { %10450 = vst [vmem:[#allocation44_spill] sm:$0xff] %v7341_v49  ;;  %3153 = vmatprep.mubr.f32.mxu0 %v6799_v0  ;;  %3242 = vmatprep.mubr.f32.mxu1 %v6799_v0  ;;  %v6537_v43 = vpack.c.bf16 %v228_v24, %v148_v15  ;;  %v390_v15 = vld [vmem:[#allocation4 + $0x9b0] sm:$0xff]  ;;  %v153_v24 = vld [vmem:[#allocation4 + $0x248] sm:$0xff] }
 0x14b   :  { %v7345_v54 = vpop.f32.mrb[16].mxu0  ;;  %6530 = vmatpush1.bf16.msra.mxu1 %v6529_v33  ;;  %6524 = vmatprep.subr.bf16.mxu0 %v6523_v34 }
 0x14c   :  { %10451 = vst [vmem:[#allocation45_spill] sm:$0xff] %v7345_v54  ;;  %v7347_v60 = vpop.f32.mrb[17].mxu0  ;;  %6223 = vmatmul.mubr.msk.f32.gmra.mrb[122].mxu0 %vm400_vm0, %v7167_v20  ;;  %v7351_v61 = vpop.f32.mrb[16].mxu1  ;;  %6532 = vmatprep.subr.bf16.mxu1 %v6531_v42 }
 0x14d   :  { %10452 = vst [vmem:[#allocation46_spill] sm:$0xff] %v7347_v60  ;;  %10453 = vst [vmem:[#allocation47_spill] sm:$0xff] %v7351_v61  ;;  %6227 = vmatmul.mubr.msk.f32.gmra.mrb[122].mxu1 %vm400_vm0, %v7167_v20  ;;  %3159 = vmatprep.mubr.f32.mxu0 %v6799_v0  ;;  %v7356_v57 = vpop.f32.mrb[17].mxu1 }
 0x14e   :  { %10454 = vst [vmem:[#allocation48_spill] sm:$0xff] %v7356_v57  ;;  %3248 = vmatprep.mubr.f32.mxu1 %v6799_v0  ;;  %6526 = vmatpush1.bf16.msra.mxu0 %v6525_v52  ;;  %v6539_v52 = vpack.c.bf16 %v389_v38, %v309_v37  ;;  %v235_v37 = vld [vmem:[#allocation4 + $0x4d8] sm:$0xff] }
 0x14f   :  { %v7359_v5 = vpop.f32.mrb[18].mxu0  ;;  %6534 = vmatpush1.bf16.msra.mxu1 %v6533_v55  ;;  %6536 = vmatprep.subr.bf16.mxu0 %v6535_v56  ;;  %v308_v55 = vld [vmem:[#allocation4 + $0x720] sm:$0xff] }
 0x150   :  { %10455 = vst [vmem:[#allocation49_spill] sm:$0xff] %v7359_v5  ;;  %v7361_v7 = vpop.f32.mrb[19].mxu0  ;;  %6224 = vmatmul.mubr.msk.f32.gmra.mrb[124].mxu0 %vm400_vm0, %v7175_v22  ;;  %v7365_v12 = vpop.f32.mrb[18].mxu1  ;;  %6544 = vmatprep.subr.bf16.mxu1 %v6543_v47  ;;  %v388_v56 = vld [vmem:[#allocation4 + $0x9a0] sm:$0xff]  ;;  %v310_v47 = vld [vmem:[#allocation4 + $0x730] sm:$0xff] }
 0x151   :  { %10456 = vst [vmem:[#allocation50_spill] sm:$0xff] %v7361_v7  ;;  %10457 = vst [vmem:[#allocation51_spill] sm:$0xff] %v7365_v12  ;;  %6228 = vmatmul.mubr.msk.f32.gmra.mrb[124].mxu1 %vm400_vm0, %v7175_v22  ;;  %3165 = vmatprep.mubr.f32.mxu0 %v6799_v0  ;;  %v7370_v13 = vpop.f32.mrb[19].mxu1  ;;  %v6541_v38 = vpack.c.bf16 %v388_v56, %v308_v55  ;;  %v152_v56 = vld [vmem:[#allocation4 + $0x240] sm:$0xff] }
 0x152   :  { %10458 = vst [vmem:[#allocation52_spill] sm:$0xff] %v7370_v13  ;;  %3254 = vmatprep.mubr.f32.mxu1 %v6799_v0 }
 0x153   :  { %v7373_v25 = vpop.f32.mrb[20].mxu0 }
 0x154   :  { %10459 = vst [vmem:[#allocation53_spill] sm:$0xff] %v7373_v25  ;;  %v7375_v33 = vpop.f32.mrb[21].mxu0  ;;  %6225 = vmatmul.mubr.msk.f32.gmra.mrb[126].mxu0 %vm400_vm0, %v7183_v26  ;;  %v7379_v34 = vpop.f32.mrb[20].mxu1  ;;  %v233_v25 = vld [vmem:[#allocation4 + $0x4c8] sm:$0xff] }
 0x155   :  { %10460 = vst [vmem:[#allocation54_spill] sm:$0xff] %v7375_v33  ;;  %10461 = vst [vmem:[#allocation55_spill] sm:$0xff] %v7379_v34  ;;  %6229 = vmatmul.mubr.msk.f32.gmra.mrb[126].mxu1 %vm400_vm0, %v7183_v26  ;;  %3325 = vmatprep.mubr.f32.mxu0 %v6799_v0  ;;  %v7384_v42 = vpop.f32.mrb[21].mxu1 }
 0x156   :  { %10462 = vst [vmem:[#allocation56_spill] sm:$0xff] %v7384_v42  ;;  %3414 = vmatprep.mubr.f32.mxu1 %v6799_v0  ;;  %v6547_v42 = vpack.c.bf16 %v391_v45, %v311_v44  ;;  %v6549_v44 = vpack.c.bf16 %v390_v15, %v310_v47  ;;  %v6551_v45 = vpack.c.bf16 %v233_v25, %v153_v24  ;;  %v232_v47 = vld [vmem:[#allocation4 + $0x4c0] sm:$0xff]  ;;  %v154_v24 = vld [vmem:[#allocation4 + $0x250] sm:$0xff] }
 0x157   :  { %v7387_v50 = vpop.f32.mrb[22].mxu0 }
 0x158   :  { %10463 = vst [vmem:[#allocation57_spill] sm:$0xff] %v7387_v50  ;;  %v7389_v33 = vpop.f32.mrb[23].mxu0  ;;  %6230 = vmatmul.mubr.msk.f32.vlgmr.msra.gmra.mrb[128].mxu0 %vm400_vm0, %v7159_v11  ;;  %v7393_v34 = vpop.f32.mrb[22].mxu1  ;;  %v237_v50 = vld [vmem:[#allocation4 + $0x4e8] sm:$0xff] }
 0x159   :  { %10464 = vst [vmem:[#allocation58_spill] sm:$0xff] %v7389_v33  ;;  %10465 = vst [vmem:[#allocation59_spill] sm:$0xff] %v7393_v34  ;;  %6234 = vmatmul.mubr.msk.f32.vlgmr.msra.gmra.mrb[128].mxu1 %vm400_vm0, %v7159_v11  ;;  %6538 = vmatpush1.bf16.msra.mxu0 %v6537_v43  ;;  %v7397_v28 = vpop.f32.mrb[23].mxu1 }
 0x15a   :  { %10466 = vst [vmem:[#allocation60_spill] sm:$0xff] %v7397_v28  ;;  %3331 = vmatprep.mubr.f32.mxu0 %v6799_v0  ;;  %3420 = vmatprep.mubr.f32.mxu1 %v6799_v0  ;;  %v6559_v28 = vpack.c.bf16 %v235_v37, %v155_v35  ;;  %v234_v37 = vld [vmem:[#allocation4 + $0x4d0] sm:$0xff] }
 0x15b   :  { %v7401_v33 = vpop.f32.mrb[24].mxu0  ;;  %6546 = vmatpush1.bf16.msra.mxu1 %v6545_v51  ;;  %6540 = vmatprep.subr.bf16.mxu0 %v6539_v52 }
 0x15c   :  { %10467 = vst [vmem:[#allocation61_spill] sm:$0xff] %v7401_v33  ;;  %v7403_v34 = vpop.f32.mrb[25].mxu0  ;;  %6231 = vmatmul.mubr.msk.f32.gmra.mrb[130].mxu0 %vm400_vm0, %v7167_v20  ;;  %v7407_v43 = vpop.f32.mrb[24].mxu1  ;;  %6548 = vmatprep.subr.bf16.mxu1 %v6547_v42 }
 0x15d   :  { %10468 = vst [vmem:[#allocation62_spill] sm:$0xff] %v7403_v34  ;;  %10469 = vst [vmem:[#allocation63_spill] sm:$0xff] %v7407_v43  ;;  %6235 = vmatmul.mubr.msk.f32.gmra.mrb[130].mxu1 %vm400_vm0, %v7167_v20  ;;  %3337 = vmatprep.mubr.f32.mxu0 %v6799_v0  ;;  %v7412_v55 = vpop.f32.mrb[25].mxu1  ;;  %v314_v34 = vld [vmem:[#allocation4 + $0x750] sm:$0xff] }
 0x15e   :  { %10470 = vst [vmem:[#allocation64_spill] sm:$0xff] %v7412_v55  ;;  %3426 = vmatprep.mubr.f32.mxu1 %v6799_v0  ;;  %6542 = vmatpush1.bf16.msra.mxu0 %v6541_v38  ;;  %v313_v38 = vld [vmem:[#allocation4 + $0x748] sm:$0xff]  ;;  %v392_v55 = vld [vmem:[#allocation4 + $0x9c0] sm:$0xff] }
 0x15f   :  { %v7415_v25 = vpop.f32.mrb[26].mxu0  ;;  %6550 = vmatpush1.bf16.msra.mxu1 %v6549_v44  ;;  %6552 = vmatprep.subr.bf16.mxu0 %v6551_v45  ;;  %v393_v44 = vld [vmem:[#allocation4 + $0x9c8] sm:$0xff] }
 0x160   :  { %10471 = vst [vmem:[#allocation65_spill] sm:$0xff] %v7415_v25  ;;  %v7417_v51 = vpop.f32.mrb[27].mxu0  ;;  %6232 = vmatmul.mubr.msk.f32.gmra.mrb[132].mxu0 %vm400_vm0, %v7175_v22  ;;  %v7421_v42 = vpop.f32.mrb[26].mxu1  ;;  %6560 = vmatprep.subr.bf16.mxu1 %v6559_v28  ;;  %v6555_v25 = vpack.c.bf16 %v393_v44, %v313_v38  ;;  %v239_v38 = vld [vmem:[#allocation4 + $0x4f8] sm:$0xff] }
 0x161   :  { %10472 = vst [vmem:[#allocation66_spill] sm:$0xff] %v7417_v51  ;;  %10473 = vst [vmem:[#allocation67_spill] sm:$0xff] %v7421_v42  ;;  %6236 = vmatmul.mubr.msk.f32.gmra.mrb[132].mxu1 %vm400_vm0, %v7175_v22  ;;  %3343 = vmatprep.mubr.f32.mxu0 %v6799_v0  ;;  %v7426_v52 = vpop.f32.mrb[27].mxu1  ;;  %v395_v51 = vld [vmem:[#allocation4 + $0x9d8] sm:$0xff]  ;;  %v6561_v42 = vpack.c.bf16 %v234_v37, %v154_v24 }
 0x162   :  { %10474 = vst [vmem:[#allocation68_spill] sm:$0xff] %v7426_v52  ;;  %3432 = vmatprep.mubr.f32.mxu1 %v6799_v0  ;;  %v6553_v52 = vpack.c.bf16 %v232_v47, %v152_v56  ;;  %v394_v56 = vld [vmem:[#allocation4 + $0x9d0] sm:$0xff]  ;;  %v157_v47 = vld [vmem:[#allocation4 + $0x268] sm:$0xff]  ;;  %v159_v37 = vld [vmem:[#allocation4 + $0x278] sm:$0xff] }
 0x163   :  { %v7429_v15 = vpop.f32.mrb[28].mxu0 }
 0x164   :  { %10475 = vst [vmem:[#allocation69_spill] sm:$0xff] %v7429_v15  ;;  %v7431_v35 = vpop.f32.mrb[29].mxu0  ;;  %6233 = vmatmul.mubr.msk.f32.gmra.mrb[134].mxu0 %vm400_vm0, %v7183_v26  ;;  %v7435_v28 = vpop.f32.mrb[28].mxu1  ;;  %v315_v15 = vld [vmem:[#allocation4 + $0x758] sm:$0xff] }
 0x165   :  { %10476 = vst [vmem:[#allocation70_spill] sm:$0xff] %v7431_v35  ;;  %10477 = vst [vmem:[#allocation71_spill] sm:$0xff] %v7435_v28  ;;  %6237 = vmatmul.mubr.msk.f32.gmra.mrb[134].mxu1 %vm400_vm0, %v7183_v26  ;;  %3503 = vmatprep.mubr.f32.mxu0 %v6799_v0  ;;  %v7440_v45 = vpop.f32.mrb[29].mxu1  ;;  %v312_v28 = vld [vmem:[#allocation4 + $0x740] sm:$0xff] }
 0x166   :  { %10478 = vst [vmem:[#allocation72_spill] sm:$0xff] %v7440_v45  ;;  %3592 = vmatprep.mubr.f32.mxu1 %v6799_v0  ;;  %v6563_v45 = vpack.c.bf16 %v395_v51, %v315_v15  ;;  %v6557_v44 = vpack.c.bf16 %v392_v55, %v312_v28  ;;  %v6565_v51 = vpack.c.bf16 %v394_v56, %v314_v34  ;;  %v156_v28 = vld [vmem:[#allocation4 + $0x260] sm:$0xff] }
 0x167   :  { %v7443_v35 = vpop.f32.mrb[30].mxu0  ;;  %v6567_v15 = vpack.c.bf16 %v237_v50, %v157_v47  ;;  %v158_v47 = vld [vmem:[#allocation4 + $0x270] sm:$0xff] }
 0x168   :  { %10479 = vst [vmem:[#allocation73_spill] sm:$0xff] %v7443_v35  ;;  %v7445_v43 = vpop.f32.mrb[31].mxu0  ;;  %6238 = vmatmul.mubr.msk.f32.vlgmr.msra.gmra.mrb[136].mxu0 %vm400_vm0, %v7159_v11  ;;  %v7449_v33 = vpop.f32.mrb[30].mxu1 }
 0x169   :  { %10480 = vst [vmem:[#allocation74_spill] sm:$0xff] %v7445_v43  ;;  %10481 = vst [vmem:[#allocation75_spill] sm:$0xff] %v7449_v33  ;;  %6242 = vmatmul.mubr.msk.f32.vlgmr.msra.gmra.mrb[136].mxu1 %vm400_vm0, %v7159_v11  ;;  %6554 = vmatpush1.bf16.msra.mxu0 %v6553_v52  ;;  %v7453_v24 = vpop.f32.mrb[31].mxu1 }
 0x16a   :  { %10482 = vst [vmem:[#allocation76_spill] sm:$0xff] %v7453_v24  ;;  %3509 = vmatprep.mubr.f32.mxu0 %v6799_v0  ;;  %3598 = vmatprep.mubr.f32.mxu1 %v6799_v0  ;;  %v6575_v24 = vpack.c.bf16 %v239_v38, %v159_v37  ;;  %v238_v38 = vld [vmem:[#allocation4 + $0x4f0] sm:$0xff] }
 0x16b   :  { %v7457_v43 = vpop.f32.mrb[32].mxu0  ;;  %6562 = vmatpush1.bf16.msra.mxu1 %v6561_v42  ;;  %6556 = vmatprep.subr.bf16.mxu0 %v6555_v25 }
 0x16c   :  { %10483 = vst [vmem:[#allocation77_spill] sm:$0xff] %v7457_v43  ;;  %v7459_v33 = vpop.f32.mrb[33].mxu0  ;;  %6239 = vmatmul.mubr.msk.f32.gmra.mrb[138].mxu0 %vm400_vm0, %v7167_v20  ;;  %v7463_v52 = vpop.f32.mrb[32].mxu1  ;;  %6564 = vmatprep.subr.bf16.mxu1 %v6563_v45  ;;  %v236_v45 = vld [vmem:[#allocation4 + $0x4e0] sm:$0xff] }
 0x16d   :  { %10484 = vst [vmem:[#allocation78_spill] sm:$0xff] %v7459_v33  ;;  %10485 = vst [vmem:[#allocation79_spill] sm:$0xff] %v7463_v52  ;;  %6243 = vmatmul.mubr.msk.f32.gmra.mrb[138].mxu1 %vm400_vm0, %v7167_v20  ;;  %3515 = vmatprep.mubr.f32.mxu0 %v6799_v0  ;;  %v7468_v55 = vpop.f32.mrb[33].mxu1 }
 0x16e   :  { %10486 = vst [vmem:[#allocation80_spill] sm:$0xff] %v7468_v55  ;;  %3604 = vmatprep.mubr.f32.mxu1 %v6799_v0  ;;  %6558 = vmatpush1.bf16.msra.mxu0 %v6557_v44  ;;  %v317_v44 = vld [vmem:[#allocation4 + $0x768] sm:$0xff]  ;;  %v396_v55 = vld [vmem:[#allocation4 + $0x9e0] sm:$0xff] }
 0x16f   :  { %v7471_v34 = vpop.f32.mrb[34].mxu0  ;;  %6566 = vmatpush1.bf16.msra.mxu1 %v6565_v51  ;;  %6568 = vmatprep.subr.bf16.mxu0 %v6567_v15  ;;  %v397_v51 = vld [vmem:[#allocation4 + $0x9e8] sm:$0xff] }
 0x170   :  { %10487 = vst [vmem:[#allocation81_spill] sm:$0xff] %v7471_v34  ;;  %v7473_v50 = vpop.f32.mrb[35].mxu0  ;;  %6240 = vmatmul.mubr.msk.f32.gmra.mrb[140].mxu0 %vm400_vm0, %v7175_v22  ;;  %v7477_v25 = vpop.f32.mrb[34].mxu1  ;;  %6576 = vmatprep.subr.bf16.mxu1 %v6575_v24  ;;  %v6571_v34 = vpack.c.bf16 %v397_v51, %v317_v44 }
 0x171   :  { %10488 = vst [vmem:[#allocation82_spill] sm:$0xff] %v7473_v50  ;;  %10489 = vst [vmem:[#allocation83_spill] sm:$0xff] %v7477_v25  ;;  %6244 = vmatmul.mubr.msk.f32.gmra.mrb[140].mxu1 %vm400_vm0, %v7175_v22  ;;  %3521 = vmatprep.mubr.f32.mxu0 %v6799_v0  ;;  %v7482_v42 = vpop.f32.mrb[35].mxu1  ;;  %v399_v50 = vld [vmem:[#allocation4 + $0x9f8] sm:$0xff]  ;;  %v6577_v25 = vpack.c.bf16 %v238_v38, %v158_v47 }
 0x172   :  { %10490 = vst [vmem:[#allocation84_spill] sm:$0xff] %v7482_v42  ;;  %3610 = vmatprep.mubr.f32.mxu1 %v6799_v0  ;;  %v6569_v42 = vpack.c.bf16 %v236_v45, %v156_v28  ;;  %v398_v28 = vld [vmem:[#allocation4 + $0x9f0] sm:$0xff] }
 0x173   :  { %v7485_v56 = vpop.f32.mrb[36].mxu0 }
 0x174   :  { %10491 = vst [vmem:[#allocation85_spill] sm:$0xff] %v7485_v56  ;;  %v7487_v37 = vpop.f32.mrb[37].mxu0  ;;  %6241 = vmatmul.mubr.msk.f32.gmra.mrb[142].mxu0 %vm400_vm0, %v7183_v26  ;;  %v7491_v24 = vpop.f32.mrb[36].mxu1  ;;  %v319_v56 = vld [vmem:[#allocation4 + $0x778] sm:$0xff] }
 0x175   :  { %10492 = vst [vmem:[#allocation86_spill] sm:$0xff] %v7487_v37  ;;  %10493 = vst [vmem:[#allocation87_spill] sm:$0xff] %v7491_v24  ;;  %6245 = vmatmul.mubr.msk.f32.gmra.mrb[142].mxu1 %vm400_vm0, %v7183_v26  ;;  %3681 = vmatprep.mubr.f32.mxu0 %v6799_v0  ;;  %v7496_v15 = vpop.f32.mrb[37].mxu1  ;;  %v316_v24 = vld [vmem:[#allocation4 + $0x760] sm:$0xff]  ;;  %v6579_v43 = vpack.c.bf16 %v399_v50, %v319_v56 }
 0x176   :  { %10494 = vst [vmem:[#allocation88_spill] sm:$0xff] %v7496_v15  ;;  %3770 = vmatprep.mubr.f32.mxu1 %v6799_v0  ;;  %v318_v15 = vld [vmem:[#allocation4 + $0x770] sm:$0xff]  ;;  %v6573_v47 = vpack.c.bf16 %v396_v55, %v316_v24 }
 0x177   :  { %v7499_v37 = vpop.f32.mrb[38].mxu0  ;;  %v6581_v44 = vpack.c.bf16 %v398_v28, %v318_v15 }
 0x178   :  { %10495 = vst [vmem:[#allocation89_spill] sm:$0xff] %v7499_v37  ;;  %v7501_v33 = vpop.f32.mrb[39].mxu0  ;;  %6246 = vmatmul.mubr.msk.f32.vlgmr.msra.gmra.mrb[144].mxu0 %vm400_vm0, %v7159_v11  ;;  %v7505_v52 = vpop.f32.mrb[38].mxu1 }
 0x179   :  { %10496 = vst [vmem:[#allocation90_spill] sm:$0xff] %v7501_v33  ;;  %10497 = vst [vmem:[#allocation91_spill] sm:$0xff] %v7505_v52  ;;  %6250 = vmatmul.mubr.msk.f32.vlgmr.msra.gmra.mrb[144].mxu1 %vm400_vm0, %v7159_v11  ;;  %6570 = vmatpush1.bf16.msra.mxu0 %v6569_v42  ;;  %v7509_v45 = vpop.f32.mrb[39].mxu1 }
 0x17a   :  { %10498 = vst [vmem:[#allocation92_spill] sm:$0xff] %v7509_v45  ;;  %3687 = vmatprep.mubr.f32.mxu0 %v6799_v0  ;;  %3776 = vmatprep.mubr.f32.mxu1 %v6799_v0 }
 0x17b   :  { %v7513_v38 = vpop.f32.mrb[40].mxu0  ;;  %6578 = vmatpush1.bf16.msra.mxu1 %v6577_v25  ;;  %6572 = vmatprep.subr.bf16.mxu0 %v6571_v34 }
 0x17c   :  { %v7517_v56 = vpop.f32.mrb[40].mxu1  ;;  %v7519_v51 = vpop.f32.mrb[41].mxu0  ;;  %6247 = vmatmul.mubr.msk.f32.gmra.mrb[146].mxu0 %vm400_vm0, %v7167_v20  ;;  %6580 = vmatprep.subr.bf16.mxu1 %v6579_v43 }
 0x17d   :  { %v7527_v25 = vpop.f32.mrb[41].mxu1  ;;  %6251 = vmatmul.mubr.msk.f32.gmra.mrb[146].mxu1 %vm400_vm0, %v7167_v20  ;;  %3693 = vmatprep.mubr.f32.mxu0 %v6799_v0 }
 0x17e   :  { %3782 = vmatprep.mubr.f32.mxu1 %v6799_v0  ;;  %6574 = vmatpush1.bf16.msra.mxu0 %v6573_v47 }
 0x17f   :  { %v7535_v43 = vpop.f32.mrb[42].mxu0  ;;  %6582 = vmatpush1.bf16.msra.mxu1 %v6581_v44 }
 0x180   :  { %10499 = vst [vmem:[#allocation93_spill] sm:$0xff] %v7535_v43  ;;  %v7539_v15 = vpop.f32.mrb[42].mxu1  ;;  %v7541_v28 = vpop.f32.mrb[43].mxu0  ;;  %6248 = vmatmul.mubr.msk.f32.gmra.mrb[148].mxu0 %vm400_vm0, %v7175_v22 }
 0x181   :  { %10500 = vst [vmem:[#allocation94_spill] sm:$0xff] %v7539_v15  ;;  %10501 = vst [vmem:[#allocation95_spill] sm:$0xff] %v7541_v28  ;;  %v7549_v47 = vpop.f32.mrb[43].mxu1  ;;  %6252 = vmatmul.mubr.msk.f32.gmra.mrb[148].mxu1 %vm400_vm0, %v7175_v22  ;;  %3699 = vmatprep.mubr.f32.mxu0 %v6799_v0 }
 0x182   :  { %10502 = vst [vmem:[#allocation96_spill] sm:$0xff] %v7549_v47  ;;  %3788 = vmatprep.mubr.f32.mxu1 %v6799_v0 }
 0x183   :  { %v7557_v24 = vpop.f32.mrb[44].mxu0 }
 0x184   :  { %10503 = vst [vmem:[#allocation97_spill] sm:$0xff] %v7557_v24  ;;  %v7561_v42 = vpop.f32.mrb[44].mxu1  ;;  %v7563_v34 = vpop.f32.mrb[45].mxu0  ;;  %6249 = vmatmul.mubr.msk.f32.gmra.mrb[150].mxu0 %vm400_vm0, %v7183_v26 }
 0x185   :  { %10504 = vst [vmem:[#allocation98_spill] sm:$0xff] %v7561_v42  ;;  %10505 = vst [vmem:[#allocation99_spill] sm:$0xff] %v7563_v34  ;;  %v7571_v47 = vpop.f32.mrb[45].mxu1  ;;  %6253 = vmatmul.mubr.msk.f32.gmra.mrb[150].mxu1 %vm400_vm0, %v7183_v26  ;;  %3859 = vmatprep.mubr.f32.mxu0 %v6799_v0 }
 0x186   :  { %10506 = vst [vmem:[#allocation100_spill] sm:$0xff] %v7571_v47  ;;  %3948 = vmatprep.mubr.f32.mxu1 %v6799_v0 }
 0x187   :  { %v7579_v24 = vpop.f32.mrb[46].mxu0 }
 0x188   :  { %10507 = vst [vmem:[#allocation101_spill] sm:$0xff] %v7579_v24  ;;  %v7583_v42 = vpop.f32.mrb[46].mxu1  ;;  %v7585_v44 = vpop.f32.mrb[47].mxu0  ;;  %6254 = vmatmul.mubr.msk.f32.vlgmr.msra.gmra.mrb[152].mxu0 %vm400_vm0, %v7159_v11 }
 0x189   :  { %10508 = vst [vmem:[#allocation102_spill] sm:$0xff] %v7583_v42  ;;  %10509 = vst [vmem:[#allocation103_spill] sm:$0xff] %v7585_v44  ;;  %v7593_v47 = vpop.f32.mrb[47].mxu1  ;;  %6258 = vmatmul.mubr.msk.f32.vlgmr.msra.gmra.mrb[152].mxu1 %vm400_vm0, %v7159_v11  ;;  %3865 = vmatprep.mubr.f32.mxu0 %v6799_v0 }
 0x18a   :  { %10510 = vst [vmem:[#allocation104_spill] sm:$0xff] %v7593_v47  ;;  %3954 = vmatprep.mubr.f32.mxu1 %v6799_v0 }
 0x18b   :  { %v7601_v24 = vpop.f32.mrb[48].mxu0 }
 0x18c   :  { %10511 = vst [vmem:[#allocation105_spill] sm:$0xff] %v7601_v24  ;;  %v7605_v42 = vpop.f32.mrb[48].mxu1  ;;  %v7607_v55 = vpop.f32.mrb[49].mxu0  ;;  %6255 = vmatmul.mubr.msk.f32.gmra.mrb[154].mxu0 %vm400_vm0, %v7167_v20 }
 0x18d   :  { %10512 = vst [vmem:[#allocation106_spill] sm:$0xff] %v7605_v42  ;;  %10513 = vst [vmem:[#allocation107_spill] sm:$0xff] %v7607_v55  ;;  %v7615_v47 = vpop.f32.mrb[49].mxu1  ;;  %6259 = vmatmul.mubr.msk.f32.gmra.mrb[154].mxu1 %vm400_vm0, %v7167_v20  ;;  %3871 = vmatprep.mubr.f32.mxu0 %v6799_v0 }
 0x18e   :  { %10514 = vst [vmem:[#allocation108_spill] sm:$0xff] %v7615_v47  ;;  %3960 = vmatprep.mubr.f32.mxu1 %v6799_v0 }
 0x18f   :  { %v7623_v24 = vpop.f32.mrb[50].mxu0 }
 0x190   :  { %10515 = vst [vmem:[#allocation109_spill] sm:$0xff] %v7623_v24  ;;  %v7627_v42 = vpop.f32.mrb[50].mxu1  ;;  %v7629_v50 = vpop.f32.mrb[51].mxu0  ;;  %6256 = vmatmul.mubr.msk.f32.gmra.mrb[156].mxu0 %vm400_vm0, %v7175_v22 }
 0x191   :  { %10516 = vst [vmem:[#allocation110_spill] sm:$0xff] %v7627_v42  ;;  %10517 = vst [vmem:[#allocation111_spill] sm:$0xff] %v7629_v50  ;;  %v7637_v47 = vpop.f32.mrb[51].mxu1  ;;  %6260 = vmatmul.mubr.msk.f32.gmra.mrb[156].mxu1 %vm400_vm0, %v7175_v22  ;;  %3877 = vmatprep.mubr.f32.mxu0 %v6799_v0 }
 0x192   :  { %10518 = vst [vmem:[#allocation112_spill] sm:$0xff] %v7637_v47  ;;  %3966 = vmatprep.mubr.f32.mxu1 %v6799_v0  ;;  %v4400_v0 = vlaneseq }
 0x193   :  { %v7645_v24 = vpop.f32.mrb[52].mxu0 }
 0x194   :  { %10519 = vst [vmem:[#allocation113_spill] sm:$0xff] %v7645_v24  ;;  %v7649_v42 = vpop.f32.mrb[52].mxu1  ;;  %v7651_v34 = vpop.f32.mrb[53].mxu0  ;;  %6257 = vmatmul.mubr.msk.f32.gmra.mrb[158].mxu0 %vm400_vm0, %v7183_v26  ;;  %v7716_v57 = vshrl.u32 %v4400_v0, 7 }
 0x195   :  { %10520 = vst [vmem:[#allocation114_spill] sm:$0xff] %v7649_v42  ;;  %10521 = vst [vmem:[#allocation115_spill] sm:$0xff] %v7651_v34  ;;  %v7659_v47 = vpop.f32.mrb[53].mxu1  ;;  %6261 = vmatmul.mubr.msk.f32.gmra.mrb[158].mxu1 %vm400_vm0, %v7183_v26 }
 0x196   :  { %10522 = vst [vmem:[#allocation116_spill] sm:$0xff] %v7659_v47  ;;  %v7740_v39 = vmul.u32 2654435761, %v7716_v57 }
 0x197   :  { %v7665_v20 = vpop.f32.mrb[54].mxu0 }
 0x198   :  { %10523 = vst [vmem:[#allocation117_spill] sm:$0xff] %v7665_v20  ;;  %v7669_v6 = vpop.f32.mrb[54].mxu1  ;;  %v7671_v4 = vpop.f32.mrb[55].mxu0  ;;  %10544 = vst [vmem:[#allocation134_spill] sm:$0xff] %v7740_v39 }
 0x199   :  { %10524 = vst [vmem:[#allocation118_spill] sm:$0xff] %v7669_v6  ;;  %10525 = vst [vmem:[#allocation119_spill] sm:$0xff] %v7671_v4  ;;  %v7677_v34 = vpop.f32.mrb[55].mxu1  ;;  %v7774_v6 = vstv %s10185_s0 }
 0x19a   :  { %10526 = vst [vmem:[#allocation120_spill] sm:$0xff] %v7677_v34  ;;  %v7697_v34 = vand.u32 127, %v4400_v0  ;;  %10554 = vst [vmem:[#allocation140_spill] sm:$0xff] %v7774_v6 }
 0x19b   :  { %v7681_v47 = vpop.f32.mrb[56].mxu0 }
 0x19c   :  { %10527 = vst [vmem:[#allocation121_spill] sm:$0xff] %v7681_v47  ;;  %v7685_v20 = vpop.f32.mrb[56].mxu1  ;;  %v7687_v29 = vpop.f32.mrb[57].mxu0  ;;  %10531 = vst [vmem:[#allocation125_spill] sm:$0xff] %v7697_v34  ;;  %v4410_v11 = vadd.s32 512, %v7697_v34  ;;  %v4412_v24 = vadd.s32 768, %v7697_v34 }
 0x19d   :  { %10528 = vst [vmem:[#allocation122_spill] sm:$0xff] %v7685_v20  ;;  %10529 = vst [vmem:[#allocation123_spill] sm:$0xff] %v7687_v29  ;;  %v7693_v4 = vpop.f32.mrb[57].mxu1  ;;  %v4411_v5 = vadd.s32 640, %v7697_v34  ;;  %v4413_v60 = vadd.s32 896, %v7697_v34 }
 0x19e   :  { %10530 = vst [vmem:[#allocation124_spill] sm:$0xff] %v7693_v4 }
 0x19f   :  { %v7699_v49 = vpop.f32.mrb[58].mxu0  ;;  %v7748_v22 = vmul.u32 2246822519, %v4413_v60 }
 0x1a0   :  { %10532 = vst [vmem:[#allocation126_spill] sm:$0xff] %v7699_v49  ;;  %v7703_v47 = vpop.f32.mrb[58].mxu1  ;;  %v7705_v54 = vpop.f32.mrb[59].mxu0 }
 0x1a1   :  { %10533 = vst [vmem:[#allocation127_spill] sm:$0xff] %v7703_v47  ;;  %10534 = vst [vmem:[#allocation128_spill] sm:$0xff] %v7705_v54  ;;  %v7712_v26 = vpop.f32.mrb[59].mxu1  ;;  %v7729_v54 = vmul.u32 2246822519, %v4410_v11 }
 0x1a2   :  { %10535 = vst [vmem:[#allocation129_spill] sm:$0xff] %v7712_v26  ;;  %v7742_v47 = vmul.u32 2246822519, %v4412_v24  ;;  %v7746_v11 = vmul.u32 2246822519, %v4411_v5  ;;  %v4457_v24 = vadd.s32 %v7748_v22, %v7740_v39 }
 0x1a3   :  { %v7719_v49 = vpop.f32.mrb[60].mxu0  ;;  %v4454_v61 = vadd.s32 %v7729_v54, %v7740_v39 }
 0x1a4   :  { %10536 = vst [vmem:[#allocation130_spill] sm:$0xff] %v7719_v49  ;;  %v7725_v12 = vpop.f32.mrb[60].mxu1  ;;  %v7727_v29 = vpop.f32.mrb[61].mxu0  ;;  %v4455_v26 = vadd.s32 %v7746_v11, %v7740_v39 }
 0x1a5   :  { %10538 = vst [vmem:[#allocation131_spill] sm:$0xff] %v7725_v12  ;;  %10539 = vst [vmem:[#allocation132_spill] sm:$0xff] %v7727_v29  ;;  %v7735_v7 = vpop.f32.mrb[61].mxu1  ;;  %v4456_v12 = vadd.s32 %v7742_v47, %v7740_v39  ;;  %v4535_v20 = vadd.s32 %v7774_v6, %v4454_v61  ;;  %v4538_v61 = vadd.s32 %v7774_v6, %v4457_v24 }
 0x1a6   :  { %10542 = vst [vmem:[#allocation133_spill] sm:$0xff] %v7735_v7  ;;  %v4536_v0 = vadd.s32 %v7774_v6, %v4455_v26 }
 0x1a7   :  { %v7744_v49 = vpop.f32.mrb[62].mxu0  ;;  %v4537_v50 = vadd.s32 %v7774_v6, %v4456_v12  ;;  %v4618_v3 = vshrl.u32 %v4538_v61, 16 }
 0x1a8   :  { %10545 = vst [vmem:[#allocation135_spill] sm:$0xff] %v7744_v49  ;;  %v7752_v13 = vpop.f32.mrb[62].mxu1  ;;  %v7754_v29 = vpop.f32.mrb[63].mxu0  ;;  %v4402_v49 = vadd.s32 8, %v7716_v57  ;;  %v4616_v2 = vshrl.u32 %v4536_v0, 16 }
 0x1a9   :  { %10547 = vst [vmem:[#allocation136_spill] sm:$0xff] %v7752_v13  ;;  %10548 = vst [vmem:[#allocation137_spill] sm:$0xff] %v7754_v29  ;;  %v7762_v5 = vpop.f32.mrb[63].mxu1 }
 0x1aa   :  { %10551 = vst [vmem:[#allocation138_spill] sm:$0xff] %v7762_v5  ;;  %v7796_v5 = vmul.u32 2654435761, %v4402_v49 }
 0x1ab   :  { %v7769_v4 = vpop.f32.mrb[64].mxu0 }
 0x1ac   :  { %10553 = vst [vmem:[#allocation139_spill] sm:$0xff] %v7769_v4  ;;  %v7782_v60 = vpop.f32.mrb[64].mxu1  ;;  %v7784_v29 = vpop.f32.mrb[65].mxu0  ;;  %10562 = vst [vmem:[#allocation144_spill] sm:$0xff] %v7796_v5  ;;  %v4474_v9 = vadd.s32 %v7729_v54, %v7796_v5  ;;  %v4475_v1 = vadd.s32 %v7746_v11, %v7796_v5 }
 0x1ad   :  { %10556 = vst [vmem:[#allocation141_spill] sm:$0xff] %v7782_v60  ;;  %10557 = vst [vmem:[#allocation142_spill] sm:$0xff] %v7784_v29  ;;  %v7791_v8 = vpop.f32.mrb[65].mxu1  ;;  %v4615_v29 = vshrl.u32 %v4535_v20, 16  ;;  %v4617_v60 = vshrl.u32 %v4537_v50, 16 }
 0x1ae   :  { %10560 = vst [vmem:[#allocation143_spill] sm:$0xff] %v7791_v8  ;;  %v4555_v41 = vadd.s32 %v7774_v6, %v4474_v9  ;;  %v4698_v9 = vxor.u32 %v4618_v3, %v4538_v61 }
 0x1af   :  { %v7798_v4 = vpop.f32.mrb[66].mxu0  ;;  %v4695_v8 = vxor.u32 %v4615_v29, %v4535_v20  ;;  %v4697_v59 = vxor.u32 %v4617_v60, %v4537_v50  ;;  %v4696_v29 = vxor.u32 %v4616_v2, %v4536_v0  ;;  %v4556_v20 = vadd.s32 %v7774_v6, %v4475_v1 }
 0x1b0   :  { %10563 = vst [vmem:[#allocation145_spill] sm:$0xff] %v7798_v4  ;;  %v7804_v13 = vpop.f32.mrb[66].mxu1  ;;  %v7806_v18 = vpop.f32.mrb[67].mxu0  ;;  %v4476_v4 = vadd.s32 %v7742_v47, %v7796_v5  ;;  %v4635_v32 = vshrl.u32 %v4555_v41, 16  ;;  %v4477_v1 = vadd.s32 %v7748_v22, %v7796_v5  ;;  %v4407_v2 = vadd.s32 128, %v7697_v34 }
 0x1b1   :  { %10565 = vst [vmem:[#allocation146_spill] sm:$0xff] %v7804_v13  ;;  %10566 = vst [vmem:[#allocation147_spill] sm:$0xff] %v7806_v18  ;;  %v7814_v26 = vpop.f32.mrb[67].mxu1  ;;  %v4775_v49 = vmul.u32 2146121005, %v4695_v8  ;;  %v4636_v50 = vshrl.u32 %v4556_v20, 16 }
 0x1b2   :  { %10569 = vst [vmem:[#allocation148_spill] sm:$0xff] %v7814_v26  ;;  %v4557_v13 = vadd.s32 %v7774_v6, %v4476_v4  ;;  %v4777_v61 = vmul.u32 2146121005, %v4697_v59  ;;  %v4776_v4 = vmul.u32 2146121005, %v4696_v29  ;;  %v4715_v26 = vxor.u32 %v4635_v32, %v4555_v41 }
 0x1b3   :  { %v7820_v7 = vpop.f32.mrb[68].mxu0  ;;  %v4558_v3 = vadd.s32 %v7774_v6, %v4477_v1  ;;  %v7884_v41 = vmul.u32 2246822519, %v7697_v34  ;;  %v7905_v40 = vmul.u32 2246822519, %v4407_v2 }
 0x1b4   :  { %10571 = vst [vmem:[#allocation149_spill] sm:$0xff] %v7820_v7  ;;  %v7826_v42 = vpop.f32.mrb[68].mxu1  ;;  %v7828_v18 = vpop.f32.mrb[69].mxu0  ;;  %v4403_v7 = vadd.s32 16, %v7716_v57  ;;  %v4637_v24 = vshrl.u32 %v4557_v13, 16  ;;  %v4857_v53 = vshrl.u32 %v4777_v61, 15 }
 0x1b5   :  { %10573 = vst [vmem:[#allocation150_spill] sm:$0xff] %v7826_v42  ;;  %10574 = vst [vmem:[#allocation151_spill] sm:$0xff] %v7828_v18  ;;  %v7835_v55 = vpop.f32.mrb[69].mxu1  ;;  %v4855_v42 = vshrl.u32 %v4775_v49, 15  ;;  %v4856_v0 = vshrl.u32 %v4776_v4, 15  ;;  %v4638_v48 = vshrl.u32 %v4558_v3, 16 }
 0x1b6   :  { %10577 = vst [vmem:[#allocation152_spill] sm:$0xff] %v7835_v55  ;;  %v7861_v8 = vmul.u32 2654435761, %v4403_v7  ;;  %v4717_v32 = vxor.u32 %v4637_v24, %v4557_v13  ;;  %v4716_v7 = vxor.u32 %v4636_v50, %v4556_v20  ;;  %v4795_v13 = vmul.u32 2146121005, %v4715_v26 }
 0x1b7   :  { %v7841_v12 = vpop.f32.mrb[70].mxu0  ;;  %v7896_v55 = vxor.u32 %v4855_v42, %v4775_v49  ;;  %v7909_v1 = vxor.u32 %v4857_v53, %v4777_v61 }
 0x1b8   :  { %10579 = vst [vmem:[#allocation153_spill] sm:$0xff] %v7841_v12  ;;  %v7846_v63 = vpop.f32.mrb[70].mxu1  ;;  %v7848_v18 = vpop.f32.mrb[71].mxu0  ;;  %10586 = vst [vmem:[#allocation157_spill] sm:$0xff] %v7861_v8  ;;  %v4494_v59 = vadd.s32 %v7729_v54, %v7861_v8  ;;  %v4496_v29 = vadd.s32 %v7742_v47, %v7861_v8  ;;  %v4797_v42 = vmul.u32 2146121005, %v4717_v32 }
 0x1b9   :  { %10580 = vst [vmem:[#allocation154_spill] sm:$0xff] %v7846_v63  ;;  %10581 = vst [vmem:[#allocation155_spill] sm:$0xff] %v7848_v18  ;;  %v7854_v62 = vpop.f32.mrb[71].mxu1  ;;  %v4778_v63 = vmul.u32 2146121005, %v4698_v9  ;;  %v4404_v18 = vadd.s32 24, %v7716_v57 }
 0x1ba   :  { %10584 = vst [vmem:[#allocation156_spill] sm:$0xff] %v7854_v62  ;;  %v4575_v24 = vadd.s32 %v7774_v6, %v4494_v59  ;;  %v7915_v59 = vxor.u32 %v4856_v0, %v4776_v4  ;;  %v4796_v50 = vmul.u32 2146121005, %v4716_v7  ;;  %v5015_v53 = vmul.u32 2221713035, %v7896_v55 }
 0x1bb   :  { %v7863_v12 = vpop.f32.mrb[72].mxu0  ;;  %v7911_v49 = vmul.u32 2654435761, %v4404_v18  ;;  %v4875_v18 = vshrl.u32 %v4795_v13, 15  ;;  %v4718_v7 = vxor.u32 %v4638_v48, %v4558_v3  ;;  %v5017_v2 = vmul.u32 2221713035, %v7909_v1 }
 0x1bc   :  { %10587 = vst [vmem:[#allocation158_spill] sm:$0xff] %v7863_v12  ;;  %v7867_v60 = vpop.f32.mrb[72].mxu1  ;;  %v7869_v35 = vpop.f32.mrb[73].mxu0  ;;  %v4655_v61 = vshrl.u32 %v4575_v24, 16  ;;  %v4877_v55 = vshrl.u32 %v4797_v42, 15 }
 0x1bd   :  { %10589 = vst [vmem:[#allocation159_spill] sm:$0xff] %v7867_v60  ;;  %10590 = vst [vmem:[#allocation160_spill] sm:$0xff] %v7869_v35  ;;  %v7877_v9 = vpop.f32.mrb[73].mxu1  ;;  %v4858_v60 = vshrl.u32 %v4778_v63, 15  ;;  %v5016_v4 = vmul.u32 2221713035, %v7915_v59  ;;  %v7950_v1 = vxor.u32 %v4875_v18, %v4795_v13  ;;  %v4514_v13 = vadd.s32 %v7729_v54, %v7911_v49 }
 0x1be   :  { %10593 = vst [vmem:[#allocation161_spill] sm:$0xff] %v7877_v9  ;;  %10603 = vst [vmem:[#allocation166_spill] sm:$0xff] %v7911_v49  ;;  %v4798_v32 = vmul.u32 2146121005, %v4718_v7  ;;  %v4957_v37 = vxor.u32 %v4877_v55, %v4797_v42  ;;  %v5095_v18 = vshrl.u32 %v5015_v53, 16  ;;  %v7968_v59 = vadd.s32 %v7884_v41, %v7740_v39 }
 0x1bf   :  { %v7886_v44 = vpop.f32.mrb[74].mxu0  ;;  %v7917_v12 = vxor.u32 %v4858_v60, %v4778_v63  ;;  %v4876_v60 = vshrl.u32 %v4796_v50, 15  ;;  %v5096_v42 = vshrl.u32 %v5016_v4, 16  ;;  %v4595_v33 = vadd.s32 %v7774_v6, %v4514_v13 }
 0x1c0   :  { %10595 = vst [vmem:[#allocation162_spill] sm:$0xff] %v7886_v44  ;;  %v7892_v57 = vpop.f32.mrb[74].mxu1  ;;  %v7894_v62 = vpop.f32.mrb[75].mxu0  ;;  %v5037_v45 = vmul.u32 2221713035, %v4957_v37 }
 0x1c1   :  { %10597 = vst [vmem:[#allocation163_spill] sm:$0xff] %v7892_v57  ;;  %10598 = vst [vmem:[#allocation164_spill] sm:$0xff] %v7894_v62  ;;  %v7903_v46 = vpop.f32.mrb[75].mxu1  ;;  %v4577_v62 = vadd.s32 %v7774_v6, %v4496_v29  ;;  %v4495_v29 = vadd.s32 %v7746_v11, %v7861_v8  ;;  %v7996_v31 = vxor.u32 %v5096_v42, %v5016_v4  ;;  %v4675_v23 = vshrl.u32 %v4595_v33, 16 }
 0x1c2   :  { %10601 = vst [vmem:[#allocation165_spill] sm:$0xff] %v7903_v46  ;;  %v4497_v46 = vadd.s32 %v7748_v22, %v7861_v8 }
 0x1c3   :  { %v7913_v26 = vpop.f32.mrb[76].mxu0  ;;  %v4576_v48 = vadd.s32 %v7774_v6, %v4495_v29  ;;  %10618 = vst [vmem:[#allocation177_spill] sm:$0xff] %v7996_v31 }
 0x1c4   :  { %10604 = vst [vmem:[#allocation167_spill] sm:$0xff] %v7913_v26  ;;  %v7922_v57 = vpop.f32.mrb[76].mxu1  ;;  %v7924_v44 = vpop.f32.mrb[77].mxu0  ;;  %v5018_v26 = vmul.u32 2221713035, %v7917_v12  ;;  %v4578_v12 = vadd.s32 %v7774_v6, %v4497_v46  ;;  %v4516_v46 = vadd.s32 %v7742_v47, %v7911_v49 }
 0x1c5   :  { %10606 = vst [vmem:[#allocation168_spill] sm:$0xff] %v7922_v57  ;;  %10607 = vst [vmem:[#allocation169_spill] sm:$0xff] %v7924_v44  ;;  %v7931_v0 = vpop.f32.mrb[77].mxu1  ;;  %v4657_v44 = vshrl.u32 %v4577_v62, 16 }
 0x1c6   :  { %10610 = vst [vmem:[#allocation170_spill] sm:$0xff] %v7931_v0  ;;  %v4735_v0 = vxor.u32 %v4655_v61, %v4575_v24  ;;  %v4956_v61 = vxor.u32 %v4876_v60, %v4796_v50  ;;  %v4878_v50 = vshrl.u32 %v4798_v32, 15  ;;  %v5098_v60 = vshrl.u32 %v5018_v26, 16 }
 0x1c7   :  { %v7940_v35 = vpop.f32.mrb[78].mxu0  ;;  %v4737_v20 = vxor.u32 %v4657_v44, %v4577_v62  ;;  %v4656_v62 = vshrl.u32 %v4576_v48, 16  ;;  %v7981_v44 = vadd.s32 %v7905_v40, %v7740_v39  ;;  %v4597_v13 = vadd.s32 %v7774_v6, %v4516_v46 }
 0x1c8   :  { %10612 = vst [vmem:[#allocation171_spill] sm:$0xff] %v7940_v35  ;;  %v7945_v3 = vpop.f32.mrb[78].mxu1  ;;  %v7947_v63 = vpop.f32.mrb[79].mxu0  ;;  %v5097_v35 = vshrl.u32 %v5017_v2, 16  ;;  %v4815_v55 = vmul.u32 2146121005, %v4735_v0  ;;  %v7986_v0 = vxor.u32 %v5095_v18, %v5015_v53  ;;  %v8001_v18 = vxor.u32 %v4878_v50, %v4798_v32 }
 0x1c9   :  { %10613 = vst [vmem:[#allocation172_spill] sm:$0xff] %v7945_v3  ;;  %10614 = vst [vmem:[#allocation173_spill] sm:$0xff] %v7947_v63  ;;  %v7956_v57 = vpop.f32.mrb[79].mxu1  ;;  %v4658_v63 = vshrl.u32 %v4578_v12, 16  ;;  %v5036_v47 = vmul.u32 2221713035, %v4956_v61 }
 0x1ca   :  { %10615 = vst [vmem:[#allocation174_spill] sm:$0xff] %v7956_v57  ;;  %v5035_v57 = vmul.u32 2221713035, %v7950_v1  ;;  %10616 = vst [vmem:[#allocation175_spill] sm:$0xff] %v7986_v0  ;;  %v4817_v52 = vmul.u32 2146121005, %v4737_v20  ;;  %v4515_v1 = vadd.s32 %v7746_v11, %v7911_v49  ;;  %v7994_v30 = vxor.u32 %v5097_v35, %v5017_v2 }
 0x1cb   :  { %v7964_v24 = vpop.f32.mrb[80].mxu0  ;;  %v4895_v37 = vshrl.u32 %v4815_v55, 15  ;;  %v8003_v20 = vxor.u32 %v4656_v62, %v4576_v48  ;;  %v4414_v11 = vadd.s32 1024, %v7697_v34  ;;  %v5117_v61 = vshrl.u32 %v5037_v45, 16 }
 0x1cc   :  { %v7970_v7 = vpop.f32.mrb[81].mxu0  ;;  %v7972_v29 = vpop.f32.mrb[80].mxu1  ;;  %10617 = vst [vmem:[#allocation176_spill] sm:$0xff] %v7994_v30  ;;  %v5115_v53 = vshrl.u32 %v5035_v57, 16  ;;  %v4738_v0 = vxor.u32 %v4658_v63, %v4578_v12  ;;  %v4416_v35 = vadd.s32 1280, %v7697_v34  ;;  %v5116_v4 = vshrl.u32 %v5036_v47, 16 }
 0x1cd   :  { %v7976_v54 = vpop.f32.mrb[81].mxu1  ;;  %v4897_v42 = vshrl.u32 %v4817_v52, 15  ;;  %v4596_v46 = vadd.s32 %v7774_v6, %v4515_v1  ;;  %v8010_v31 = vmul.u32 2246822519, %v4414_v11  ;;  %v8016_v48 = vxor.u32 %v5098_v60, %v5018_v26 }
 0x1ce   :  { %v8018_v50 = vxor.u32 %v4895_v37, %v4815_v55  ;;  %v4677_v63 = vshrl.u32 %v4597_v13, 16  ;;  %v4517_v12 = vadd.s32 %v7748_v22, %v7911_v49  ;;  %v5038_v1 = vmul.u32 2221713035, %v8001_v18 }
 0x1cf   :  { %v7984_v3 = vpop.f32.mrb[82].mxu0  ;;  %10623 = vst [vmem:[#allocation182_spill] sm:$0xff] %v8016_v48  ;;  %v4816_v11 = vmul.u32 2146121005, %v8003_v20  ;;  %v4818_v26 = vmul.u32 2146121005, %v4738_v0  ;;  %v4755_v55 = vxor.u32 %v4675_v23, %v4595_v33  ;;  %v8036_v22 = vxor.u32 %v5116_v4, %v5036_v47 }
 0x1d0   :  { %v7990_v9 = vpop.f32.mrb[83].mxu0  ;;  %v7992_v36 = vpop.f32.mrb[82].mxu1  ;;  %v8032_v60 = vmul.u32 2246822519, %v4416_v35  ;;  %v8038_v48 = vxor.u32 %v4897_v42, %v4817_v52  ;;  %v4598_v23 = vadd.s32 %v7774_v6, %v4517_v12  ;;  %v5118_v47 = vshrl.u32 %v5038_v1, 16 }
 0x1d1   :  { %v7999_v27 = vpop.f32.mrb[83].mxu1  ;;  %10628 = vst [vmem:[#allocation187_spill] sm:$0xff] %v8036_v22  ;;  %v4531_v35 = vadd.s32 %v7774_v6, %v7968_v59  ;;  %v4896_v42 = vshrl.u32 %v4816_v11, 15  ;;  %v4898_v22 = vshrl.u32 %v4818_v26, 15 }
 0x1d2   :  { %10619 = vst [vmem:[#allocation178_spill] sm:$0xff] %v7999_v27  ;;  %v4460_v33 = vadd.s32 %v8032_v60, %v7740_v39 }
 0x1d3   :  { %v8007_v2 = vpop.f32.mrb[84].mxu0 }
 0x1d4   :  { %10620 = vst [vmem:[#allocation179_spill] sm:$0xff] %v8007_v2  ;;  %v8012_v30 = vpop.f32.mrb[85].mxu0  ;;  %v8014_v32 = vpop.f32.mrb[84].mxu1  ;;  %v8024_v2 = vxor.u32 %v5115_v53, %v5035_v57  ;;  %v4676_v57 = vshrl.u32 %v4596_v46, 16  ;;  %v4415_v53 = vadd.s32 1152, %v7697_v34 }
 0x1d5   :  { %10621 = vst [vmem:[#allocation180_spill] sm:$0xff] %v8012_v30  ;;  %10622 = vst [vmem:[#allocation181_spill] sm:$0xff] %v8014_v32  ;;  %v8022_v62 = vpop.f32.mrb[85].mxu1  ;;  %v4458_v30 = vadd.s32 %v8010_v31, %v7740_v39  ;;  %v8030_v32 = vxor.u32 %v5117_v61, %v5037_v45  ;;  %v5055_v45 = vmul.u32 2221713035, %v8018_v50  ;;  %v4757_v61 = vxor.u32 %v4677_v63, %v4597_v13 }
 0x1d6   :  { %10624 = vst [vmem:[#allocation183_spill] sm:$0xff] %v8022_v62  ;;  %10625 = vst [vmem:[#allocation184_spill] sm:$0xff] %v8024_v2  ;;  %v8054_v4 = vmul.u32 2246822519, %v4415_v53  ;;  %v4541_v13 = vadd.s32 %v7774_v6, %v4460_v33  ;;  %v5057_v63 = vmul.u32 2221713035, %v8038_v48  ;;  %v4756_v12 = vxor.u32 %v4676_v57, %v4596_v46 }
 0x1d7   :  { %10626 = vst [vmem:[#allocation185_spill] sm:$0xff] %v8030_v32  ;;  %v8034_v37 = vpop.f32.mrb[86].mxu0  ;;  %v4539_v52 = vadd.s32 %v7774_v6, %v4458_v30  ;;  %v4835_v32 = vmul.u32 2146121005, %v4755_v55  ;;  %v4532_v30 = vadd.s32 %v7774_v6, %v7981_v44  ;;  %v5135_v53 = vshrl.u32 %v5055_v45, 16 }
 0x1d8   :  { %10627 = vst [vmem:[#allocation186_spill] sm:$0xff] %v8034_v37  ;;  %v8041_v18 = vpop.f32.mrb[87].mxu0  ;;  %v8043_v20 = vpop.f32.mrb[86].mxu1  ;;  %10632 = vst [vmem:[#allocation191_spill] sm:$0xff] %v8054_v4  ;;  %v4459_v2 = vadd.s32 %v8054_v4, %v7740_v39  ;;  %v4678_v55 = vshrl.u32 %v4598_v23, 16  ;;  %v4478_v33 = vadd.s32 %v8010_v31, %v7796_v5  ;;  %v4611_v46 = vshrl.u32 %v4531_v35, 16 }
 0x1d9   :  { %10629 = vst [vmem:[#allocation188_spill] sm:$0xff] %v8041_v18  ;;  %10630 = vst [vmem:[#allocation189_spill] sm:$0xff] %v8043_v20  ;;  %v8049_v0 = vpop.f32.mrb[87].mxu1  ;;  %v4837_v18 = vmul.u32 2146121005, %v4757_v61  ;;  %v4619_v48 = vshrl.u32 %v4539_v52, 16  ;;  %v4976_v37 = vxor.u32 %v4896_v42, %v4816_v11  ;;  %v8074_v44 = vxor.u32 %v4898_v22, %v4818_v26 }
 0x1da   :  { %10631 = vst [vmem:[#allocation190_spill] sm:$0xff] %v8049_v0  ;;  %v4540_v57 = vadd.s32 %v7774_v6, %v4459_v2  ;;  %v4417_v20 = vadd.s32 1408, %v7697_v34  ;;  %v4621_v62 = vshrl.u32 %v4541_v13, 16  ;;  %v8078_v61 = vxor.u32 %v5118_v47, %v5038_v1 }
 0x1db   :  { %v8057_v50 = vpop.f32.mrb[88].mxu0  ;;  %v4836_v28 = vmul.u32 2146121005, %v4756_v12  ;;  %v4612_v15 = vshrl.u32 %v4532_v30, 16  ;;  %v5137_v2 = vshrl.u32 %v5057_v63, 16  ;;  %v4917_v27 = vshrl.u32 %v4837_v18, 15 }
 0x1dc   :  { %10633 = vst [vmem:[#allocation192_spill] sm:$0xff] %v8057_v50  ;;  %v8064_v0 = vpop.f32.mrb[89].mxu0  ;;  %v8066_v59 = vpop.f32.mrb[88].mxu1  ;;  %10638 = vst [vmem:[#allocation197_spill] sm:$0xff] %v8078_v61  ;;  %v8080_v19 = vmul.u32 2246822519, %v4417_v20  ;;  %v4758_v43 = vxor.u32 %v4678_v55, %v4598_v23  ;;  %v4559_v11 = vadd.s32 %v7774_v6, %v4478_v33  ;;  %v4699_v22 = vxor.u32 %v4619_v48, %v4539_v52 }
 0x1dd   :  { %10634 = vst [vmem:[#allocation193_spill] sm:$0xff] %v8064_v0  ;;  %10635 = vst [vmem:[#allocation194_spill] sm:$0xff] %v8066_v59  ;;  %v8070_v50 = vpop.f32.mrb[89].mxu1  ;;  %v4915_v0 = vshrl.u32 %v4835_v32, 15  ;;  %v4691_v42 = vxor.u32 %v4611_v46, %v4531_v35  ;;  %v5056_v20 = vmul.u32 2221713035, %v4976_v37  ;;  %v4701_v61 = vxor.u32 %v4621_v62, %v4541_v13 }
 0x1de   :  { %10636 = vst [vmem:[#allocation195_spill] sm:$0xff] %v8070_v50  ;;  %v4461_v1 = vadd.s32 %v8080_v19, %v7740_v39  ;;  %v5058_v47 = vmul.u32 2221713035, %v8074_v44  ;;  %v4692_v55 = vxor.u32 %v4612_v15, %v4532_v30  ;;  %v4470_v52 = vadd.s32 %v7884_v41, %v7796_v5 }
 0x1df   :  { %v8076_v59 = vpop.f32.mrb[90].mxu0  ;;  %v8092_v12 = vxor.u32 %v4915_v0, %v4835_v32  ;;  %v8103_v48 = vxor.u32 %v5135_v53, %v5055_v45  ;;  %v4997_v37 = vxor.u32 %v4917_v27, %v4837_v18  ;;  %v4838_v46 = vmul.u32 2146121005, %v4758_v43 }
 0x1e0   :  { %10637 = vst [vmem:[#allocation196_spill] sm:$0xff] %v8076_v59  ;;  %v8082_v50 = vpop.f32.mrb[91].mxu0  ;;  %v8084_v21 = vpop.f32.mrb[90].mxu1  ;;  %v4620_v59 = vshrl.u32 %v4540_v57, 16  ;;  %v4542_v23 = vadd.s32 %v7774_v6, %v4461_v1  ;;  %v4639_v32 = vshrl.u32 %v4559_v11, 16  ;;  %v8107_v62 = vxor.u32 %v5137_v2, %v5057_v63 }
 0x1e1   :  { %10639 = vst [vmem:[#allocation198_spill] sm:$0xff] %v8082_v50  ;;  %10640 = vst [vmem:[#allocation199_spill] sm:$0xff] %v8084_v21  ;;  %v8087_v26 = vpop.f32.mrb[91].mxu1  ;;  %v4916_v21 = vshrl.u32 %v4836_v28, 15  ;;  %v4779_v13 = vmul.u32 2146121005, %v4699_v22  ;;  %v4551_v18 = vadd.s32 %v7774_v6, %v4470_v52 }
 0x1e2   :  { %10641 = vst [vmem:[#allocation200_spill] sm:$0xff] %v8087_v26  ;;  %10645 = vst [vmem:[#allocation204_spill] sm:$0xff] %v8103_v48  ;;  %v4771_v44 = vmul.u32 2146121005, %v4691_v42  ;;  %v4700_v1 = vxor.u32 %v4620_v59, %v4540_v57  ;;  %v5136_v15 = vshrl.u32 %v5056_v20, 16  ;;  %v5138_v2 = vshrl.u32 %v5058_v47, 16 }
 0x1e3   :  { %v8094_v50 = vpop.f32.mrb[92].mxu0  ;;  %10647 = vst [vmem:[#allocation206_spill] sm:$0xff] %v8107_v62  ;;  %v4781_v30 = vmul.u32 2146121005, %v4701_v61  ;;  %v5075_v45 = vmul.u32 2221713035, %v8092_v12  ;;  %v4996_v27 = vxor.u32 %v4916_v21, %v4836_v28  ;;  %v4719_v61 = vxor.u32 %v4639_v32, %v4559_v11 }
 0x1e4   :  { %10642 = vst [vmem:[#allocation201_spill] sm:$0xff] %v8094_v50  ;;  %v8099_v35 = vpop.f32.mrb[93].mxu0  ;;  %v8101_v33 = vpop.f32.mrb[92].mxu1  ;;  %v4622_v50 = vshrl.u32 %v4542_v23, 16  ;;  %v4772_v43 = vmul.u32 2146121005, %v4692_v55  ;;  %v4479_v12 = vadd.s32 %v8054_v4, %v7796_v5  ;;  %v8123_v21 = vxor.u32 %v5136_v15, %v5056_v20 }
 0x1e5   :  { %10643 = vst [vmem:[#allocation202_spill] sm:$0xff] %v8099_v35  ;;  %10644 = vst [vmem:[#allocation203_spill] sm:$0xff] %v8101_v33  ;;  %v8105_v0 = vpop.f32.mrb[93].mxu1  ;;  %v4480_v35 = vadd.s32 %v8032_v60, %v7796_v5  ;;  %v5077_v59 = vmul.u32 2221713035, %v4997_v37  ;;  %v4918_v57 = vshrl.u32 %v4838_v46, 15 }
 0x1e6   :  { %10646 = vst [vmem:[#allocation205_spill] sm:$0xff] %v8105_v0  ;;  %v4859_v42 = vshrl.u32 %v4779_v13, 15  ;;  %v4851_v62 = vshrl.u32 %v4771_v44, 15  ;;  %v4780_v0 = vmul.u32 2146121005, %v4700_v1  ;;  %10652 = vst [vmem:[#allocation211_spill] sm:$0xff] %v8123_v21  ;;  %v4702_v55 = vxor.u32 %v4622_v50, %v4542_v23 }
 0x1e7   :  { %v8111_v26 = vpop.f32.mrb[94].mxu0  ;;  %v4861_v28 = vshrl.u32 %v4781_v30, 15  ;;  %v4561_v52 = vadd.s32 %v7774_v6, %v4480_v35  ;;  %v5076_v37 = vmul.u32 2221713035, %v4996_v27  ;;  %v4631_v11 = vshrl.u32 %v4551_v18, 16 }
 0x1e8   :  { %10648 = vst [vmem:[#allocation207_spill] sm:$0xff] %v8111_v26  ;;  %v8115_v53 = vpop.f32.mrb[95].mxu0  ;;  %v8117_v63 = vpop.f32.mrb[94].mxu1  ;;  %v4852_v26 = vshrl.u32 %v4772_v43, 15  ;;  %v5157_v1 = vshrl.u32 %v5077_v59, 16  ;;  %v4998_v33 = vxor.u32 %v4918_v57, %v4838_v46  ;;  %v4560_v20 = vadd.s32 %v7774_v6, %v4479_v12 }
 0x1e9   :  { %10649 = vst [vmem:[#allocation208_spill] sm:$0xff] %v8115_v53  ;;  %10650 = vst [vmem:[#allocation209_spill] sm:$0xff] %v8117_v63  ;;  %v8119_v22 = vpop.f32.mrb[95].mxu1  ;;  %v5155_v63 = vshrl.u32 %v5075_v45, 16  ;;  %v4799_v48 = vmul.u32 2146121005, %v4719_v61  ;;  %v8135_v50 = vxor.u32 %v5138_v2, %v5058_v47  ;;  %v8137_v23 = vxor.u32 %v4859_v42, %v4779_v13 }
 0x1ea   :  { %10651 = vst [vmem:[#allocation210_spill] sm:$0xff] %v8119_v22  ;;  %v4931_v35 = vxor.u32 %v4851_v62, %v4771_v44  ;;  %v8139_v27 = vxor.u32 %v4861_v28, %v4781_v30  ;;  %v4782_v21 = vmul.u32 2146121005, %v4702_v55  ;;  %v4641_v17 = vshrl.u32 %v4561_v52, 16 }
 0x1eb   :  { %v8126_v53 = vpop.f32.mrb[96].mxu0  ;;  %v8145_v46 = vxor.u32 %v5155_v63, %v5075_v45  ;;  %v5156_v57 = vshrl.u32 %v5076_v37, 16  ;;  %v4932_v61 = vxor.u32 %v4852_v26, %v4772_v43  ;;  %v4711_v12 = vxor.u32 %v4631_v11, %v4551_v18 }
 0x1ec   :  { %10653 = vst [vmem:[#allocation212_spill] sm:$0xff] %v8126_v53  ;;  %v8128_v32 = vpop.f32.mrb[97].mxu0  ;;  %v8130_v22 = vpop.f32.mrb[96].mxu1  ;;  %v4860_v53 = vshrl.u32 %v4780_v0, 15  ;;  %v8151_v62 = vxor.u32 %v5157_v1, %v5077_v59  ;;  %v5078_v44 = vmul.u32 2221713035, %v4998_v33  ;;  %v4481_v45 = vadd.s32 %v8080_v19, %v7796_v5 }
 0x1ed   :  { %10654 = vst [vmem:[#allocation213_spill] sm:$0xff] %v8128_v32  ;;  %10655 = vst [vmem:[#allocation214_spill] sm:$0xff] %v8130_v22  ;;  %v8133_v15 = vpop.f32.mrb[97].mxu1  ;;  %v4471_v32 = vadd.s32 %v7905_v40, %v7796_v5  ;;  %v4879_v30 = vshrl.u32 %v4799_v48, 15  ;;  %v4640_v2 = vshrl.u32 %v4560_v20, 16  ;;  %v4862_v43 = vshrl.u32 %v4782_v21, 15 }
 0x1ee   :  { %10656 = vst [vmem:[#allocation215_spill] sm:$0xff] %v8133_v15  ;;  %10658 = vst [vmem:[#allocation217_spill] sm:$0xff] %v8145_v46  ;;  %v5019_v28 = vmul.u32 2221713035, %v8137_v23  ;;  %v5011_v55 = vmul.u32 2221713035, %v4931_v35  ;;  %v4721_v18 = vxor.u32 %v4641_v17, %v4561_v52  ;;  %v8162_v33 = vxor.u32 %v5156_v57, %v5076_v37 }
 0x1ef   :  { %v8143_v22 = vpop.f32.mrb[98].mxu0  ;;  %10661 = vst [vmem:[#allocation220_spill] sm:$0xff] %v8151_v62  ;;  %v5021_v26 = vmul.u32 2221713035, %v8139_v27  ;;  %v4552_v63 = vadd.s32 %v7774_v6, %v4471_v32  ;;  %v5012_v11 = vmul.u32 2221713035, %v4932_v61  ;;  %v4498_v23 = vadd.s32 %v8010_v31, %v7861_v8 }
 0x1f0   :  { %10657 = vst [vmem:[#allocation216_spill] sm:$0xff] %v8143_v22  ;;  %v8147_v47 = vpop.f32.mrb[99].mxu0  ;;  %v8149_v13 = vpop.f32.mrb[98].mxu1  ;;  %v4940_v22 = vxor.u32 %v4860_v53, %v4780_v0  ;;  %10664 = vst [vmem:[#allocation223_spill] sm:$0xff] %v8162_v33  ;;  %v4791_v1 = vmul.u32 2146121005, %v4711_v12  ;;  %v4959_v5 = vxor.u32 %v4879_v30, %v4799_v48  ;;  %v4720_v27 = vxor.u32 %v4640_v2, %v4560_v20 }
 0x1f1   :  { %10659 = vst [vmem:[#allocation218_spill] sm:$0xff] %v8147_v47  ;;  %10660 = vst [vmem:[#allocation219_spill] sm:$0xff] %v8149_v13  ;;  %v8153_v42 = vpop.f32.mrb[99].mxu1  ;;  %v5158_v53 = vshrl.u32 %v5078_v44, 16  ;;  %v4490_v17 = vadd.s32 %v7884_v41, %v7861_v8  ;;  %v5099_v32 = vshrl.u32 %v5019_v28, 16  ;;  %v5091_v37 = vshrl.u32 %v5011_v55, 16 }
 0x1f2   :  { %10662 = vst [vmem:[#allocation221_spill] sm:$0xff] %v8153_v42  ;;  %v5020_v57 = vmul.u32 2221713035, %v4940_v22  ;;  %v4562_v61 = vadd.s32 %v7774_v6, %v4481_v45  ;;  %v4942_v12 = vxor.u32 %v4862_v43, %v4782_v21  ;;  %v4632_v42 = vshrl.u32 %v4552_v63, 16 }
 0x1f3   :  { %v8160_v59 = vpop.f32.mrb[100].mxu0  ;;  %v5101_v48 = vshrl.u32 %v5021_v26, 16  ;;  %v5092_v20 = vshrl.u32 %v5012_v11, 16  ;;  %v4871_v30 = vshrl.u32 %v4791_v1, 15  ;;  %v4579_v2 = vadd.s32 %v7774_v6, %v4498_v23 }
 0x1f4   :  { %10663 = vst [vmem:[#allocation222_spill] sm:$0xff] %v8160_v59  ;;  %v8166_v35 = vpop.f32.mrb[101].mxu0  ;;  %v8168_v0 = vpop.f32.mrb[100].mxu1  ;;  %v4801_v59 = vmul.u32 2146121005, %v4721_v18  ;;  %v8184_v22 = vxor.u32 %v5158_v53, %v5078_v44  ;;  %v4571_v43 = vadd.s32 %v7774_v6, %v4490_v17  ;;  %v8189_v13 = vxor.u32 %v5091_v37, %v5011_v55 }
 0x1f5   :  { %10665 = vst [vmem:[#allocation224_spill] sm:$0xff] %v8166_v35  ;;  %10666 = vst [vmem:[#allocation225_spill] sm:$0xff] %v8168_v0  ;;  %v8172_v52 = vpop.f32.mrb[101].mxu1  ;;  %v4500_v35 = vadd.s32 %v8032_v60, %v7861_v8  ;;  %v5039_v45 = vmul.u32 2221713035, %v4959_v5  ;;  %v4642_v33 = vshrl.u32 %v4562_v61, 16  ;;  %v8192_v62 = vxor.u32 %v5099_v32, %v5019_v28 }
 0x1f6   :  { %10667 = vst [vmem:[#allocation226_spill] sm:$0xff] %v8172_v52  ;;  %10671 = vst [vmem:[#allocation230_spill] sm:$0xff] %v8184_v22  ;;  %v4800_v21 = vmul.u32 2146121005, %v4720_v27  ;;  %v5022_v23 = vmul.u32 2221713035, %v4942_v12  ;;  %v4712_v46 = vxor.u32 %v4632_v42, %v4552_v63  ;;  %v8196_v44 = vxor.u32 %v5101_v48, %v5021_v26 }
 0x1f7   :  { %v8177_v0 = vpop.f32.mrb[102].mxu0  ;;  %v4581_v15 = vadd.s32 %v7774_v6, %v4500_v35  ;;  %v8198_v5 = vxor.u32 %v5092_v20, %v5012_v11  ;;  %v8200_v53 = vxor.u32 %v4871_v30, %v4791_v1  ;;  %v4659_v27 = vshrl.u32 %v4579_v2, 16 }
 0x1f8   :  { %10668 = vst [vmem:[#allocation227_spill] sm:$0xff] %v8177_v0  ;;  %v8180_v47 = vpop.f32.mrb[103].mxu0  ;;  %v8182_v52 = vpop.f32.mrb[102].mxu1  ;;  %v5100_v0 = vshrl.u32 %v5020_v57, 16  ;;  %v5119_v37 = vshrl.u32 %v5039_v45, 16  ;;  %v4880_v35 = vshrl.u32 %v4800_v21, 15  ;;  %v4499_v32 = vadd.s32 %v8054_v4, %v7861_v8 }
 0x1f9   :  { %10669 = vst [vmem:[#allocation228_spill] sm:$0xff] %v8180_v47  ;;  %10670 = vst [vmem:[#allocation229_spill] sm:$0xff] %v8182_v52  ;;  %v8187_v18 = vpop.f32.mrb[103].mxu1  ;;  %v4881_v47 = vshrl.u32 %v4801_v59, 15  ;;  %v4651_v28 = vshrl.u32 %v4571_v43, 16  ;;  %v4722_v26 = vxor.u32 %v4642_v33, %v4562_v61  ;;  %v4661_v11 = vshrl.u32 %v4581_v15, 16 }
 0x1fa   :  { %10672 = vst [vmem:[#allocation231_spill] sm:$0xff] %v8187_v18  ;;  %v8210_v63 = vxor.u32 %v5100_v0, %v5020_v57  ;;  %v4491_v1 = vadd.s32 %v7905_v40, %v7861_v8  ;;  %v5102_v12 = vshrl.u32 %v5022_v23, 16  ;;  %v4792_v20 = vmul.u32 2146121005, %v4712_v46 }
 0x1fb   :  { %v8194_v52 = vpop.f32.mrb[104].mxu0  ;;  %v8214_v48 = vxor.u32 %v4881_v47, %v4801_v59  ;;  %v4580_v30 = vadd.s32 %v7774_v6, %v4499_v32  ;;  %v4739_v4 = vxor.u32 %v4659_v27, %v4579_v2  ;;  %v4501_v0 = vadd.s32 %v8080_v19, %v7861_v8 }
 0x1fc   :  { %10673 = vst [vmem:[#allocation232_spill] sm:$0xff] %v8194_v52  ;;  %v8202_v55 = vpop.f32.mrb[105].mxu0  ;;  %v8204_v17 = vpop.f32.mrb[104].mxu1  ;;  %v4572_v33 = vadd.s32 %v7774_v6, %v4491_v1  ;;  %v8229_v47 = vxor.u32 %v4880_v35, %v4800_v21  ;;  %v4731_v46 = vxor.u32 %v4651_v28, %v4571_v43  ;;  %v8234_v8 = vxor.u32 %v5102_v12, %v5022_v23 }
 0x1fd   :  { %10674 = vst [vmem:[#allocation233_spill] sm:$0xff] %v8202_v55  ;;  %10675 = vst [vmem:[#allocation234_spill] sm:$0xff] %v8204_v17  ;;  %v8208_v42 = vpop.f32.mrb[105].mxu1  ;;  %v4660_v59 = vshrl.u32 %v4580_v30, 16  ;;  %v4741_v17 = vxor.u32 %v4661_v11, %v4581_v15  ;;  %v4582_v2 = vadd.s32 %v7774_v6, %v4501_v0  ;;  %v4819_v43 = vmul.u32 2146121005, %v4739_v4 }
 0x1fe   :  { %10676 = vst [vmem:[#allocation235_spill] sm:$0xff] %v8208_v42  ;;  %v8227_v42 = vxor.u32 %v5119_v37, %v5039_v45  ;;  %v4652_v27 = vshrl.u32 %v4572_v33, 16  ;;  %v10683_v45 = vmul.u32 2221713035, %v8200_v53  ;;  %v4518_v11 = vadd.s32 %v8010_v31, %v7911_v49 }
 0x1ff   :  { %v8217_v55 = vpop.f32.mrb[106].mxu0  ;;  %v4740_v52 = vxor.u32 %v4660_v59, %v4580_v30  ;;  %v4662_v37 = vshrl.u32 %v4582_v2, 16  ;;  %v4510_v12 = vadd.s32 %v7884_v41, %v7911_v49  ;;  %v4821_v59 = vmul.u32 2146121005, %v4741_v17 }
 0x200   :  { %10677 = vst [vmem:[#allocation236_spill] sm:$0xff] %v8217_v55  ;;  %v8223_v57 = vpop.f32.mrb[107].mxu0  ;;  %v8225_v61 = vpop.f32.mrb[106].mxu1  ;;  %10680 = vst [vmem:[#allocation239_spill] sm:$0xff] %v8227_v42  ;;  %v4802_v55 = vmul.u32 2146121005, %v4722_v26  ;;  %v4732_v35 = vxor.u32 %v4652_v27, %v4572_v33  ;;  %v4599_v1 = vadd.s32 %v7774_v6, %v4518_v11 }
 0x201   :  { %10678 = vst [vmem:[#allocation237_spill] sm:$0xff] %v8223_v57  ;;  %10679 = vst [vmem:[#allocation238_spill] sm:$0xff] %v8225_v61  ;;  %v8231_v32 = vpop.f32.mrb[107].mxu1  ;;  %v4872_v57 = vshrl.u32 %v4792_v20, 15  ;;  %v8241_v21 = vshrl.u32 %v10683_v45, 16  ;;  %v4742_v45 = vxor.u32 %v4662_v37, %v4582_v2  ;;  %v4899_v41 = vshrl.u32 %v4819_v43, 15 }
 0x202   :  { %10681 = vst [vmem:[#allocation240_spill] sm:$0xff] %v8231_v32  ;;  %v4811_v26 = vmul.u32 2146121005, %v4731_v46  ;;  %v4882_v0 = vshrl.u32 %v4802_v55, 15  ;;  %v4820_v4 = vmul.u32 2146121005, %v4740_v52  ;;  %v4520_v46 = vadd.s32 %v8032_v60, %v7911_v49 }
 0x203   :  { %v8237_v61 = vpop.f32.mrb[108].mxu0  ;;  %v8254_v33 = vxor.u32 %v4872_v57, %v4792_v20  ;;  %v4812_v27 = vmul.u32 2146121005, %v4732_v35  ;;  %v10688_v31 = vmul.u32 2221713035, %v8214_v48  ;;  %v4591_v17 = vadd.s32 %v7774_v6, %v4510_v12 }
 0x204   :  { %10682 = vst [vmem:[#allocation241_spill] sm:$0xff] %v8237_v61  ;;  %v8243_v28 = vpop.f32.mrb[109].mxu0  ;;  %v8245_v15 = vpop.f32.mrb[108].mxu1  ;;  %v10691_v57 = vmul.u32 2221713035, %v8229_v47  ;;  %v4891_v37 = vshrl.u32 %v4811_v26, 15  ;;  %v4601_v35 = vadd.s32 %v7774_v6, %v4520_v46  ;;  %v4511_v46 = vadd.s32 %v7905_v40, %v7911_v49 }
 0x205   :  { %10684 = vst [vmem:[#allocation242_spill] sm:$0xff] %v8243_v28  ;;  %10685 = vst [vmem:[#allocation243_spill] sm:$0xff] %v8245_v15  ;;  %v8252_v30 = vpop.f32.mrb[109].mxu1  ;;  %v8263_v28 = vshrl.u32 %v10688_v31, 16  ;;  %v4679_v60 = vshrl.u32 %v4599_v1, 16  ;;  %v8277_v31 = vxor.u32 %v4882_v0, %v4802_v55  ;;  %v4671_v15 = vshrl.u32 %v4591_v17, 16 }
 0x206   :  { %10686 = vst [vmem:[#allocation244_spill] sm:$0xff] %v8252_v30  ;;  %v4822_v30 = vmul.u32 2146121005, %v4742_v45  ;;  %v8272_v2 = vshrl.u32 %v10691_v57, 16  ;;  %v4900_v45 = vshrl.u32 %v4820_v4, 15  ;;  %v8282_v57 = vxor.u32 %v4899_v41, %v4819_v43 }
 0x207   :  { %v8259_v23 = vpop.f32.mrb[110].mxu0  ;;  %v4759_v61 = vxor.u32 %v4679_v60, %v4599_v1  ;;  %v4751_v22 = vxor.u32 %v4671_v15, %v4591_v17  ;;  %v8290_v0 = vxor.u32 %v4891_v37, %v4811_v26  ;;  %v4521_v1 = vadd.s32 %v8080_v19, %v7911_v49  ;;  %v8383_v49 = vpop.permute.xlu0 %4219 }
 0x208   :  { %10687 = vst [vmem:[#allocation245_spill] sm:$0xff] %v8259_v23  ;;  %v8266_v52 = vpop.f32.mrb[111].mxu0  ;;  %v8268_v20 = vpop.f32.mrb[110].mxu1  ;;  %v4901_v23 = vshrl.u32 %v4821_v59, 15  ;;  %v4902_v18 = vshrl.u32 %v4822_v30, 15  ;;  %v8298_v41 = vxor.u32 %v4900_v45, %v4820_v4  ;;  %v4592_v40 = vadd.s32 %v7774_v6, %v4511_v46  ;;  %10718 = vst [vmem:[#allocation269_spill] sm:$0xff] %v8383_v49 }
 0x209   :  { %10689 = vst [vmem:[#allocation246_spill] sm:$0xff] %v8266_v52  ;;  %10690 = vst [vmem:[#allocation247_spill] sm:$0xff] %v8268_v20  ;;  %v8275_v11 = vpop.f32.mrb[111].mxu1  ;;  %v4892_v52 = vshrl.u32 %v4812_v27, 15  ;;  %v4681_v20 = vshrl.u32 %v4601_v35, 16  ;;  %v4602_v26 = vadd.s32 %v7774_v6, %v4521_v1  ;;  %vm5251_vm1 = vcmp.lt.u32.totalorder %v8189_v13, 2147483648 }
 0x20a   :  { %10692 = vst [vmem:[#allocation248_spill] sm:$0xff] %v8275_v11  ;;  %v4839_v42 = vmul.u32 2146121005, %v4759_v61  ;;  %v8296_v43 = vxor.u32 %v4901_v23, %v4821_v59  ;;  %v4831_v15 = vmul.u32 2146121005, %v4751_v22  ;;  %v8307_v19 = vxor.u32 %v4902_v18, %v4822_v30  ;;  %v10752_v13 = vld [vmem:[#allocation21_spill] sm:$0xff] }
 0x20b   :  { %v8280_v32 = vpop.f32.mrb[112].mxu0  ;;  %v4761_v12 = vxor.u32 %v4681_v20, %v4601_v35  ;;  %v8301_v17 = vxor.u32 %v4892_v52, %v4812_v27  ;;  %v5042_v20 = vmul.u32 2221713035, %v8277_v31  ;;  %v4672_v23 = vshrl.u32 %v4592_v40, 16 }
 0x20c   :  { %10693 = vst [vmem:[#allocation249_spill] sm:$0xff] %v8280_v32  ;;  %v8286_v11 = vpop.f32.mrb[113].mxu0  ;;  %v8288_v55 = vpop.f32.mrb[112].mxu1  ;;  %v4911_v37 = vshrl.u32 %v4831_v15, 15  ;;  %v5059_v22 = vmul.u32 2221713035, %v8282_v57 }
 0x20d   :  { %10694 = vst [vmem:[#allocation250_spill] sm:$0xff] %v8286_v11  ;;  %10695 = vst [vmem:[#allocation251_spill] sm:$0xff] %v8288_v55  ;;  %v8294_v60 = vpop.f32.mrb[113].mxu1  ;;  %v4919_v11 = vshrl.u32 %v4839_v42, 15  ;;  %v4841_v55 = vmul.u32 2146121005, %v4761_v12  ;;  %v4752_v30 = vxor.u32 %v4672_v23, %v4592_v40 }
 0x20e   :  { %10696 = vst [vmem:[#allocation252_spill] sm:$0xff] %v8294_v60  ;;  %v4682_v35 = vshrl.u32 %v4602_v26, 16  ;;  %v5051_v12 = vmul.u32 2221713035, %v8290_v0  ;;  %v5061_v31 = vmul.u32 2221713035, %v8296_v43  ;;  %v8320_v18 = vxor.u32 %v4911_v37, %v4831_v15 }
 0x20f   :  { %v8304_v61 = vpop.f32.mrb[114].mxu0  ;;  %v8314_v27 = vxor.u32 %v4919_v11, %v4839_v42  ;;  %v4921_v52 = vshrl.u32 %v4841_v55, 15  ;;  %v5060_v46 = vmul.u32 2221713035, %v8298_v41  ;;  %v5052_v1 = vmul.u32 2221713035, %v8301_v17 }
 0x210   :  { %10697 = vst [vmem:[#allocation253_spill] sm:$0xff] %v8304_v61  ;;  %v8309_v59 = vpop.f32.mrb[115].mxu0  ;;  %v8311_v4 = vpop.f32.mrb[114].mxu1  ;;  %v10702_v11 = vmul.u32 2221713035, %v8200_v53  ;;  %vm5252_vm2 = vcmp.lt.u32.totalorder %v8198_v5, 2147483648 }
 0x211   :  { %10698 = vst [vmem:[#allocation254_spill] sm:$0xff] %v8309_v59  ;;  %10699 = vst [vmem:[#allocation255_spill] sm:$0xff] %v8311_v4  ;;  %v8316_v45 = vpop.f32.mrb[115].mxu1  ;;  %v5001_v59 = vxor.u32 %v4921_v52, %v4841_v55  ;;  %v8324_v4 = vxor.u32 %v4682_v35, %v4602_v26  ;;  %v10703_v0 = vmul.u32 2221713035, %v8254_v33  ;;  %v5122_v26 = vshrl.u32 %v5042_v20, 16 }
 0x212   :  { %10700 = vst [vmem:[#allocation256_spill] sm:$0xff] %v8316_v45  ;;  %v8331_v57 = vxor.u32 %v8241_v21, %v10702_v11  ;;  %v5062_v15 = vmul.u32 2221713035, %v8307_v19  ;;  %v4832_v40 = vmul.u32 2146121005, %v4752_v30  ;;  %v4408_v21 = vadd.s32 256, %v7697_v34 }
 0x213   :  { %v8326_v42 = vpop.f32.mrb[116].mxu0  ;;  %v5112_v43 = vshrl.u32 %v10703_v0, 16  ;;  %v10706_v55 = vmul.u32 2221713035, %v8214_v48  ;;  %v5079_v53 = vmul.u32 2221713035, %v8314_v27 }
 0x214   :  { %10701 = vst [vmem:[#allocation257_spill] sm:$0xff] %v8326_v42  ;;  %v8336_v37 = vpop.f32.mrb[117].mxu0  ;;  %v8338_v41 = vpop.f32.mrb[116].mxu1  ;;  %v10708_v52 = vmul.u32 2221713035, %v8229_v47  ;;  %v5139_v35 = vshrl.u32 %v5059_v22, 16 }
 0x215   :  { %10704 = vst [vmem:[#allocation258_spill] sm:$0xff] %v8336_v37  ;;  %10705 = vst [vmem:[#allocation259_spill] sm:$0xff] %v8338_v41  ;;  %v8343_v17 = vxor.u32 %v8263_v28, %v10706_v55  ;;  %v8347_v23 = vpop.f32.mrb[117].mxu1  ;;  %v5071_v30 = vmul.u32 2221713035, %v8320_v18  ;;  %v5131_v48 = vshrl.u32 %v5051_v12, 16 }
 0x216   :  { %10707 = vst [vmem:[#allocation260_spill] sm:$0xff] %v8347_v23  ;;  %v8352_v19 = vxor.u32 %v8272_v2, %v10708_v52  ;;  %v5081_v11 = vmul.u32 2221713035, %v5001_v59  ;;  %v5141_v0 = vshrl.u32 %v5061_v31, 16  ;;  %v4842_v28 = vmul.u32 2146121005, %v8324_v4 }
 0x217   :  { %v4912_v55 = vshrl.u32 %v4832_v40, 15  ;;  %v8356_v37 = vpop.f32.mrb[118].mxu0  ;;  %v5140_v27 = vshrl.u32 %v5060_v46, 16  ;;  %v5132_v41 = vshrl.u32 %v5052_v1, 16  ;;  %v4418_v23 = vadd.s32 1536, %v7697_v34 }
 0x218   :  { %10709 = vst [vmem:[#allocation261_spill] sm:$0xff] %v8356_v37  ;;  %v8359_v42 = vmul.u32 2246822519, %v4408_v21  ;;  %v8361_v47 = vpop.f32.mrb[119].mxu0  ;;  %v8363_v2 = vpop.f32.mrb[118].mxu1  ;;  %v5142_v52 = vshrl.u32 %v5062_v15, 16  ;;  %v8373_v37 = vxor.u32 %v5122_v26, %v5042_v20  ;;  %v8375_v21 = vxor.u32 %v5139_v35, %v5059_v22 }
 0x219   :  { %10711 = vst [vmem:[#allocation263_spill] sm:$0xff] %v8361_v47  ;;  %10712 = vst [vmem:[#allocation264_spill] sm:$0xff] %v8363_v2  ;;  %v10713_v18 = vmul.u32 2221713035, %v8254_v33  ;;  %v5159_v45 = vshrl.u32 %v5079_v53, 16  ;;  %v4420_v4 = vadd.s32 1792, %v7697_v34  ;;  %v8377_v32 = vxor.u32 %v5131_v48, %v5051_v12 }
 0x21a   :  { %10710 = vst [vmem:[#allocation262_spill] sm:$0xff] %v8359_v42  ;;  %v8370_v61 = vpop.f32.mrb[119].mxu1  ;;  %10715 = vst [vmem:[#allocation266_spill] sm:$0xff] %v8375_v21  ;;  %v5151_v60 = vshrl.u32 %v5071_v30, 16  ;;  %v5161_v47 = vshrl.u32 %v5081_v11, 16  ;;  %v8379_v2 = vxor.u32 %v5141_v0, %v5061_v31  ;;  %v4922_v33 = vshrl.u32 %v4842_v28, 15 }
 0x21b   :  { %v8367_v59 = vxor.u32 %v5112_v43, %v10713_v18  ;;  %10714 = vst [vmem:[#allocation265_spill] sm:$0xff] %v8370_v61  ;;  %10716 = vst [vmem:[#allocation267_spill] sm:$0xff] %v8377_v32  ;;  %v8381_v43 = vxor.u32 %v4912_v55, %v4832_v40  ;;  %v3149_v18 = vpop.f32.mrb[120].mxu0  ;;  %v8386_v61 = vxor.u32 %v5140_v27, %v5060_v46  ;;  %v8390_v22 = vmul.u32 2246822519, %v4418_v23 }
 0x21c   :  { %10717 = vst [vmem:[#allocation268_spill] sm:$0xff] %v8379_v2  ;;  %v8388_v20 = vxor.u32 %v5132_v41, %v5052_v1  ;;  %v4452_v12 = vadd.s32 %v8359_v42, %v7740_v39  ;;  %v4053_v31 = vmax.f32 %v7964_v24, %v3149_v18  ;;  %v3238_v26 = vpop.f32.mrb[120].mxu1  ;;  %v3151_v35 = vpop.f32.mrb[121].mxu0  ;;  %v8395_v40 = vxor.u32 %v5142_v52, %v5062_v15  ;;  %v10761_v42 = vld [vmem:[#allocation99_spill] sm:$0xff] }
 0x21d   :  { %10719 = vst [vmem:[#allocation270_spill] sm:$0xff] %v8386_v61  ;;  %10721 = vst [vmem:[#allocation272_spill] sm:$0xff] %v8390_v22  ;;  %v8397_v48 = vxor.u32 %v5159_v45, %v5079_v53  ;;  %v8399_v0 = vmul.u32 2246822519, %v4420_v4  ;;  %v4055_v46 = vmax.f32 %v7972_v29, %v3238_v26  ;;  %v4054_v1 = vmax.f32 %v7970_v7, %v3151_v35  ;;  %v3240_v41 = vpop.f32.mrb[121].mxu1  ;;  %v8440_v18 = vpop.permute.xlu0 %4224  ;;  %v10735_v35 = vld [vmem:[#allocation178_spill] sm:$0xff] }
 0x21e   :  { %10720 = vst [vmem:[#allocation271_spill] sm:$0xff] %v8388_v20  ;;  %10722 = vst [vmem:[#allocation273_spill] sm:$0xff] %v8395_v40  ;;  %v8403_v23 = vxor.u32 %v5151_v60, %v5071_v30  ;;  %v8405_v55 = vxor.u32 %v5161_v47, %v5081_v11  ;;  %v10727_v24 = vmax.f32 %v7227_v10, %v7513_v38  ;;  %v10367_v45 = vmul.u32 2221713035, %v8381_v43  ;;  %v5676_v61 = vld [vmem:[#allocation9 + $0x2b8] sm:$0xff] }
 0x21f   :  { %10723 = vst [vmem:[#allocation274_spill] sm:$0xff] %v8397_v48  ;;  %10724 = vst [vmem:[#allocation275_spill] sm:$0xff] %v8399_v0  ;;  %v4056_v15 = vmax.f32 %v7976_v54, %v3240_v41  ;;  %v8411_v52 = vxor.u32 %v4922_v33, %v4842_v28  ;;  %v10728_v29 = vmax.f32 %v7233_v14, %v7517_v56  ;;  %v3155_v30 = vpop.f32.mrb[122].mxu0  ;;  %v8450_v41 = vld [vmem:[#allocation9] sm:$0xff]  ;;  %vm5271_vm3 = vcmp.lt.u32.totalorder %v8331_v57, 2147483648 }
 0x220   :  { %10725 = vst [vmem:[#allocation276_spill] sm:$0xff] %v8403_v23  ;;  %10726 = vst [vmem:[#allocation277_spill] sm:$0xff] %v8405_v55  ;;  %v4133_v27 = vmax.f32 %v10727_v24, %v4053_v31  ;;  %v10729_v7 = vmax.f32 %v7229_v58, %v7519_v51  ;;  %v4462_v10 = vadd.s32 %v8390_v22, %v7740_v39  ;;  %v3244_v56 = vpop.f32.mrb[122].mxu1  ;;  %v3157_v28 = vpop.f32.mrb[123].mxu0  ;;  %v10736_v24 = vld [vmem:[#allocation19_spill] sm:$0xff]  ;;  %v10760_v22 = vld [vmem:[#allocation22_spill] sm:$0xff] }
 0x221   :  { %v8417_v53 = vmax.f32 %v10728_v29, %v4055_v46  ;;  %v8425_v38 = vadd.s32 %v7774_v6, %v4452_v12  ;;  %v10730_v54 = vmax.f32 %v7238_v16, %v7527_v25  ;;  %v4073_v14 = vmax.f32 %v7984_v3, %v3155_v30  ;;  %v3246_v33 = vpop.f32.mrb[123].mxu1  ;;  %v10732_v3 = vld [vmem:[#allocation17_spill] sm:$0xff] }
 0x222   :  { %v4134_v60 = vmax.f32 %v10729_v7, %v4054_v1  ;;  %v4237_v47 = vadd.f32 %v8383_v49, %v4133_v27  ;;  %v8436_v58 = vadd.s32 %v8399_v0, %v7740_v39  ;;  %v4075_v51 = vmax.f32 %v7992_v36, %v3244_v56  ;;  %v10733_v12 = vld [vmem:[#allocation93_spill] sm:$0xff]  ;;  %v10737_v27 = vld [vmem:[#allocation94_spill] sm:$0xff] }
 0x223   :  { %v8430_v11 = vmax.f32 %v10730_v54, %v4056_v15  ;;  %v4074_v4 = vmax.f32 %v7990_v9, %v3157_v28  ;;  %v8444_v25 = vadd.s32 384, %v7697_v34  ;;  %v10734_v31 = vmax.f32 %v10732_v3, %v10733_v12  ;;  %v8452_v36 = vld [vmem:[#allocation9 + $0x140] sm:$0xff]  ;;  %v10740_v7 = vld [vmem:[#allocation18_spill] sm:$0xff] }
 0x224   :  { %v4238_v16 = vadd.f32 %v8383_v49, %v4134_v60  ;;  %v4076_v46 = vmax.f32 %v10735_v35, %v3246_v33  ;;  %v4317_v1 = vmax.f32 %v4237_v47, 0.0  ;;  %v10738_v15 = vmax.f32 %v10736_v24, %v10737_v27  ;;  %v10741_v60 = vld [vmem:[#allocation95_spill] sm:$0xff]  ;;  %v8465_v56 = vld [vmem:[#allocation9 + $0x280] sm:$0xff]  ;;  %v3250_v24 = vpop.f32.mrb[124].mxu1 }
 0x225   :  { %10731 = vst [vmem:[#allocation278_spill] sm:$0xff] %v8430_v11  ;;  %v4153_v26 = vmax.f32 %v10734_v31, %v4073_v14  ;;  %v10742_v30 = vmax.f32 %v10740_v7, %v10741_v60  ;;  %v3161_v14 = vpop.f32.mrb[124].mxu0  ;;  %v5152_v47 = vshrl.u32 %v10367_v45, 16  ;;  %v10743_v33 = vld [vmem:[#allocation20_spill] sm:$0xff]  ;;  %v10747_v35 = vld [vmem:[#allocation179_spill] sm:$0xff]  ;;  %v8479_v7 = vld [vmem:[#allocation9 + $0x148] sm:$0xff]  ;;  %v10762_v11 = vmax.f32 %v10760_v22, %v10761_v42 }
 0x226   :  { %v8458_v29 = vmax.f32 %v10738_v15, %v4075_v51  ;;  %v4318_v28 = vmax.f32 %v4238_v16, 0.0  ;;  %v10744_v3 = vld [vmem:[#allocation96_spill] sm:$0xff]  ;;  %v4093_v51 = vmax.f32 %v10747_v35, %v3161_v14  ;;  %v3163_v27 = vpop.f32.mrb[125].mxu0  ;;  %v8477_v15 = vld [vmem:[#allocation9 + $0x8] sm:$0xff]  ;;  %10748 = vst [vmem:[#allocation178_spill] sm:$0xff] %v8479_v7  ;;  %v8518_v42 = vadd.s32 %v7774_v6, %v4462_v10 }
 0x227   :  { %v8463_v54 = vmax.f32 %v10742_v30, %v4074_v4  ;;  %v10745_v12 = vmax.f32 %v10743_v33, %v10744_v3  ;;  %v5331_v4 = vsel %vm5251_vm1, %v4317_v1, 0.0  ;;  %v4257_v16 = vadd.f32 %v8440_v18, %v4153_v26  ;;  %v10749_v60 = vld [vmem:[#allocation181_spill] sm:$0xff]  ;;  %v10750_v33 = vld [vmem:[#allocation180_spill] sm:$0xff]  ;;  %v3252_v3 = vpop.f32.mrb[125].mxu1 }
 0x228   :  { %10739 = vst [vmem:[#allocation17_spill] sm:$0xff] %v8458_v29  ;;  %v4095_v30 = vmax.f32 %v10749_v60, %v3250_v24  ;;  %v5451_v14 = vmul.f32 %v8450_v41, %v5331_v4  ;;  %v8487_v35 = vld [vmem:[#allocation9 + $0x288] sm:$0xff]  ;;  %v5709_v29 = vmul.f32 %v8465_v56, %v5331_v4  ;;  %v5332_v24 = vsel %vm5252_vm2, %v4318_v28, 0.0 }
 0x229   :  { %v8472_v31 = vmax.f32 %v10745_v12, %v4076_v46  ;;  %v4094_v46 = vmax.f32 %v10750_v33, %v3163_v27  ;;  %v5580_v12 = vmul.f32 %v8452_v36, %v5331_v4  ;;  %10751 = vst [vmem:[#allocation19_spill] sm:$0xff] %v8487_v35  ;;  %v10753_v1 = vld [vmem:[#allocation97_spill] sm:$0xff]  ;;  %v10756_v27 = vld [vmem:[#allocation23_spill] sm:$0xff]  ;;  %v10757_v60 = vld [vmem:[#allocation98_spill] sm:$0xff]  ;;  %vm5272_vm6 = vcmp.lt.u32.totalorder %v8367_v59, 2147483648 }
 0x22a   :  { %v10754_v45 = vmax.f32 %v10752_v13, %v10753_v1  ;;  %v10758_v33 = vmax.f32 %v10756_v27, %v10757_v60  ;;  %v3167_v13 = vpop.f32.mrb[126].mxu0  ;;  %v10764_v4 = vld [vmem:[#allocation100_spill] sm:$0xff]  ;;  %v10767_v28 = vld [vmem:[#allocation186_spill] sm:$0xff]  ;;  %v3256_v27 = vpop.f32.mrb[126].mxu1  ;;  %v5710_v60 = vmul.f32 %v8487_v35, %v5332_v24  ;;  %v10768_v22 = vld [vmem:[#allocation189_spill] sm:$0xff]  ;;  %v4258_v57 = vadd.f32 %v8440_v18, %v8463_v54 }
 0x22b   :  { %10746 = vst [vmem:[#allocation93_spill] sm:$0xff] %v8472_v31  ;;  %v10755_v31 = vld [vmem:[#allocation183_spill] sm:$0xff]  ;;  %v8506_v39 = vmax.f32 %v10762_v11, %v4094_v46  ;;  %v4113_v1 = vmax.f32 %v10767_v28, %v3167_v13  ;;  %v4115_v11 = vmax.f32 %v10768_v22, %v3256_v27  ;;  %v10769_v46 = vld [vmem:[#allocation188_spill] sm:$0xff]  ;;  %v4613_v27 = vshrl.u32 %v8425_v38, 16 }
 0x22c   :  { %v8492_v9 = vmax.f32 %v10754_v45, %v4093_v51  ;;  %v4096_v26 = vmax.f32 %v10755_v31, %v3252_v3  ;;  %v8501_v0 = vmax.f32 %v10758_v33, %v4095_v30  ;;  %v5452_v45 = vmul.f32 %v8477_v15, %v5332_v24  ;;  %v10763_v51 = vld [vmem:[#allocation24_spill] sm:$0xff]  ;;  %v3169_v30 = vpop.f32.mrb[127].mxu0  ;;  %v10778_v22 = vld [vmem:[#allocation27_spill] sm:$0xff] }
 0x22d   :  { %v5581_v31 = vmul.f32 %v8479_v7, %v5332_v24  ;;  %v10765_v3 = vmax.f32 %v10763_v51, %v10764_v4  ;;  %v4114_v33 = vmax.f32 %v10769_v46, %v3169_v30  ;;  %v10773_v51 = vld [vmem:[#allocation101_spill] sm:$0xff]  ;;  %v10776_v24 = vld [vmem:[#allocation175_spill] sm:$0xff]  ;;  %v8533_v10 = vadd.f32 %v5710_v60, %v5709_v29  ;;  %v10779_v30 = vld [vmem:[#allocation102_spill] sm:$0xff] }
 0x22e   :  { %10759 = vst [vmem:[#allocation94_spill] sm:$0xff] %v8501_v0  ;;  %v3258_v0 = vpop.f32.mrb[127].mxu1  ;;  %v8522_v48 = vadd.f32 %v5452_v45, %v5451_v14  ;;  %vm5255_vm4 = vcmp.lt.u32.totalorder %v10776_v24, 2147483648  ;;  %v10780_v46 = vmax.f32 %v10778_v22, %v10779_v30  ;;  %v10783_v45 = vld [vmem:[#allocation103_spill] sm:$0xff]  ;;  %v10788_v29 = vld [vmem:[#allocation104_spill] sm:$0xff]  ;;  %vm5298_vm0 = vcmp.lt.u32.totalorder %v8135_v50, 2147483648 }
 0x22f   :  { %v8513_v5 = vmax.f32 %v10765_v3, %v4096_v26  ;;  %v8524_v55 = vadd.f32 %v5581_v31, %v5580_v12  ;;  %v10772_v26 = vld [vmem:[#allocation25_spill] sm:$0xff]  ;;  %v10775_v3 = vld [vmem:[#allocation190_spill] sm:$0xff]  ;;  %10777 = vst [vmem:[#allocation96_spill] sm:$0xff] %v8533_v10  ;;  %v10791_v10 = vld [vmem:[#allocation192_spill] sm:$0xff]  ;;  %v3416_v22 = vpop.f32.mrb[128].mxu1 }
 0x230   :  { %10770 = vst [vmem:[#allocation95_spill] sm:$0xff] %v8522_v48  ;;  %v10774_v4 = vmax.f32 %v10772_v26, %v10773_v51  ;;  %v4116_v28 = vmax.f32 %v10775_v3, %v3258_v0  ;;  %v8539_v14 = vmax.f32 %v10780_v46, %v4115_v11  ;;  %v10782_v12 = vld [vmem:[#allocation26_spill] sm:$0xff]  ;;  %v4337_v26 = vmax.f32 %v4257_v16, 0.0  ;;  %v10792_v11 = vld [vmem:[#allocation176_spill] sm:$0xff]  ;;  %v8562_v46 = vpop.permute.xlu1 %4229  ;;  %v10861_v59 = vld [vmem:[#allocation203_spill] sm:$0xff] }
 0x231   :  { %10766 = vst [vmem:[#allocation18_spill] sm:$0xff] %v8513_v5  ;;  %10771 = vst [vmem:[#allocation20_spill] sm:$0xff] %v8524_v55  ;;  %v10784_v31 = vmax.f32 %v10782_v12, %v10783_v45  ;;  %v10786_v0 = vmul.u32 2221713035, %v8411_v52  ;;  %vm5257_vm5 = vcmp.lt.u32.totalorder %v10792_v11, 2147483648  ;;  %v8560_v16 = vadd.s32 1664, %v7697_v34 }
 0x232   :  { %v8529_v13 = vmax.f32 %v10774_v4, %v4113_v1  ;;  %10781 = vst [vmem:[#allocation179_spill] sm:$0xff] %v8539_v14  ;;  %v3327_v1 = vpop.f32.mrb[128].mxu0  ;;  %v10787_v4 = vld [vmem:[#allocation28_spill] sm:$0xff]  ;;  %10795 = vst [vmem:[#allocation183_spill] sm:$0xff] %v8562_v46  ;;  %v10796_v12 = vld [vmem:[#allocation194_spill] sm:$0xff] }
 0x233   :  { %v8544_v5 = vmax.f32 %v10784_v31, %v4114_v33  ;;  %v5162_v51 = vshrl.u32 %v10786_v0, 16  ;;  %v10789_v60 = vmax.f32 %v10787_v4, %v10788_v29  ;;  %v4057_v55 = vmax.f32 %v10791_v10, %v3327_v1  ;;  %v3329_v30 = vpop.f32.mrb[129].mxu0  ;;  %10794 = vst [vmem:[#allocation97_spill] sm:$0xff] %v8560_v16  ;;  %v10797_v31 = vld [vmem:[#allocation193_spill] sm:$0xff]  ;;  %v3418_v0 = vpop.f32.mrb[129].mxu1  ;;  %v10804_v14 = vld [vmem:[#allocation195_spill] sm:$0xff] }
 0x234   :  { %v8557_v33 = vadd.s32 %v7774_v6, %v8436_v58  ;;  %v4059_v45 = vmax.f32 %v10796_v12, %v3416_v22  ;;  %v10798_v10 = vmul.u32 2221713035, %v8381_v43  ;;  %v8572_v4 = vmul.u32 2246822519, %v8444_v25  ;;  %v10801_v58 = vld [vmem:[#allocation29_spill] sm:$0xff]  ;;  %v10806_v12 = vld [vmem:[#allocation31_spill] sm:$0xff] }
 0x235   :  { %10785 = vst [vmem:[#allocation181_spill] sm:$0xff] %v8544_v5  ;;  %v8551_v3 = vmax.f32 %v10789_v60, %v4116_v28  ;;  %v4058_v28 = vmax.f32 %v10797_v31, %v3329_v30  ;;  %v10802_v29 = vld [vmem:[#allocation105_spill] sm:$0xff]  ;;  %v4060_v34 = vmax.f32 %v10804_v14, %v3418_v0  ;;  %v4623_v22 = vshrl.u32 %v8518_v42, 16  ;;  %v10807_v31 = vld [vmem:[#allocation106_spill] sm:$0xff] }
 0x236   :  { %10793 = vst [vmem:[#allocation21_spill] sm:$0xff] %v8557_v33  ;;  %v8569_v1 = vxor.u32 %v5152_v47, %v10798_v10  ;;  %10800 = vst [vmem:[#allocation98_spill] sm:$0xff] %v8572_v4  ;;  %v10803_v60 = vmax.f32 %v10801_v58, %v10802_v29  ;;  %v8580_v30 = vxor.u32 %v4613_v27, %v8425_v38  ;;  %v10809_v47 = vld [vmem:[#allocation30_spill] sm:$0xff]  ;;  %v10810_v10 = vld [vmem:[#allocation107_spill] sm:$0xff]  ;;  %v5351_v58 = vsel %vm5271_vm3, %v4337_v26, 0.0  ;;  %v8619_v4 = vpop.permute.xlu1 %4234 }
 0x237   :  { %10790 = vst [vmem:[#allocation180_spill] sm:$0xff] %v8551_v3  ;;  %v10808_v48 = vmax.f32 %v10806_v12, %v10807_v31  ;;  %v10811_v6 = vmax.f32 %v10809_v47, %v10810_v10  ;;  %v10814_v38 = vld [vmem:[#allocation177_spill] sm:$0xff]  ;;  %v10815_v27 = vld [vmem:[#allocation32_spill] sm:$0xff]  ;;  %v3422_v31 = vpop.f32.mrb[130].mxu1  ;;  %v10822_v47 = vld [vmem:[#allocation198_spill] sm:$0xff]  ;;  %vm5261_vm3 = vcmp.lt.u32.totalorder %v8196_v44, 2147483648 }
 0x238   :  { %10799 = vst [vmem:[#allocation23_spill] sm:$0xff] %v8569_v1  ;;  %v4137_v3 = vmax.f32 %v10803_v60, %v4057_v55  ;;  %10805 = vst [vmem:[#allocation22_spill] sm:$0xff] %v8580_v30  ;;  %v3333_v1 = vpop.f32.mrb[130].mxu0  ;;  %v10812_v55 = vmul.u32 2221713035, %v8411_v52  ;;  %vm5256_vm7 = vcmp.lt.u32.totalorder %v10814_v38, 2147483648 }
 0x239   :  { %v4139_v43 = vmax.f32 %v10808_v48, %v4059_v45  ;;  %v4138_v25 = vmax.f32 %v10811_v6, %v4058_v28  ;;  %v10816_v29 = vld [vmem:[#allocation108_spill] sm:$0xff]  ;;  %v3335_v6 = vpop.f32.mrb[131].mxu0  ;;  %v10819_v52 = vld [vmem:[#allocation182_spill] sm:$0xff]  ;;  %10829 = vst [vmem:[#allocation186_spill] sm:$0xff] %v8619_v4  ;;  %v10834_v33 = vld [vmem:[#allocation111_spill] sm:$0xff] }
 0x23a   :  { %v8592_v14 = vxor.u32 %v5162_v51, %v10812_v55  ;;  %v4241_v0 = vadd.f32 %v8383_v49, %v4137_v3  ;;  %v10817_v60 = vmax.f32 %v10815_v27, %v10816_v29  ;;  %v10818_v45 = vld [vmem:[#allocation196_spill] sm:$0xff]  ;;  %vm5258_vm8 = vcmp.lt.u32.totalorder %v10819_v52, 2147483648  ;;  %v10821_v3 = vld [vmem:[#allocation199_spill] sm:$0xff]  ;;  %v3424_v55 = vpop.f32.mrb[131].mxu1  ;;  %v10824_v27 = vld [vmem:[#allocation33_spill] sm:$0xff] }
 0x23b   :  { %v4077_v12 = vmax.f32 %v10818_v45, %v3333_v1  ;;  %v4243_v26 = vadd.f32 %v8383_v49, %v4139_v43  ;;  %v10820_v51 = vld [vmem:[#allocation184_spill] sm:$0xff]  ;;  %v4079_v28 = vmax.f32 %v10821_v3, %v3422_v31  ;;  %v4078_v10 = vmax.f32 %v10822_v47, %v3335_v6  ;;  %v10825_v29 = vld [vmem:[#allocation109_spill] sm:$0xff]  ;;  %v10830_v3 = vld [vmem:[#allocation35_spill] sm:$0xff] }
 0x23c   :  { %10813 = vst [vmem:[#allocation99_spill] sm:$0xff] %v8592_v14  ;;  %v4140_v48 = vmax.f32 %v10817_v60, %v4060_v34  ;;  %vm5275_vm9 = vcmp.lt.u32.totalorder %v10820_v51, 2147483648  ;;  %v8609_v34 = vadd.f32 %v8562_v46, %v8492_v9  ;;  %v4321_v1 = vmax.f32 %v4241_v0, 0.0  ;;  %v10827_v45 = vld [vmem:[#allocation200_spill] sm:$0xff]  ;;  %v10831_v47 = vld [vmem:[#allocation110_spill] sm:$0xff] }
 0x23d   :  { %v10826_v60 = vmax.f32 %v10824_v27, %v10825_v29  ;;  %v4080_v43 = vmax.f32 %v10827_v45, %v3424_v55  ;;  %v8617_v14 = vadd.f32 %v8562_v46, %v8506_v39  ;;  %v4323_v31 = vmax.f32 %v4243_v26, 0.0  ;;  %v10833_v0 = vld [vmem:[#allocation34_spill] sm:$0xff]  ;;  %v10840_v45 = vld [vmem:[#allocation112_spill] sm:$0xff] }
 0x23e   :  { %10823 = vst [vmem:[#allocation24_spill] sm:$0xff] %v8609_v34  ;;  %v4242_v6 = vadd.f32 %v8383_v49, %v4138_v25  ;;  %v10832_v9 = vmax.f32 %v10830_v3, %v10831_v47  ;;  %v10835_v5 = vmax.f32 %v10833_v0, %v10834_v33  ;;  %v8628_v29 = vld [vmem:[#allocation9 + $0x50] sm:$0xff]  ;;  %v10839_v25 = vld [vmem:[#allocation36_spill] sm:$0xff]  ;;  %v4338_v33 = vmax.f32 %v4258_v57, 0.0  ;;  %v10847_v57 = vld [vmem:[#allocation185_spill] sm:$0xff] }
 0x23f   :  { %v4157_v54 = vmax.f32 %v10826_v60, %v4077_v12  ;;  %10828 = vst [vmem:[#allocation100_spill] sm:$0xff] %v8617_v14  ;;  %v3339_v12 = vpop.f32.mrb[132].mxu0  ;;  %10836 = vst [vmem:[#allocation189_spill] sm:$0xff] %v8628_v29  ;;  %v8630_v55 = vld [vmem:[#allocation9 + $0x190] sm:$0xff]  ;;  %v4244_v60 = vadd.f32 %v8383_v49, %v4140_v48  ;;  %v10841_v40 = vmax.f32 %v10839_v25, %v10840_v45  ;;  %vm5277_vm10 = vcmp.lt.u32.totalorder %v10847_v57, 2147483648  ;;  %v10860_v34 = vld [vmem:[#allocation204_spill] sm:$0xff] }
 0x240   :  { %v4159_v16 = vmax.f32 %v10832_v9, %v4079_v28  ;;  %v4158_v27 = vmax.f32 %v10835_v5, %v4078_v10  ;;  %10837 = vst [vmem:[#allocation188_spill] sm:$0xff] %v8630_v55  ;;  %v8632_v39 = vld [vmem:[#allocation9 + $0x2d0] sm:$0xff]  ;;  %v3428_v28 = vpop.f32.mrb[132].mxu1  ;;  %v8639_v47 = vpop.f32.mrb[133].mxu0  ;;  %v5335_v5 = vsel %vm5255_vm4, %v4321_v1, 0.0  ;;  %v8643_v10 = vld [vmem:[#allocation9 + $0x20] sm:$0xff]  ;;  %v8647_v0 = vadd.f32 %v8383_v49, %v8417_v53 }
 0x241   :  { %10838 = vst [vmem:[#allocation25_spill] sm:$0xff] %v8632_v39  ;;  %v4261_v26 = vadd.f32 %v8440_v18, %v4157_v54  ;;  %v4160_v3 = vmax.f32 %v10841_v40, %v4080_v43  ;;  %10842 = vst [vmem:[#allocation101_spill] sm:$0xff] %v8643_v10  ;;  %v3430_v9 = vpop.f32.mrb[133].mxu1  ;;  %v8650_v48 = vxor.u32 %v4623_v22, %v8518_v42  ;;  %v8653_v40 = vld [vmem:[#allocation9 + $0x160] sm:$0xff]  ;;  %v5337_v22 = vsel %vm5257_vm5, %v4323_v31, 0.0  ;;  %v5417_v25 = vld [vmem:[#allocation9 + $0x30] sm:$0xff] }
 0x242   :  { %10843 = vst [vmem:[#allocation190_spill] sm:$0xff] %v8647_v0  ;;  %10845 = vst [vmem:[#allocation27_spill] sm:$0xff] %v8653_v40  ;;  %v8655_v43 = vld [vmem:[#allocation9 + $0x2a0] sm:$0xff]  ;;  %v8659_v24 = vmul.f32 %v8628_v29, %v5351_v58  ;;  %v8662_v1 = vmul.f32 %v8630_v55, %v5351_v58  ;;  %v8665_v53 = vmul.f32 %v8632_v39, %v5351_v58  ;;  %v4322_v45 = vmax.f32 %v4242_v6, 0.0  ;;  %v8673_v54 = vpop.f32.mrb[134].mxu0  ;;  %v5546_v58 = vld [vmem:[#allocation9 + $0x170] sm:$0xff] }
 0x243   :  { %10844 = vst [vmem:[#allocation175_spill] sm:$0xff] %v8650_v48  ;;  %10846 = vst [vmem:[#allocation102_spill] sm:$0xff] %v8655_v43  ;;  %v8669_v42 = vadd.f32 %v8619_v4, %v8529_v13  ;;  %v4341_v30 = vmax.f32 %v4261_v26, 0.0  ;;  %v10853_v48 = vld [vmem:[#allocation187_spill] sm:$0xff]  ;;  %v10854_v13 = vld [vmem:[#allocation197_spill] sm:$0xff]  ;;  %v8682_v11 = vpop.f32.mrb[134].mxu1  ;;  %v8694_v0 = vmul.f32 %v8655_v43, %v5335_v5 }
 0x244   :  { %10848 = vst [vmem:[#allocation26_spill] sm:$0xff] %v8659_v24  ;;  %10849 = vst [vmem:[#allocation103_spill] sm:$0xff] %v8662_v1  ;;  %v8678_v1 = vmul.f32 %v8643_v10, %v5335_v5  ;;  %vm5276_vm11 = vcmp.lt.u32.totalorder %v10853_v48, 2147483648  ;;  %vm5278_vm12 = vcmp.lt.u32.totalorder %v10854_v13, 2147483648  ;;  %v8684_v31 = vpop.f32.mrb[135].mxu0  ;;  %v8688_v6 = vsel %vm5272_vm6, %v4338_v33, 0.0 }
 0x245   :  { %10850 = vst [vmem:[#allocation28_spill] sm:$0xff] %v8665_v53  ;;  %10851 = vst [vmem:[#allocation104_spill] sm:$0xff] %v8669_v42  ;;  %v4324_v53 = vmax.f32 %v4244_v60, 0.0  ;;  %v8691_v24 = vmul.f32 %v8653_v40, %v5335_v5  ;;  %v4263_v60 = vadd.f32 %v8440_v18, %v4159_v16  ;;  %v10858_v26 = vld [vmem:[#allocation201_spill] sm:$0xff]  ;;  %v8698_v10 = vpop.f32.mrb[135].mxu1  ;;  %v8700_v42 = vmul.f32 %v5417_v25, %v5337_v22  ;;  %v5675_v14 = vld [vmem:[#allocation9 + $0x2b0] sm:$0xff] }
 0x246   :  { %10852 = vst [vmem:[#allocation192_spill] sm:$0xff] %v8678_v1  ;;  %10855 = vst [vmem:[#allocation176_spill] sm:$0xff] %v8688_v6  ;;  %v4097_v1 = vmax.f32 %v10858_v26, %v3339_v12  ;;  %vm5295_vm13 = vcmp.lt.u32.totalorder %v10860_v34, 2147483648  ;;  %v4099_v33 = vmax.f32 %v10861_v59, %v3428_v28  ;;  %v10862_v39 = vld [vmem:[#allocation202_spill] sm:$0xff]  ;;  %v8707_v5 = vmul.f32 %v5546_v58, %v5337_v22  ;;  %v8719_v59 = vpop.f32.mrb[136].mxu0  ;;  %v8731_v23 = vpop.f32.mrb[136].mxu1 }
 0x247   :  { %10856 = vst [vmem:[#allocation194_spill] sm:$0xff] %v8691_v24  ;;  %10857 = vst [vmem:[#allocation193_spill] sm:$0xff] %v8694_v0  ;;  %v4098_v40 = vmax.f32 %v10862_v39, %v8639_v47  ;;  %v10863_v24 = vld [vmem:[#allocation205_spill] sm:$0xff]  ;;  %v5336_v16 = vsel %vm5256_vm7, %v4322_v45, 0.0  ;;  %v4264_v28 = vadd.f32 %v8440_v18, %v4160_v3  ;;  %v5338_v39 = vsel %vm5258_vm8, %v4324_v53, 0.0  ;;  %v5418_v47 = vld [vmem:[#allocation9 + $0x38] sm:$0xff] }
 0x248   :  { %10859 = vst [vmem:[#allocation29_spill] sm:$0xff] %v8700_v42  ;;  %v4100_v55 = vmax.f32 %v10863_v24, %v3430_v9  ;;  %10864 = vst [vmem:[#allocation105_spill] sm:$0xff] %v8707_v5  ;;  %v8711_v12 = vld [vmem:[#allocation9 + $0x28] sm:$0xff]  ;;  %v4262_v42 = vadd.f32 %v8440_v18, %v4158_v27  ;;  %v5547_v9 = vld [vmem:[#allocation9 + $0x178] sm:$0xff]  ;;  %v5355_v38 = vsel %vm5275_vm9, %v4341_v30, 0.0  ;;  %v8733_v3 = vpop.f32.mrb[137].mxu0 }
 0x249   :  { %10865 = vst [vmem:[#allocation195_spill] sm:$0xff] %v8711_v12  ;;  %v8713_v26 = vld [vmem:[#allocation9 + $0x168] sm:$0xff]  ;;  %v10871_v0 = vld [vmem:[#allocation39_spill] sm:$0xff]  ;;  %v4343_v2 = vmax.f32 %v4263_v60, 0.0  ;;  %v8749_v32 = vmul.f32 %v8711_v12, %v5336_v16  ;;  %v10906_v13 = vld [vmem:[#allocation44_spill] sm:$0xff]  ;;  %vm5262_vm4 = vcmp.lt.u32.totalorder %v8234_v8, 2147483648 }
 0x24a   :  { %10866 = vst [vmem:[#allocation31_spill] sm:$0xff] %v8713_v26  ;;  %v8715_v25 = vld [vmem:[#allocation9 + $0x2a8] sm:$0xff]  ;;  %v5425_v52 = vld [vmem:[#allocation9 + $0x70] sm:$0xff]  ;;  %v8752_v60 = vmul.f32 %v8713_v26, %v5336_v16  ;;  %vm5259_vm6 = vcmp.lt.u32.totalorder %v8192_v62, 2147483648  ;;  %vm5260_vm7 = vcmp.lt.u32.totalorder %v8210_v63, 2147483648 }
 0x24b   :  { %10867 = vst [vmem:[#allocation106_spill] sm:$0xff] %v8715_v25  ;;  %v10868_v24 = vld [vmem:[#allocation37_spill] sm:$0xff]  ;;  %v10872_v43 = vld [vmem:[#allocation114_spill] sm:$0xff]  ;;  %v10876_v30 = vld [vmem:[#allocation115_spill] sm:$0xff] }
 0x24c   :  { %v10869_v45 = vld [vmem:[#allocation113_spill] sm:$0xff]  ;;  %v10873_v29 = vmax.f32 %v10871_v0, %v10872_v43  ;;  %v5554_v53 = vld [vmem:[#allocation9 + $0x1b0] sm:$0xff]  ;;  %v8744_v43 = vpop.f32.mrb[137].mxu1  ;;  %10883 = vst [vmem:[#allocation107_spill] sm:$0xff] %v8749_v32  ;;  %10884 = vst [vmem:[#allocation177_spill] sm:$0xff] %v8752_v60 }
 0x24d   :  { %v10870_v58 = vmax.f32 %v10868_v24, %v10869_v45  ;;  %v10874_v6 = vld [vmem:[#allocation206_spill] sm:$0xff]  ;;  %v10878_v24 = vld [vmem:[#allocation40_spill] sm:$0xff]  ;;  %v10904_v60 = vld [vmem:[#allocation119_spill] sm:$0xff] }
 0x24e   :  { %v4179_v27 = vmax.f32 %v10873_v29, %v4099_v33  ;;  %vm5297_vm14 = vcmp.lt.u32.totalorder %v10874_v6, 2147483648  ;;  %v10875_v51 = vld [vmem:[#allocation38_spill] sm:$0xff]  ;;  %v10881_v29 = vld [vmem:[#allocation207_spill] sm:$0xff]  ;;  %v8746_v33 = vmul.f32 %v5675_v14, %v5337_v22  ;;  %v8764_v14 = vmul.f32 %v5676_v61, %v5338_v39 }
 0x24f   :  { %v4177_v5 = vmax.f32 %v10870_v58, %v4097_v1  ;;  %v10877_v21 = vmax.f32 %v10875_v51, %v10876_v30  ;;  %v10879_v1 = vld [vmem:[#allocation116_spill] sm:$0xff]  ;;  %v4117_v0 = vmax.f32 %v10881_v29, %v8673_v54  ;;  %v8755_v51 = vmul.f32 %v8715_v25, %v5336_v16  ;;  %v8772_v16 = vpop.f32.mrb[138].mxu1  ;;  %v10896_v25 = vld [vmem:[#allocation209_spill] sm:$0xff]  ;;  %v10936_v50 = vld [vmem:[#allocation122_spill] sm:$0xff] }
 0x250   :  { %v10880_v45 = vmax.f32 %v10878_v24, %v10879_v1  ;;  %10882 = vst [vmem:[#allocation30_spill] sm:$0xff] %v8746_v33  ;;  %v4342_v54 = vmax.f32 %v4262_v42, 0.0  ;;  %v4344_v30 = vmax.f32 %v4264_v28, 0.0  ;;  %v8762_v24 = vpop.f32.mrb[138].mxu0  ;;  %10889 = vst [vmem:[#allocation182_spill] sm:$0xff] %v8764_v14  ;;  %v8766_v22 = vmul.f32 %v5425_v52, %v5355_v38  ;;  %v10893_v52 = vld [vmem:[#allocation117_spill] sm:$0xff] }
 0x251   :  { %v4178_v20 = vmax.f32 %v10877_v21, %v4098_v40  ;;  %10885 = vst [vmem:[#allocation32_spill] sm:$0xff] %v8755_v51  ;;  %v10886_v21 = vld [vmem:[#allocation211_spill] sm:$0xff]  ;;  %v8758_v40 = vmul.f32 %v5418_v47, %v5338_v39  ;;  %v8768_v1 = vmul.f32 %v5554_v53, %v5355_v38  ;;  %v8774_v47 = vpop.f32.mrb[139].mxu0  ;;  %v5357_v42 = vsel %vm5277_vm10, %v4343_v2, 0.0  ;;  %v5556_v14 = vld [vmem:[#allocation9 + $0x1c0] sm:$0xff]  ;;  %v5557_v51 = vld [vmem:[#allocation9 + $0x1c8] sm:$0xff] }
 0x252   :  { %v4180_v58 = vmax.f32 %v10880_v45, %v4100_v55  ;;  %vm5296_vm15 = vcmp.lt.u32.totalorder %v10886_v21, 2147483648  ;;  %v8760_v55 = vmul.f32 %v5547_v9, %v5338_v39  ;;  %10890 = vst [vmem:[#allocation184_spill] sm:$0xff] %v8766_v22  ;;  %v4281_v45 = vadd.f32 %v8562_v46, %v4177_v5  ;;  %v5683_v9 = vld [vmem:[#allocation9 + $0x2f0] sm:$0xff]  ;;  %v10892_v39 = vld [vmem:[#allocation41_spill] sm:$0xff]  ;;  %v8784_v5 = vpop.f32.mrb[139].mxu1  ;;  %v10897_v2 = vld [vmem:[#allocation208_spill] sm:$0xff] }
 0x253   :  { %10887 = vst [vmem:[#allocation108_spill] sm:$0xff] %v8758_v40  ;;  %10891 = vst [vmem:[#allocation199_spill] sm:$0xff] %v8768_v1  ;;  %v4283_v28 = vadd.f32 %v8562_v46, %v4179_v27  ;;  %v4282_v61 = vadd.f32 %v8562_v46, %v4178_v20  ;;  %v10894_v53 = vmax.f32 %v10892_v39, %v10893_v52  ;;  %v10895_v1 = vld [vmem:[#allocation217_spill] sm:$0xff]  ;;  %v10898_v20 = vld [vmem:[#allocation210_spill] sm:$0xff]  ;;  %v8797_v33 = vpop.f32.mrb[140].mxu0  ;;  %vm5281_vm10 = vcmp.lt.u32.totalorder %v8343_v17, 2147483648 }
 0x254   :  { %10888 = vst [vmem:[#allocation196_spill] sm:$0xff] %v8760_v55  ;;  %vm5315_vm1 = vcmp.lt.u32.totalorder %v10895_v1, 2147483648  ;;  %v5427_v22 = vld [vmem:[#allocation9 + $0x80] sm:$0xff]  ;;  %v4361_v40 = vmax.f32 %v4281_v45, 0.0  ;;  %v4119_v57 = vmax.f32 %v10896_v25, %v8682_v11  ;;  %v4118_v27 = vmax.f32 %v10897_v2, %v8684_v31  ;;  %v5426_v39 = vld [vmem:[#allocation9 + $0x78] sm:$0xff]  ;;  %10899 = vst [vmem:[#allocation198_spill] sm:$0xff] %v8797_v33 }
 0x255   :  { %v4197_v29 = vmax.f32 %v10894_v53, %v4117_v0  ;;  %v5685_v55 = vld [vmem:[#allocation9 + $0x300] sm:$0xff]  ;;  %v4120_v26 = vmax.f32 %v10898_v20, %v8698_v10  ;;  %v5356_v0 = vsel %vm5276_vm11, %v4342_v54, 0.0  ;;  %v5555_v52 = vld [vmem:[#allocation9 + $0x1b8] sm:$0xff]  ;;  %v5358_v53 = vsel %vm5278_vm12, %v4344_v30, 0.0  ;;  %v5428_v25 = vld [vmem:[#allocation9 + $0x88] sm:$0xff]  ;;  %v8815_v33 = vpop.f32.mrb[141].mxu0 }
 0x256   :  { %v4363_v12 = vmax.f32 %v4283_v28, 0.0  ;;  %v4284_v45 = vadd.f32 %v8562_v46, %v4180_v58  ;;  %v5684_v11 = vld [vmem:[#allocation9 + $0x2f8] sm:$0xff]  ;;  %v10901_v10 = vld [vmem:[#allocation118_spill] sm:$0xff]  ;;  %v8813_v46 = vpop.f32.mrb[140].mxu1  ;;  %v8817_v7 = vmul.f32 %v5683_v9, %v5355_v38  ;;  %v5564_v38 = vld [vmem:[#allocation9 + $0x200] sm:$0xff]  ;;  %v8837_v34 = vmul.f32 %v5557_v51, %v5358_v53 }
 0x257   :  { %v4301_v31 = vadd.f32 %v8619_v4, %v4197_v29  ;;  %v10900_v2 = vld [vmem:[#allocation43_spill] sm:$0xff]  ;;  %v10903_v54 = vld [vmem:[#allocation42_spill] sm:$0xff]  ;;  %v10907_v30 = vld [vmem:[#allocation120_spill] sm:$0xff]  ;;  %v8819_v29 = vmul.f32 %v5427_v22, %v5357_v42  ;;  %v8833_v22 = vmul.f32 %v5684_v11, %v5356_v0  ;;  %vm5280_vm11 = vcmp.lt.u32.totalorder %v8352_v19, 2147483648 }
 0x258   :  { %v10902_v20 = vmax.f32 %v10900_v2, %v10901_v10  ;;  %v10905_v32 = vmax.f32 %v10903_v54, %v10904_v60  ;;  %v10908_v28 = vmax.f32 %v10906_v13, %v10907_v30  ;;  %10909 = vst [vmem:[#allocation33_spill] sm:$0xff] %v8817_v7  ;;  %v5686_v2 = vld [vmem:[#allocation9 + $0x308] sm:$0xff]  ;;  %v5435_v60 = vld [vmem:[#allocation9 + $0xc0] sm:$0xff]  ;;  %v8825_v10 = vmul.f32 %v5556_v14, %v5357_v42  ;;  %v8840_v14 = vpop.f32.mrb[142].mxu0 }
 0x259   :  { %10910 = vst [vmem:[#allocation109_spill] sm:$0xff] %v8819_v29  ;;  %v8831_v54 = vmul.f32 %v5555_v52, %v5356_v0  ;;  %v5693_v9 = vld [vmem:[#allocation9 + $0x340] sm:$0xff]  ;;  %10915 = vst [vmem:[#allocation111_spill] sm:$0xff] %v8833_v22  ;;  %v8835_v13 = vmul.f32 %v5428_v25, %v5358_v53  ;;  %v5566_v52 = vld [vmem:[#allocation9 + $0x210] sm:$0xff]  ;;  %v4381_v11 = vmax.f32 %v4301_v31, 0.0  ;;  %v8850_v51 = vpop.f32.mrb[143].mxu0 }
 0x25a   :  { %v4199_v48 = vmax.f32 %v10902_v20, %v4119_v57  ;;  %v8806_v35 = vmax.f32 %v10905_v32, %v4118_v27  ;;  %v8811_v58 = vmax.f32 %v10908_v28, %v4120_v26  ;;  %v5375_v57 = vsel %vm5295_vm13, %v4361_v40, 0.0  ;;  %v8823_v27 = vpop.f32.mrb[141].mxu1  ;;  %10911 = vst [vmem:[#allocation200_spill] sm:$0xff] %v8825_v10  ;;  %10917 = vst [vmem:[#allocation112_spill] sm:$0xff] %v8837_v34  ;;  %v5437_v40 = vld [vmem:[#allocation9 + $0xd0] sm:$0xff]  ;;  %v10918_v30 = vld [vmem:[#allocation220_spill] sm:$0xff] }
 0x25b   :  { %v4362_v32 = vmax.f32 %v4282_v61, 0.0  ;;  %v8827_v26 = vmul.f32 %v5685_v55, %v5357_v42  ;;  %v8829_v20 = vmul.f32 %v5426_v39, %v5356_v0  ;;  %10914 = vst [vmem:[#allocation34_spill] sm:$0xff] %v8831_v54  ;;  %10916 = vst [vmem:[#allocation36_spill] sm:$0xff] %v8835_v13  ;;  %v4364_v61 = vmax.f32 %v4284_v45, 0.0  ;;  %v5695_v0 = vld [vmem:[#allocation9 + $0x350] sm:$0xff]  ;;  %v8848_v25 = vpop.f32.mrb[142].mxu1 }
 0x25c   :  { %vm5317_vm2 = vcmp.lt.u32.totalorder %v10918_v30, 2147483648  ;;  %v8842_v55 = vmul.f32 %v5686_v2, %v5358_v53  ;;  %v8844_v42 = vmul.f32 %v5435_v60, %v5375_v57  ;;  %v5377_v39 = vsel %vm5297_vm14, %v4363_v12, 0.0  ;;  %v5436_v2 = vld [vmem:[#allocation9 + $0xc8] sm:$0xff]  ;;  %v10923_v60 = vld [vmem:[#allocation212_spill] sm:$0xff]  ;;  %v8862_v6 = vpop.f32.mrb[143].mxu1 }
 0x25d   :  { %10912 = vst [vmem:[#allocation35_spill] sm:$0xff] %v8827_v26  ;;  %10913 = vst [vmem:[#allocation110_spill] sm:$0xff] %v8829_v20  ;;  %v8852_v28 = vmul.f32 %v5564_v38, %v5375_v57  ;;  %v8854_v45 = vmul.f32 %v5693_v9, %v5375_v57  ;;  %v5376_v53 = vsel %vm5296_vm15, %v4362_v32, 0.0  ;;  %v5565_v12 = vld [vmem:[#allocation9 + $0x208] sm:$0xff]  ;;  %v4303_v31 = vadd.f32 %v8619_v4, %v4199_v48  ;;  %v10926_v32 = vld [vmem:[#allocation215_spill] sm:$0xff]  ;;  %v8879_v26 = vpop.f32.mrb[144].mxu0 }
 0x25e   :  { %10919 = vst [vmem:[#allocation185_spill] sm:$0xff] %v8842_v55  ;;  %10920 = vst [vmem:[#allocation187_spill] sm:$0xff] %v8844_v42  ;;  %v4061_v42 = vmax.f32 %v10923_v60, %v8719_v59  ;;  %v10924_v38 = vld [vmem:[#allocation214_spill] sm:$0xff]  ;;  %v10925_v9 = vld [vmem:[#allocation213_spill] sm:$0xff]  ;;  %v8873_v59 = vmul.f32 %v5566_v52, %v5377_v39  ;;  %v8875_v60 = vmul.f32 %v5695_v0, %v5377_v39  ;;  %v5378_v34 = vsel %vm5298_vm0, %v4364_v61, 0.0 }
 0x25f   :  { %10921 = vst [vmem:[#allocation197_spill] sm:$0xff] %v8852_v28  ;;  %10922 = vst [vmem:[#allocation201_spill] sm:$0xff] %v8854_v45  ;;  %v4063_v57 = vmax.f32 %v10924_v38, %v8731_v23  ;;  %v4062_v21 = vmax.f32 %v10925_v9, %v8733_v3  ;;  %v4064_v45 = vmax.f32 %v10926_v32, %v8744_v43  ;;  %v5694_v55 = vld [vmem:[#allocation9 + $0x348] sm:$0xff]  ;;  %v5438_v48 = vld [vmem:[#allocation9 + $0xd8] sm:$0xff]  ;;  %v5395_v43 = vsel %vm5315_vm1, %v4381_v11, 0.0 }
 0x260   :  { %v8871_v28 = vmul.f32 %v5437_v40, %v5377_v39  ;;  %10928 = vst [vmem:[#allocation203_spill] sm:$0xff] %v8873_v59  ;;  %10929 = vst [vmem:[#allocation202_spill] sm:$0xff] %v8875_v60  ;;  %v5567_v13 = vld [vmem:[#allocation9 + $0x218] sm:$0xff]  ;;  %v8881_v23 = vmul.f32 %v5436_v2, %v5376_v53  ;;  %v5445_v40 = vld [vmem:[#allocation9 + $0x110] sm:$0xff]  ;;  %v8892_v59 = vpop.f32.mrb[144].mxu1  ;;  %v8896_v2 = vmul.f32 %v5565_v12, %v5376_v53  ;;  %vm5282_vm12 = vcmp.lt.u32.totalorder %v8373_v37, 2147483648 }
 0x261   :  { %v5696_v3 = vld [vmem:[#allocation9 + $0x358] sm:$0xff]  ;;  %v10932_v52 = vld [vmem:[#allocation45_spill] sm:$0xff]  ;;  %v10939_v1 = vld [vmem:[#allocation46_spill] sm:$0xff]  ;;  %v8912_v12 = vmul.f32 %v5567_v13, %v5378_v34 }
 0x262   :  { %10927 = vst [vmem:[#allocation204_spill] sm:$0xff] %v8871_v28  ;;  %10930 = vst [vmem:[#allocation205_spill] sm:$0xff] %v8881_v23  ;;  %v10931_v38 = vld [vmem:[#allocation223_spill] sm:$0xff]  ;;  %v10933_v39 = vld [vmem:[#allocation121_spill] sm:$0xff]  ;;  %v8894_v28 = vpop.f32.mrb[145].mxu0 }
 0x263   :  { %vm5316_vm5 = vcmp.lt.u32.totalorder %v10931_v38, 2147483648  ;;  %v10934_v0 = vmax.f32 %v10932_v52, %v10933_v39  ;;  %v10935_v32 = vld [vmem:[#allocation47_spill] sm:$0xff]  ;;  %10938 = vst [vmem:[#allocation37_spill] sm:$0xff] %v8896_v2  ;;  %v10942_v22 = vld [vmem:[#allocation48_spill] sm:$0xff]  ;;  %10948 = vst [vmem:[#allocation114_spill] sm:$0xff] %v8912_v12 }
 0x264   :  { %v10937_v61 = vmax.f32 %v10935_v32, %v10936_v50  ;;  %v5574_v23 = vld [vmem:[#allocation9 + $0x250] sm:$0xff]  ;;  %v10943_v54 = vld [vmem:[#allocation124_spill] sm:$0xff]  ;;  %v8910_v32 = vmul.f32 %v5438_v48, %v5378_v34  ;;  %v4383_v50 = vmax.f32 %v4303_v31, 0.0  ;;  %v10967_v30 = vld [vmem:[#allocation129_spill] sm:$0xff] }
 0x265   :  { %v4141_v9 = vmax.f32 %v10934_v0, %v4061_v42  ;;  %v10940_v11 = vld [vmem:[#allocation123_spill] sm:$0xff]  ;;  %v10944_v20 = vmax.f32 %v10942_v22, %v10943_v54  ;;  %v10945_v42 = vld [vmem:[#allocation216_spill] sm:$0xff]  ;;  %v8906_v0 = vpop.f32.mrb[145].mxu1  ;;  %v8926_v54 = vpop.f32.mrb[146].mxu0  ;;  %v8928_v22 = vmul.f32 %v5574_v23, %v5395_v43  ;;  %v10953_v31 = vld [vmem:[#allocation230_spill] sm:$0xff] }
 0x266   :  { %v4143_v60 = vmax.f32 %v10937_v61, %v4063_v57  ;;  %v10941_v10 = vmax.f32 %v10939_v1, %v10940_v11  ;;  %v4081_v39 = vmax.f32 %v10945_v42, %v8762_v24  ;;  %v8908_v57 = vmul.f32 %v5694_v55, %v5376_v53  ;;  %10947 = vst [vmem:[#allocation39_spill] sm:$0xff] %v8910_v32  ;;  %v8934_v53 = vpop.f32.mrb[146].mxu1  ;;  %v10955_v48 = vld [vmem:[#allocation126_spill] sm:$0xff]  ;;  %v10959_v11 = vld [vmem:[#allocation221_spill] sm:$0xff]  ;;  %v10994_v19 = vld [vmem:[#allocation224_spill] sm:$0xff] }
 0x267   :  { %v4144_v52 = vmax.f32 %v10944_v20, %v4064_v45  ;;  %v8915_v61 = vmul.f32 %v5696_v3, %v5378_v34  ;;  %v4302_v20 = vadd.f32 %v8619_v4, %v8806_v35  ;;  %v8923_v24 = vadd.f32 %v8619_v4, %v8811_v58  ;;  %10951 = vst [vmem:[#allocation115_spill] sm:$0xff] %v8928_v22  ;;  %v10952_v45 = vld [vmem:[#allocation239_spill] sm:$0xff]  ;;  %v8936_v35 = vpop.f32.mrb[147].mxu0  ;;  %v8948_v42 = vpop.f32.mrb[147].mxu1  ;;  %v5447_v22 = vld [vmem:[#allocation9 + $0x120] sm:$0xff]  ;;  %v5678_v62 = vld [vmem:[#allocation9 + $0x2c8] sm:$0xff] }
 0x268   :  { %v4142_v29 = vmax.f32 %v10941_v10, %v4062_v21  ;;  %10946 = vst [vmem:[#allocation113_spill] sm:$0xff] %v8908_v57  ;;  %v8917_v10 = vmul.f32 %v5445_v40, %v5395_v43  ;;  %v4245_v13 = vadd.f32 %v8383_v49, %v4141_v9  ;;  %v4247_v34 = vadd.f32 %v8383_v49, %v4143_v60  ;;  %v5703_v58 = vld [vmem:[#allocation9 + $0x390] sm:$0xff]  ;;  %v10954_v21 = vld [vmem:[#allocation49_spill] sm:$0xff]  ;;  %v10966_v57 = vld [vmem:[#allocation52_spill] sm:$0xff] }
 0x269   :  { %10949 = vst [vmem:[#allocation206_spill] sm:$0xff] %v8915_v61  ;;  %v4248_v55 = vadd.f32 %v8383_v49, %v4144_v52  ;;  %vm5279_vm8 = vcmp.lt.u32.totalorder %v10952_v45, 2147483648  ;;  %vm5318_vm9 = vcmp.lt.u32.totalorder %v10953_v31, 2147483648  ;;  %v10956_v3 = vmax.f32 %v10954_v21, %v10955_v48  ;;  %v10957_v40 = vld [vmem:[#allocation219_spill] sm:$0xff]  ;;  %v10958_v60 = vld [vmem:[#allocation218_spill] sm:$0xff]  ;;  %v11008_v7 = vld [vmem:[#allocation25_spill] sm:$0xff] }
 0x26a   :  { %10950 = vst [vmem:[#allocation38_spill] sm:$0xff] %v8917_v10  ;;  %v4083_v9 = vmax.f32 %v10957_v40, %v8772_v16  ;;  %v4082_v1 = vmax.f32 %v10958_v60, %v8774_v47  ;;  %v4084_v52 = vmax.f32 %v10959_v11, %v8784_v5  ;;  %v5397_v10 = vsel %vm5317_vm2, %v4383_v50, 0.0  ;;  %v10961_v16 = vld [vmem:[#allocation127_spill] sm:$0xff]  ;;  %v10963_v47 = vld [vmem:[#allocation50_spill] sm:$0xff]  ;;  %v10964_v5 = vld [vmem:[#allocation128_spill] sm:$0xff] }
 0x26b   :  { %v4161_v23 = vmax.f32 %v10956_v3, %v4081_v39  ;;  %v4327_v61 = vmax.f32 %v4247_v34, 0.0  ;;  %v4246_v12 = vadd.f32 %v8383_v49, %v4142_v29  ;;  %v4328_v21 = vmax.f32 %v4248_v55, 0.0  ;;  %v5576_v39 = vld [vmem:[#allocation9 + $0x260] sm:$0xff]  ;;  %v10960_v3 = vld [vmem:[#allocation51_spill] sm:$0xff]  ;;  %v8963_v34 = vpop.f32.mrb[148].mxu0  ;;  %v10993_v17 = vld [vmem:[#allocation270_spill] sm:$0xff] }
 0x26c   :  { %v4382_v48 = vmax.f32 %v4302_v20, 0.0  ;;  %v10962_v40 = vmax.f32 %v10960_v3, %v10961_v16  ;;  %v10965_v60 = vmax.f32 %v10963_v47, %v10964_v5  ;;  %v10968_v50 = vmax.f32 %v10966_v57, %v10967_v30  ;;  %10969 = vst [vmem:[#allocation40_spill] sm:$0xff] %v8963_v34  ;;  %v8973_v3 = vpop.f32.mrb[148].mxu1  ;;  %v10976_v47 = vld [vmem:[#allocation19_spill] sm:$0xff] }
 0x26d   :  { %v8965_v29 = vmul.f32 %v5703_v58, %v5395_v43  ;;  %v5341_v20 = vsel %vm5261_vm3, %v4327_v61, 0.0  ;;  %v5342_v55 = vsel %vm5262_vm4, %v4328_v21, 0.0  ;;  %10971 = vst [vmem:[#allocation207_spill] sm:$0xff] %v8973_v3  ;;  %v8977_v57 = vmul.f32 %v5447_v22, %v5397_v10  ;;  %v5705_v21 = vld [vmem:[#allocation9 + $0x3a0] sm:$0xff]  ;;  %v5446_v22 = vld [vmem:[#allocation9 + $0x118] sm:$0xff] }
 0x26e   :  { %v4163_v32 = vmax.f32 %v10962_v40, %v4083_v9  ;;  %v4162_v11 = vmax.f32 %v10965_v60, %v4082_v1  ;;  %v4164_v2 = vmax.f32 %v10968_v50, %v4084_v52  ;;  %v4265_v9 = vadd.f32 %v8440_v18, %v4161_v23  ;;  %v8975_v1 = vpop.f32.mrb[149].mxu0  ;;  %v5575_v5 = vld [vmem:[#allocation9 + $0x258] sm:$0xff]  ;;  %v5677_v50 = vld [vmem:[#allocation9 + $0x2c0] sm:$0xff] }
 0x26f   :  { %10970 = vst [vmem:[#allocation116_spill] sm:$0xff] %v8965_v29  ;;  %10972 = vst [vmem:[#allocation211_spill] sm:$0xff] %v8975_v1  ;;  %v4384_v52 = vmax.f32 %v8923_v24, 0.0  ;;  %v4325_v43 = vmax.f32 %v4245_v13, 0.0  ;;  %v5804_v58 = vmul.f32 %v8450_v41, %v5341_v20  ;;  %v8982_v44 = vmul.f32 %v5576_v39, %v5397_v10  ;;  %v10975_v24 = vld [vmem:[#allocation178_spill] sm:$0xff]  ;;  %v5704_v60 = vld [vmem:[#allocation9 + $0x398] sm:$0xff] }
 0x270   :  { %10973 = vst [vmem:[#allocation41_spill] sm:$0xff] %v8977_v57  ;;  %v5892_v8 = vmul.f32 %v8452_v36, %v5341_v20  ;;  %v5980_v61 = vmul.f32 %v8465_v56, %v5341_v20  ;;  %v4326_v23 = vmax.f32 %v4246_v12, 0.0  ;;  %v5396_v16 = vsel %vm5316_vm5, %v4382_v48, 0.0  ;;  %v5419_v12 = vld [vmem:[#allocation9 + $0x40] sm:$0xff]  ;;  %v5680_v31 = vld [vmem:[#allocation9 + $0x2d8] sm:$0xff]  ;;  %v11011_v1 = vld [vmem:[#allocation54_spill] sm:$0xff] }
 0x271   :  { %10974 = vst [vmem:[#allocation117_spill] sm:$0xff] %v8982_v44  ;;  %v5805_v40 = vmul.f32 %v8477_v15, %v5342_v55  ;;  %v5893_v13 = vmul.f32 %v10975_v24, %v5342_v55  ;;  %v5981_v41 = vmul.f32 %v10976_v47, %v5342_v55  ;;  %v4345_v39 = vmax.f32 %v4265_v9, 0.0  ;;  %v5548_v48 = vld [vmem:[#allocation9 + $0x180] sm:$0xff] }
 0x272   :  { %v4267_v30 = vadd.f32 %v8440_v18, %v4163_v32  ;;  %v4266_v36 = vadd.f32 %v8440_v18, %v4162_v11  ;;  %v4268_v56 = vadd.f32 %v8440_v18, %v4164_v2  ;;  %v5339_v38 = vsel %vm5259_vm6, %v4325_v43, 0.0  ;;  %v5420_v2 = vld [vmem:[#allocation9 + $0x48] sm:$0xff]  ;;  %v11030_v3 = vld [vmem:[#allocation136_spill] sm:$0xff] }
 0x273   :  { %v8996_v15 = vadd.f32 %v5805_v40, %v5804_v58  ;;  %v8998_v20 = vadd.f32 %v5893_v13, %v5892_v8  ;;  %v9000_v55 = vadd.f32 %v5981_v41, %v5980_v61  ;;  %v9002_v24 = vmul.f32 %v5705_v21, %v5397_v10  ;;  %v5549_v11 = vld [vmem:[#allocation9 + $0x188] sm:$0xff]  ;;  %v5429_v8 = vld [vmem:[#allocation9 + $0x90] sm:$0xff]  ;;  %v9014_v21 = vld [vmem:[#allocation9 + $0x58] sm:$0xff] }
 0x274   :  { %v9004_v9 = vmul.f32 %v5446_v22, %v5396_v16  ;;  %v5340_v32 = vsel %vm5260_vm7, %v4326_v23, 0.0  ;;  %v4347_v43 = vmax.f32 %v4267_v30, 0.0  ;;  %v9008_v47 = vmul.f32 %v5575_v5, %v5396_v16  ;;  %v5558_v61 = vld [vmem:[#allocation9 + $0x1d0] sm:$0xff]  ;;  %v5551_v30 = vld [vmem:[#allocation9 + $0x198] sm:$0xff] }
 0x275   :  { %10977 = vst [vmem:[#allocation217_spill] sm:$0xff] %v9002_v24  ;;  %v9010_v57 = vmul.f32 %v5704_v60, %v5396_v16  ;;  %v5359_v58 = vsel %vm5279_vm8, %v4345_v39, 0.0  ;;  %v4346_v10 = vmax.f32 %v4266_v36, 0.0  ;;  %v10981_v22 = vld [vmem:[#allocation267_spill] sm:$0xff]  ;;  %v9019_v63 = vsel %vm5318_vm9, %v4384_v52, 0.0  ;;  %v10984_v52 = vld [vmem:[#allocation266_spill] sm:$0xff] }
 0x276   :  { %10978 = vst [vmem:[#allocation209_spill] sm:$0xff] %v9004_v9  ;;  %10979 = vst [vmem:[#allocation208_spill] sm:$0xff] %v9008_v47  ;;  %vm5291_vm13 = vcmp.lt.u32.totalorder %v10981_v22, 2147483648  ;;  %v9021_v23 = vmul.f32 %v5419_v12, %v5339_v38  ;;  %v9023_v40 = vmul.f32 %v5548_v48, %v5339_v38  ;;  %v5687_v16 = vld [vmem:[#allocation9 + $0x310] sm:$0xff]  ;;  %v4348_v13 = vmax.f32 %v4268_v56, 0.0  ;;  %v10987_v48 = vld [vmem:[#allocation176_spill] sm:$0xff] }
 0x277   :  { %10980 = vst [vmem:[#allocation210_spill] sm:$0xff] %v9010_v57  ;;  %10982 = vst [vmem:[#allocation43_spill] sm:$0xff] %v9019_v63  ;;  %v10983_v41 = vld [vmem:[#allocation271_spill] sm:$0xff]  ;;  %v9026_v45 = vmul.f32 %v5677_v50, %v5339_v38  ;;  %v9028_v5 = vmul.f32 %v5420_v2, %v5340_v32  ;;  %v9030_v60 = vmul.f32 %v5549_v11, %v5340_v32  ;;  %vm5299_vm15 = vcmp.lt.u32.totalorder %v10984_v52, 2147483648  ;;  %v10988_v50 = vld [vmem:[#allocation268_spill] sm:$0xff] }
 0x278   :  { %vm5292_vm14 = vcmp.lt.u32.totalorder %v10983_v41, 2147483648  ;;  %v9032_v39 = vmul.f32 %v5678_v62, %v5340_v32  ;;  %v9035_v36 = vmul.f32 %v5429_v8, %v5359_v58  ;;  %v9037_v12 = vmul.f32 %v5558_v61, %v5359_v58  ;;  %v5430_v11 = vld [vmem:[#allocation9 + $0x98] sm:$0xff]  ;;  %v10990_v62 = vld [vmem:[#allocation198_spill] sm:$0xff]  ;;  %v10992_v61 = vld [vmem:[#allocation225_spill] sm:$0xff] }
 0x279   :  { %v5361_v56 = vsel %vm5281_vm10, %v4347_v43, 0.0  ;;  %v9043_v38 = vmul.f32 %v9014_v21, %v10987_v48  ;;  %vm5301_vm0 = vcmp.lt.u32.totalorder %v10988_v50, 2147483648  ;;  %v9046_v2 = vmul.f32 %v5687_v16, %v5359_v58  ;;  %v10991_v8 = vld [vmem:[#allocation222_spill] sm:$0xff]  ;;  %v10995_v16 = vld [vmem:[#allocation276_spill] sm:$0xff]  ;;  %v11002_v47 = vld [vmem:[#allocation131_spill] sm:$0xff] }
 0x27a   :  { %10985 = vst [vmem:[#allocation118_spill] sm:$0xff] %v9035_v36  ;;  %10986 = vst [vmem:[#allocation42_spill] sm:$0xff] %v9037_v12  ;;  %v5360_v32 = vsel %vm5280_vm11, %v4346_v10, 0.0  ;;  %v4101_v24 = vmax.f32 %v10991_v8, %v10990_v62  ;;  %v4103_v57 = vmax.f32 %v10992_v61, %v8813_v46  ;;  %vm5300_vm1 = vcmp.lt.u32.totalorder %v10993_v17, 2147483648  ;;  %v10996_v62 = vld [vmem:[#allocation189_spill] sm:$0xff]  ;;  %v5559_v46 = vld [vmem:[#allocation9 + $0x1d8] sm:$0xff] }
 0x27b   :  { %10989 = vst [vmem:[#allocation119_spill] sm:$0xff] %v9046_v2  ;;  %v5362_v43 = vsel %vm5282_vm12, %v4348_v13, 0.0  ;;  %v9058_v29 = vmul.f32 %v5551_v30, %v10987_v48  ;;  %v9061_v58 = vmul.f32 %v5680_v31, %v10987_v48  ;;  %v4102_v10 = vmax.f32 %v10994_v19, %v8815_v33  ;;  %v10998_v61 = vld [vmem:[#allocation53_spill] sm:$0xff]  ;;  %v10999_v9 = vld [vmem:[#allocation130_spill] sm:$0xff]  ;;  %v11001_v13 = vld [vmem:[#allocation55_spill] sm:$0xff] }
 0x27c   :  { %vm5311_vm2 = vcmp.lt.u32.totalorder %v10995_v16, 2147483648  ;;  %v9067_v8 = vmul.f32 %v10996_v62, %v5361_v56  ;;  %v11000_v44 = vmax.f32 %v10998_v61, %v10999_v9  ;;  %v11003_v63 = vmax.f32 %v11001_v13, %v11002_v47  ;;  %v11004_v48 = vld [vmem:[#allocation226_spill] sm:$0xff]  ;;  %v11005_v36 = vld [vmem:[#allocation273_spill] sm:$0xff]  ;;  %v11006_v33 = vld [vmem:[#allocation188_spill] sm:$0xff]  ;;  %v9089_v61 = vpop.f32.mrb[149].mxu1 }
 0x27d   :  { %v4104_v12 = vmax.f32 %v11004_v48, %v8823_v27  ;;  %vm5302_vm3 = vcmp.lt.u32.totalorder %v11005_v36, 2147483648  ;;  %v9079_v19 = vmul.f32 %v11006_v33, %v5361_v56  ;;  %v9082_v62 = vmul.f32 %v11008_v7, %v5361_v56  ;;  %v11012_v9 = vld [vmem:[#allocation132_spill] sm:$0xff]  ;;  %11014 = vst [vmem:[#allocation214_spill] sm:$0xff] %v9089_v61  ;;  %v11016_v47 = vld [vmem:[#allocation183_spill] sm:$0xff]  ;;  %v11018_v48 = vld [vmem:[#allocation133_spill] sm:$0xff] }
 0x27e   :  { %10997 = vst [vmem:[#allocation44_spill] sm:$0xff] %v9067_v8  ;;  %v4181_v37 = vmax.f32 %v11000_v44, %v4101_v24  ;;  %v4183_v2 = vmax.f32 %v11003_v63, %v4103_v57  ;;  %v9084_v8 = vmul.f32 %v5430_v11, %v5360_v32  ;;  %v11013_v44 = vmax.f32 %v11011_v1, %v11012_v9  ;;  %v9091_v57 = vpop.f32.mrb[150].mxu0  ;;  %v11017_v13 = vld [vmem:[#allocation56_spill] sm:$0xff]  ;;  %v11020_v7 = vld [vmem:[#allocation227_spill] sm:$0xff] }
 0x27f   :  { %11007 = vst [vmem:[#allocation120_spill] sm:$0xff] %v9079_v19  ;;  %11009 = vst [vmem:[#allocation220_spill] sm:$0xff] %v9082_v62  ;;  %v11019_v33 = vmax.f32 %v11017_v13, %v11018_v48  ;;  %v4121_v56 = vmax.f32 %v11020_v7, %v8840_v14  ;;  %v9100_v11 = vmul.f32 %v5559_v46, %v5360_v32  ;;  %v5688_v62 = vld [vmem:[#allocation9 + $0x318] sm:$0xff]  ;;  %v11024_v13 = vld [vmem:[#allocation57_spill] sm:$0xff] }
 0x280   :  { %11010 = vst [vmem:[#allocation212_spill] sm:$0xff] %v9084_v8  ;;  %v4182_v24 = vmax.f32 %v11013_v44, %v4102_v10  ;;  %11015 = vst [vmem:[#allocation213_spill] sm:$0xff] %v9091_v57  ;;  %v4285_v27 = vadd.f32 %v11016_v47, %v4181_v37  ;;  %v4287_v63 = vadd.f32 %v11016_v47, %v4183_v2  ;;  %v11022_v10 = vld [vmem:[#allocation229_spill] sm:$0xff]  ;;  %v11023_v44 = vld [vmem:[#allocation228_spill] sm:$0xff] }
 0x281   :  { %v4184_v19 = vmax.f32 %v11019_v33, %v4104_v12  ;;  %11021 = vst [vmem:[#allocation215_spill] sm:$0xff] %v9100_v11  ;;  %v4123_v9 = vmax.f32 %v11022_v10, %v8848_v25  ;;  %v4122_v37 = vmax.f32 %v11023_v44, %v8850_v51  ;;  %v11025_v12 = vld [vmem:[#allocation135_spill] sm:$0xff]  ;;  %v11027_v14 = vld [vmem:[#allocation24_spill] sm:$0xff]  ;;  %v11033_v44 = vld [vmem:[#allocation137_spill] sm:$0xff]  ;;  %v9121_v34 = vmul.f32 %v5688_v62, %v5360_v32 }
 0x282   :  { %v4286_v1 = vadd.f32 %v11016_v47, %v4182_v24  ;;  %v4365_v57 = vmax.f32 %v4285_v27, 0.0  ;;  %v4367_v2 = vmax.f32 %v4287_v63, 0.0  ;;  %v11026_v48 = vmax.f32 %v11024_v13, %v11025_v12  ;;  %v5431_v24 = vld [vmem:[#allocation9 + $0xa0] sm:$0xff]  ;;  %v11029_v10 = vld [vmem:[#allocation59_spill] sm:$0xff]  ;;  %v11032_v63 = vld [vmem:[#allocation58_spill] sm:$0xff] }
 0x283   :  { %v4288_v8 = vadd.f32 %v11016_v47, %v4184_v19  ;;  %v11028_v46 = vmax.f32 %v11027_v14, 0.0  ;;  %v5560_v11 = vld [vmem:[#allocation9 + $0x1e0] sm:$0xff]  ;;  %v11031_v51 = vmax.f32 %v11029_v10, %v11030_v3  ;;  %v11034_v19 = vmax.f32 %v11032_v63, %v11033_v44  ;;  %11035 = vst [vmem:[#allocation223_spill] sm:$0xff] %v9121_v34  ;;  %v5690_v14 = vld [vmem:[#allocation9 + $0x328] sm:$0xff] }
 0x284   :  { %v4201_v33 = vmax.f32 %v11026_v48, %v4121_v56  ;;  %v5689_v61 = vld [vmem:[#allocation9 + $0x320] sm:$0xff]  ;;  %v4366_v25 = vmax.f32 %v4286_v1, 0.0  ;;  %v9124_v56 = vmul.f32 %v9014_v21, %v5362_v43  ;;  %v5432_v48 = vld [vmem:[#allocation9 + $0xa8] sm:$0xff]  ;;  %v9132_v10 = vmul.f32 %v5551_v30, %v5362_v43 }
 0x285   :  { %v5371_v7 = vsel %vm5291_vm13, %v11028_v46, 0.0  ;;  %v4203_v27 = vmax.f32 %v11031_v51, %v4123_v9  ;;  %v4202_v47 = vmax.f32 %v11034_v19, %v4122_v37  ;;  %v11037_v13 = vld [vmem:[#allocation100_spill] sm:$0xff]  ;;  %v5561_v1 = vld [vmem:[#allocation9 + $0x1e8] sm:$0xff]  ;;  %v9134_v37 = vmul.f32 %v5680_v31, %v5362_v43  ;;  %v9138_v51 = vpop.f32.mrb[150].mxu1 }
 0x286   :  { %11036 = vst [vmem:[#allocation45_spill] sm:$0xff] %v9124_v56  ;;  %v11038_v22 = vmax.f32 %v11037_v13, 0.0  ;;  %v11039_v46 = vld [vmem:[#allocation104_spill] sm:$0xff]  ;;  %v11040_v9 = vld [vmem:[#allocation277_spill] sm:$0xff]  ;;  %11041 = vst [vmem:[#allocation121_spill] sm:$0xff] %v9132_v10  ;;  %v5379_v21 = vsel %vm5299_vm15, %v4365_v57, 0.0  ;;  %v9142_v19 = vmul.f32 %v5431_v24, %v5371_v7  ;;  %v9144_v13 = vmul.f32 %v5560_v11, %v5371_v7 }
 0x287   :  { %v4377_v3 = vmax.f32 %v11039_v46, 0.0  ;;  %vm5321_vm4 = vcmp.lt.u32.totalorder %v11040_v9, 2147483648  ;;  %11042 = vst [vmem:[#allocation47_spill] sm:$0xff] %v9134_v37  ;;  %v5439_v32 = vld [vmem:[#allocation9 + $0xe0] sm:$0xff]  ;;  %v4368_v62 = vmax.f32 %v4288_v8, 0.0  ;;  %11043 = vst [vmem:[#allocation122_spill] sm:$0xff] %v9138_v51  ;;  %v9146_v30 = vmul.f32 %v5689_v61, %v5371_v7 }
 0x288   :  { %v5372_v12 = vsel %vm5292_vm14, %v11038_v22, 0.0  ;;  %v5568_v41 = vld [vmem:[#allocation9 + $0x220] sm:$0xff]  ;;  %v5381_v44 = vsel %vm5301_vm0, %v4367_v2, 0.0  ;;  %11044 = vst [vmem:[#allocation46_spill] sm:$0xff] %v9142_v19  ;;  %11045 = vst [vmem:[#allocation123_spill] sm:$0xff] %v9144_v13  ;;  %v11047_v31 = vld [vmem:[#allocation274_spill] sm:$0xff]  ;;  %v9157_v50 = vmul.f32 %v5439_v32, %v5379_v21  ;;  %v4305_v46 = vadd.f32 %v8619_v4, %v4201_v33 }
 0x289   :  { %v5697_v63 = vld [vmem:[#allocation9 + $0x360] sm:$0xff]  ;;  %11046 = vst [vmem:[#allocation48_spill] sm:$0xff] %v9146_v30  ;;  %vm5319_vm5 = vcmp.lt.u32.totalorder %v11047_v31, 2147483648  ;;  %v5380_v52 = vsel %vm5300_vm1, %v4366_v25, 0.0  ;;  %v5440_v43 = vld [vmem:[#allocation9 + $0xe8] sm:$0xff]  ;;  %v9151_v8 = vmul.f32 %v5432_v48, %v5372_v12  ;;  %v9153_v57 = vmul.f32 %v5561_v1, %v5372_v12  ;;  %v5543_v13 = vld [vmem:[#allocation9 + $0x158] sm:$0xff] }
 0x28a   :  { %v9155_v22 = vmul.f32 %v5690_v14, %v5372_v12  ;;  %11051 = vst [vmem:[#allocation230_spill] sm:$0xff] %v9157_v50  ;;  %v5569_v2 = vld [vmem:[#allocation9 + $0x228] sm:$0xff]  ;;  %v4307_v7 = vadd.f32 %v8619_v4, %v4203_v27  ;;  %v5391_v37 = vsel %vm5311_vm2, %v4377_v3, 0.0  ;;  %v9163_v10 = vmul.f32 %v5568_v41, %v5379_v21  ;;  %v11058_v27 = vld [vmem:[#allocation231_spill] sm:$0xff] }
 0x28b   :  { %11048 = vst [vmem:[#allocation124_spill] sm:$0xff] %v9151_v8  ;;  %11049 = vst [vmem:[#allocation216_spill] sm:$0xff] %v9153_v57  ;;  %v9165_v17 = vmul.f32 %v5697_v63, %v5379_v21  ;;  %v9167_v25 = vmul.f32 %v5431_v24, %v5381_v44  ;;  %v5698_v56 = vld [vmem:[#allocation9 + $0x368] sm:$0xff]  ;;  %v5382_v12 = vsel %vm5302_vm3, %v4368_v62, 0.0  ;;  %v9171_v32 = vmul.f32 %v5560_v11, %v5381_v44  ;;  %v5441_v21 = vld [vmem:[#allocation9 + $0xf0] sm:$0xff] }
 0x28c   :  { %11050 = vst [vmem:[#allocation239_spill] sm:$0xff] %v9155_v22  ;;  %11052 = vst [vmem:[#allocation49_spill] sm:$0xff] %v9163_v10  ;;  %v9173_v50 = vmul.f32 %v5689_v61, %v5381_v44  ;;  %v9175_v33 = vmul.f32 %v5440_v43, %v5380_v52  ;;  %v4124_v16 = vmax.f32 %v11058_v27, %v8862_v6  ;;  %v4387_v41 = vmax.f32 %v4307_v7, 0.0  ;;  %v11060_v24 = vld [vmem:[#allocation232_spill] sm:$0xff]  ;;  %v5570_v61 = vld [vmem:[#allocation9 + $0x230] sm:$0xff] }
 0x28d   :  { %11053 = vst [vmem:[#allocation126_spill] sm:$0xff] %v9165_v17  ;;  %11054 = vst [vmem:[#allocation219_spill] sm:$0xff] %v9167_v25  ;;  %v9179_v3 = vmul.f32 %v5569_v2, %v5380_v52  ;;  %v4065_v63 = vmax.f32 %v11060_v24, %v8879_v26  ;;  %v11061_v25 = vld [vmem:[#allocation175_spill] sm:$0xff]  ;;  %v9184_v36 = vmul.f32 %v5698_v56, %v5380_v52  ;;  %v11064_v44 = vld [vmem:[#allocation60_spill] sm:$0xff]  ;;  %v9203_v24 = vpop.f32.mrb[151].mxu0 }
 0x28e   :  { %11055 = vst [vmem:[#allocation218_spill] sm:$0xff] %v9171_v32  ;;  %11056 = vst [vmem:[#allocation221_spill] sm:$0xff] %v9173_v50  ;;  %v4783_v17 = vmul.u32 2146121005, %v11061_v25  ;;  %v9186_v11 = vmul.f32 %v5432_v48, %v5382_v12  ;;  %v9188_v62 = vld [vmem:[#allocation9 + $0x370] sm:$0xff]  ;;  %v4385_v50 = vmax.f32 %v4305_v46, 0.0  ;;  %v9198_v26 = vadd.f32 %v8619_v4, %v4202_v47 }
 0x28f   :  { %11057 = vst [vmem:[#allocation51_spill] sm:$0xff] %v9175_v33  ;;  %11059 = vst [vmem:[#allocation127_spill] sm:$0xff] %v9179_v3  ;;  %v11065_v43 = vld [vmem:[#allocation138_spill] sm:$0xff]  ;;  %v9195_v3 = vmul.f32 %v5561_v1, %v5382_v12  ;;  %v11071_v56 = vld [vmem:[#allocation61_spill] sm:$0xff]  ;;  %v9213_v1 = vsel %vm5321_vm4, %v4387_v41, 0.0  ;;  %v9215_v47 = vmul.f32 %v5570_v61, %v5391_v37  ;;  %v9218_v46 = vmul.f32 %v9188_v62, %v5391_v37 }
 0x290   :  { %11062 = vst [vmem:[#allocation50_spill] sm:$0xff] %v9184_v36  ;;  %11063 = vst [vmem:[#allocation128_spill] sm:$0xff] %v9186_v11  ;;  %v11066_v33 = vmax.f32 %v11064_v44, %v11065_v43  ;;  %v11067_v2 = vld [vmem:[#allocation22_spill] sm:$0xff]  ;;  %v11072_v52 = vld [vmem:[#allocation139_spill] sm:$0xff]  ;;  %v9205_v36 = vmul.f32 %v5690_v14, %v5382_v12  ;;  %v9207_v11 = vmul.f32 %v5441_v21, %v5391_v37  ;;  %v9229_v9 = vsel %vm5319_vm5, %v4385_v50, 0.0 }
 0x291   :  { %v11068_v27 = vmul.u32 2146121005, %v11067_v2  ;;  %11069 = vst [vmem:[#allocation52_spill] sm:$0xff] %v9195_v3  ;;  %11070 = vst [vmem:[#allocation129_spill] sm:$0xff] %v9198_v26  ;;  %v11073_v48 = vmax.f32 %v11071_v56, %v11072_v52  ;;  %v11081_v2 = vld [vmem:[#allocation234_spill] sm:$0xff]  ;;  %v11083_v56 = vld [vmem:[#allocation21_spill] sm:$0xff]  ;;  %v9243_v31 = vmul.f32 %v5570_v61, %v9213_v1 }
 0x292   :  { %v4204_v6 = vmax.f32 %v11066_v33, %v4124_v16  ;;  %11074 = vst [vmem:[#allocation178_spill] sm:$0xff] %v9203_v24  ;;  %11075 = vst [vmem:[#allocation19_spill] sm:$0xff] %v9205_v36  ;;  %v4863_v33 = vshrl.u32 %v4783_v17, 15  ;;  %v4625_v37 = vshrl.u32 %v11083_v56, 16  ;;  %v11084_v52 = vld [vmem:[#allocation233_spill] sm:$0xff]  ;;  %v11092_v26 = vld [vmem:[#allocation142_spill] sm:$0xff] }
 0x293   :  { %v4853_v7 = vshrl.u32 %v11068_v27, 15  ;;  %v4145_v25 = vmax.f32 %v11073_v48, %v4065_v63  ;;  %11076 = vst [vmem:[#allocation267_spill] sm:$0xff] %v9207_v11  ;;  %v11077_v16 = vmov %v11068_v27  ;;  %11078 = vst [vmem:[#allocation271_spill] sm:$0xff] %v9215_v47  ;;  %v11080_v63 = vld [vmem:[#allocation181_spill] sm:$0xff]  ;;  %v4066_v48 = vmax.f32 %v11084_v52, %v8894_v28  ;;  %v11096_v50 = vld [vmem:[#allocation98_spill] sm:$0xff] }
 0x294   :  { %11079 = vst [vmem:[#allocation266_spill] sm:$0xff] %v9218_v46  ;;  %v9222_v43 = vadd.f32 %v8619_v4, %v11080_v63  ;;  %v4943_v12 = vxor.u32 %v4863_v33, %v4783_v17  ;;  %11082 = vst [vmem:[#allocation176_spill] sm:$0xff] %v9229_v9  ;;  %v11086_v17 = vld [vmem:[#allocation63_spill] sm:$0xff]  ;;  %v11087_v33 = vld [vmem:[#allocation141_spill] sm:$0xff] }
 0x295   :  { %v4933_v44 = vxor.u32 %v4853_v7, %v11077_v16  ;;  %v4249_v14 = vadd.f32 %v8383_v49, %v4145_v25  ;;  %v4067_v7 = vmax.f32 %v11081_v2, %v8892_v59  ;;  %v11085_v16 = vld [vmem:[#allocation190_spill] sm:$0xff]  ;;  %v9240_v59 = vmul.f32 %v5441_v21, %v9213_v1  ;;  %11090 = vst [vmem:[#allocation198_spill] sm:$0xff] %v9243_v31  ;;  %v11101_v3 = vld [vmem:[#allocation95_spill] sm:$0xff] }
 0x296   :  { %v4319_v63 = vmax.f32 %v11085_v16, 0.0  ;;  %v5023_v46 = vmul.u32 2221713035, %v4943_v12  ;;  %v4705_v2 = vxor.u32 %v4625_v37, %v11083_v56  ;;  %v5413_v16 = vld [vmem:[#allocation9 + $0x10] sm:$0xff]  ;;  %v5672_v19 = vld [vmem:[#allocation9 + $0x298] sm:$0xff] }
 0x297   :  { %v5013_v27 = vmul.u32 2221713035, %v4933_v44  ;;  %v11088_v44 = vmax.f32 %v11086_v17, %v11087_v33  ;;  %11089 = vst [vmem:[#allocation268_spill] sm:$0xff] %v9240_v59  ;;  %v4329_v41 = vmax.f32 %v4249_v14, 0.0  ;;  %v11091_v12 = vld [vmem:[#allocation62_spill] sm:$0xff]  ;;  %v9257_v14 = vadd.f32 %v8619_v4, %v4204_v6  ;;  %v11103_v4 = vld [vmem:[#allocation96_spill] sm:$0xff] }
 0x298   :  { %v5103_v28 = vshrl.u32 %v5023_v46, 16  ;;  %v11093_v9 = vmax.f32 %v11091_v12, %v11092_v26  ;;  %v5542_v17 = vld [vmem:[#allocation9 + $0x150] sm:$0xff]  ;;  %v4785_v33 = vmul.u32 2146121005, %v4705_v2 }
 0x299   :  { %v5093_v25 = vshrl.u32 %v5013_v27, 16  ;;  %v4147_v11 = vmax.f32 %v11088_v44, %v4067_v7  ;;  %v5671_v7 = vld [vmem:[#allocation9 + $0x290] sm:$0xff]  ;;  %v11094_v44 = vld [vmem:[#allocation97_spill] sm:$0xff] }
 0x29a   :  { %v4146_v47 = vmax.f32 %v11093_v9, %v4066_v48  ;;  %v9252_v61 = vmul.u32 2246822519, %v11094_v44  ;;  %v11095_v31 = vld [vmem:[#allocation134_spill] sm:$0xff]  ;;  %v11098_v9 = vld [vmem:[#allocation23_spill] sm:$0xff] }
 0x29b   :  { %v5173_v52 = vxor.u32 %v5093_v25, %v5013_v27  ;;  %v4251_v21 = vadd.f32 %v8383_v49, %v4147_v11  ;;  %v4453_v59 = vadd.s32 %v11096_v50, %v11095_v31  ;;  %v5183_v27 = vxor.u32 %v5103_v28, %v5023_v46  ;;  %v11097_v56 = vld [vmem:[#allocation278_spill] sm:$0xff]  ;;  %v11099_v25 = vld [vmem:[#allocation140_spill] sm:$0xff]  ;;  %v11127_v57 = vld [vmem:[#allocation27_spill] sm:$0xff] }
 0x29c   :  { %v9261_v26 = vadd.f32 %v8383_v49, %v11097_v56  ;;  %vm5312_vm7 = vcmp.lt.u32.totalorder %v11098_v9, 2147483648  ;;  %v4865_v11 = vshrl.u32 %v4785_v33, 15  ;;  %v4463_v48 = vadd.s32 %v9252_v61, %v11095_v31  ;;  %v9268_v56 = vpop.f32.mrb[151].mxu1 }
 0x29d   :  { %vm5253_vm6 = vcmp.lt.u32.totalorder %v5173_v52, 2147483648  ;;  %v4534_v2 = vadd.s32 %v11099_v25, %v4453_v59  ;;  %vm5263_vm8 = vcmp.lt.u32.totalorder %v5183_v27, 2147483648  ;;  %v4331_v46 = vmax.f32 %v4251_v21, 0.0  ;;  %11100 = vst [vmem:[#allocation222_spill] sm:$0xff] %v9268_v56  ;;  %v9279_v21 = vpop.f32.mrb[152].mxu0  ;;  %v11112_v56 = vld [vmem:[#allocation262_spill] sm:$0xff] }
 0x29e   :  { %v5333_v37 = vsel %vm5253_vm6, %v4319_v63, 0.0  ;;  %v5343_v36 = vsel %vm5263_vm8, %v4329_v41, 0.0  ;;  %v4945_v28 = vxor.u32 %v4865_v11, %v4785_v33  ;;  %v4544_v52 = vadd.s32 %v11099_v25, %v4463_v48  ;;  %v11102_v63 = vld [vmem:[#allocation20_spill] sm:$0xff]  ;;  %11104 = vst [vmem:[#allocation225_spill] sm:$0xff] %v9279_v21 }
 0x29f   :  { %v5453_v12 = vmul.f32 %v5413_v16, %v5333_v37  ;;  %v5582_v44 = vmul.f32 %v5542_v17, %v5333_v37  ;;  %v5711_v6 = vmul.f32 %v5671_v7, %v5333_v37  ;;  %v5806_v59 = vmul.f32 %v5413_v16, %v5343_v36  ;;  %v11110_v21 = vld [vmem:[#allocation236_spill] sm:$0xff] }
 0x2a0   :  { %v5894_v27 = vmul.f32 %v5542_v17, %v5343_v36  ;;  %v5982_v51 = vmul.f32 %v5671_v7, %v5343_v36  ;;  %v5025_v37 = vmul.u32 2221713035, %v4945_v28  ;;  %v4614_v41 = vshrl.u32 %v4534_v2, 16  ;;  %v11107_v7 = vld [vmem:[#allocation64_spill] sm:$0xff] }
 0x2a1   :  { %v9271_v32 = vadd.f32 %v11101_v3, %v5453_v12  ;;  %v9274_v10 = vadd.f32 %v11102_v63, %v5582_v44  ;;  %v9277_v24 = vadd.f32 %v11103_v4, %v5711_v6  ;;  %v9282_v33 = vadd.f32 %v8996_v15, %v5806_v59  ;;  %v11105_v3 = vld [vmem:[#allocation235_spill] sm:$0xff]  ;;  %v11106_v12 = vld [vmem:[#allocation125_spill] sm:$0xff] }
 0x2a2   :  { %v4624_v11 = vshrl.u32 %v4544_v52, 16  ;;  %v4068_v48 = vmax.f32 %v11105_v3, %v8906_v0  ;;  %v4421_v44 = vadd.s32 1920, %v11106_v12  ;;  %v9288_v63 = vadd.f32 %v8998_v20, %v5894_v27  ;;  %v11108_v6 = vld [vmem:[#allocation143_spill] sm:$0xff]  ;;  %v11111_v27 = vld [vmem:[#allocation144_spill] sm:$0xff] }
 0x2a3   :  { %v9291_v4 = vadd.f32 %v9000_v55, %v5982_v51  ;;  %v5105_v36 = vshrl.u32 %v5025_v37, 16  ;;  %v4694_v16 = vxor.u32 %v4614_v41, %v4534_v2  ;;  %v11109_v28 = vmax.f32 %v11107_v7, %v11108_v6  ;;  %v11113_v41 = vld [vmem:[#allocation65_spill] sm:$0xff] }
 0x2a4   :  { %v4704_v17 = vxor.u32 %v4624_v11, %v4544_v52  ;;  %v9296_v59 = vmul.u32 2246822519, %v4421_v44  ;;  %v4085_v0 = vmax.f32 %v11110_v21, %v8926_v54  ;;  %v4250_v12 = vadd.f32 %v8383_v49, %v4146_v47  ;;  %v11114_v11 = vld [vmem:[#allocation145_spill] sm:$0xff] }
 0x2a5   :  { %v4148_v15 = vmax.f32 %v11109_v28, %v4068_v48  ;;  %v5185_v3 = vxor.u32 %v5105_v36, %v5025_v37  ;;  %v4774_v20 = vmul.u32 2146121005, %v4694_v16  ;;  %v4472_v55 = vadd.s32 %v11112_v56, %v11111_v27  ;;  %v11117_v37 = vld [vmem:[#allocation272_spill] sm:$0xff] }
 0x2a6   :  { %v4784_v51 = vmul.u32 2146121005, %v4704_v17  ;;  %v4465_v52 = vadd.s32 %v9296_v59, %v11095_v31  ;;  %v11115_v48 = vmax.f32 %v11113_v41, %v11114_v11  ;;  %v9315_v54 = vmul.f32 %v9188_v62, %v9213_v1  ;;  %v11123_v41 = vld [vmem:[#allocation67_spill] sm:$0xff] }
 0x2a7   :  { %v9304_v2 = vadd.f32 %v8383_v49, %v4148_v15  ;;  %vm5265_vm9 = vcmp.lt.u32.totalorder %v5185_v3, 2147483648  ;;  %v4854_v47 = vshrl.u32 %v4774_v20, 15  ;;  %v4482_v21 = vadd.s32 %v11117_v37, %v11111_v27  ;;  %v11124_v49 = vld [vmem:[#allocation146_spill] sm:$0xff] }
 0x2a8   :  { %v9311_v44 = vmax.f32 %v11115_v48, %v4085_v0  ;;  %11116 = vst [vmem:[#allocation270_spill] sm:$0xff] %v9315_v54  ;;  %v11118_v16 = vmax.f32 %v9222_v43, 0.0  ;;  %v4864_v7 = vshrl.u32 %v4784_v51, 15  ;;  %v4546_v6 = vadd.s32 %v11099_v25, %v4465_v52  ;;  %v9328_v0 = vpop.f32.mrb[152].mxu1 }
 0x2a9   :  { %v5345_v28 = vsel %vm5265_vm9, %v4331_v46, 0.0  ;;  %v4320_v62 = vmax.f32 %v9261_v26, 0.0  ;;  %v4330_v1 = vmax.f32 %v4250_v12, 0.0  ;;  %v4934_v15 = vxor.u32 %v4854_v47, %v4774_v20  ;;  %11119 = vst [vmem:[#allocation224_spill] sm:$0xff] %v9328_v0  ;;  %v11121_v46 = vld [vmem:[#allocation275_spill] sm:$0xff]  ;;  %v11122_v26 = vld [vmem:[#allocation101_spill] sm:$0xff] }
 0x2aa   :  { %v9324_v17 = vsel %vm5312_vm7, %v11118_v16, 0.0  ;;  %v4944_v3 = vxor.u32 %v4864_v7, %v4784_v51  ;;  %v4626_v11 = vshrl.u32 %v4546_v6, 16  ;;  %v4553_v43 = vadd.s32 %v11099_v25, %v4472_v55  ;;  %v11120_v16 = vld [vmem:[#allocation238_spill] sm:$0xff] }
 0x2ab   :  { %v5014_v48 = vmul.u32 2221713035, %v4934_v15  ;;  %v4563_v9 = vadd.s32 %v11099_v25, %v4482_v21  ;;  %v4087_v36 = vmax.f32 %v11120_v16, %v8934_v53  ;;  %v4484_v52 = vadd.s32 %v11121_v46, %v11111_v27  ;;  %v11126_v16 = vld [vmem:[#allocation237_spill] sm:$0xff] }
 0x2ac   :  { %v5808_v12 = vmul.f32 %v11122_v26, %v5345_v28  ;;  %v5024_v20 = vmul.u32 2221713035, %v4944_v3  ;;  %v4706_v47 = vxor.u32 %v4626_v11, %v4546_v6  ;;  %v4633_v54 = vshrl.u32 %v4553_v43, 16  ;;  %v5414_v6 = vld [vmem:[#allocation9 + $0x18] sm:$0xff] }
 0x2ad   :  { %v5094_v51 = vshrl.u32 %v5014_v48, 16  ;;  %v4643_v7 = vshrl.u32 %v4563_v9, 16  ;;  %v11125_v31 = vmax.f32 %v11123_v41, %v11124_v49  ;;  %v4565_v21 = vadd.s32 %v11099_v25, %v4484_v52  ;;  %v11129_v41 = vld [vmem:[#allocation147_spill] sm:$0xff] }
 0x2ae   :  { %v5104_v15 = vshrl.u32 %v5024_v20, 16  ;;  %v4786_v0 = vmul.u32 2146121005, %v4706_v47  ;;  %v4713_v53 = vxor.u32 %v4633_v54, %v4553_v43  ;;  %v4086_v22 = vmax.f32 %v11126_v16, %v8936_v35  ;;  %v9352_v54 = vpop.f32.mrb[153].mxu0  ;;  %v11131_v43 = vld [vmem:[#allocation102_spill] sm:$0xff] }
 0x2af   :  { %v9341_v55 = vmax.f32 %v11125_v31, %v4087_v36  ;;  %v5896_v26 = vmul.f32 %v11127_v57, %v5345_v28  ;;  %v5174_v3 = vxor.u32 %v5094_v51, %v5014_v48  ;;  %v4723_v11 = vxor.u32 %v4643_v7, %v4563_v9  ;;  %v11128_v36 = vld [vmem:[#allocation66_spill] sm:$0xff] }
 0x2b0   :  { %v4645_v8 = vshrl.u32 %v4565_v21, 16  ;;  %v5184_v30 = vxor.u32 %v5104_v15, %v5024_v20  ;;  %v4866_v49 = vshrl.u32 %v4786_v0, 15  ;;  %v4793_v31 = vmul.u32 2146121005, %v4713_v53 }
 0x2b1   :  { %v11130_v52 = vmax.f32 %v11128_v36, %v11129_v41  ;;  %v5984_v35 = vmul.f32 %v11131_v43, %v5345_v28  ;;  %vm5254_vm10 = vcmp.lt.u32.totalorder %v5174_v3, 2147483648  ;;  %v4803_v57 = vmul.u32 2146121005, %v4723_v11  ;;  %v11134_v11 = vld [vmem:[#allocation194_spill] sm:$0xff]  ;;  %v11135_v43 = vld [vmem:[#allocation193_spill] sm:$0xff] }
 0x2b2   :  { %v9355_v48 = vxor.u32 %v4645_v8, %v4565_v21  ;;  %vm5264_vm11 = vcmp.lt.u32.totalorder %v5184_v30, 2147483648  ;;  %v5334_v9 = vsel %vm5254_vm10, %v4320_v62, 0.0  ;;  %v4946_v20 = vxor.u32 %v4866_v49, %v4786_v0 }
 0x2b3   :  { %v9350_v34 = vmax.f32 %v11130_v52, %v4086_v22  ;;  %v4873_v47 = vshrl.u32 %v4793_v31, 15  ;;  %v5344_v51 = vsel %vm5264_vm11, %v4330_v1, 0.0  ;;  %v5454_v7 = vmul.f32 %v5414_v6, %v5334_v9  ;;  %v9357_v52 = vpop.f32.mrb[153].mxu1 }
 0x2b4   :  { %v5583_v15 = vmul.f32 %v5543_v13, %v5334_v9  ;;  %v5712_v53 = vmul.f32 %v5672_v19, %v5334_v9  ;;  %v5807_v16 = vmul.f32 %v5414_v6, %v5344_v51  ;;  %v5895_v36 = vmul.f32 %v5543_v13, %v5344_v51  ;;  %v11132_v6 = vld [vmem:[#allocation99_spill] sm:$0xff] }
 0x2b5   :  { %v5983_v22 = vmul.f32 %v5672_v19, %v5344_v51  ;;  %v5026_v41 = vmul.u32 2221713035, %v4946_v20  ;;  %v5493_v28 = vadd.f32 %v9271_v32, %v5454_v7  ;;  %v4883_v30 = vshrl.u32 %v4803_v57, 15  ;;  %v11133_v19 = vld [vmem:[#allocation192_spill] sm:$0xff]  ;;  %v11136_v7 = vld [vmem:[#allocation107_spill] sm:$0xff] }
 0x2b6   :  { %v5622_v3 = vadd.f32 %v9274_v10, %v5583_v15  ;;  %v5751_v8 = vadd.f32 %v9277_v24, %v5712_v53  ;;  %v5846_v62 = vadd.f32 %v9282_v33, %v5807_v16  ;;  %v5934_v1 = vadd.f32 %v9288_v63, %v5895_v36  ;;  %v11137_v15 = vld [vmem:[#allocation177_spill] sm:$0xff]  ;;  %v11138_v53 = vld [vmem:[#allocation32_spill] sm:$0xff] }
 0x2b7   :  { %v6022_v0 = vadd.f32 %v9291_v4, %v5983_v22  ;;  %v5106_v21 = vshrl.u32 %v5026_v41, 16  ;;  %vm5322_vm12 = vcmp.lt.u32.totalorder %v11132_v6, 2147483648  ;;  %v5494_v13 = vadd.f32 %v5493_v28, %v11133_v19  ;;  %v11139_v36 = vld [vmem:[#allocation17_spill] sm:$0xff] }
 0x2b8   :  { %v5623_v49 = vadd.f32 %v5622_v3, %v11134_v11  ;;  %v5752_v32 = vadd.f32 %v5751_v8, %v11135_v43  ;;  %v4953_v9 = vxor.u32 %v4873_v47, %v4793_v31  ;;  %v5847_v20 = vadd.f32 %v5846_v62, %v5808_v12  ;;  %v11140_v8 = vld [vmem:[#allocation29_spill] sm:$0xff]  ;;  %v5442_v11 = vld [vmem:[#allocation9 + $0xf8] sm:$0xff] }
 0x2b9   :  { %v5186_v10 = vxor.u32 %v5106_v21, %v5026_v41  ;;  %v5935_v24 = vadd.f32 %v5934_v1, %v5896_v26  ;;  %v6023_v51 = vadd.f32 %v6022_v0, %v5984_v35  ;;  %v5495_v33 = vadd.f32 %v5494_v13, %v11136_v7  ;;  %v11141_v47 = vld [vmem:[#allocation105_spill] sm:$0xff]  ;;  %v11142_v26 = vld [vmem:[#allocation30_spill] sm:$0xff]  ;;  %v11144_v1 = vld [vmem:[#allocation195_spill] sm:$0xff] }
 0x2ba   :  { %v5624_v63 = vadd.f32 %v5623_v49, %v11137_v15  ;;  %v5753_v4 = vadd.f32 %v5752_v32, %v11138_v53  ;;  %v4963_v16 = vxor.u32 %v4883_v30, %v4803_v57  ;;  %v4259_v22 = vadd.f32 %v8440_v18, %v11139_v36  ;;  %v11145_v21 = vld [vmem:[#allocation31_spill] sm:$0xff]  ;;  %v11146_v30 = vld [vmem:[#allocation106_spill] sm:$0xff]  ;;  %v11148_v32 = vld [vmem:[#allocation196_spill] sm:$0xff] }
 0x2bb   :  { %vm5266_vm13 = vcmp.lt.u32.totalorder %v5186_v10, 2147483648  ;;  %v5033_v28 = vmul.u32 2221713035, %v4953_v9  ;;  %v4805_v3 = vmul.u32 2146121005, %v9355_v48  ;;  %v5496_v31 = vadd.f32 %v5495_v33, %v11140_v8  ;;  %v9383_v49 = vld [vmem:[#allocation9 + $0x238] sm:$0xff] }
 0x2bc   :  { %v5625_v12 = vadd.f32 %v5624_v63, %v11141_v47  ;;  %v5754_v35 = vadd.f32 %v5753_v4, %v11142_v26  ;;  %v11143_v41 = vmax.f32 %v9304_v2, 0.0  ;;  %v5043_v13 = vmul.u32 2221713035, %v4963_v16  ;;  %v11147_v48 = vld [vmem:[#allocation108_spill] sm:$0xff]  ;;  %v11149_v10 = vld [vmem:[#allocation182_spill] sm:$0xff]  ;;  %v11155_v6 = vld [vmem:[#allocation93_spill] sm:$0xff] }
 0x2bd   :  { %v5497_v43 = vadd.f32 %v5496_v31, %v11147_v48  ;;  %v5113_v33 = vshrl.u32 %v5033_v28, 16  ;;  %v4339_v53 = vmax.f32 %v4259_v22, 0.0  ;;  %v9394_v4 = vld [vmem:[#allocation9 + $0x378] sm:$0xff]  ;;  %v9400_v47 = vmul.f32 %v5442_v11, %v9324_v17 }
 0x2be   :  { %v5346_v62 = vsel %vm5266_vm13, %v11143_v41, 0.0  ;;  %v5626_v9 = vadd.f32 %v5625_v12, %v11148_v32  ;;  %v5755_v7 = vadd.f32 %v5754_v35, %v11149_v10  ;;  %v9417_v26 = vmul.f32 %v9394_v4, %v9324_v17  ;;  %v9419_v41 = vld [vmem:[#allocation9 + $0x1a0] sm:$0xff] }
 0x2bf   :  { %v5809_v0 = vmul.f32 %v11144_v1, %v5346_v62  ;;  %v5897_v57 = vmul.f32 %v11145_v21, %v5346_v62  ;;  %v5985_v19 = vmul.f32 %v11146_v30, %v5346_v62  ;;  %v5498_v16 = vadd.f32 %v5497_v43, %v9021_v23  ;;  %11150 = vst [vmem:[#allocation276_spill] sm:$0xff] %v9400_v47  ;;  %v11154_v62 = vld [vmem:[#allocation26_spill] sm:$0xff]  ;;  %v11156_v30 = vld [vmem:[#allocation103_spill] sm:$0xff] }
 0x2c0   :  { %v5627_v36 = vadd.f32 %v5626_v9, %v9023_v40  ;;  %v5756_v8 = vadd.f32 %v5755_v7, %v9026_v45  ;;  %v5193_v31 = vxor.u32 %v5113_v33, %v5033_v28  ;;  %v9409_v40 = vld [vmem:[#allocation9 + $0x60] sm:$0xff]  ;;  %v11152_v45 = vmax.f32 %v9257_v14, 0.0  ;;  %11153 = vst [vmem:[#allocation53_spill] sm:$0xff] %v9417_v26  ;;  %v11179_v26 = vld [vmem:[#allocation183_spill] sm:$0xff] }
 0x2c1   :  { %v9388_v15 = vadd.f32 %v5847_v20, %v5809_v0  ;;  %v9390_v2 = vadd.f32 %v5935_v24, %v5897_v57  ;;  %v9392_v63 = vadd.f32 %v6023_v51, %v5985_v19  ;;  %v9404_v20 = vmul.f32 %v9383_v49, %v9324_v17  ;;  %v9434_v17 = vpop.f32.mrb[154].mxu0  ;;  %v11157_v19 = vld [vmem:[#allocation28_spill] sm:$0xff] }
 0x2c2   :  { %v5123_v24 = vshrl.u32 %v5043_v13, 16  ;;  %v4885_v51 = vshrl.u32 %v4805_v3, 15  ;;  %v5499_v22 = vadd.f32 %v5498_v16, %v9028_v5  ;;  %v5628_v12 = vadd.f32 %v5627_v36, %v9030_v60  ;;  %v9421_v5 = vld [vmem:[#allocation9 + $0x2e0] sm:$0xff] }
 0x2c3   :  { %11151 = vst [vmem:[#allocation189_spill] sm:$0xff] %v9404_v20  ;;  %v5757_v23 = vadd.f32 %v5756_v8, %v9032_v39  ;;  %vm5273_vm14 = vcmp.lt.u32.totalorder %v5193_v31, 2147483648  ;;  %v5402_v28 = vsel %vm5322_vm12, %v11152_v45, 0.0  ;;  %v4269_v39 = vadd.f32 %v8440_v18, %v9311_v44  ;;  %v11162_v45 = vld [vmem:[#allocation40_spill] sm:$0xff] }
 0x2c4   :  { %v5353_v35 = vsel %vm5273_vm14, %v4339_v53, 0.0  ;;  %v4965_v60 = vxor.u32 %v4885_v51, %v4805_v3  ;;  %v5500_v1 = vadd.f32 %v5499_v22, %v11154_v62  ;;  %v9428_v14 = vadd.f32 %v8440_v18, %v9341_v55  ;;  %v11159_v51 = vld [vmem:[#allocation68_spill] sm:$0xff] }
 0x2c5   :  { %v9432_v0 = vadd.f32 %v8440_v18, %v11155_v6  ;;  %v5203_v21 = vxor.u32 %v5123_v24, %v5043_v13  ;;  %v5463_v57 = vmul.f32 %v9409_v40, %v5353_v35  ;;  %v5629_v3 = vadd.f32 %v5628_v12, %v11156_v30  ;;  %v11160_v22 = vld [vmem:[#allocation148_spill] sm:$0xff] }
 0x2c6   :  { %v5758_v48 = vadd.f32 %v5757_v23, %v11157_v19  ;;  %v5501_v44 = vadd.f32 %v5500_v1, %v9043_v38  ;;  %v5592_v43 = vmul.f32 %v9419_v41, %v5353_v35  ;;  %v5721_v55 = vmul.f32 %v9421_v5, %v5353_v35  ;;  %v11158_v38 = vld [vmem:[#allocation240_spill] sm:$0xff]  ;;  %v11163_v35 = vld [vmem:[#allocation241_spill] sm:$0xff] }
 0x2c7   :  { %v5045_v32 = vmul.u32 2221713035, %v4965_v60  ;;  %v5630_v9 = vadd.f32 %v5629_v3, %v9058_v29  ;;  %v4473_v13 = vadd.s32 %v11096_v50, %v11111_v27  ;;  %v4483_v7 = vadd.s32 %v9252_v61, %v11111_v27  ;;  %v11165_v3 = vld [vmem:[#allocation69_spill] sm:$0xff] }
 0x2c8   :  { %v5759_v10 = vadd.f32 %v5758_v48, %v9061_v58  ;;  %v9448_v33 = vadd.f32 %v5501_v44, %v5463_v57  ;;  %v4088_v16 = vmax.f32 %v11158_v38, %v8948_v42  ;;  %v4485_v36 = vadd.s32 %v9296_v59, %v11111_v27  ;;  %v11166_v19 = vld [vmem:[#allocation149_spill] sm:$0xff] }
 0x2c9   :  { %v5125_v53 = vshrl.u32 %v5045_v32, 16  ;;  %v9454_v8 = vadd.f32 %v5630_v9, %v5592_v43  ;;  %v4554_v58 = vadd.s32 %v11099_v25, %v4473_v13  ;;  %v4564_v31 = vadd.s32 %v11099_v25, %v4483_v7  ;;  %v11168_v44 = vld [vmem:[#allocation157_spill] sm:$0xff]  ;;  %v9481_v9 = vpop.f32.mrb[155].mxu0 }
 0x2ca   :  { %v9456_v29 = vadd.f32 %v5759_v10, %v5721_v55  ;;  %v9462_v24 = vadd.f32 %v8440_v18, %v9350_v34  ;;  %v11161_v12 = vmax.f32 %v11159_v51, %v11160_v22  ;;  %v4566_v42 = vadd.s32 %v11099_v25, %v4485_v36  ;;  %v9479_v55 = vpop.f32.mrb[154].mxu1 }
 0x2cb   :  { %v4105_v60 = vmax.f32 %v11163_v35, %v11162_v45  ;;  %v9470_v62 = vmul.f32 %v5442_v11, %v5402_v28  ;;  %v4349_v1 = vmax.f32 %v4269_v39, 0.0  ;;  %v4634_v6 = vshrl.u32 %v4554_v58, 16 }
 0x2cc   :  { %v4168_v23 = vmax.f32 %v11161_v12, %v4088_v16  ;;  %v4644_v57 = vshrl.u32 %v4564_v31, 16  ;;  %vm5283_vm15 = vcmp.lt.u32.totalorder %v5203_v21, 2147483648  ;;  %v4646_v30 = vshrl.u32 %v4566_v42, 16  ;;  %v9486_v21 = vpop.f32.mrb[155].mxu1  ;;  %v11178_v16 = vld [vmem:[#allocation94_spill] sm:$0xff] }
 0x2cd   :  { %11164 = vst [vmem:[#allocation130_spill] sm:$0xff] %v9470_v62  ;;  %v11167_v34 = vmax.f32 %v11165_v3, %v11166_v19  ;;  %v4492_v43 = vadd.s32 %v11112_v56, %v11168_v44  ;;  %v9484_v11 = vmul.f32 %v9383_v49, %v5402_v28  ;;  %v5205_v39 = vxor.u32 %v5125_v53, %v5045_v32  ;;  %v11171_v53 = vld [vmem:[#allocation207_spill] sm:$0xff] }
 0x2ce   :  { %v4714_v10 = vxor.u32 %v4634_v6, %v4554_v58  ;;  %v4724_v13 = vxor.u32 %v4644_v57, %v4564_v31  ;;  %v9489_v7 = vmul.f32 %v9394_v4, %v5402_v28  ;;  %v4351_v38 = vmax.f32 %v9428_v14, 0.0  ;;  %v11172_v58 = vld [vmem:[#allocation243_spill] sm:$0xff]  ;;  %v9501_v28 = vpop.f32.mrb[156].mxu0  ;;  %v9503_v14 = vpop.f32.mrb[156].mxu1 }
 0x2cf   :  { %v9475_v48 = vmax.f32 %v11167_v34, %v4105_v60  ;;  %11169 = vst [vmem:[#allocation55_spill] sm:$0xff] %v9484_v11  ;;  %v5363_v51 = vsel %vm5283_vm15, %v4349_v1, 0.0  ;;  %v4726_v45 = vxor.u32 %v4646_v30, %v4566_v42  ;;  %v4502_v49 = vadd.s32 %v11117_v37, %v11168_v44  ;;  %v11173_v57 = vld [vmem:[#allocation71_spill] sm:$0xff]  ;;  %v11174_v30 = vld [vmem:[#allocation150_spill] sm:$0xff] }
 0x2d0   :  { %11170 = vst [vmem:[#allocation131_spill] sm:$0xff] %v9489_v7  ;;  %v4794_v22 = vmul.u32 2146121005, %v4714_v10  ;;  %v4804_v12 = vmul.u32 2146121005, %v4724_v13  ;;  %v4573_v32 = vadd.s32 %v11099_v25, %v4492_v43  ;;  %v4107_v31 = vmax.f32 %v11172_v58, %v11171_v53  ;;  %v11176_v53 = vld [vmem:[#allocation211_spill] sm:$0xff] }
 0x2d1   :  { %v4504_v4 = vadd.s32 %v11121_v46, %v11168_v44  ;;  %vm5285_vm0 = vcmp.lt.u32.totalorder %v5205_v39, 2147483648  ;;  %v4806_v1 = vmul.u32 2146121005, %v4726_v45  ;;  %v4583_v42 = vadd.s32 %v11099_v25, %v4502_v49  ;;  %v11177_v58 = vld [vmem:[#allocation242_spill] sm:$0xff] }
 0x2d2   :  { %v4874_v35 = vshrl.u32 %v4794_v22, 15  ;;  %v4884_v60 = vshrl.u32 %v4804_v12, 15  ;;  %v4653_v6 = vshrl.u32 %v4573_v32, 16  ;;  %v11175_v3 = vmax.f32 %v11173_v57, %v11174_v30  ;;  %v11180_v57 = vld [vmem:[#allocation70_spill] sm:$0xff] }
 0x2d3   :  { %v4585_v34 = vadd.s32 %v11099_v25, %v4504_v4  ;;  %v4886_v13 = vshrl.u32 %v4806_v1, 15  ;;  %v4106_v36 = vmax.f32 %v11177_v58, %v11176_v53  ;;  %v9514_v47 = vadd.f32 %v11179_v26, %v11178_v16  ;;  %v5553_v53 = vld [vmem:[#allocation9 + $0x1a8] sm:$0xff] }
 0x2d4   :  { %v4187_v19 = vmax.f32 %v11175_v3, %v4107_v31  ;;  %v4954_v43 = vxor.u32 %v4874_v35, %v4794_v22  ;;  %v4964_v10 = vxor.u32 %v4884_v60, %v4804_v12  ;;  %v4663_v45 = vshrl.u32 %v4583_v42, 16  ;;  %v11181_v31 = vld [vmem:[#allocation151_spill] sm:$0xff]  ;;  %v9519_v22 = vpop.f32.mrb[157].mxu0 }
 0x2d5   :  { %v4733_v20 = vxor.u32 %v4653_v6, %v4573_v32  ;;  %v4665_v49 = vshrl.u32 %v4585_v34, 16  ;;  %v4966_v62 = vxor.u32 %v4886_v13, %v4806_v1  ;;  %v11182_v30 = vmax.f32 %v11180_v57, %v11181_v31  ;;  %11183 = vst [vmem:[#allocation226_spill] sm:$0xff] %v9519_v22  ;;  %v5424_v13 = vld [vmem:[#allocation9 + $0x68] sm:$0xff]  ;;  %v6616_v31 = vld [vmem:[#allocation9 + $0x2f0] sm:$0xff] }
 0x2d6   :  { %v5034_v7 = vmul.u32 2221713035, %v4954_v43  ;;  %v5044_v11 = vmul.u32 2221713035, %v4964_v10  ;;  %v5365_v12 = vsel %vm5285_vm0, %v4351_v38, 0.0  ;;  %v4743_v35 = vxor.u32 %v4663_v45, %v4583_v42  ;;  %v9534_v38 = vpop.f32.mrb[157].mxu1 }
 0x2d7   :  { %v4186_v4 = vmax.f32 %v11182_v30, %v4106_v36  ;;  %v4813_v60 = vmul.u32 2146121005, %v4733_v20  ;;  %v4745_v3 = vxor.u32 %v4665_v49, %v4585_v34  ;;  %v9523_v16 = vmul.f32 %v9409_v40, %v5363_v51  ;;  %11185 = vst [vmem:[#allocation188_spill] sm:$0xff] %v9534_v38  ;;  %v6614_v20 = vld [vmem:[#allocation9 + $0x70] sm:$0xff] }
 0x2d8   :  { %v9526_v32 = vmul.f32 %v9419_v41, %v5363_v51  ;;  %v9529_v6 = vmul.f32 %v9421_v5, %v5363_v51  ;;  %v5114_v1 = vshrl.u32 %v5034_v7, 16  ;;  %v5124_v43 = vshrl.u32 %v5044_v11, 16  ;;  %v5682_v5 = vld [vmem:[#allocation9 + $0x2e8] sm:$0xff]  ;;  %v6615_v49 = vld [vmem:[#allocation9 + $0x1b0] sm:$0xff] }
 0x2d9   :  { %v9532_v36 = vadd.f32 %v8440_v18, %v4168_v23  ;;  %v4823_v10 = vmul.u32 2146121005, %v4743_v35  ;;  %v4893_v39 = vshrl.u32 %v4813_v60, 15  ;;  %v9536_v42 = vmul.f32 %v6614_v20, %v5365_v12 }
 0x2da   :  { %11184 = vst [vmem:[#allocation273_spill] sm:$0xff] %v9529_v6  ;;  %v5194_v40 = vxor.u32 %v5114_v1, %v5034_v7  ;;  %v5046_v34 = vmul.u32 2221713035, %v4966_v62  ;;  %v9541_v51 = vadd.f32 %v11179_v26, %v9475_v48  ;;  %v9544_v58 = vadd.f32 %v11179_v26, %v4187_v19 }
 0x2db   :  { %11186 = vst [vmem:[#allocation25_spill] sm:$0xff] %v9536_v42  ;;  %v4973_v23 = vxor.u32 %v4893_v39, %v4813_v60  ;;  %v4825_v45 = vmul.u32 2146121005, %v4745_v3  ;;  %v9546_v57 = vmul.f32 %v6615_v49, %v5365_v12  ;;  %v9548_v7 = vmul.f32 %v6616_v31, %v5365_v12  ;;  %v11192_v3 = vld [vmem:[#allocation199_spill] sm:$0xff] }
 0x2dc   :  { %vm5274_vm1 = vcmp.lt.u32.totalorder %v5194_v40, 2147483648  ;;  %v4903_v62 = vshrl.u32 %v4823_v10, 15  ;;  %v5204_v30 = vxor.u32 %v5124_v43, %v5044_v11  ;;  %v11189_v35 = vmax.f32 %v9432_v0, 0.0 }
 0x2dd   :  { %11187 = vst [vmem:[#allocation54_spill] sm:$0xff] %v9546_v57  ;;  %11188 = vst [vmem:[#allocation132_spill] sm:$0xff] %v9548_v7  ;;  %v4352_v48 = vmax.f32 %v9532_v36, 0.0  ;;  %v5053_v20 = vmul.u32 2221713035, %v4973_v23  ;;  %v5126_v41 = vshrl.u32 %v5046_v34, 16  ;;  %v4493_v12 = vadd.s32 %v11096_v50, %v11168_v44 }
 0x2de   :  { %v5354_v1 = vsel %vm5274_vm1, %v11189_v35, 0.0  ;;  %v4905_v38 = vshrl.u32 %v4825_v45, 15  ;;  %v4983_v36 = vxor.u32 %v4903_v62, %v4823_v10  ;;  %vm5284_vm2 = vcmp.lt.u32.totalorder %v5204_v30, 2147483648  ;;  %v11190_v23 = vld [vmem:[#allocation18_spill] sm:$0xff]  ;;  %v11193_v7 = vld [vmem:[#allocation33_spill] sm:$0xff] }
 0x2df   :  { %v5464_v60 = vmul.f32 %v5424_v13, %v5354_v1  ;;  %v5593_v39 = vmul.f32 %v5553_v53, %v5354_v1  ;;  %v5722_v19 = vmul.f32 %v5682_v5, %v5354_v1  ;;  %v5133_v40 = vshrl.u32 %v5053_v20, 16  ;;  %v11191_v1 = vld [vmem:[#allocation184_spill] sm:$0xff]  ;;  %v11194_v62 = vld [vmem:[#allocation110_spill] sm:$0xff] }
 0x2e0   :  { %v9562_v31 = vadd.f32 %v11179_v26, %v11190_v23  ;;  %v9565_v35 = vadd.f32 %v11179_v26, %v4186_v4  ;;  %v4574_v10 = vadd.s32 %v11099_v25, %v4493_v12  ;;  %v11195_v23 = vld [vmem:[#allocation34_spill] sm:$0xff]  ;;  %v11196_v4 = vld [vmem:[#allocation111_spill] sm:$0xff]  ;;  %v5063_v6 = vmul.u32 2221713035, %v4983_v36 }
 0x2e1   :  { %v5503_v11 = vadd.f32 %v9448_v33, %v5464_v60  ;;  %v5632_v0 = vadd.f32 %v9454_v8, %v5593_v39  ;;  %v5761_v43 = vadd.f32 %v9456_v29, %v5722_v19  ;;  %v5206_v60 = vxor.u32 %v5126_v41, %v5046_v34  ;;  %v11218_v34 = vld [vmem:[#allocation72_spill] sm:$0xff] }
 0x2e2   :  { %v5213_v8 = vxor.u32 %v5133_v40, %v5053_v20  ;;  %v4985_v39 = vxor.u32 %v4905_v38, %v4825_v45  ;;  %v4503_v29 = vadd.s32 %v9252_v61, %v11168_v44  ;;  %v11198_v45 = vld [vmem:[#allocation109_spill] sm:$0xff]  ;;  %v11199_v20 = vld [vmem:[#allocation200_spill] sm:$0xff] }
 0x2e3   :  { %v5504_v49 = vadd.f32 %v5503_v11, %v11191_v1  ;;  %v5633_v22 = vadd.f32 %v5632_v0, %v11192_v3  ;;  %v5762_v33 = vadd.f32 %v5761_v43, %v11193_v7  ;;  %v11197_v11 = vmax.f32 %v9462_v24, 0.0  ;;  %v11201_v24 = vld [vmem:[#allocation36_spill] sm:$0xff] }
 0x2e4   :  { %v4584_v41 = vadd.s32 %v11099_v25, %v4503_v29  ;;  %vm5286_vm3 = vcmp.lt.u32.totalorder %v5206_v60, 2147483648  ;;  %vm5293_vm4 = vcmp.lt.u32.totalorder %v5213_v8, 2147483648  ;;  %v4654_v43 = vshrl.u32 %v4574_v10, 16  ;;  %v11202_v40 = vld [vmem:[#allocation112_spill] sm:$0xff]  ;;  %v11208_v60 = vld [vmem:[#allocation118_spill] sm:$0xff] }
 0x2e5   :  { %v5505_v19 = vadd.f32 %v5504_v49, %v11194_v62  ;;  %v5634_v57 = vadd.f32 %v5633_v22, %v11195_v23  ;;  %v5763_v42 = vadd.f32 %v5762_v33, %v11196_v4  ;;  %v5364_v3 = vsel %vm5284_vm2, %v11197_v11, 0.0  ;;  %v11200_v49 = vld [vmem:[#allocation35_spill] sm:$0xff]  ;;  %v11203_v33 = vld [vmem:[#allocation185_spill] sm:$0xff]  ;;  %v9588_v4 = vpop.f32.mrb[158].mxu0  ;;  %v11209_v11 = vld [vmem:[#allocation42_spill] sm:$0xff] }
 0x2e6   :  { %v5065_v22 = vmul.u32 2221713035, %v4985_v39  ;;  %v4664_v36 = vshrl.u32 %v4584_v41, 16  ;;  %v5143_v23 = vshrl.u32 %v5063_v6, 16  ;;  %11204 = vst [vmem:[#allocation56_spill] sm:$0xff] %v9588_v4  ;;  %v9590_v29 = vmul.f32 %v5424_v13, %v5364_v3 }
 0x2e7   :  { %v5506_v7 = vadd.f32 %v5505_v19, %v11198_v45  ;;  %v5635_v12 = vadd.f32 %v5634_v57, %v11199_v20  ;;  %v5764_v0 = vadd.f32 %v5763_v42, %v11200_v49  ;;  %v9592_v19 = vmul.f32 %v5553_v53, %v5364_v3  ;;  %v11210_v20 = vld [vmem:[#allocation119_spill] sm:$0xff] }
 0x2e8   :  { %11205 = vst [vmem:[#allocation133_spill] sm:$0xff] %v9590_v29  ;;  %v9594_v57 = vmul.f32 %v5682_v5, %v5364_v3  ;;  %v5366_v42 = vsel %vm5286_vm3, %v4352_v48, 0.0  ;;  %v5145_v13 = vshrl.u32 %v5065_v22, 16  ;;  %v4744_v53 = vxor.u32 %v4664_v36, %v4584_v41  ;;  %v11214_v5 = vld [vmem:[#allocation244_spill] sm:$0xff]  ;;  %v11221_v36 = vld [vmem:[#allocation46_spill] sm:$0xff]  ;;  %v11265_v29 = vld [vmem:[#allocation203_spill] sm:$0xff] }
 0x2e9   :  { %v5507_v30 = vadd.f32 %v5506_v7, %v11201_v24  ;;  %v5636_v1 = vadd.f32 %v5635_v12, %v11202_v40  ;;  %v5765_v62 = vadd.f32 %v5764_v0, %v11203_v33  ;;  %11206 = vst [vmem:[#allocation227_spill] sm:$0xff] %v9592_v19  ;;  %v11211_v12 = vmax.f32 %v9514_v47, 0.0  ;;  %v9602_v0 = vpop.f32.mrb[158].mxu1  ;;  %v5433_v24 = vld [vmem:[#allocation9 + $0xb0] sm:$0xff]  ;;  %v11215_v48 = vld [vmem:[#allocation212_spill] sm:$0xff] }
 0x2ea   :  { %11207 = vst [vmem:[#allocation229_spill] sm:$0xff] %v9594_v57  ;;  %11212 = vst [vmem:[#allocation228_spill] sm:$0xff] %v9602_v0  ;;  %v4734_v40 = vxor.u32 %v4654_v43, %v4574_v10  ;;  %v11213_v33 = vld [vmem:[#allocation214_spill] sm:$0xff]  ;;  %v11219_v0 = vld [vmem:[#allocation152_spill] sm:$0xff]  ;;  %v4505_v41 = vadd.s32 %v9296_v59, %v11168_v44 }
 0x2eb   :  { %v5508_v39 = vadd.f32 %v5507_v30, %v11208_v60  ;;  %v5637_v45 = vadd.f32 %v5636_v1, %v11209_v11  ;;  %v5766_v7 = vadd.f32 %v5765_v62, %v11210_v20  ;;  %v5373_v49 = vsel %vm5293_vm4, %v11211_v12, 0.0  ;;  %v11216_v30 = vld [vmem:[#allocation215_spill] sm:$0xff] }
 0x2ec   :  { %v4108_v3 = vmax.f32 %v11214_v5, %v11213_v33  ;;  %v11217_v1 = vld [vmem:[#allocation223_spill] sm:$0xff]  ;;  %v5223_v62 = vxor.u32 %v5143_v23, %v5063_v6  ;;  %v4814_v8 = vmul.u32 2146121005, %v4734_v40  ;;  %v4824_v12 = vmul.u32 2146121005, %v4744_v53 }
 0x2ed   :  { %v5509_v38 = vadd.f32 %v5508_v39, %v11215_v48  ;;  %v5638_v60 = vadd.f32 %v5637_v45, %v11216_v30  ;;  %v5767_v11 = vadd.f32 %v5766_v7, %v11217_v1  ;;  %v5562_v20 = vld [vmem:[#allocation9 + $0x1f0] sm:$0xff]  ;;  %v11220_v4 = vmax.f32 %v11218_v34, %v11219_v0  ;;  %v11223_v7 = vld [vmem:[#allocation48_spill] sm:$0xff] }
 0x2ee   :  { %v9609_v47 = vld [vmem:[#allocation9 + $0x330] sm:$0xff]  ;;  %v5473_v43 = vmul.f32 %v5433_v24, %v5373_v49  ;;  %v5602_v23 = vmul.f32 %v5562_v20, %v5373_v49  ;;  %v5225_v40 = vxor.u32 %v5145_v13, %v5065_v22  ;;  %v4894_v53 = vshrl.u32 %v4814_v8, 15  ;;  %v11224_v48 = vld [vmem:[#allocation124_spill] sm:$0xff] }
 0x2ef   :  { %v9614_v10 = vmax.f32 %v11220_v4, %v4108_v3  ;;  %v5510_v39 = vadd.f32 %v5509_v38, %v11221_v36  ;;  %v11222_v45 = vld [vmem:[#allocation123_spill] sm:$0xff]  ;;  %v5768_v6 = vadd.f32 %v5767_v11, %v11223_v7  ;;  %v5731_v5 = vmul.f32 %v9609_v47, %v5373_v49  ;;  %v11225_v34 = vld [vmem:[#allocation216_spill] sm:$0xff]  ;;  %v11227_v36 = vld [vmem:[#allocation213_spill] sm:$0xff] }
 0x2f0   :  { %v5639_v33 = vadd.f32 %v5638_v60, %v11222_v45  ;;  %v11226_v0 = vld [vmem:[#allocation239_spill] sm:$0xff]  ;;  %v4904_v1 = vshrl.u32 %v4824_v12, 15  ;;  %vm5303_vm5 = vcmp.lt.u32.totalorder %v5223_v62, 2147483648  ;;  %v4974_v57 = vxor.u32 %v4894_v53, %v4814_v8  ;;  %v11228_v60 = vld [vmem:[#allocation245_spill] sm:$0xff]  ;;  %v9635_v62 = vpop.f32.mrb[159].mxu0 }
 0x2f1   :  { %v5511_v30 = vadd.f32 %v5510_v39, %v11224_v48  ;;  %v5769_v3 = vadd.f32 %v5768_v6, %v11226_v0  ;;  %v4586_v38 = vadd.s32 %v11099_v25, %v4505_v41  ;;  %v4125_v45 = vmax.f32 %v11228_v60, %v11227_v36  ;;  %v6617_v22 = vld [vmem:[#allocation9 + $0x78] sm:$0xff]  ;;  %11233 = vst [vmem:[#allocation135_spill] sm:$0xff] %v9635_v62  ;;  %v6620_v62 = vld [vmem:[#allocation9 + $0xc0] sm:$0xff] }
 0x2f2   :  { %v5640_v4 = vadd.f32 %v5639_v33, %v11225_v34  ;;  %v4984_v49 = vxor.u32 %v4904_v1, %v4824_v12  ;;  %v9628_v13 = vmul.f32 %v6617_v22, %v5366_v42  ;;  %v5054_v39 = vmul.u32 2221713035, %v4974_v57  ;;  %v11230_v33 = vld [vmem:[#allocation73_spill] sm:$0xff]  ;;  %v6618_v1 = vld [vmem:[#allocation9 + $0x1b8] sm:$0xff] }
 0x2f3   :  { %v5512_v11 = vadd.f32 %v5511_v30, %v5473_v43  ;;  %v5770_v19 = vadd.f32 %v5769_v3, %v5731_v5  ;;  %v4666_v48 = vshrl.u32 %v4586_v38, 16  ;;  %v11231_v34 = vld [vmem:[#allocation153_spill] sm:$0xff]  ;;  %v11234_v8 = vmax.f32 %v9541_v51, 0.0  ;;  %v11235_v43 = vld [vmem:[#allocation166_spill] sm:$0xff]  ;;  %v6619_v60 = vld [vmem:[#allocation9 + $0x2f8] sm:$0xff] }
 0x2f4   :  { %v5641_v7 = vadd.f32 %v5640_v4, %v5602_v23  ;;  %11229 = vst [vmem:[#allocation57_spill] sm:$0xff] %v9628_v13  ;;  %v11232_v6 = vmax.f32 %v11230_v33, %v11231_v34  ;;  %vm5305_vm6 = vcmp.lt.u32.totalorder %v5225_v40, 2147483648  ;;  %v4512_v23 = vadd.s32 %v11112_v56, %v11235_v43  ;;  %v11236_v30 = vld [vmem:[#allocation122_spill] sm:$0xff]  ;;  %v11237_v4 = vld [vmem:[#allocation247_spill] sm:$0xff] }
 0x2f5   :  { %v5383_v41 = vsel %vm5303_vm5, %v11234_v8, 0.0  ;;  %v4522_v12 = vadd.s32 %v11117_v37, %v11235_v43  ;;  %v5064_v5 = vmul.u32 2221713035, %v4984_v49  ;;  %v5134_v57 = vshrl.u32 %v5054_v39, 16  ;;  %v11241_v49 = vld [vmem:[#allocation75_spill] sm:$0xff]  ;;  %v11242_v34 = vld [vmem:[#allocation154_spill] sm:$0xff] }
 0x2f6   :  { %v9633_v0 = vmax.f32 %v11232_v6, %v4125_v45  ;;  %v4746_v53 = vxor.u32 %v4666_v48, %v4586_v38  ;;  %v4127_v3 = vmax.f32 %v11237_v4, %v11236_v30  ;;  %v9645_v36 = vmul.f32 %v6618_v1, %v5366_v42  ;;  %v9658_v6 = vpop.f32.mrb[159].mxu1  ;;  %v11248_v1 = vld [vmem:[#allocation246_spill] sm:$0xff] }
 0x2f7   :  { %v9647_v45 = vmul.f32 %v6619_v60, %v5366_v42  ;;  %v4593_v51 = vadd.s32 %v11099_v25, %v4512_v23  ;;  %v4603_v22 = vadd.s32 %v11099_v25, %v4522_v12  ;;  %v9651_v56 = vmul.f32 %v5433_v24, %v5383_v41  ;;  %11244 = vst [vmem:[#allocation58_spill] sm:$0xff] %v9658_v6  ;;  %v9665_v23 = vld [vmem:[#allocation9 + $0xb8] sm:$0xff] }
 0x2f8   :  { %11238 = vst [vmem:[#allocation24_spill] sm:$0xff] %v9645_v36  ;;  %v5214_v33 = vxor.u32 %v5134_v57, %v5054_v39  ;;  %v4826_v37 = vmul.u32 2146121005, %v4746_v53  ;;  %v11243_v38 = vmax.f32 %v11241_v49, %v11242_v34  ;;  %v9660_v8 = vmul.f32 %v5562_v20, %v5383_v41  ;;  %v9667_v12 = vld [vmem:[#allocation9 + $0x1f8] sm:$0xff] }
 0x2f9   :  { %11239 = vst [vmem:[#allocation59_spill] sm:$0xff] %v9647_v45  ;;  %11240 = vst [vmem:[#allocation136_spill] sm:$0xff] %v9651_v56  ;;  %v11246_v42 = vmax.f32 %v9544_v58, 0.0  ;;  %v9669_v24 = vld [vmem:[#allocation9 + $0x338] sm:$0xff]  ;;  %v4673_v39 = vshrl.u32 %v4593_v51, 16  ;;  %v4683_v57 = vshrl.u32 %v4603_v22, 16  ;;  %v4524_v34 = vadd.s32 %v11121_v46, %v11235_v43 }
 0x2fa   :  { %v9656_v48 = vmax.f32 %v11243_v38, %v4127_v3  ;;  %11245 = vst [vmem:[#allocation137_spill] sm:$0xff] %v9660_v8  ;;  %v5144_v53 = vshrl.u32 %v5064_v5, 16  ;;  %vm5294_vm7 = vcmp.lt.u32.totalorder %v5214_v33, 2147483648  ;;  %v4906_v4 = vshrl.u32 %v4826_v37, 15  ;;  %v11247_v3 = vld [vmem:[#allocation178_spill] sm:$0xff] }
 0x2fb   :  { %v5385_v30 = vsel %vm5305_vm6, %v11246_v42, 0.0  ;;  %v4126_v60 = vmax.f32 %v11248_v1, %v11247_v3  ;;  %v11249_v20 = vmax.f32 %v9562_v31, 0.0  ;;  %v4753_v58 = vxor.u32 %v4673_v39, %v4593_v51  ;;  %v6621_v3 = vld [vmem:[#allocation9 + $0x200] sm:$0xff] }
 0x2fc   :  { %v4763_v40 = vxor.u32 %v4683_v57, %v4603_v22  ;;  %v9678_v38 = vmul.f32 %v9609_v47, %v5383_v41  ;;  %v9683_v8 = vmul.f32 %v6620_v62, %v5385_v30  ;;  %v9685_v31 = vmul.f32 %v6621_v3, %v5385_v30  ;;  %v11255_v3 = vld [vmem:[#allocation201_spill] sm:$0xff] }
 0x2fd   :  { %v5374_v49 = vsel %vm5294_vm7, %v11249_v20, 0.0  ;;  %v9689_v51 = vadd.f32 %v11179_v26, %v9614_v10  ;;  %v4986_v46 = vxor.u32 %v4906_v4, %v4826_v37  ;;  %v4833_v39 = vmul.u32 2146121005, %v4753_v58  ;;  %v11256_v37 = vld [vmem:[#allocation74_spill] sm:$0xff]  ;;  %v11261_v58 = vld [vmem:[#allocation113_spill] sm:$0xff] }
 0x2fe   :  { %11250 = vst [vmem:[#allocation100_spill] sm:$0xff] %v9678_v38  ;;  %v5474_v42 = vmul.f32 %v9665_v23, %v5374_v49  ;;  %v5603_v6 = vmul.f32 %v9667_v12, %v5374_v49  ;;  %v5732_v33 = vmul.f32 %v9669_v24, %v5374_v49  ;;  %11251 = vst [vmem:[#allocation104_spill] sm:$0xff] %v9683_v8  ;;  %v4843_v20 = vmul.u32 2146121005, %v4763_v40  ;;  %v11253_v38 = vld [vmem:[#allocation187_spill] sm:$0xff]  ;;  %v11254_v8 = vld [vmem:[#allocation197_spill] sm:$0xff] }
 0x2ff   :  { %11252 = vst [vmem:[#allocation277_spill] sm:$0xff] %v9685_v31  ;;  %v5224_v57 = vxor.u32 %v5144_v53, %v5064_v5  ;;  %v5066_v1 = vmul.u32 2221713035, %v4986_v46  ;;  %v4605_v49 = vadd.s32 %v11099_v25, %v4524_v34  ;;  %v4913_v45 = vshrl.u32 %v4833_v39, 15  ;;  %v11260_v53 = vld [vmem:[#allocation37_spill] sm:$0xff] }
 0x300   :  { %v5513_v22 = vadd.f32 %v5512_v11, %v5474_v42  ;;  %v5642_v47 = vadd.f32 %v5641_v7, %v5603_v6  ;;  %v5771_v41 = vadd.f32 %v5770_v19, %v5732_v33  ;;  %v4923_v10 = vshrl.u32 %v4843_v20, 15  ;;  %v11257_v11 = vld [vmem:[#allocation155_spill] sm:$0xff]  ;;  %v11259_v6 = vld [vmem:[#allocation205_spill] sm:$0xff]  ;;  %v11263_v33 = vld [vmem:[#allocation186_spill] sm:$0xff] }
 0x301   :  { %v5146_v36 = vshrl.u32 %v5066_v1, 16  ;;  %v4685_v13 = vshrl.u32 %v4605_v49, 16  ;;  %v11258_v7 = vmax.f32 %v11256_v37, %v11257_v11  ;;  %v4993_v34 = vxor.u32 %v4913_v45, %v4833_v39 }
 0x302   :  { %v5514_v62 = vadd.f32 %v5513_v22, %v11253_v38  ;;  %v5643_v56 = vadd.f32 %v5642_v47, %v11254_v8  ;;  %v5772_v31 = vadd.f32 %v5771_v41, %v11255_v3  ;;  %v6622_v38 = vld [vmem:[#allocation9 + $0x340] sm:$0xff]  ;;  %v11262_v8 = vld [vmem:[#allocation179_spill] sm:$0xff]  ;;  %v5003_v22 = vxor.u32 %v4923_v10, %v4843_v20 }
 0x303   :  { %v4206_v19 = vmax.f32 %v11258_v7, %v4126_v60  ;;  %v9701_v42 = vmul.f32 %v6622_v38, %v5385_v30  ;;  %v4299_v46 = vadd.f32 %v11263_v33, %v11262_v8  ;;  %v4765_v47 = vxor.u32 %v4685_v13, %v4605_v49  ;;  %v11264_v41 = vld [vmem:[#allocation204_spill] sm:$0xff]  ;;  %v11266_v60 = vld [vmem:[#allocation202_spill] sm:$0xff]  ;;  %v11267_v30 = vld [vmem:[#allocation39_spill] sm:$0xff] }
 0x304   :  { %v5515_v5 = vadd.f32 %v5514_v62, %v11259_v6  ;;  %v5644_v4 = vadd.f32 %v5643_v56, %v11260_v53  ;;  %v5773_v40 = vadd.f32 %v5772_v31, %v11261_v58  ;;  %v5073_v62 = vmul.u32 2221713035, %v4993_v34  ;;  %v11268_v6 = vld [vmem:[#allocation114_spill] sm:$0xff] }
 0x305   :  { %v4372_v56 = vmax.f32 %v9689_v51, 0.0  ;;  %v5226_v7 = vxor.u32 %v5146_v36, %v5066_v1  ;;  %v5083_v31 = vmul.u32 2221713035, %v5003_v22  ;;  %v4845_v45 = vmul.u32 2146121005, %v4765_v47  ;;  %v11269_v58 = vld [vmem:[#allocation206_spill] sm:$0xff] }
 0x306   :  { %v5516_v3 = vadd.f32 %v5515_v5, %v11264_v41  ;;  %v5645_v37 = vadd.f32 %v5644_v4, %v11265_v29  ;;  %v5774_v11 = vadd.f32 %v5773_v40, %v11266_v60  ;;  %vm5304_vm8 = vcmp.lt.u32.totalorder %v5224_v57, 2147483648  ;;  %v11270_v51 = vld [vmem:[#allocation230_spill] sm:$0xff]  ;;  %v11272_v1 = vld [vmem:[#allocation49_spill] sm:$0xff]  ;;  %v11278_v41 = vld [vmem:[#allocation248_spill] sm:$0xff] }
 0x307   :  { %v4309_v13 = vadd.f32 %v11263_v33, %v9633_v0  ;;  %v4379_v49 = vmax.f32 %v4299_v46, 0.0  ;;  %v5153_v29 = vshrl.u32 %v5073_v62, 16  ;;  %v9716_v10 = vadd.f32 %v11263_v33, %v9656_v48  ;;  %v11274_v5 = vld [vmem:[#allocation126_spill] sm:$0xff] }
 0x308   :  { %v5517_v39 = vadd.f32 %v5516_v3, %v11267_v30  ;;  %v5646_v53 = vadd.f32 %v5645_v37, %v11268_v6  ;;  %v5775_v20 = vadd.f32 %v5774_v11, %v11269_v58  ;;  %v5163_v40 = vshrl.u32 %v5083_v31, 16  ;;  %v11277_v47 = vld [vmem:[#allocation222_spill] sm:$0xff]  ;;  %v11280_v30 = vld [vmem:[#allocation249_spill] sm:$0xff] }
 0x309   :  { %v11276_v34 = vmax.f32 %v9565_v35, 0.0  ;;  %vm5306_vm9 = vcmp.lt.u32.totalorder %v5226_v7, 2147483648  ;;  %v5233_v0 = vxor.u32 %v5153_v29, %v5073_v62  ;;  %v4925_v8 = vshrl.u32 %v4845_v45, 15  ;;  %v11279_v35 = vld [vmem:[#allocation225_spill] sm:$0xff]  ;;  %v11282_v29 = vld [vmem:[#allocation76_spill] sm:$0xff] }
 0x30a   :  { %v9719_v36 = vadd.f32 %v5517_v39, %v11270_v51  ;;  %v9722_v57 = vadd.f32 %v5646_v53, %v11272_v1  ;;  %v9725_v4 = vadd.f32 %v5775_v20, %v11274_v5  ;;  %v5243_v46 = vxor.u32 %v5163_v40, %v5083_v31  ;;  %v11281_v53 = vld [vmem:[#allocation180_spill] sm:$0xff]  ;;  %v6623_v7 = vld [vmem:[#allocation9 + $0xc8] sm:$0xff] }
 0x30b   :  { %v5384_v38 = vsel %vm5304_vm8, %v11276_v34, 0.0  ;;  %v4513_v48 = vadd.s32 %v11096_v50, %v11235_v43  ;;  %v4523_v22 = vadd.s32 %v9252_v61, %v11235_v43  ;;  %v4128_v3 = vmax.f32 %v11278_v41, %v11277_v47  ;;  %v11283_v51 = vld [vmem:[#allocation156_spill] sm:$0xff]  ;;  %v11285_v40 = vld [vmem:[#allocation77_spill] sm:$0xff]  ;;  %v11286_v34 = vld [vmem:[#allocation158_spill] sm:$0xff] }
 0x30c   :  { %11271 = vst [vmem:[#allocation274_spill] sm:$0xff] %v9719_v36  ;;  %11273 = vst [vmem:[#allocation231_spill] sm:$0xff] %v9722_v57  ;;  %v4389_v37 = vmax.f32 %v4309_v13, 0.0  ;;  %v5005_v60 = vxor.u32 %v4925_v8, %v4845_v45  ;;  %v4525_v11 = vadd.s32 %v9296_v59, %v11235_v43  ;;  %v4069_v39 = vmax.f32 %v11280_v30, %v11279_v35  ;;  %v11289_v47 = vld [vmem:[#allocation224_spill] sm:$0xff]  ;;  %v11305_v57 = vld [vmem:[#allocation161_spill] sm:$0xff] }
 0x30d   :  { %11275 = vst [vmem:[#allocation232_spill] sm:$0xff] %v9725_v4  ;;  %v9740_v62 = vmul.f32 %v9665_v23, %v5384_v38  ;;  %v9743_v31 = vmul.f32 %v9667_v12, %v5384_v38  ;;  %v4594_v50 = vadd.s32 %v11099_v25, %v4513_v48  ;;  %v4604_v61 = vadd.s32 %v11099_v25, %v4523_v22  ;;  %v11288_v48 = vld [vmem:[#allocation125_spill] sm:$0xff] }
 0x30e   :  { %v9748_v6 = vmul.f32 %v9669_v24, %v5384_v38  ;;  %v5386_v45 = vsel %vm5306_vm9, %v4372_v56, 0.0  ;;  %v9754_v58 = vadd.f32 %v11263_v33, %v11281_v53  ;;  %vm5313_vm10 = vcmp.lt.u32.totalorder %v5233_v0, 2147483648  ;;  %v5701_v59 = vld [vmem:[#allocation9 + $0x380] sm:$0xff] }
 0x30f   :  { %vm5323_vm11 = vcmp.lt.u32.totalorder %v5243_v46, 2147483648  ;;  %v5085_v23 = vmul.u32 2221713035, %v5005_v60  ;;  %v9757_v12 = vadd.f32 %v11263_v33, %v4206_v19  ;;  %v4674_v20 = vshrl.u32 %v4594_v50, 16  ;;  %v11290_v19 = vld [vmem:[#allocation251_spill] sm:$0xff]  ;;  %v6624_v60 = vld [vmem:[#allocation9 + $0x208] sm:$0xff] }
 0x310   :  { %v4684_v13 = vshrl.u32 %v4604_v61, 16  ;;  %v11284_v24 = vmax.f32 %v11282_v29, %v11283_v51  ;;  %v4606_v56 = vadd.s32 %v11099_v25, %v4525_v11  ;;  %v9763_v5 = vmul.f32 %v6623_v7, %v5386_v45  ;;  %v5443_v51 = vld [vmem:[#allocation9 + $0x100] sm:$0xff]  ;;  %v11294_v46 = vld [vmem:[#allocation134_spill] sm:$0xff] }
 0x311   :  { %v11287_v38 = vmax.f32 %v11285_v40, %v11286_v34  ;;  %v4422_v22 = vadd.s32 2048, %v11288_v48  ;;  %v4071_v41 = vmax.f32 %v11290_v19, %v11289_v47  ;;  %v9771_v35 = vmul.f32 %v6624_v60, %v5386_v45  ;;  %v11292_v40 = vld [vmem:[#allocation159_spill] sm:$0xff] }
 0x312   :  { %v4208_v1 = vmax.f32 %v11284_v24, %v4128_v3  ;;  %v4754_v30 = vxor.u32 %v4674_v20, %v4594_v50  ;;  %v4764_v53 = vxor.u32 %v4684_v13, %v4604_v61  ;;  %v4686_v3 = vshrl.u32 %v4606_v56, 16  ;;  %v5572_v24 = vld [vmem:[#allocation9 + $0x240] sm:$0xff]  ;;  %v6625_v50 = vld [vmem:[#allocation9 + $0x348] sm:$0xff] }
 0x313   :  { %v4149_v8 = vmax.f32 %v11287_v38, %v4069_v39  ;;  %v5393_v11 = vsel %vm5313_vm10, %v4379_v49, 0.0  ;;  %v5403_v29 = vsel %vm5323_vm11, %v4389_v37, 0.0  ;;  %v9775_v7 = vmul.u32 2246822519, %v4422_v22  ;;  %v11291_v39 = vld [vmem:[#allocation79_spill] sm:$0xff]  ;;  %v11299_v49 = vld [vmem:[#allocation250_spill] sm:$0xff] }
 0x314   :  { %v11293_v34 = vmax.f32 %v11291_v39, %v11292_v40  ;;  %v5165_v47 = vshrl.u32 %v5085_v23, 16  ;;  %v4834_v19 = vmul.u32 2146121005, %v4754_v30  ;;  %v4844_v60 = vmul.u32 2146121005, %v4764_v53 }
 0x315   :  { %v4766_v4 = vxor.u32 %v4686_v3, %v4606_v56  ;;  %v9780_v61 = vmul.f32 %v6625_v50, %v5386_v45  ;;  %v4466_v37 = vadd.s32 %v9775_v7, %v11294_v46  ;;  %v9786_v20 = vmul.f32 %v5443_v51, %v5393_v11 }
 0x316   :  { %v4151_v38 = vmax.f32 %v11293_v34, %v4071_v41  ;;  %v4914_v13 = vshrl.u32 %v4834_v19, 15  ;;  %v4924_v22 = vshrl.u32 %v4844_v60, 15  ;;  %v9788_v39 = vmul.f32 %v5572_v24, %v5393_v11 }
 0x317   :  { %11295 = vst [vmem:[#allocation175_spill] sm:$0xff] %v9786_v20  ;;  %v4846_v41 = vmul.u32 2146121005, %v4766_v4  ;;  %v9790_v30 = vmul.f32 %v5701_v59, %v5393_v11  ;;  %v9792_v56 = vmul.f32 %v5443_v51, %v5403_v29  ;;  %v4547_v45 = vadd.s32 %v11099_v25, %v4466_v37  ;;  %v11300_v51 = vld [vmem:[#allocation252_spill] sm:$0xff] }
 0x318   :  { %11296 = vst [vmem:[#allocation60_spill] sm:$0xff] %v9788_v39  ;;  %v5245_v53 = vxor.u32 %v5165_v47, %v5085_v23  ;;  %v4994_v3 = vxor.u32 %v4914_v13, %v4834_v19  ;;  %v5004_v40 = vxor.u32 %v4924_v22, %v4844_v60  ;;  %v4424_v0 = vadd.s32 2304, %v11288_v48  ;;  %v11301_v23 = vld [vmem:[#allocation78_spill] sm:$0xff]  ;;  %v11302_v47 = vld [vmem:[#allocation160_spill] sm:$0xff] }
 0x319   :  { %11297 = vst [vmem:[#allocation138_spill] sm:$0xff] %v9790_v30  ;;  %11298 = vst [vmem:[#allocation22_spill] sm:$0xff] %v9792_v56  ;;  %v4926_v34 = vshrl.u32 %v4846_v41, 15  ;;  %v4627_v50 = vshrl.u32 %v4547_v45, 16  ;;  %v4070_v20 = vmax.f32 %v11299_v49, %v9352_v54  ;;  %v4423_v4 = vadd.s32 2176, %v11288_v48  ;;  %v11304_v49 = vld [vmem:[#allocation80_spill] sm:$0xff] }
 0x31a   :  { %v5074_v36 = vmul.u32 2221713035, %v4994_v3  ;;  %v5084_v39 = vmul.u32 2221713035, %v5004_v40  ;;  %v4072_v56 = vmax.f32 %v11300_v51, %v9357_v52  ;;  %v11303_v19 = vmax.f32 %v11301_v23, %v11302_v47 }
 0x31b   :  { %v5006_v11 = vxor.u32 %v4926_v34, %v4846_v41  ;;  %v4707_v30 = vxor.u32 %v4627_v50, %v4547_v45  ;;  %v9801_v37 = vmul.u32 2246822519, %v4424_v0  ;;  %v9806_v13 = vmul.u32 2246822519, %v4423_v4 }
 0x31c   :  { %v4150_v60 = vmax.f32 %v11303_v19, %v4070_v20  ;;  %vm5325_vm12 = vcmp.lt.u32.totalorder %v5245_v53, 2147483648  ;;  %v5154_v22 = vshrl.u32 %v5074_v36, 16  ;;  %v5164_v54 = vshrl.u32 %v5084_v39, 16  ;;  %v11309_v53 = vld [vmem:[#allocation269_spill] sm:$0xff] }
 0x31d   :  { %v11306_v3 = vmax.f32 %v11304_v49, %v11305_v57  ;;  %v5086_v41 = vmul.u32 2221713035, %v5006_v11  ;;  %v4787_v34 = vmul.u32 2146121005, %v4707_v30  ;;  %v4468_v52 = vadd.s32 %v9801_v37, %v11294_v46 }
 0x31e   :  { %v4467_v0 = vadd.s32 %v9806_v13, %v11294_v46  ;;  %v9815_v45 = vmul.f32 %v5572_v24, %v5403_v29  ;;  %v9818_v20 = vadd.f32 %v11263_v33, %v4208_v1  ;;  %v4253_v50 = vadd.f32 %v11309_v53, %v4149_v8 }
 0x31f   :  { %v4152_v40 = vmax.f32 %v11306_v3, %v4072_v56  ;;  %v9822_v4 = vadd.f32 %v11309_v53, %v4151_v38  ;;  %v11310_v57 = vmax.f32 %v9716_v10, 0.0  ;;  %v4867_v30 = vshrl.u32 %v4787_v34, 15  ;;  %v6626_v10 = vld [vmem:[#allocation9 + $0x110] sm:$0xff] }
 0x320   :  { %11307 = vst [vmem:[#allocation61_spill] sm:$0xff] %v9815_v45  ;;  %11308 = vst [vmem:[#allocation139_spill] sm:$0xff] %v9818_v20  ;;  %v4549_v11 = vadd.s32 %v11099_v25, %v4468_v52  ;;  %v9828_v51 = vadd.f32 %v11309_v53, %v4150_v60  ;;  %v9830_v23 = vmul.f32 %v5701_v59, %v5403_v29  ;;  %v5166_v8 = vshrl.u32 %v5086_v41, 16  ;;  %v6627_v52 = vld [vmem:[#allocation9 + $0x250] sm:$0xff]  ;;  %v11333_v20 = vld [vmem:[#allocation165_spill] sm:$0xff] }
 0x321   :  { %v5405_v56 = vsel %vm5325_vm12, %v11310_v57, 0.0  ;;  %v5234_v24 = vxor.u32 %v5154_v22, %v5074_v36  ;;  %v9832_v47 = vxor.u32 %v5164_v54, %v5084_v39  ;;  %v4548_v1 = vadd.s32 %v11099_v25, %v4467_v0  ;;  %v6628_v36 = vld [vmem:[#allocation9 + $0x390] sm:$0xff] }
 0x322   :  { %11311 = vst [vmem:[#allocation181_spill] sm:$0xff] %v9830_v23  ;;  %v4947_v19 = vxor.u32 %v4867_v30, %v4787_v34  ;;  %v4629_v38 = vshrl.u32 %v4549_v11, 16  ;;  %v9836_v49 = vadd.f32 %v11309_v53, %v4152_v40  ;;  %v9838_v3 = vmul.f32 %v6626_v10, %v5405_v56  ;;  %v6629_v23 = vld [vmem:[#allocation9 + $0x30] sm:$0xff] }
 0x323   :  { %v9840_v57 = vmul.f32 %v6627_v52, %v5405_v56  ;;  %v4333_v29 = vmax.f32 %v4253_v50, 0.0  ;;  %v9843_v39 = vmul.f32 %v6628_v36, %v5405_v56  ;;  %vm5314_vm13 = vcmp.lt.u32.totalorder %v5234_v24, 2147483648 }
 0x324   :  { %11312 = vst [vmem:[#allocation234_spill] sm:$0xff] %v9838_v3  ;;  %v5027_v60 = vmul.u32 2221713035, %v4947_v19  ;;  %v4709_v40 = vxor.u32 %v4629_v38, %v4549_v11  ;;  %v4628_v34 = vshrl.u32 %v4548_v1, 16  ;;  %v4425_v0 = vadd.s32 2432, %v11288_v48  ;;  %v11315_v19 = vld [vmem:[#allocation253_spill] sm:$0xff] }
 0x325   :  { %11313 = vst [vmem:[#allocation21_spill] sm:$0xff] %v9840_v57  ;;  %11314 = vst [vmem:[#allocation233_spill] sm:$0xff] %v9843_v39  ;;  %vm5324_vm14 = vcmp.lt.u32.totalorder %v9832_v47, 2147483648  ;;  %v9849_v53 = vxor.u32 %v5166_v8, %v5086_v41  ;;  %v4089_v36 = vmax.f32 %v11315_v19, %v9434_v17  ;;  %v4486_v11 = vadd.s32 %v9775_v7, %v11111_v27  ;;  %v11316_v38 = vld [vmem:[#allocation255_spill] sm:$0xff] }
 0x326   :  { %v5107_v30 = vshrl.u32 %v5027_v60, 16  ;;  %v4789_v10 = vmul.u32 2146121005, %v4709_v40  ;;  %v4708_v56 = vxor.u32 %v4628_v34, %v4548_v1  ;;  %v9852_v52 = vmul.u32 2246822519, %v4425_v0  ;;  %v11317_v40 = vld [vmem:[#allocation81_spill] sm:$0xff] }
 0x327   :  { %v4091_v54 = vmax.f32 %v11316_v38, %v9479_v55  ;;  %v4488_v41 = vadd.s32 %v9801_v37, %v11111_v27  ;;  %v11318_v34 = vld [vmem:[#allocation162_spill] sm:$0xff]  ;;  %v11320_v17 = vmax.f32 %v9754_v58, 0.0  ;;  %v4567_v55 = vadd.s32 %v11099_v25, %v4486_v11  ;;  %v11322_v19 = vld [vmem:[#allocation163_spill] sm:$0xff] }
 0x328   :  { %v5187_v59 = vxor.u32 %v5107_v30, %v5027_v60  ;;  %v4869_v8 = vshrl.u32 %v4789_v10, 15  ;;  %v4788_v22 = vmul.u32 2146121005, %v4708_v56  ;;  %v4469_v1 = vadd.s32 %v9852_v52, %v11294_v46  ;;  %v11321_v30 = vld [vmem:[#allocation83_spill] sm:$0xff] }
 0x329   :  { %v11319_v0 = vmax.f32 %v11317_v40, %v11318_v34  ;;  %v9870_v60 = vsel %vm5314_vm13, %v11320_v17, 0.0  ;;  %v11323_v38 = vmax.f32 %v11321_v30, %v11322_v19  ;;  %v6631_v58 = vld [vmem:[#allocation9 + $0x2b0] sm:$0xff]  ;;  %v4647_v57 = vshrl.u32 %v4567_v55, 16 }
 0x32a   :  { %vm5267_vm15 = vcmp.lt.u32.totalorder %v5187_v59, 2147483648  ;;  %v4949_v39 = vxor.u32 %v4869_v8, %v4789_v10  ;;  %v4868_v3 = vshrl.u32 %v4788_v22, 15  ;;  %v4550_v46 = vadd.s32 %v11099_v25, %v4469_v1 }
 0x32b   :  { %v4169_v50 = vmax.f32 %v11319_v0, %v4089_v36  ;;  %v4171_v48 = vmax.f32 %v11323_v38, %v4091_v54  ;;  %v5347_v56 = vsel %vm5267_vm15, %v4333_v29, 0.0  ;;  %v6630_v36 = vld [vmem:[#allocation9 + $0x170] sm:$0xff]  ;;  %v4569_v0 = vadd.s32 %v11099_v25, %v4488_v41 }
 0x32c   :  { %v5810_v40 = vmul.f32 %v6629_v23, %v5347_v56  ;;  %v5898_v34 = vmul.f32 %v6630_v36, %v5347_v56  ;;  %v5986_v24 = vmul.f32 %v6631_v58, %v5347_v56  ;;  %v5029_v59 = vmul.u32 2221713035, %v4949_v39 }
 0x32d   :  { %v4948_v17 = vxor.u32 %v4868_v3, %v4788_v22  ;;  %v4630_v11 = vshrl.u32 %v4550_v46, 16  ;;  %v9882_v10 = vadd.f32 %v8440_v18, %v4169_v50  ;;  %v4727_v19 = vxor.u32 %v4647_v57, %v4567_v55  ;;  %v11326_v55 = vld [vmem:[#allocation82_spill] sm:$0xff] }
 0x32e   :  { %v5849_v30 = vadd.f32 %v9388_v15, %v5810_v40  ;;  %v5937_v29 = vadd.f32 %v9390_v2, %v5898_v34  ;;  %v6025_v54 = vadd.f32 %v9392_v63, %v5986_v24  ;;  %v5109_v23 = vshrl.u32 %v5029_v59, 16  ;;  %v11325_v15 = vld [vmem:[#allocation254_spill] sm:$0xff] }
 0x32f   :  { %v5028_v8 = vmul.u32 2221713035, %v4948_v17  ;;  %v4710_v1 = vxor.u32 %v4630_v11, %v4550_v46  ;;  %v11324_v38 = vmax.f32 %v9757_v12, 0.0  ;;  %v4649_v39 = vshrl.u32 %v4569_v0, 16  ;;  %v11327_v12 = vld [vmem:[#allocation164_spill] sm:$0xff] }
 0x330   :  { %v4090_v22 = vmax.f32 %v11325_v15, %v9481_v9  ;;  %v4487_v2 = vadd.s32 %v9806_v13, %v11111_v27  ;;  %v5189_v63 = vxor.u32 %v5109_v23, %v5029_v59  ;;  %v4807_v56 = vmul.u32 2146121005, %v4727_v19 }
 0x331   :  { %v9888_v3 = vsel %vm5324_vm14, %v11324_v38, 0.0  ;;  %v5108_v50 = vshrl.u32 %v5028_v8, 16  ;;  %v4790_v41 = vmul.u32 2146121005, %v4710_v1  ;;  %v4353_v46 = vmax.f32 %v9882_v10, 0.0  ;;  %v6632_v10 = vld [vmem:[#allocation9 + $0x40] sm:$0xff] }
 0x332   :  { %v4729_v57 = vxor.u32 %v4649_v39, %v4569_v0  ;;  %v11328_v40 = vmax.f32 %v11326_v55, %v11327_v12  ;;  %v4568_v36 = vadd.s32 %v11099_v25, %v4487_v2  ;;  %vm5269_vm0 = vcmp.lt.u32.totalorder %v5189_v63, 2147483648  ;;  %v6633_v1 = vld [vmem:[#allocation9 + $0x180] sm:$0xff]  ;;  %v6637_v12 = vld [vmem:[#allocation9 + $0x2b8] sm:$0xff] }
 0x333   :  { %v5188_v34 = vxor.u32 %v5108_v50, %v5028_v8  ;;  %v4870_v58 = vshrl.u32 %v4790_v41, 15  ;;  %v4887_v9 = vshrl.u32 %v4807_v56, 15  ;;  %v11329_v24 = vmax.f32 %v9822_v4, 0.0  ;;  %v6634_v2 = vld [vmem:[#allocation9 + $0x2c0] sm:$0xff] }
 0x334   :  { %v4170_v47 = vmax.f32 %v11328_v40, %v4090_v22  ;;  %v9902_v59 = vadd.f32 %v8440_v18, %v4171_v48  ;;  %v4809_v11 = vmul.u32 2146121005, %v4729_v57  ;;  %v4648_v23 = vshrl.u32 %v4568_v36, 16  ;;  %v6635_v48 = vld [vmem:[#allocation9 + $0x38] sm:$0xff] }
 0x335   :  { %v5349_v17 = vsel %vm5269_vm0, %v11329_v24, 0.0  ;;  %vm5268_vm1 = vcmp.lt.u32.totalorder %v5188_v34, 2147483648  ;;  %v11330_v8 = vmax.f32 %v9828_v51, 0.0  ;;  %v4950_v15 = vxor.u32 %v4870_v58, %v4790_v41  ;;  %v6636_v57 = vld [vmem:[#allocation9 + $0x178] sm:$0xff] }
 0x336   :  { %v5812_v0 = vmul.f32 %v6632_v10, %v5349_v17  ;;  %v5900_v19 = vmul.f32 %v6633_v1, %v5349_v17  ;;  %v9905_v38 = vadd.f32 %v8440_v18, %v4170_v47  ;;  %v4967_v22 = vxor.u32 %v4887_v9, %v4807_v56  ;;  %v11331_v51 = vld [vmem:[#allocation256_spill] sm:$0xff] }
 0x337   :  { %v5348_v39 = vsel %vm5268_vm1, %v11330_v8, 0.0  ;;  %v4889_v4 = vshrl.u32 %v4809_v11, 15  ;;  %v5988_v63 = vmul.f32 %v6634_v2, %v5349_v17  ;;  %v5030_v24 = vmul.u32 2221713035, %v4950_v15 }
 0x338   :  { %v5811_v50 = vmul.f32 %v6635_v48, %v5348_v39  ;;  %v5899_v55 = vmul.f32 %v6636_v57, %v5348_v39  ;;  %v5987_v40 = vmul.f32 %v6637_v12, %v5348_v39  ;;  %v5047_v10 = vmul.u32 2221713035, %v4967_v22  ;;  %v11332_v57 = vld [vmem:[#allocation84_spill] sm:$0xff]  ;;  %v6640_v12 = vld [vmem:[#allocation9 + $0x2c8] sm:$0xff] }
 0x339   :  { %v4969_v34 = vxor.u32 %v4889_v4, %v4809_v11  ;;  %v4728_v1 = vxor.u32 %v4648_v23, %v4568_v36  ;;  %v4092_v41 = vmax.f32 %v11331_v51, %v9486_v21  ;;  %v5110_v56 = vshrl.u32 %v5030_v24, 16  ;;  %v11335_v23 = vld [vmem:[#allocation257_spill] sm:$0xff] }
 0x33a   :  { %v5850_v47 = vadd.f32 %v5849_v30, %v5811_v50  ;;  %v5938_v45 = vadd.f32 %v5937_v29, %v5899_v55  ;;  %v6026_v33 = vadd.f32 %v6025_v54, %v5987_v40  ;;  %v5127_v58 = vshrl.u32 %v5047_v10, 16  ;;  %v6639_v55 = vld [vmem:[#allocation9 + $0x188] sm:$0xff]  ;;  %v6642_v51 = vld [vmem:[#allocation9 + $0x1c0] sm:$0xff] }
 0x33b   :  { %v5049_v9 = vmul.u32 2221713035, %v4969_v34  ;;  %v4808_v17 = vmul.u32 2146121005, %v4728_v1  ;;  %v11334_v39 = vmax.f32 %v11332_v57, %v11333_v20  ;;  %v5190_v22 = vxor.u32 %v5110_v56, %v5030_v24  ;;  %v6641_v24 = vld [vmem:[#allocation9 + $0x80] sm:$0xff] }
 0x33c   :  { %v5851_v8 = vadd.f32 %v5850_v47, %v5812_v0  ;;  %v5939_v2 = vadd.f32 %v5938_v45, %v5900_v19  ;;  %v6027_v48 = vadd.f32 %v6026_v33, %v5988_v63  ;;  %v5207_v11 = vxor.u32 %v5127_v58, %v5047_v10  ;;  %v6643_v56 = vld [vmem:[#allocation9 + $0x300] sm:$0xff] }
 0x33d   :  { %v4172_v15 = vmax.f32 %v11334_v39, %v4092_v41  ;;  %v5129_v36 = vshrl.u32 %v5049_v9, 16  ;;  %v4888_v30 = vshrl.u32 %v4808_v17, 15  ;;  %v4355_v29 = vmax.f32 %v9902_v59, 0.0  ;;  %v6638_v59 = vld [vmem:[#allocation9 + $0x48] sm:$0xff]  ;;  %v11337_v39 = vld [vmem:[#allocation44_spill] sm:$0xff] }
 0x33e   :  { %v4489_v21 = vadd.s32 %v9852_v52, %v11111_v27  ;;  %v4109_v45 = vmax.f32 %v11335_v23, %v9501_v28  ;;  %vm5270_vm2 = vcmp.lt.u32.totalorder %v5190_v22, 2147483648  ;;  %vm5287_vm3 = vcmp.lt.u32.totalorder %v5207_v11, 2147483648  ;;  %v11338_v22 = vld [vmem:[#allocation120_spill] sm:$0xff] }
 0x33f   :  { %v9916_v54 = vadd.f32 %v8440_v18, %v4172_v15  ;;  %v5209_v33 = vxor.u32 %v5129_v36, %v5049_v9  ;;  %v4968_v20 = vxor.u32 %v4888_v30, %v4808_v17  ;;  %v11336_v0 = vmax.f32 %v9836_v49, 0.0  ;;  %v6644_v9 = vld [vmem:[#allocation9 + $0x90] sm:$0xff]  ;;  %v11339_v36 = vld [vmem:[#allocation220_spill] sm:$0xff] }
 0x340   :  { %v5367_v4 = vsel %vm5287_vm3, %v4353_v46, 0.0  ;;  %v4354_v63 = vmax.f32 %v9905_v38, 0.0  ;;  %v4506_v18 = vadd.s32 %v9775_v7, %v11168_v44  ;;  %v4570_v28 = vadd.s32 %v11099_v25, %v4489_v21 }
 0x341   :  { %v5350_v19 = vsel %vm5270_vm2, %v11336_v0, 0.0  ;;  %v9928_v10 = vmul.f32 %v6641_v24, %v5367_v4  ;;  %vm5289_vm4 = vcmp.lt.u32.totalorder %v5209_v33, 2147483648  ;;  %v5048_v49 = vmul.u32 2221713035, %v4968_v20  ;;  %v11343_v20 = vld [vmem:[#allocation259_spill] sm:$0xff] }
 0x342   :  { %v5813_v50 = vmul.f32 %v6638_v59, %v5350_v19  ;;  %v5901_v27 = vmul.f32 %v6639_v55, %v5350_v19  ;;  %v5989_v40 = vmul.f32 %v6640_v12, %v5350_v19  ;;  %v4356_v46 = vmax.f32 %v9916_v54, 0.0  ;;  %v11344_v19 = vld [vmem:[#allocation45_spill] sm:$0xff]  ;;  %v11346_v55 = vld [vmem:[#allocation47_spill] sm:$0xff] }
 0x343   :  { %v5369_v47 = vsel %vm5289_vm4, %v4355_v29, 0.0  ;;  %v5908_v41 = vmul.f32 %v6642_v51, %v5367_v4  ;;  %v5996_v58 = vmul.f32 %v6643_v56, %v5367_v4  ;;  %v5128_v57 = vshrl.u32 %v5048_v49, 16  ;;  %v11345_v59 = vld [vmem:[#allocation121_spill] sm:$0xff] }
 0x344   :  { %v5852_v34 = vadd.f32 %v5851_v8, %v5813_v50  ;;  %v5940_v38 = vadd.f32 %v5939_v2, %v5901_v27  ;;  %v6028_v1 = vadd.f32 %v6027_v48, %v5989_v40  ;;  %v9931_v17 = vmul.f32 %v6644_v9, %v5369_v47  ;;  %v11340_v8 = vld [vmem:[#allocation85_spill] sm:$0xff]  ;;  %v11341_v2 = vld [vmem:[#allocation167_spill] sm:$0xff] }
 0x345   :  { %v4650_v21 = vshrl.u32 %v4570_v28, 16  ;;  %v5208_v23 = vxor.u32 %v5128_v57, %v5048_v49  ;;  %v11342_v48 = vmax.f32 %v11340_v8, %v11341_v2  ;;  %v4587_v33 = vadd.s32 %v11099_v25, %v4506_v18  ;;  %v6645_v40 = vld [vmem:[#allocation9 + $0x1d0] sm:$0xff]  ;;  %v11353_v8 = vld [vmem:[#allocation229_spill] sm:$0xff] }
 0x346   :  { %v5853_v15 = vadd.f32 %v5852_v34, %v11337_v39  ;;  %v5941_v11 = vadd.f32 %v5940_v38, %v11338_v22  ;;  %v6029_v30 = vadd.f32 %v6028_v1, %v11339_v36  ;;  %v4111_v0 = vmax.f32 %v11343_v20, %v9503_v14  ;;  %v11347_v34 = vld [vmem:[#allocation87_spill] sm:$0xff]  ;;  %v11348_v38 = vld [vmem:[#allocation168_spill] sm:$0xff]  ;;  %v11350_v14 = vld [vmem:[#allocation273_spill] sm:$0xff] }
 0x347   :  { %v4189_v29 = vmax.f32 %v11342_v48, %v4109_v45  ;;  %v4730_v12 = vxor.u32 %v4650_v21, %v4570_v28  ;;  %v5910_v24 = vmul.f32 %v6645_v40, %v5369_v47  ;;  %vm5288_vm5 = vcmp.lt.u32.totalorder %v5208_v23, 2147483648  ;;  %v6646_v57 = vld [vmem:[#allocation9 + $0x310] sm:$0xff]  ;;  %v11351_v36 = vld [vmem:[#allocation133_spill] sm:$0xff] }
 0x348   :  { %v5854_v4 = vadd.f32 %v5853_v15, %v11344_v19  ;;  %v5942_v50 = vadd.f32 %v5941_v11, %v11345_v59  ;;  %v6030_v27 = vadd.f32 %v6029_v30, %v11346_v55  ;;  %v4667_v49 = vshrl.u32 %v4587_v33, 16  ;;  %v6647_v15 = vld [vmem:[#allocation9 + $0x88] sm:$0xff]  ;;  %v11352_v21 = vld [vmem:[#allocation227_spill] sm:$0xff] }
 0x349   :  { %v11349_v1 = vmax.f32 %v11347_v34, %v11348_v38  ;;  %v5368_v9 = vsel %vm5288_vm5, %v4354_v63, 0.0  ;;  %v5998_v39 = vmul.f32 %v6646_v57, %v5369_v47  ;;  %v4810_v28 = vmul.u32 2146121005, %v4730_v12  ;;  %v11354_v19 = vld [vmem:[#allocation25_spill] sm:$0xff]  ;;  %v11355_v59 = vld [vmem:[#allocation54_spill] sm:$0xff] }
 0x34a   :  { %v5855_v18 = vadd.f32 %v5854_v4, %v9523_v16  ;;  %v5943_v51 = vadd.f32 %v5942_v50, %v9526_v32  ;;  %v6031_v56 = vadd.f32 %v6030_v27, %v11350_v14  ;;  %v5821_v22 = vmul.f32 %v6647_v15, %v5368_v9  ;;  %v6648_v16 = vld [vmem:[#allocation9 + $0x1c8] sm:$0xff]  ;;  %v11356_v50 = vld [vmem:[#allocation132_spill] sm:$0xff] }
 0x34b   :  { %v4191_v45 = vmax.f32 %v11349_v1, %v4111_v0  ;;  %v9952_v11 = vadd.f32 %v11179_v26, %v4189_v29  ;;  %v5909_v48 = vmul.f32 %v6648_v16, %v5368_v9  ;;  %v6649_v32 = vld [vmem:[#allocation9 + $0x308] sm:$0xff]  ;;  %v4890_v0 = vshrl.u32 %v4810_v28, 15 }
 0x34c   :  { %v5856_v30 = vadd.f32 %v5855_v18, %v11351_v36  ;;  %v5944_v23 = vadd.f32 %v5943_v51, %v11352_v21  ;;  %v6032_v2 = vadd.f32 %v6031_v56, %v11353_v8  ;;  %v5997_v20 = vmul.f32 %v6649_v32, %v5368_v9  ;;  %v11357_v27 = vld [vmem:[#allocation226_spill] sm:$0xff]  ;;  %v11359_v51 = vld [vmem:[#allocation57_spill] sm:$0xff]  ;;  %v11361_v56 = vld [vmem:[#allocation59_spill] sm:$0xff] }
 0x34d   :  { %v4747_v63 = vxor.u32 %v4667_v49, %v4587_v33  ;;  %v4508_v47 = vadd.s32 %v9801_v37, %v11168_v44  ;;  %v11358_v12 = vld [vmem:[#allocation258_spill] sm:$0xff]  ;;  %v4970_v34 = vxor.u32 %v4890_v0, %v4810_v28  ;;  %v4373_v38 = vmax.f32 %v9952_v11, 0.0  ;;  %v11360_v49 = vld [vmem:[#allocation24_spill] sm:$0xff]  ;;  %v11363_v15 = vld [vmem:[#allocation169_spill] sm:$0xff] }
 0x34e   :  { %v5857_v4 = vadd.f32 %v5856_v30, %v11354_v19  ;;  %v5945_v29 = vadd.f32 %v5944_v23, %v11355_v59  ;;  %v6033_v55 = vadd.f32 %v6032_v2, %v11356_v50  ;;  %v4110_v40 = vmax.f32 %v11358_v12, %v11357_v27  ;;  %v11362_v57 = vld [vmem:[#allocation86_spill] sm:$0xff] }
 0x34f   :  { %v4827_v1 = vmul.u32 2146121005, %v4747_v63  ;;  %v4589_v18 = vadd.s32 %v11099_v25, %v4508_v47  ;;  %v11364_v36 = vmax.f32 %v11362_v57, %v11363_v15  ;;  %v5050_v21 = vmul.u32 2221713035, %v4970_v34  ;;  %v11366_v34 = vld [vmem:[#allocation260_spill] sm:$0xff] }
 0x350   :  { %v5858_v33 = vadd.f32 %v5857_v4, %v11359_v51  ;;  %v5946_v14 = vadd.f32 %v5945_v29, %v11360_v49  ;;  %v6034_v9 = vadd.f32 %v6033_v55, %v11361_v56  ;;  %v4507_v28 = vadd.s32 %v9806_v13, %v11168_v44  ;;  %v11368_v49 = vld [vmem:[#allocation170_spill] sm:$0xff]  ;;  %v6650_v57 = vld [vmem:[#allocation9 + $0x98] sm:$0xff] }
 0x351   :  { %v4190_v30 = vmax.f32 %v11364_v36, %v4110_v40  ;;  %v4907_v23 = vshrl.u32 %v4827_v1, 15  ;;  %v4669_v8 = vshrl.u32 %v4589_v18, 16  ;;  %v9976_v32 = vadd.f32 %v11179_v26, %v4191_v45  ;;  %v11365_v40 = vld [vmem:[#allocation188_spill] sm:$0xff] }
 0x352   :  { %v5859_v11 = vadd.f32 %v5858_v33, %v9928_v10  ;;  %v5947_v2 = vadd.f32 %v5946_v14, %v5908_v41  ;;  %v6035_v16 = vadd.f32 %v6034_v9, %v5996_v58  ;;  %v5130_v0 = vshrl.u32 %v5050_v21, 16  ;;  %v11367_v33 = vld [vmem:[#allocation88_spill] sm:$0xff] }
 0x353   :  { %v4987_v63 = vxor.u32 %v4907_v23, %v4827_v1  ;;  %v4749_v47 = vxor.u32 %v4669_v8, %v4589_v18  ;;  %v4588_v19 = vadd.s32 %v11099_v25, %v4507_v28  ;;  %v9980_v50 = vadd.f32 %v11179_v26, %v4190_v30  ;;  %v9985_v18 = vld [vmem:[#allocation9 + $0x108] sm:$0xff]  ;;  %v6651_v36 = vld [vmem:[#allocation9 + $0x1d8] sm:$0xff] }
 0x354   :  { %v5860_v4 = vadd.f32 %v5859_v11, %v5821_v22  ;;  %v5948_v59 = vadd.f32 %v5947_v2, %v5909_v48  ;;  %v6036_v29 = vadd.f32 %v6035_v16, %v5997_v20  ;;  %v5210_v55 = vxor.u32 %v5130_v0, %v5050_v21  ;;  %v6652_v21 = vld [vmem:[#allocation9 + $0x318] sm:$0xff] }
 0x355   :  { %v5067_v27 = vmul.u32 2221713035, %v4987_v63  ;;  %v4829_v12 = vmul.u32 2146121005, %v4749_v47  ;;  %v4668_v10 = vshrl.u32 %v4588_v19, 16  ;;  %v4112_v1 = vmax.f32 %v11366_v34, %v11365_v40  ;;  %v6653_v40 = vld [vmem:[#allocation9 + $0xd0] sm:$0xff] }
 0x356   :  { %v5861_v41 = vadd.f32 %v5860_v4, %v9931_v17  ;;  %v5949_v58 = vadd.f32 %v5948_v59, %v5910_v24  ;;  %v6037_v45 = vadd.f32 %v6036_v29, %v5998_v39  ;;  %vm5290_vm6 = vcmp.lt.u32.totalorder %v5210_v55, 2147483648  ;;  %v11370_v24 = vld [vmem:[#allocation56_spill] sm:$0xff]  ;;  %v11371_v39 = vld [vmem:[#allocation261_spill] sm:$0xff]  ;;  %v11372_v4 = vld [vmem:[#allocation219_spill] sm:$0xff] }
 0x357   :  { %v5147_v22 = vshrl.u32 %v5067_v27, 16  ;;  %v4909_v48 = vshrl.u32 %v4829_v12, 15  ;;  %v4748_v20 = vxor.u32 %v4668_v10, %v4588_v19  ;;  %v5370_v51 = vsel %vm5290_vm6, %v4356_v46, 0.0  ;;  %v11373_v29 = vld [vmem:[#allocation218_spill] sm:$0xff] }
 0x358   :  { %v11369_v14 = vmax.f32 %v11367_v33, %v11368_v49  ;;  %v4509_v17 = vadd.s32 %v9852_v52, %v11168_v44  ;;  %v4129_v9 = vmax.f32 %v11371_v39, %v11370_v24  ;;  %v5823_v15 = vmul.f32 %v6650_v57, %v5370_v51  ;;  %v11381_v57 = vld [vmem:[#allocation136_spill] sm:$0xff] }
 0x359   :  { %v5911_v30 = vmul.f32 %v6651_v36, %v5370_v51  ;;  %v5999_v23 = vmul.f32 %v6652_v21, %v5370_v51  ;;  %v5227_v8 = vxor.u32 %v5147_v22, %v5067_v27  ;;  %v9998_v54 = vmul.f32 %v9985_v18, %v9870_v60  ;;  %v11374_v27 = vld [vmem:[#allocation221_spill] sm:$0xff]  ;;  %v11383_v36 = vld [vmem:[#allocation100_spill] sm:$0xff] }
 0x35a   :  { %v4192_v56 = vmax.f32 %v11369_v14, %v4112_v1  ;;  %v4989_v46 = vxor.u32 %v4909_v48, %v4829_v12  ;;  %v4828_v28 = vmul.u32 2146121005, %v4748_v20  ;;  %v4590_v11 = vadd.s32 %v11099_v25, %v4509_v17  ;;  %v11377_v48 = vld [vmem:[#allocation19_spill] sm:$0xff]  ;;  %v11378_v14 = vld [vmem:[#allocation89_spill] sm:$0xff] }
 0x35b   :  { %v5862_v2 = vadd.f32 %v5861_v41, %v5823_v15  ;;  %v5950_v44 = vadd.f32 %v5949_v58, %v5911_v30  ;;  %v6038_v16 = vadd.f32 %v6037_v45, %v5999_v23  ;;  %vm5307_vm7 = vcmp.lt.u32.totalorder %v5227_v8, 2147483648  ;;  %v11379_v17 = vld [vmem:[#allocation171_spill] sm:$0xff] }
 0x35c   :  { %v5387_v0 = vsel %vm5307_vm7, %v4373_v38, 0.0  ;;  %v4375_v63 = vmax.f32 %v9976_v32, 0.0  ;;  %v5069_v47 = vmul.u32 2221713035, %v4989_v46  ;;  %v4908_v19 = vshrl.u32 %v4828_v28, 15  ;;  %v11375_v38 = vld [vmem:[#allocation128_spill] sm:$0xff] }
 0x35d   :  { %v5863_v59 = vadd.f32 %v5862_v2, %v11372_v4  ;;  %v5951_v55 = vadd.f32 %v5950_v44, %v11373_v29  ;;  %v6039_v10 = vadd.f32 %v6038_v16, %v11374_v27  ;;  %v4374_v12 = vmax.f32 %v9980_v50, 0.0  ;;  %v11376_v32 = vld [vmem:[#allocation52_spill] sm:$0xff]  ;;  %v6654_v23 = vld [vmem:[#allocation9 + $0x210] sm:$0xff] }
 0x35e   :  { %v5830_v34 = vmul.f32 %v6653_v40, %v5387_v0  ;;  %v5149_v1 = vshrl.u32 %v5069_v47, 16  ;;  %v4988_v41 = vxor.u32 %v4908_v19, %v4828_v28  ;;  %v10007_v58 = vadd.f32 %v11179_v26, %v4192_v56  ;;  %v11382_v56 = vld [vmem:[#allocation137_spill] sm:$0xff]  ;;  %v6655_v16 = vld [vmem:[#allocation9 + $0x350] sm:$0xff] }
 0x35f   :  { %v5864_v45 = vadd.f32 %v5863_v59, %v11375_v38  ;;  %v5952_v22 = vadd.f32 %v5951_v55, %v11376_v32  ;;  %v6040_v20 = vadd.f32 %v6039_v10, %v11377_v48  ;;  %v4670_v51 = vshrl.u32 %v4590_v11, 16  ;;  %v6656_v19 = vld [vmem:[#allocation9 + $0xe0] sm:$0xff] }
 0x360   :  { %v5229_v33 = vxor.u32 %v5149_v1, %v5069_v47  ;;  %v5068_v49 = vmul.u32 2221713035, %v4988_v41  ;;  %v11380_v24 = vmax.f32 %v11378_v14, %v11379_v17  ;;  %v4526_v39 = vadd.s32 %v9775_v7, %v11235_v43  ;;  %v6657_v59 = vld [vmem:[#allocation9 + $0x220] sm:$0xff] }
 0x361   :  { %v5865_v26 = vadd.f32 %v5864_v45, %v11381_v57  ;;  %v5953_v15 = vadd.f32 %v5952_v22, %v11382_v56  ;;  %v6041_v30 = vadd.f32 %v6040_v20, %v11383_v36  ;;  %v4750_v21 = vxor.u32 %v4670_v51, %v4590_v11  ;;  %v11384_v55 = vld [vmem:[#allocation104_spill] sm:$0xff]  ;;  %v11385_v10 = vld [vmem:[#allocation277_spill] sm:$0xff]  ;;  %v11388_v36 = vld [vmem:[#allocation91_spill] sm:$0xff] }
 0x362   :  { %v10015_v50 = vmax.f32 %v11380_v24, %v4129_v9  ;;  %v5918_v8 = vmul.f32 %v6654_v23, %v5387_v0  ;;  %vm5309_vm8 = vcmp.lt.u32.totalorder %v5229_v33, 2147483648  ;;  %v5148_v46 = vshrl.u32 %v5068_v49, 16  ;;  %v6659_v20 = vld [vmem:[#allocation9 + $0xd8] sm:$0xff]  ;;  %v5573_v24 = vld [vmem:[#allocation9 + $0x248] sm:$0xff] }
 0x363   :  { %v4607_v28 = vadd.s32 %v11099_v25, %v4526_v39  ;;  %v5866_v2 = vadd.f32 %v5865_v26, %v9740_v62  ;;  %v5954_v9 = vadd.f32 %v5953_v15, %v9743_v31  ;;  %v6042_v44 = vadd.f32 %v6041_v30, %v9748_v6  ;;  %v6658_v62 = vld [vmem:[#allocation9 + $0x360] sm:$0xff]  ;;  %v6660_v33 = vld [vmem:[#allocation9 + $0x218] sm:$0xff] }
 0x364   :  { %v5389_v7 = vsel %vm5309_vm8, %v4375_v63, 0.0  ;;  %v6006_v47 = vmul.f32 %v6655_v16, %v5387_v0  ;;  %v5228_v11 = vxor.u32 %v5148_v46, %v5068_v49  ;;  %v4830_v41 = vmul.u32 2146121005, %v4750_v21  ;;  %v11386_v6 = vld [vmem:[#allocation228_spill] sm:$0xff]  ;;  %v11392_v21 = vld [vmem:[#allocation263_spill] sm:$0xff]  ;;  %v5702_v46 = vld [vmem:[#allocation9 + $0x388] sm:$0xff] }
 0x365   :  { %v5832_v4 = vmul.f32 %v6656_v19, %v5389_v7  ;;  %v5920_v29 = vmul.f32 %v6657_v59, %v5389_v7  ;;  %v5867_v27 = vadd.f32 %v5866_v2, %v11384_v55  ;;  %v5955_v40 = vadd.f32 %v5954_v9, %v11385_v10  ;;  %v11387_v63 = vld [vmem:[#allocation264_spill] sm:$0xff]  ;;  %v11393_v16 = vld [vmem:[#allocation90_spill] sm:$0xff] }
 0x366   :  { %v6043_v1 = vadd.f32 %v6042_v44, %v9701_v42  ;;  %v6008_v38 = vmul.f32 %v6658_v62, %v5389_v7  ;;  %vm5308_vm9 = vcmp.lt.u32.totalorder %v5228_v11, 2147483648  ;;  %v4687_v31 = vshrl.u32 %v4607_v28, 16  ;;  %v6661_v42 = vld [vmem:[#allocation9 + $0x358] sm:$0xff] }
 0x367   :  { %v4131_v45 = vmax.f32 %v11387_v63, %v11386_v6  ;;  %v5868_v0 = vadd.f32 %v5867_v27, %v9763_v5  ;;  %v5956_v32 = vadd.f32 %v5955_v40, %v9771_v35  ;;  %v5388_v48 = vsel %vm5308_vm9, %v4374_v12, 0.0  ;;  %v11389_v5 = vld [vmem:[#allocation172_spill] sm:$0xff]  ;;  %v11391_v12 = vld [vmem:[#allocation135_spill] sm:$0xff]  ;;  %v11396_v6 = vld [vmem:[#allocation58_spill] sm:$0xff] }
 0x368   :  { %v6044_v22 = vadd.f32 %v6043_v1, %v9780_v61  ;;  %v5831_v51 = vmul.f32 %v6659_v20, %v5388_v48  ;;  %v5919_v49 = vmul.f32 %v6660_v33, %v5388_v48  ;;  %v6007_v14 = vmul.f32 %v6661_v42, %v5388_v48  ;;  %v11397_v63 = vld [vmem:[#allocation265_spill] sm:$0xff]  ;;  %v11400_v48 = vld [vmem:[#allocation174_spill] sm:$0xff]  ;;  %v11403_v42 = vld [vmem:[#allocation231_spill] sm:$0xff] }
 0x369   :  { %v4910_v17 = vshrl.u32 %v4830_v41, 15  ;;  %v5869_v39 = vadd.f32 %v5868_v0, %v5830_v34  ;;  %v5957_v57 = vadd.f32 %v5956_v32, %v5918_v8  ;;  %v4767_v56 = vxor.u32 %v4687_v31, %v4607_v28  ;;  %v11398_v0 = vld [vmem:[#allocation191_spill] sm:$0xff] }
 0x36a   :  { %v6045_v26 = vadd.f32 %v6044_v22, %v6006_v47  ;;  %v11390_v30 = vmax.f32 %v11388_v36, %v11389_v5  ;;  %v4528_v61 = vadd.s32 %v9801_v37, %v11235_v43  ;;  %v4130_v23 = vmax.f32 %v11392_v21, %v11391_v12  ;;  %v11394_v47 = vld [vmem:[#allocation173_spill] sm:$0xff]  ;;  %v11399_v22 = vld [vmem:[#allocation92_spill] sm:$0xff]  ;;  %v11406_v21 = vld [vmem:[#allocation186_spill] sm:$0xff] }
 0x36b   :  { %v4990_v15 = vxor.u32 %v4910_v17, %v4830_v41  ;;  %v5870_v2 = vadd.f32 %v5869_v39, %v5831_v51  ;;  %v5958_v9 = vadd.f32 %v5957_v57, %v5919_v49  ;;  %v4847_v7 = vmul.u32 2146121005, %v4767_v56  ;;  %v11402_v49 = vld [vmem:[#allocation127_spill] sm:$0xff]  ;;  %v6663_v5 = vld [vmem:[#allocation9 + $0x228] sm:$0xff] }
 0x36c   :  { %v4211_v35 = vmax.f32 %v11390_v30, %v4131_v45  ;;  %v6046_v44 = vadd.f32 %v6045_v26, %v6007_v14  ;;  %v10042_v34 = vmul.f32 %v5573_v24, %v9870_v60  ;;  %v4609_v28 = vadd.s32 %v11099_v25, %v4528_v61  ;;  %v11404_v14 = vld [vmem:[#allocation139_spill] sm:$0xff]  ;;  %v6664_v61 = vld [vmem:[#allocation9 + $0x368] sm:$0xff] }
 0x36d   :  { %v5070_v8 = vmul.u32 2221713035, %v4990_v15  ;;  %v11395_v19 = vmax.f32 %v11393_v16, %v11394_v47  ;;  %v5871_v11 = vadd.f32 %v5870_v2, %v5832_v4  ;;  %v5959_v37 = vadd.f32 %v5958_v9, %v5920_v29  ;;  %v6662_v15 = vld [vmem:[#allocation9 + $0xe8] sm:$0xff] }
 0x36e   :  { %v6047_v55 = vadd.f32 %v6046_v44, %v6008_v38  ;;  %v4927_v27 = vshrl.u32 %v4847_v7, 15  ;;  %v10049_v10 = vmul.f32 %v5702_v46, %v9870_v60  ;;  %v4376_v40 = vmax.f32 %v10007_v58, 0.0 }
 0x36f   :  { %v4210_v59 = vmax.f32 %v11395_v19, %v4130_v23  ;;  %v5150_v1 = vshrl.u32 %v5070_v8, 16  ;;  %v4689_v41 = vshrl.u32 %v4609_v28, 16  ;;  %v4527_v31 = vadd.s32 %v9806_v13, %v11235_v43 }
 0x370   :  { %v5007_v62 = vxor.u32 %v4927_v27, %v4847_v7  ;;  %v4132_v45 = vmax.f32 %v11397_v63, %v11396_v6  ;;  %v4519_v4 = vadd.s32 %v11398_v0, %v11235_v43  ;;  %v10060_v29 = vmul.f32 %v9985_v18, %v9888_v3  ;;  %v11410_v63 = vld [vmem:[#allocation270_spill] sm:$0xff] }
 0x371   :  { %vm5326_vm10 = vcmp.lt.u32.totalorder %v9849_v53, 2147483648  ;;  %v5230_v60 = vxor.u32 %v5150_v1, %v5070_v8  ;;  %v4769_v58 = vxor.u32 %v4689_v41, %v4609_v28  ;;  %v4608_v32 = vadd.s32 %v11099_v25, %v4527_v31  ;;  %v11408_v41 = vld [vmem:[#allocation268_spill] sm:$0xff]  ;;  %v11409_v31 = vld [vmem:[#allocation198_spill] sm:$0xff] }
 0x372   :  { %v5087_v38 = vmul.u32 2221713035, %v5007_v62  ;;  %v11401_v13 = vmax.f32 %v11399_v22, %v11400_v48  ;;  %v4600_v51 = vadd.s32 %v11099_v25, %v4519_v4  ;;  %v10071_v33 = vmul.f32 %v5573_v24, %v9888_v3  ;;  %v11412_v4 = vld [vmem:[#allocation55_spill] sm:$0xff]  ;;  %v5577_v22 = vld [vmem:[#allocation9 + $0x268] sm:$0xff] }
 0x373   :  { %vm5310_vm11 = vcmp.lt.u32.totalorder %v5230_v60, 2147483648  ;;  %v4849_v18 = vmul.u32 2146121005, %v4769_v58  ;;  %v5648_v53 = vadd.f32 %v11403_v42, %v11402_v49  ;;  %v11405_v17 = vmax.f32 %v11404_v14, 0.0  ;;  %v11413_v58 = vld [vmem:[#allocation131_spill] sm:$0xff]  ;;  %v11416_v14 = vld [vmem:[#allocation274_spill] sm:$0xff] }
 0x374   :  { %v10067_v20 = vmax.f32 %v11401_v13, %v4132_v45  ;;  %v5390_v57 = vsel %vm5310_vm11, %v4376_v40, 0.0  ;;  %v5167_v26 = vshrl.u32 %v5087_v38, 16  ;;  %v4688_v56 = vshrl.u32 %v4608_v32, 16  ;;  %v11407_v40 = vld [vmem:[#allocation271_spill] sm:$0xff] }
 0x375   :  { %v10077_v39 = vsel %vm5326_vm10, %v11405_v17, 0.0  ;;  %v5833_v36 = vmul.f32 %v6662_v15, %v5390_v57  ;;  %v5921_v30 = vmul.f32 %v6663_v5, %v5390_v57  ;;  %v6009_v12 = vmul.f32 %v6664_v61, %v5390_v57  ;;  %v6665_v48 = vld [vmem:[#allocation9 + $0x258] sm:$0xff] }
 0x376   :  { %v4929_v24 = vshrl.u32 %v4849_v18, 15  ;;  %v4313_v23 = vadd.f32 %v11406_v21, %v10015_v50  ;;  %v5247_v2 = vxor.u32 %v5167_v26, %v5087_v38  ;;  %v4768_v9 = vxor.u32 %v4688_v56, %v4608_v32  ;;  %v5578_v56 = vld [vmem:[#allocation9 + $0x270] sm:$0xff]  ;;  %v11418_v5 = vld [vmem:[#allocation60_spill] sm:$0xff] }
 0x377   :  { %v4680_v44 = vshrl.u32 %v4600_v51, 16  ;;  %v5872_v7 = vadd.f32 %v5871_v11, %v5833_v36  ;;  %v5960_v8 = vadd.f32 %v5959_v37, %v5921_v30  ;;  %v6048_v28 = vadd.f32 %v6047_v55, %v6009_v12  ;;  %v11417_v15 = vld [vmem:[#allocation43_spill] sm:$0xff] }
 0x378   :  { %v5009_v16 = vxor.u32 %v4929_v24, %v4849_v18  ;;  %v10082_v47 = vadd.f32 %v11406_v21, %v4211_v35  ;;  %v4848_v19 = vmul.u32 2146121005, %v4768_v9  ;;  %v5649_v1 = vadd.f32 %v5648_v53, %v11407_v40  ;;  %v11411_v35 = vld [vmem:[#allocation130_spill] sm:$0xff]  ;;  %v11415_v53 = vld [vmem:[#allocation51_spill] sm:$0xff]  ;;  %v11421_v9 = vld [vmem:[#allocation232_spill] sm:$0xff] }
 0x379   :  { %v4760_v27 = vxor.u32 %v4680_v44, %v4600_v51  ;;  %v5873_v62 = vadd.f32 %v5872_v7, %v11408_v41  ;;  %v5961_v6 = vadd.f32 %v5960_v8, %v11409_v31  ;;  %v6049_v50 = vadd.f32 %v6048_v28, %v11410_v63  ;;  %v11419_v12 = vld [vmem:[#allocation267_spill] sm:$0xff] }
 0x37a   :  { %v4314_v45 = vadd.f32 %v11406_v21, %v4210_v59  ;;  %v10090_v11 = vmul.f32 %v5702_v46, %v9888_v3  ;;  %v4393_v37 = vmax.f32 %v4313_v23, 0.0  ;;  %vm5327_vm12 = vcmp.lt.u32.totalorder %v5247_v2, 2147483648  ;;  %v11414_v3 = vld [vmem:[#allocation189_spill] sm:$0xff]  ;;  %v11420_v23 = vld [vmem:[#allocation50_spill] sm:$0xff] }
 0x37b   :  { %v5089_v55 = vmul.u32 2221713035, %v5009_v16  ;;  %v10093_v0 = vadd.f32 %v5873_v62, %v11411_v35  ;;  %v5962_v60 = vadd.f32 %v5961_v6, %v11412_v4  ;;  %v10097_v38 = vadd.f32 %v6049_v50, %v11413_v58  ;;  %v11422_v16 = vld [vmem:[#allocation61_spill] sm:$0xff]  ;;  %v11425_v62 = vld [vmem:[#allocation266_spill] sm:$0xff] }
 0x37c   :  { %v4928_v32 = vshrl.u32 %v4848_v19, 15  ;;  %v5927_v13 = vmul.f32 %v6665_v48, %v10077_v39  ;;  %v4840_v51 = vmul.u32 2146121005, %v4760_v27  ;;  %v5650_v46 = vadd.f32 %v5649_v1, %v11414_v3  ;;  %v11423_v27 = vld [vmem:[#allocation176_spill] sm:$0xff]  ;;  %v11428_v35 = vld [vmem:[#allocation53_spill] sm:$0xff]  ;;  %v11430_v3 = vld [vmem:[#allocation138_spill] sm:$0xff] }
 0x37d   :  { %v5169_v59 = vshrl.u32 %v5089_v55, 16  ;;  %v4395_v18 = vmax.f32 %v10082_v47, 0.0  ;;  %v4394_v49 = vmax.f32 %v4314_v45, 0.0  ;;  %v5519_v17 = vadd.f32 %v11416_v14, %v11415_v53  ;;  %v11424_v1 = vld [vmem:[#allocation276_spill] sm:$0xff]  ;;  %v11426_v45 = vld [vmem:[#allocation115_spill] sm:$0xff] }
 0x37e   :  { %v5008_v42 = vxor.u32 %v4928_v32, %v4848_v19  ;;  %v10105_v57 = vsel %vm5327_vm12, %v4393_v37, 0.0  ;;  %v4920_v26 = vshrl.u32 %v4840_v51, 15  ;;  %v5617_v36 = vmul.f32 %v5577_v22, %v11417_v15  ;;  %v6666_v6 = vld [vmem:[#allocation9 + $0x260] sm:$0xff] }
 0x37f   :  { %v5651_v30 = vadd.f32 %v5650_v46, %v11418_v5  ;;  %v5520_v24 = vadd.f32 %v5519_v17, %v11419_v12  ;;  %v5777_v44 = vadd.f32 %v11421_v9, %v11420_v23  ;;  %v4529_v7 = vadd.s32 %v9852_v52, %v11235_v43  ;;  %v11429_v32 = vld [vmem:[#allocation208_spill] sm:$0xff]  ;;  %v11432_v17 = vld [vmem:[#allocation117_spill] sm:$0xff]  ;;  %v11433_v12 = vld [vmem:[#allocation38_spill] sm:$0xff] }
 0x380   :  { %v5088_v61 = vmul.u32 2221713035, %v5008_v42  ;;  %v5249_v8 = vxor.u32 %v5169_v59, %v5089_v55  ;;  %v5000_v28 = vxor.u32 %v4920_v26, %v4840_v51  ;;  %v5963_v47 = vadd.f32 %v5962_v60, %v11422_v16  ;;  %v11427_v55 = vld [vmem:[#allocation175_spill] sm:$0xff]  ;;  %v11431_v42 = vld [vmem:[#allocation21_spill] sm:$0xff] }
 0x381   :  { %v5652_v2 = vadd.f32 %v5651_v30, %v10042_v34  ;;  %v5618_v40 = vmul.f32 %v5578_v56, %v11423_v27  ;;  %v5521_v41 = vadd.f32 %v5520_v24, %v11424_v1  ;;  %v5778_v31 = vadd.f32 %v5777_v44, %v11425_v62  ;;  %v11436_v16 = vld [vmem:[#allocation209_spill] sm:$0xff] }
 0x382   :  { %v5168_v19 = vshrl.u32 %v5088_v61, 16  ;;  %v5928_v63 = vmul.f32 %v6666_v6, %v10105_v57  ;;  %v5080_v50 = vmul.u32 2221713035, %v5000_v28  ;;  %v4610_v43 = vadd.s32 %v11099_v25, %v4529_v7  ;;  %v11434_v7 = vld [vmem:[#allocation129_spill] sm:$0xff] }
 0x383   :  { %v5653_v37 = vadd.f32 %v5652_v2, %v11426_v45  ;;  %v5522_v34 = vadd.f32 %v5521_v41, %v11427_v55  ;;  %v5779_v4 = vadd.f32 %v5778_v31, %v11428_v35  ;;  %v5964_v60 = vadd.f32 %v5963_v47, %v10071_v33  ;;  %v10134_v33 = vld [vmem:[#allocation9 + $0x278] sm:$0xff]  ;;  %v5449_v2 = vld [vmem:[#allocation9 + $0x130] sm:$0xff]  ;;  %v5706_v47 = vld [vmem:[#allocation9 + $0x3a8] sm:$0xff] }
 0x384   :  { %v5248_v52 = vxor.u32 %v5168_v19, %v5088_v61  ;;  %vm5329_vm13 = vcmp.lt.u32.totalorder %v5249_v8, 2147483648  ;;  %v5160_v58 = vshrl.u32 %v5080_v50, 16  ;;  %v4690_v59 = vshrl.u32 %v4610_v43, 16  ;;  %v5448_v61 = vld [vmem:[#allocation9 + $0x128] sm:$0xff]  ;;  %v11437_v19 = vld [vmem:[#allocation116_spill] sm:$0xff] }
 0x385   :  { %v5654_v48 = vadd.f32 %v5653_v37, %v11429_v32  ;;  %v5523_v51 = vadd.f32 %v5522_v34, %v9998_v54  ;;  %v5780_v46 = vadd.f32 %v5779_v4, %v11430_v3  ;;  %v5965_v53 = vadd.f32 %v5964_v60, %v11431_v42  ;;  %v5450_v55 = vld [vmem:[#allocation9 + $0x138] sm:$0xff]  ;;  %v11440_v35 = vld [vmem:[#allocation22_spill] sm:$0xff]  ;;  %v11441_v60 = vld [vmem:[#allocation217_spill] sm:$0xff] }
 0x386   :  { %vm5328_vm14 = vcmp.lt.u32.totalorder %v5248_v52, 2147483648  ;;  %v5240_v14 = vxor.u32 %v5160_v58, %v5080_v50  ;;  %v4770_v5 = vxor.u32 %v4690_v59, %v4610_v43  ;;  %v10132_v30 = vsel %vm5329_vm13, %v4395_v18, 0.0  ;;  %v11439_v50 = vld [vmem:[#allocation210_spill] sm:$0xff]  ;;  %v5708_v59 = vld [vmem:[#allocation9 + $0x3b8] sm:$0xff] }
 0x387   :  { %v10129_v25 = vsel %vm5328_vm14, %v4394_v49, 0.0  ;;  %v5655_v26 = vadd.f32 %v5654_v48, %v11432_v17  ;;  %v5524_v24 = vadd.f32 %v5523_v51, %v11433_v12  ;;  %v5781_v23 = vadd.f32 %v5780_v46, %v10049_v10  ;;  %v11442_v46 = vld [vmem:[#allocation181_spill] sm:$0xff]  ;;  %v6667_v17 = vld [vmem:[#allocation9 + $0x118] sm:$0xff] }
 0x388   :  { %v5966_v54 = vadd.f32 %v5965_v53, %v5927_v13  ;;  %vm5320_vm15 = vcmp.lt.u32.totalorder %v5240_v14, 2147483648  ;;  %v4850_v44 = vmul.u32 2146121005, %v4770_v5  ;;  %v5929_v49 = vmul.f32 %v5577_v22, %v10129_v25  ;;  %v5707_v22 = vld [vmem:[#allocation9 + $0x3b0] sm:$0xff]  ;;  %v6668_v5 = vld [vmem:[#allocation9 + $0x398] sm:$0xff] }
 0x389   :  { %v5656_v9 = vadd.f32 %v5655_v26, %v5617_v36  ;;  %v11435_v8 = vmax.f32 %v11434_v7, 0.0  ;;  %v5525_v18 = vadd.f32 %v5524_v24, %v11436_v16  ;;  %v5782_v1 = vadd.f32 %v5781_v23, %v11437_v19  ;;  %v11438_v36 = vld [vmem:[#allocation41_spill] sm:$0xff] }
 0x38a   :  { %v5967_v41 = vadd.f32 %v5966_v54, %v5928_v63  ;;  %v5488_v10 = vmul.f32 %v5448_v61, %v11417_v15  ;;  %v5930_v13 = vmul.f32 %v5578_v56, %v10132_v30  ;;  %v4930_v37 = vshrl.u32 %v4850_v44, 15  ;;  %v11444_v7 = vld [vmem:[#allocation233_spill] sm:$0xff] }
 0x38b   :  { %v5400_v28 = vsel %vm5320_vm15, %v11435_v8, 0.0  ;;  %v5657_v31 = vadd.f32 %v5656_v9, %v5618_v40  ;;  %v5526_v6 = vadd.f32 %v5525_v18, %v11438_v36  ;;  %v5783_v45 = vadd.f32 %v5782_v1, %v11439_v50  ;;  %v6669_v9 = vld [vmem:[#allocation9 + $0x120] sm:$0xff] }
 0x38c   :  { %v5619_v62 = vmul.f32 %v10134_v33, %v5400_v28  ;;  %v5968_v43 = vadd.f32 %v5967_v41, %v5929_v49  ;;  %v5489_v34 = vmul.f32 %v5449_v2, %v11423_v27  ;;  %v5746_v63 = vmul.f32 %v5706_v47, %v11417_v15  ;;  %v6670_v19 = vld [vmem:[#allocation9 + $0x3a0] sm:$0xff] }
 0x38d   :  { %v5875_v40 = vadd.f32 %v10093_v0, %v11440_v35  ;;  %v5527_v4 = vadd.f32 %v5526_v6, %v5488_v10  ;;  %v5784_v58 = vadd.f32 %v5783_v45, %v11441_v60  ;;  %v5010_v56 = vxor.u32 %v4930_v37, %v4850_v44 }
 0x38e   :  { %v5658_v52 = vadd.f32 %v5657_v31, %v5619_v62  ;;  %v5969_v32 = vadd.f32 %v5968_v43, %v5930_v13  ;;  %v4316_v48 = vadd.f32 %v11406_v21, %v10067_v20  ;;  %v5747_v51 = vmul.f32 %v5707_v22, %v11423_v27  ;;  %v11443_v20 = vld [vmem:[#allocation234_spill] sm:$0xff] }
 0x38f   :  { %v5876_v3 = vadd.f32 %v5875_v40, %v10060_v29  ;;  %v6051_v15 = vadd.f32 %v10097_v38, %v11442_v46  ;;  %v5490_v42 = vmul.f32 %v5450_v55, %v5400_v28  ;;  %v5528_v53 = vadd.f32 %v5527_v4, %v5489_v34 }
 0x390   :  { %5659 = vadd.xlane.f32.xlu1 %v5658_v52  ;;  %v5785_v0 = vadd.f32 %v5784_v58, %v5746_v63  ;;  %v5090_v14 = vmul.u32 2221713035, %v5010_v56  ;;  %v5839_v26 = vmul.f32 %v6667_v17, %v10077_v39  ;;  %v6015_v12 = vmul.f32 %v6668_v5, %v10077_v39 }
 0x391   :  { %v5877_v21 = vadd.f32 %v5876_v3, %v11443_v20  ;;  %v6052_v24 = vadd.f32 %v6051_v15, %v10090_v11  ;;  %v5529_v27 = vadd.f32 %v5528_v53, %v5490_v42  ;;  %v5748_v23 = vmul.f32 %v5708_v59, %v5400_v28 }
 0x392   :  { %v5786_v29 = vadd.f32 %v5785_v0, %v5747_v51  ;;  %v5170_v54 = vshrl.u32 %v5090_v14, 16  ;;  %v5840_v38 = vmul.f32 %v6669_v9, %v10105_v57  ;;  %v4396_v44 = vmax.f32 %v4316_v48, 0.0 }
 0x393   :  { %v5878_v49 = vadd.f32 %v5877_v21, %v5839_v26  ;;  %v6053_v8 = vadd.f32 %v6052_v24, %v11444_v7  ;;  %5530 = vadd.xlane.f32.xlu0 %v5529_v27  ;;  %v6016_v39 = vmul.f32 %v6670_v19, %v10105_v57  ;;  %v5841_v1 = vmul.f32 %v5448_v61, %v10129_v25 }
 0x394   :  { %v5787_v16 = vadd.f32 %v5786_v29, %v5748_v23  ;;  %v5250_v18 = vxor.u32 %v5170_v54, %v5090_v14  ;;  %v5842_v28 = vmul.f32 %v5449_v2, %v10132_v30  ;;  %v6017_v10 = vmul.f32 %v5706_v47, %v10129_v25 }
 0x395   :  { %v5879_v11 = vadd.f32 %v5878_v49, %v5840_v38  ;;  %v6054_v41 = vadd.f32 %v6053_v8, %v6015_v12  ;;  %v6018_v45 = vmul.f32 %v5707_v22, %v10132_v30  ;;  %vm6073_vm3 = vcmask 1040384  }
 0x396   :  { %vm5330_vm0 = vcmp.lt.u32.totalorder %v5250_v18, 2147483648  ;;  %vm6083_vm4 = vcmask 17408  }
 0x397   :  { %v5410_v62 = vsel %vm5330_vm0, %v4396_v44, 0.0  ;;  %v5880_v31 = vadd.f32 %v5879_v11, %v5841_v1  ;;  %v6055_v13 = vadd.f32 %v6054_v41, %v6016_v39  ;;  %5788 = vadd.xlane.f32.xlu0 %v5787_v16  ;;  %v11445_v16 = vld [vmem:[#allocation125_spill] sm:$0xff] }
 0x398   :  { %v5931_v36 = vmul.f32 %v10134_v33, %v5410_v62  ;;  %v5843_v6 = vmul.f32 %v5450_v55, %v5410_v62  ;;  %v6019_v43 = vmul.f32 %v5708_v59, %v5410_v62  ;;  %vm5798_vm1 = vcmp.eq.s32.totalorder %v11445_v16, 1 }
 0x399   :  { %v5881_v50 = vadd.f32 %v5880_v31, %v5842_v28  ;;  %v6056_v57 = vadd.f32 %v6055_v13, %v6017_v10  ;;  %vm5797_vm2 = vcmp.eq.s32.totalorder %v11445_v16, 0  ;;  %v6262_v31 = vld [vmem:[#allocation10] ss:$0 sm:$0xff] }
 0x39a   :  { %v5970_v37 = vadd.f32 %v5969_v32, %v5931_v36 }
 0x39b   :  { %v5882_v61 = vadd.f32 %v5881_v50, %v5843_v6  ;;  %v6057_v52 = vadd.f32 %v6056_v57, %v6018_v45 }
 0x39c   :  { %5971 = vadd.xlane.f32.xlu1 %v5970_v37 }
 0x39d   :  { %5883 = vadd.xlane.f32.xlu0 %v5882_v61  ;;  %v6058_v2 = vadd.f32 %v6057_v52, %v6019_v43 }
 0x3a1   :  { %6059 = vadd.xlane.f32.xlu0 %v6058_v2 }
 0x41d   :  { %v5660_v34 = vpop.xlane.xlu1 %5659 }
 0x41e   :  { %v5661_v63 = vrot.slane %v5660_v34, 4 }
 0x420   :  { %v5662_v25 = vadd.f32 %v5661_v63, %v5660_v34  ;;  %v5531_v35 = vpop.xlane.xlu0 %5530 }
 0x421   :  { %v5532_v40 = vrot.slane %v5531_v35, 4 }
 0x422   :  { %v5663_v47 = vrot.slane %v5662_v25, 2 }
 0x423   :  { %v5533_v55 = vadd.f32 %v5532_v40, %v5531_v35 }
 0x424   :  { %v5664_v33 = vadd.f32 %v5663_v47, %v5662_v25  ;;  %v5789_v4 = vpop.xlane.xlu0 %5788 }
 0x425   :  { %v5534_v60 = vrot.slane %v5533_v55, 2  ;;  %v5790_v30 = vrot.slane %v5789_v4, 4 }
 0x426   :  { %v5665_v22 = vrot.slane %v5664_v33, 1 }
 0x427   :  { %v5791_v58 = vadd.f32 %v5790_v30, %v5789_v4  ;;  %v5535_v56 = vadd.f32 %v5534_v60, %v5533_v55 }
 0x428   :  { %v5666_v46 = vadd.f32 %v5665_v22, %v5664_v33 }
 0x429   :  { %v5972_v32 = vpop.xlane.xlu1 %5971  ;;  %v5792_v48 = vrot.slane %v5791_v58, 2  ;;  %v5536_v59 = vrot.slane %v5535_v56, 1 }
 0x42a   :  { %v5973_v51 = vrot.slane %v5972_v32, 4  ;;  %v5884_v3 = vpop.xlane.xlu0 %5883 }
 0x42b   :  { %v5885_v15 = vrot.slane %v5884_v3, 4  ;;  %v5537_v42 = vadd.f32 %v5536_v59, %v5535_v56  ;;  %v5793_v53 = vadd.f32 %v5792_v48, %v5791_v58 }
 0x42c   :  { %v5974_v0 = vadd.f32 %v5973_v51, %v5972_v32 }
 0x42d   :  { %v5886_v14 = vadd.f32 %v5885_v15, %v5884_v3  ;;  %6583 = vpush %v5537_v42  ;;  %v5794_v17 = vrot.slane %v5793_v53, 1 }
 0x42e   :  { %v5975_v26 = vrot.slane %v5974_v0, 2  ;;  %v6060_v5 = vpop.xlane.xlu0 %6059  ;;  %6585 = vpush %v5666_v46 }
 0x42f   :  { %v5887_v12 = vrot.slane %v5886_v14, 2  ;;  %v6061_v20 = vrot.slane %v6060_v5, 4  ;;  %v5795_v21 = vadd.f32 %v5794_v17, %v5793_v53 }
 0x430   :  { %v5976_v24 = vadd.f32 %v5975_v26, %v5974_v0 }
 0x431   :  { %v6062_v27 = vadd.f32 %v6061_v20, %v6060_v5  ;;  %v5888_v23 = vadd.f32 %v5887_v12, %v5886_v14  ;;  %6587 = vpush %v5795_v21 }
 0x432   :  { %v5977_v29 = vrot.slane %v5976_v24, 1 }
 0x433   :  { %v6063_v54 = vrot.slane %v6062_v27, 2  ;;  %v5889_v9 = vrot.slane %v5888_v23, 1 }
 0x434   :  { %v5978_v38 = vadd.f32 %v5977_v29, %v5976_v24 }
 0x435   :  { %v6064_v44 = vadd.f32 %v6063_v54, %v6062_v27  ;;  %v5890_v49 = vadd.f32 %v5889_v9, %v5888_v23 }
 0x437   :  { %6589 = vpush %v5890_v49  ;;  %v6065_v7 = vrot.slane %v6064_v44, 1 }
 0x438   :  { %6591 = vpush %v5978_v38 }
 0x439   :  { %v6066_v8 = vadd.f32 %v6065_v7, %v6064_v44 }
 0x43b   :  { %6593 = vpush %v6066_v8 }
 0x45e   :  { %s6584_s0 = spop %6583 }
 0x45f   :  { %s6586_s8 = spop %6585  ;;  %v5802_v41 = vstv %s6584_s0 }
 0x460   :  { %v5799_v19 = vstv %s6586_s8 }
 0x462   :  { %s6588_s9 = spop %6587 }
 0x463   :  { %v5800_v18 = vstv %s6588_s9 }
 0x464   :  { %v5801_v39 = vsel %vm5798_vm1, %v5799_v19, %v5800_v18 }
 0x465   :  { %v5803_v10 = vsel %vm5797_vm2, %v5802_v41, %v5801_v39 }
 0x468   :  { %s6590_s1 = spop %6589 }
 0x469   :  { %s6592_s10 = spop %6591  ;;  %v6071_v28 = vstv %s6590_s1 }
 0x46a   :  { %v6068_v1 = vstv %s6592_s10 }
 0x46c   :  { %s6594_s11 = spop %6593 }
 0x46d   :  { %v6069_v11 = vstv %s6594_s11 }
 0x46e   :  { %v6070_v62 = vsel %vm5798_vm1, %v6068_v1, %v6069_v11 }
 0x46f   :  { %v6072_v13 = vsel %vm5797_vm2, %v6071_v28, %v6070_v62 }
 0x470   :  { %v6074_v36 = vsel %vm6073_vm3, %v5803_v10, %v6072_v13 }
 0x471   :  { %v6082_v6 = vadd.f32 %v6262_v31, %v6074_v36 }
 0x473   :  { %6084 = vst.msk [vmem:[#allocation12] sm:$0x3] %vm6083_vm4, %v6082_v6 }
 0x474   :  { %6770 = shalt.err (!%p6767_p8)
}
 0x475   :  { %s6771_s17 = scalar_lea.hbm %s10191_s6, 32 }
 0x476   :  { %p6772_p9 = scmp.ne.s32.totalorder %s10191_s6, %s6771_s17  ;;  %p6775_p10 = scmp.lt.u32.totalorder %s6771_s17, %s10191_s6 }
 0x478   :  { %p6777_p11 = pnand %p6775_p10, %p6772_p9 }
 0x47a   :  { %6780 = shalt.err (!%p6777_p11)
}
 0x47b   :  { %6094 = dma.vmem_to_hbm [thread:$0]  %s6092_s13, 32, %s10191_s6, [#allocation6]  }
 0x47c   :  { %6787 = dma.done.wait [#allocation6], 32  }
 0x47d   :  { %6788 = vsyncadd [#allocation6], 4294967264 }
 0x47e   :  { %6098 = vsyncpa [#allocation5], 1 }
 0x47f   :  { %6099 = vsyncpa [#allocation8], 1 }
 0x480   :  { %6100 = vsyncpa [#allocation11], 1 }
 0x481   :  { %6101 = vsyncpa [#allocation6], 1 }

</bundles_post_ra>
